<compile_context>
chip_gen: v7x
topology: tpu7x:2x2x1
jax: 0.10.0
libtpu: 0.0.40
codegen_flags: <defaults>
</compile_context>

<pallas_src>
import functools

import jax
import jax.numpy as jnp
from jax import lax
from jax.experimental import pallas as pl
from jax.experimental.pallas import tpu as pltpu

EPS = 1e-5                     # nn.BatchNorm2d default eps
LANE = 128                     # TPU lane width


# ------------------------------ small helpers ------------------------------ #

def _round_up(x, m):
    return (x + m - 1) // m * m


def _pad_to(a, shape):
    pads = [(0, t - s) for s, t in zip(a.shape, shape)]
    return jnp.pad(a, pads)


def _vmem_budget_bytes():
    """Generation-aware VMEM budget (headroom left for compiler scratch)."""
    cap = 64 * 1024 * 1024                       # conservative fallback (v7x per-core)
    try:
        cap = int(pltpu.get_tpu_info().vmem_capacity_bytes)
    except Exception:
        pass
    return max(32 * 1024 * 1024, min(int(cap * 0.70), 96 * 1024 * 1024))


def _pick_tm(m_rows, bytes_per_row, vmem_budget, cap=1024):
    """Row tile for the M-gridded passes: as large as the (double-buffered)
    VMEM budget allows, capped at `cap`, multiple of 8.  The result does NOT
    have to divide m_rows; callers pad rows and mask the tail."""
    tm = (vmem_budget // 4) // max(bytes_per_row, 1)
    tm = max(8, min(cap, tm))
    tm -= tm % 8
    tm = min(tm, _round_up(m_rows, 8))
    return max(8, tm)


def _cparams(n_axes, vmem_limit):
    # All grids are data-parallel over tiles/images (per-tile partial stats,
    # no cross-step accumulation inside a kernel) -> "parallel" lets v7x
    # megacore shard the grid across its two TensorCores.
    return pltpu.CompilerParams(
        dimension_semantics=("parallel",) * n_axes,
        vmem_limit_bytes=int(vmem_limit))


def _bn_affine(stats, count, gamma_p, beta_p):
    """Per-channel scale/shift from per-tile (sum, sumsq) partials (tiny glue)."""
    s = jnp.sum(stats[:, 0, :], axis=0, keepdims=True)    # (1, C)
    ss = jnp.sum(stats[:, 1, :], axis=0, keepdims=True)   # (1, C)
    mu = s / count
    var = jnp.maximum(ss / count - mu * mu, 0.0)           # biased var (PyTorch train)
    scale = gamma_p * lax.rsqrt(var + EPS)
    shift = beta_p - mu * scale
    return scale.astype(jnp.float32), shift.astype(jnp.float32)


# ------------------------------ Pallas kernels ------------------------------ #

def _conv1_stats_kernel(x_ref, w1_ref, st_ref):
    """Pass 0: conv1 (1x1) on a row tile -> per-tile sum / sumsq of h1.
    Padding rows of x are explicit zeros, so they contribute nothing."""
    h = jnp.dot(x_ref[...], w1_ref[...], preferred_element_type=jnp.float32)
    st_ref[0:1, :] = jnp.sum(h, axis=0, keepdims=True)
    st_ref[1:2, :] = jnp.sum(h * h, axis=0, keepdims=True)


def _conv2_fused_kernel(W, Lp, pad, x_ref, m_ref, w1_ref, s1_ref, t1_ref,
                        w2_ref, h2_ref, st_ref, abuf_ref, cat_ref):
    """Pass 1 (one image per grid step):
       conv1 + bn1(affine) + relu, then the 3x3 conv2 as ONE MXU matmul with
       contraction depth 9*Pp over 9 shifted windows of a halo'd, width-strided
       (W+1) activation buffer (separator columns make boundary taps read
       zeros, so no per-tap masking is needed), plus per-image sum/sumsq of h2."""
    Pp = w1_ref.shape[1]
    rowstride = W + 1

    # conv1 (1x1) + BN1 affine + ReLU (f32 elementwise math).  The separator /
    # tail slots must be forced back to zero because PyTorch zero-pads AFTER
    # bn1+relu; m_ref is 1.0 on real pixels, 0.0 elsewhere.
    h1 = jnp.dot(x_ref[...], w1_ref[...], preferred_element_type=jnp.float32)
    msk = m_ref[...]                                           # (Lp, 1) f32
    a = jnp.maximum(h1 * s1_ref[...] + t1_ref[...], 0.0) * msk

    # Halo'd activation buffer: zero only the halo rows, store the interior once.
    zeros_halo = jnp.zeros((pad, Pp), jnp.bfloat16)
    abuf_ref[pl.ds(0, pad), :] = zeros_halo
    abuf_ref[pl.ds(pad + Lp, pad), :] = zeros_halo
    abuf_ref[pl.ds(pad, Lp), :] = a.astype(jnp.bfloat16)

    # Gather the 9 shifted windows side by side -> (Lp, 9*Pp) bf16 operand,
    # then a single matmul keeps the 3x3 reduction inside the MXU.
    for dy in range(3):
        for dx in range(3):
            t = dy * 3 + dx
            shift = (dy - 1) * rowstride + (dx - 1)
            cat_ref[:, t * Pp:(t + 1) * Pp] = abuf_ref[pl.ds(pad + shift, Lp), :]
    acc = jnp.dot(cat_ref[...], w2_ref[...], preferred_element_type=jnp.float32)

    h2_ref[...] = acc.astype(jnp.bfloat16)      # h2 travels in bf16 (halved HBM)
    accm = acc * msk                            # stats over real pixels only
    st_ref[0:1, :] = jnp.sum(accm, axis=0, keepdims=True)
    st_ref[1:2, :] = jnp.sum(accm * accm, axis=0, keepdims=True)


def _conv3_stats_kernel(h2_ref, m_ref, s2_ref, t2_ref, w3_ref, st_ref):
    """Pass 2: bn2 + relu + conv3 (1x1) on a row tile -> per-tile sum/sumsq of h3.
    Invalid rows (separators / unwritten tail) are removed with a select so any
    junk bits in never-written h2 rows cannot poison the sums."""
    a = jnp.maximum(h2_ref[...].astype(jnp.float32) * s2_ref[...] + t2_ref[...], 0.0)
    h3 = jnp.dot(a.astype(jnp.bfloat16), w3_ref[...],
                 preferred_element_type=jnp.float32)
    h3 = jnp.where(m_ref[...] > 0.5, h3, 0.0)
    st_ref[0:1, :] = jnp.sum(h3, axis=0, keepdims=True)
    st_ref[1:2, :] = jnp.sum(h3 * h3, axis=0, keepdims=True)


def _finalize_kernel(h2_ref, res_ref, s2_ref, t2_ref, w3_ref, s3_ref, t3_ref,
                     o_ref):
    """Pass 3: bn2 + relu + conv3 (recomputed, cheaper than storing h3) + bn3
       + residual add + relu.  Invalid rows produce junk that is sliced away."""
    a = jnp.maximum(h2_ref[...].astype(jnp.float32) * s2_ref[...] + t2_ref[...], 0.0)
    h3 = jnp.dot(a.astype(jnp.bfloat16), w3_ref[...],
                 preferred_element_type=jnp.float32)
    h3 = h3 * s3_ref[...] + t3_ref[...]
    o_ref[...] = jnp.maximum(h3 + res_ref[...].astype(jnp.float32), 0.0)


# --------------------------------- wrapper ---------------------------------- #

def bottleneck_forward(x_nchw, params):
    """Pallas Bottleneck.forward (training-mode BN, stride=1, downsample=None)."""
    w1, w2, w3, g1, b1, g2, b2, g3, b3 = params
    N, Cin, H, W = x_nchw.shape
    P = w1.shape[1]
    Cout = 4 * P
    assert Cin == Cout, "identity residual requires inplanes == planes * 4"

    Cip = _round_up(Cin, LANE)      # lane-dense channel dims (multiples of 128)
    Pp = _round_up(P, LANE)
    Cop = _round_up(Cout, LANE)

    Ws = W + 1                      # one zero separator column per image row
    L = H * Ws                      # strided rows per image
    Lp = _round_up(L, 8)
    halo = _round_up(Ws + 1, 8)     # >= W+2 zero rows above/below the image
    count = float(N * H * W)        # real pixel count (BN denominator)
    Mrows = N * Lp                  # rows actually produced by pass 1

    vmem_limit = _vmem_budget_bytes()
    bytes_per_row = Pp * 2 + Cip * 2 + Cop * 4   # heaviest pass (pass 3) per row
    TM = _pick_tm(Mrows, bytes_per_row, vmem_limit)
    Mp = _round_up(Mrows, TM)
    GM = Mp // TM

    # ------------- layout glue (outside the hot kernels) -------------
    # TODO(synk): callers that keep NHWC activations can drop these transposes.
    x_nhwc = jnp.transpose(x_nchw, (0, 2, 3, 1)).astype(jnp.bfloat16)
    xp = jnp.pad(x_nhwc, ((0, 0), (0, 0), (0, 1), (0, Cip - Cin)))       # (N,H,Ws,Cip)
    xp = jnp.pad(xp.reshape(N, L, Cip), ((0, 0), (0, Lp - L), (0, 0)))   # (N,Lp,Cip)
    x2d = jnp.pad(xp.reshape(Mrows, Cip), ((0, Mp - Mrows), (0, 0)))     # (Mp,Cip)

    # 1.0 on real pixels, 0.0 on separator / tail rows.
    q = jnp.arange(Lp)
    colmask = (((q % Ws) < W) & (q < L)).astype(jnp.float32).reshape(Lp, 1)
    rowmask = jnp.pad(jnp.tile(colmask, (N, 1)), ((0, Mp - Mrows), (0, 0)))

    w1p = _pad_to(w1, (Cip, Pp)).astype(jnp.bfloat16)
    w2p = _pad_to(w2.reshape(9, P, P), (9, Pp, Pp)).astype(jnp.bfloat16)
    w2p = w2p.reshape(9 * Pp, Pp)                     # taps stacked along K
    w3p = _pad_to(w3, (Pp, Cop)).astype(jnp.bfloat16)
    g1p, b1p = _pad_to(g1, (1, Pp)), _pad_to(b1, (1, Pp))
    g2p, b2p = _pad_to(g2, (1, Pp)), _pad_to(b2, (1, Pp))
    g3p, b3p = _pad_to(g3, (1, Cop)), _pad_to(b3, (1, Cop))

    # ------------- pass 0: conv1 batch statistics -------------
    stats1 = pl.pallas_call(
        _conv1_stats_kernel,
        out_shape=jax.ShapeDtypeStruct((GM, 2, Pp), jnp.float32),
        grid=(GM,),
        in_specs=[pl.BlockSpec((TM, Cip), lambda i: (i, 0)),
                  pl.BlockSpec((Cip, Pp), lambda i: (0, 0))],
        out_specs=pl.BlockSpec((None, 2, Pp), lambda i: (i, 0, 0)),
        compiler_params=_cparams(1, vmem_limit),
        cost_estimate=pl.CostEstimate(
            flops=2 * Mp * Cip * Pp, transcendentals=0,
            bytes_accessed=Mp * Cip * 2 + Cip * Pp * 2 + GM * 2 * Pp * 4),
    )(x2d, w1p)
    s1, t1 = _bn_affine(stats1, count, g1p, b1p)

    # ------------- pass 1: conv1+bn1+relu fused with 3x3 conv2 -------------
    h2, stats2 = pl.pallas_call(
        functools.partial(_conv2_fused_kernel, W, Lp, halo),
        out_shape=(jax.ShapeDtypeStruct((Mp, Pp), jnp.bfloat16),
                   jax.ShapeDtypeStruct((N, 2, Pp), jnp.float32)),
        grid=(N,),
        in_specs=[pl.BlockSpec((Lp, Cip), lambda n: (n, 0)),
                  pl.BlockSpec((Lp, 1), lambda n: (0, 0)),
                  pl.BlockSpec((Cip, Pp), lambda n: (0, 0)),
                  pl.BlockSpec((1, Pp), lambda n: (0, 0)),
                  pl.BlockSpec((1, Pp), lambda n: (0, 0)),
                  pl.BlockSpec((9 * Pp, Pp), lambda n: (0, 0))],
        out_specs=(pl.BlockSpec((Lp, Pp), lambda n: (n, 0)),
                   pl.BlockSpec((None, 2, Pp), lambda n: (n, 0, 0))),
        scratch_shapes=[pltpu.VMEM((Lp + 2 * halo, Pp), jnp.bfloat16),
                        pltpu.VMEM((Lp, 9 * Pp), jnp.bfloat16)],
        compiler_params=_cparams(1, vmem_limit),
        cost_estimate=pl.CostEstimate(
            flops=2 * N * Lp * (Cip + 9 * Pp) * Pp, transcendentals=0,
            bytes_accessed=Mrows * Cip * 2 + Mrows * Pp * 2
                           + (Cip + 9 * Pp) * Pp * 2 + N * 2 * Pp * 4),
    )(x2d, colmask, w1p, s1, t1, w2p)
    s2, t2 = _bn_affine(stats2, count, g2p, b2p)

    # ------------- pass 2: conv3 batch statistics -------------
    stats3 = pl.pallas_call(
        _conv3_stats_kernel,
        out_shape=jax.ShapeDtypeStruct((GM, 2, Cop), jnp.float32),
        grid=(GM,),
        in_specs=[pl.BlockSpec((TM, Pp), lambda i: (i, 0)),
                  pl.BlockSpec((TM, 1), lambda i: (i, 0)),
                  pl.BlockSpec((1, Pp), lambda i: (0, 0)),
                  pl.BlockSpec((1, Pp), lambda i: (0, 0)),
                  pl.BlockSpec((Pp, Cop), lambda i: (0, 0))],
        out_specs=pl.BlockSpec((None, 2, Cop), lambda i: (i, 0, 0)),
        compiler_params=_cparams(1, vmem_limit),
        cost_estimate=pl.CostEstimate(
            flops=2 * Mp * Pp * Cop, transcendentals=0,
            bytes_accessed=Mp * Pp * 2 + Pp * Cop * 2 + GM * 2 * Cop * 4),
    )(h2, rowmask, s2, t2, w3p)
    s3, t3 = _bn_affine(stats3, count, g3p, b3p)

    # ------------- pass 3: bn2+relu+conv3+bn3 + residual + relu -------------
    out2d = pl.pallas_call(
        _finalize_kernel,
        out_shape=jax.ShapeDtypeStruct((Mp, Cop), jnp.float32),
        grid=(GM,),
        in_specs=[pl.BlockSpec((TM, Pp), lambda i: (i, 0)),
                  pl.BlockSpec((TM, Cip), lambda i: (i, 0)),
                  pl.BlockSpec((1, Pp), lambda i: (0, 0)),
                  pl.BlockSpec((1, Pp), lambda i: (0, 0)),
                  pl.BlockSpec((Pp, Cop), lambda i: (0, 0)),
                  pl.BlockSpec((1, Cop), lambda i: (0, 0)),
                  pl.BlockSpec((1, Cop), lambda i: (0, 0))],
        out_specs=pl.BlockSpec((TM, Cop), lambda i: (i, 0)),
        compiler_params=_cparams(1, vmem_limit),
        cost_estimate=pl.CostEstimate(
            flops=2 * Mp * Pp * Cop, transcendentals=0,
            bytes_accessed=Mp * (Pp * 2 + Cip * 2 + Cop * 4) + Pp * Cop * 2),
    )(h2, x2d, s2, t2, w3p, s3, t3)

    # strip separator columns / padding and return NCHW
    out = out2d[:Mrows].reshape(N, Lp, Cop)[:, :L, :Cout]
    out = out.reshape(N, H, Ws, Cout)[:, :, :W, :]
    return jnp.transpose(out, (0, 3, 1, 2))


# ----------------------------- pure-JAX reference --------------------------- #
# Mirrors the kernel's MXU precision policy (bf16 matmul operands, f32
# accumulation / elementwise math) so the comparison is apples-to-apples.

def _bn_train(h, g, b):
    mu = h.mean(axis=(0, 1, 2), keepdims=True)
    var = ((h - mu) ** 2).mean(axis=(0, 1, 2), keepdims=True)
    return (h - mu) * lax.rsqrt(var + EPS) * g.reshape(1, 1, 1, -1) + b.reshape(1, 1, 1, -1)


def bottleneck_reference(x_nchw, params):
    w1, w2, w3, g1, b1, g2, b2, g3, b3 = params
    Cin, P = w1.shape
    dn = ("NHWC", "HWIO", "NHWC")
    x = jnp.transpose(x_nchw, (0, 2, 3, 1)).astype(jnp.bfloat16).astype(jnp.float32)

    def conv(h, w, padding):
        return lax.conv_general_dilated(
            h.astype(jnp.bfloat16), w.astype(jnp.bfloat16), (1, 1), padding,
            dimension_numbers=dn, preferred_element_type=jnp.float32)

    h = conv(x, w1.reshape(1, 1, Cin, P), "VALID")
    h = jax.nn.relu(_bn_train(h, g1, b1))
    h = conv(h, w2, "SAME")
    h = jax.nn.relu(_bn_train(h, g2, b2))
    h = conv(h, w3.reshape(1, 1, P, 4 * P), "VALID")
    h = _bn_train(h, g3, b3)
    out = jax.nn.relu(h + x)
    return jnp.transpose(out, (0, 3, 1, 2))


# ----------------------------------- main ------------------------------------ #

if __name__ == "__main__":
    # Small Bottleneck: planes=4, inplanes=planes*4=16, stride=1, downsample=None
    N, H, W = 2, 16, 16
    planes = 4
    inplanes = planes * 4

    key = jax.random.PRNGKey(0)
    kx, k1, k2, k3, kg1, kb1, kg2, kb2, kg3, kb3 = jax.random.split(key, 10)

    x = jax.random.normal(kx, (N, inplanes, H, W), jnp.float32)

    # Synthetic parameters (shapes from Bottleneck.__init__, HWIO for conv2).
    w1 = 0.1 * jax.random.normal(k1, (inplanes, planes), jnp.float32)       # conv1 1x1
    w2 = 0.1 * jax.random.normal(k2, (3, 3, planes, planes), jnp.float32)   # conv2 3x3
    w3 = 0.1 * jax.random.normal(k3, (planes, planes * 4), jnp.float32)     # conv3 1x1
    g1 = 1.0 + 0.1 * jax.random.normal(kg1, (1, planes), jnp.float32)
    b1 = 0.1 * jax.random.normal(kb1, (1, planes), jnp.float32)
    g2 = 1.0 + 0.1 * jax.random.normal(kg2, (1, planes), jnp.float32)
    b2 = 0.1 * jax.random.normal(kb2, (1, planes), jnp.float32)
    g3 = 1.0 + 0.1 * jax.random.normal(kg3, (1, planes * 4), jnp.float32)
    b3 = 0.1 * jax.random.normal(kb3, (1, planes * 4), jnp.float32)

    params = (w1, w2, w3, g1, b1, g2, b2, g3, b3)

    out = jax.jit(bottleneck_forward)(x, params)
    out = jax.block_until_ready(out)

    ref = jax.block_until_ready(bottleneck_reference(x, params))
    assert out.shape == (N, inplanes, H, W)
    assert jnp.allclose(out, ref, atol=2e-2, rtol=2e-2), (
        f"max abs err = {jnp.max(jnp.abs(out - ref))}")

    print("KERNEL_OK")
</pallas_src>

<mosaic_0001>
module attributes {stable_mosaic.version = 11 : i64} {
  func.func @_conv1_stats_kernel(%arg0: i32, %arg1: memref<544x128xbf16, #tpu.memory_space<vmem>>, %arg2: memref<128x128xbf16, #tpu.memory_space<vmem>>, %arg3: memref<1x2x128xf32, #tpu.memory_space<vmem>>) attributes {dimension_semantics = [#tpu.dimension_semantics<parallel>], iteration_bounds = array<i64: 1>, scalar_prefetch = 0 : i64, scratch_operands = 0 : i64, tpu.core_type = #tpu.core_type<tc>, window_params = [{transform_indices = @transform_0, window_bounds = array<i64: 544, 128>}, {pipeline_mode = #tpu.pipeline_mode<synchronous>, transform_indices = @transform_1, window_bounds = array<i64: 128, 128>}, {transform_indices = @transform_2, window_bounds = array<i64: 1, 2, 128>}]} {
    %c0 = arith.constant 0 : index
    %c0_0 = arith.constant 0 : index
    %0 = vector.load %arg1[%c0, %c0_0] : memref<544x128xbf16, #tpu.memory_space<vmem>>, vector<544x128xbf16>
    %c0_1 = arith.constant 0 : index
    %c0_2 = arith.constant 0 : index
    %1 = vector.load %arg2[%c0_1, %c0_2] : memref<128x128xbf16, #tpu.memory_space<vmem>>, vector<128x128xbf16>
    %cst = arith.constant dense<0.000000e+00> : vector<544x128xf32>
    %2 = tpu.matmul %0, %1, %cst {dimension_numbers = #tpu.dot_dimension_numbers<[1], [0], [0], [1], [0, 0, 1, 1], [], []>} : vector<544x128xbf16>, vector<128x128xbf16>, vector<544x128xf32> -> vector<544x128xf32>
    %cst_3 = arith.constant dense<0.000000e+00> : vector<128xf32>
    %3 = vector.multi_reduction <add>, %2, %cst_3 [0] : vector<544x128xf32> to vector<128xf32>
    %4 = vector.shape_cast %3 : vector<128xf32> to vector<1x128xf32>
    %c0_4 = arith.constant 0 : index
    %c0_5 = arith.constant 0 : index
    %c0_6 = arith.constant 0 : index
    %5 = vector.load %arg3[%c0_4, %c0_5, %c0_6] : memref<1x2x128xf32, #tpu.memory_space<vmem>>, vector<1x1x128xf32>
    %6 = vector.shape_cast %5 : vector<1x1x128xf32> to vector<1x128xf32>
    %7 = vector.shape_cast %4 : vector<1x128xf32> to vector<1x1x128xf32>
    tpu.vector_store %arg3[%c0_4, %c0_5, %c0_6], %7 {strides = array<i32>} : memref<1x2x128xf32, #tpu.memory_space<vmem>>, vector<1x1x128xf32>,
    %8 = arith.mulf %2, %2 : vector<544x128xf32>
    %cst_7 = arith.constant dense<0.000000e+00> : vector<128xf32>
    %9 = vector.multi_reduction <add>, %8, %cst_7 [0] : vector<544x128xf32> to vector<128xf32>
    %10 = vector.shape_cast %9 : vector<128xf32> to vector<1x128xf32>
    %c0_8 = arith.constant 0 : index
    %c1 = arith.constant 1 : index
    %c0_9 = arith.constant 0 : index
    %11 = vector.load %arg3[%c0_8, %c1, %c0_9] : memref<1x2x128xf32, #tpu.memory_space<vmem>>, vector<1x1x128xf32>
    %12 = vector.shape_cast %11 : vector<1x1x128xf32> to vector<1x128xf32>
    %13 = vector.shape_cast %10 : vector<1x128xf32> to vector<1x1x128xf32>
    tpu.vector_store %arg3[%c0_8, %c1, %c0_9], %13 {strides = array<i32>} : memref<1x2x128xf32, #tpu.memory_space<vmem>>, vector<1x1x128xf32>,
    return
  }
  func.func @transform_0(%arg0: i32) -> (i32, i32) {
    %c0_i32 = arith.constant 0 : i32
    %c0_i32_0 = arith.constant 0 : i32
    return %arg0, %c0_i32 : i32, i32
  }
  func.func @transform_1(%arg0: i32) -> (i32, i32) {
    %c0_i32 = arith.constant 0 : i32
    %c0_i32_0 = arith.constant 0 : i32
    %c0_i32_1 = arith.constant 0 : i32
    return %c0_i32, %c0_i32_0 : i32, i32
  }
  func.func @transform_2(%arg0: i32) -> (i32, i32, i32) {
    %c0_i32 = arith.constant 0 : i32
    %c0_i32_0 = arith.constant 0 : i32
    %c0_i32_1 = arith.constant 0 : i32
    return %arg0, %c0_i32, %c0_i32_0 : i32, i32, i32
  }
}

module attributes {stable_mosaic.version = 11 : i64} {
  func.func @_conv2_fused_kernel(%arg0: i32, %arg1: memref<272x128xbf16, #tpu.memory_space<vmem>>, %arg2: memref<272x1xf32, #tpu.memory_space<vmem>>, %arg3: memref<128x128xbf16, #tpu.memory_space<vmem>>, %arg4: memref<1x128xf32, #tpu.memory_space<vmem>>, %arg5: memref<1x128xf32, #tpu.memory_space<vmem>>, %arg6: memref<1152x128xbf16, #tpu.memory_space<vmem>>, %arg7: memref<272x128xbf16, #tpu.memory_space<vmem>>, %arg8: memref<1x2x128xf32, #tpu.memory_space<vmem>>, %arg9: memref<320x128xbf16, #tpu.memory_space<vmem>>, %arg10: memref<272x1152xbf16, #tpu.memory_space<vmem>>) attributes {dimension_semantics = [#tpu.dimension_semantics<parallel>], iteration_bounds = array<i64: 2>, scalar_prefetch = 0 : i64, scratch_operands = 2 : i64, tpu.core_type = #tpu.core_type<tc>, window_params = [{transform_indices = @transform_0, window_bounds = array<i64: 272, 128>}, {pipeline_mode = #tpu.pipeline_mode<synchronous>, transform_indices = @transform_1, window_bounds = array<i64: 272, 1>}, {pipeline_mode = #tpu.pipeline_mode<synchronous>, transform_indices = @transform_2, window_bounds = array<i64: 128, 128>}, {pipeline_mode = #tpu.pipeline_mode<synchronous>, transform_indices = @transform_3, window_bounds = array<i64: 1, 128>}, {pipeline_mode = #tpu.pipeline_mode<synchronous>, transform_indices = @transform_4, window_bounds = array<i64: 1, 128>}, {pipeline_mode = #tpu.pipeline_mode<synchronous>, transform_indices = @transform_5, window_bounds = array<i64: 1152, 128>}, {transform_indices = @transform_6, window_bounds = array<i64: 272, 128>}, {transform_indices = @transform_7, window_bounds = array<i64: 1, 2, 128>}]} {
    %c0 = arith.constant 0 : index
    %c0_0 = arith.constant 0 : index
    %0 = vector.load %arg1[%c0, %c0_0] : memref<272x128xbf16, #tpu.memory_space<vmem>>, vector<272x128xbf16>
    %c0_1 = arith.constant 0 : index
    %c0_2 = arith.constant 0 : index
    %1 = vector.load %arg3[%c0_1, %c0_2] : memref<128x128xbf16, #tpu.memory_space<vmem>>, vector<128x128xbf16>
    %cst = arith.constant dense<0.000000e+00> : vector<272x128xf32>
    %2 = tpu.matmul %0, %1, %cst {dimension_numbers = #tpu.dot_dimension_numbers<[1], [0], [0], [1], [0, 0, 1, 1], [], []>} : vector<272x128xbf16>, vector<128x128xbf16>, vector<272x128xf32> -> vector<272x128xf32>
    %c0_3 = arith.constant 0 : index
    %c0_4 = arith.constant 0 : index
    %3 = vector.load %arg2[%c0_3, %c0_4] : memref<272x1xf32, #tpu.memory_space<vmem>>, vector<272x1xf32>
    %c0_5 = arith.constant 0 : index
    %c0_6 = arith.constant 0 : index
    %4 = vector.load %arg4[%c0_5, %c0_6] : memref<1x128xf32, #tpu.memory_space<vmem>>, vector<1x128xf32>
    %5 = vector.broadcast %4 : vector<1x128xf32> to vector<272x128xf32>
    %6 = arith.mulf %2, %5 : vector<272x128xf32>
    %c0_7 = arith.constant 0 : index
    %c0_8 = arith.constant 0 : index
    %7 = vector.load %arg5[%c0_7, %c0_8] : memref<1x128xf32, #tpu.memory_space<vmem>>, vector<1x128xf32>
    %8 = vector.broadcast %7 : vector<1x128xf32> to vector<272x128xf32>
    %9 = arith.addf %6, %8 : vector<272x128xf32>
    %cst_9 = arith.constant 0.000000e+00 : f32
    %10 = vector.broadcast %cst_9 : f32 to vector<272x128xf32>
    %11 = arith.maximumf %9, %10 : vector<272x128xf32>
    %12 = vector.broadcast %3 : vector<272x1xf32> to vector<272x128xf32>
    %13 = arith.mulf %11, %12 : vector<272x128xf32>
    %cst_10 = arith.constant 0.000000e+00 : bf16
    %14 = vector.broadcast %cst_10 : bf16 to vector<24x128xbf16>
    %c0_11 = arith.constant 0 : index
    %c0_12 = arith.constant 0 : index
    %15 = vector.load %arg9[%c0_11, %c0_12] : memref<320x128xbf16, #tpu.memory_space<vmem>>, vector<24x128xbf16>
    tpu.vector_store %arg9[%c0_11, %c0_12], %14 {strides = array<i32>} : memref<320x128xbf16, #tpu.memory_space<vmem>>, vector<24x128xbf16>,
    %c296 = arith.constant 296 : index
    %c0_13 = arith.constant 0 : index
    %16 = vector.load %arg9[%c296, %c0_13] : memref<320x128xbf16, #tpu.memory_space<vmem>>, vector<24x128xbf16>
    tpu.vector_store %arg9[%c296, %c0_13], %14 {strides = array<i32>} : memref<320x128xbf16, #tpu.memory_space<vmem>>, vector<24x128xbf16>,
    %17 = arith.truncf %13 : vector<272x128xf32> to vector<272x128xbf16>
    %c24 = arith.constant 24 : index
    %c0_14 = arith.constant 0 : index
    %18 = vector.load %arg9[%c24, %c0_14] : memref<320x128xbf16, #tpu.memory_space<vmem>>, vector<272x128xbf16>
    tpu.vector_store %arg9[%c24, %c0_14], %17 {strides = array<i32>} : memref<320x128xbf16, #tpu.memory_space<vmem>>, vector<272x128xbf16>,
    %c6 = arith.constant 6 : index
    %c0_15 = arith.constant 0 : index
    %19 = vector.load %arg9[%c6, %c0_15] : memref<320x128xbf16, #tpu.memory_space<vmem>>, vector<272x128xbf16>
    %c0_16 = arith.constant 0 : index
    %c0_17 = arith.constant 0 : index
    %20 = vector.load %arg10[%c0_16, %c0_17] : memref<272x1152xbf16, #tpu.memory_space<vmem>>, vector<272x128xbf16>
    tpu.vector_store %arg10[%c0_16, %c0_17], %19 {strides = array<i32>} : memref<272x1152xbf16, #tpu.memory_space<vmem>>, vector<272x128xbf16>,
    %c7 = arith.constant 7 : index
    %c0_18 = arith.constant 0 : index
    %21 = vector.load %arg9[%c7, %c0_18] : memref<320x128xbf16, #tpu.memory_space<vmem>>, vector<272x128xbf16>
    %c0_19 = arith.constant 0 : index
    %c128 = arith.constant 128 : index
    %22 = vector.load %arg10[%c0_19, %c128] : memref<272x1152xbf16, #tpu.memory_space<vmem>>, vector<272x128xbf16>
    tpu.vector_store %arg10[%c0_19, %c128], %21 {strides = array<i32>} : memref<272x1152xbf16, #tpu.memory_space<vmem>>, vector<272x128xbf16>,
    %c8 = arith.constant 8 : index
    %c0_20 = arith.constant 0 : index
    %23 = vector.load %arg9[%c8, %c0_20] : memref<320x128xbf16, #tpu.memory_space<vmem>>, vector<272x128xbf16>
    %c0_21 = arith.constant 0 : index
    %c256 = arith.constant 256 : index
    %24 = vector.load %arg10[%c0_21, %c256] : memref<272x1152xbf16, #tpu.memory_space<vmem>>, vector<272x128xbf16>
    tpu.vector_store %arg10[%c0_21, %c256], %23 {strides = array<i32>} : memref<272x1152xbf16, #tpu.memory_space<vmem>>, vector<272x128xbf16>,
    %c23 = arith.constant 23 : index
    %c0_22 = arith.constant 0 : index
    %25 = vector.load %arg9[%c23, %c0_22] : memref<320x128xbf16, #tpu.memory_space<vmem>>, vector<272x128xbf16>
    %c0_23 = arith.constant 0 : index
    %c384 = arith.constant 384 : index
    %26 = vector.load %arg10[%c0_23, %c384] : memref<272x1152xbf16, #tpu.memory_space<vmem>>, vector<272x128xbf16>
    tpu.vector_store %arg10[%c0_23, %c384], %25 {strides = array<i32>} : memref<272x1152xbf16, #tpu.memory_space<vmem>>, vector<272x128xbf16>,
    %c24_24 = arith.constant 24 : index
    %c0_25 = arith.constant 0 : index
    %27 = vector.load %arg9[%c24_24, %c0_25] : memref<320x128xbf16, #tpu.memory_space<vmem>>, vector<272x128xbf16>
    %c0_26 = arith.constant 0 : index
    %c512 = arith.constant 512 : index
    %28 = vector.load %arg10[%c0_26, %c512] : memref<272x1152xbf16, #tpu.memory_space<vmem>>, vector<272x128xbf16>
    tpu.vector_store %arg10[%c0_26, %c512], %27 {strides = array<i32>} : memref<272x1152xbf16, #tpu.memory_space<vmem>>, vector<272x128xbf16>,
    %c25 = arith.constant 25 : index
    %c0_27 = arith.constant 0 : index
    %29 = vector.load %arg9[%c25, %c0_27] : memref<320x128xbf16, #tpu.memory_space<vmem>>, vector<272x128xbf16>
    %c0_28 = arith.constant 0 : index
    %c640 = arith.constant 640 : index
    %30 = vector.load %arg10[%c0_28, %c640] : memref<272x1152xbf16, #tpu.memory_space<vmem>>, vector<272x128xbf16>
    tpu.vector_store %arg10[%c0_28, %c640], %29 {strides = array<i32>} : memref<272x1152xbf16, #tpu.memory_space<vmem>>, vector<272x128xbf16>,
    %c40 = arith.constant 40 : index
    %c0_29 = arith.constant 0 : index
    %31 = vector.load %arg9[%c40, %c0_29] : memref<320x128xbf16, #tpu.memory_space<vmem>>, vector<272x128xbf16>
    %c0_30 = arith.constant 0 : index
    %c768 = arith.constant 768 : index
    %32 = vector.load %arg10[%c0_30, %c768] : memref<272x1152xbf16, #tpu.memory_space<vmem>>, vector<272x128xbf16>
    tpu.vector_store %arg10[%c0_30, %c768], %31 {strides = array<i32>} : memref<272x1152xbf16, #tpu.memory_space<vmem>>, vector<272x128xbf16>,
    %c41 = arith.constant 41 : index
    %c0_31 = arith.constant 0 : index
    %33 = vector.load %arg9[%c41, %c0_31] : memref<320x128xbf16, #tpu.memory_space<vmem>>, vector<272x128xbf16>
    %c0_32 = arith.constant 0 : index
    %c896 = arith.constant 896 : index
    %34 = vector.load %arg10[%c0_32, %c896] : memref<272x1152xbf16, #tpu.memory_space<vmem>>, vector<272x128xbf16>
    tpu.vector_store %arg10[%c0_32, %c896], %33 {strides = array<i32>} : memref<272x1152xbf16, #tpu.memory_space<vmem>>, vector<272x128xbf16>,
    %c42 = arith.constant 42 : index
    %c0_33 = arith.constant 0 : index
    %35 = vector.load %arg9[%c42, %c0_33] : memref<320x128xbf16, #tpu.memory_space<vmem>>, vector<272x128xbf16>
    %c0_34 = arith.constant 0 : index
    %c1024 = arith.constant 1024 : index
    %36 = vector.load %arg10[%c0_34, %c1024] : memref<272x1152xbf16, #tpu.memory_space<vmem>>, vector<272x128xbf16>
    tpu.vector_store %arg10[%c0_34, %c1024], %35 {strides = array<i32>} : memref<272x1152xbf16, #tpu.memory_space<vmem>>, vector<272x128xbf16>,
    %c0_35 = arith.constant 0 : index
    %c0_36 = arith.constant 0 : index
    %37 = vector.load %arg10[%c0_35, %c0_36] : memref<272x1152xbf16, #tpu.memory_space<vmem>>, vector<272x1152xbf16>
    %c0_37 = arith.constant 0 : index
    %c0_38 = arith.constant 0 : index
    %38 = vector.load %arg6[%c0_37, %c0_38] : memref<1152x128xbf16, #tpu.memory_space<vmem>>, vector<1152x128xbf16>
    %cst_39 = arith.constant dense<0.000000e+00> : vector<272x128xf32>
    %39 = tpu.matmul %37, %38, %cst_39 {dimension_numbers = #tpu.dot_dimension_numbers<[1], [0], [0], [1], [0, 0, 1, 1], [], []>} : vector<272x1152xbf16>, vector<1152x128xbf16>, vector<272x128xf32> -> vector<272x128xf32>
    %40 = arith.truncf %39 : vector<272x128xf32> to vector<272x128xbf16>
    %c0_40 = arith.constant 0 : index
    %c0_41 = arith.constant 0 : index
    %41 = vector.load %arg7[%c0_40, %c0_41] : memref<272x128xbf16, #tpu.memory_space<vmem>>, vector<272x128xbf16>
    tpu.vector_store %arg7[%c0_40, %c0_41], %40 {strides = array<i32>} : memref<272x128xbf16, #tpu.memory_space<vmem>>, vector<272x128xbf16>,
    %42 = vector.broadcast %3 : vector<272x1xf32> to vector<272x128xf32>
    %43 = arith.mulf %39, %42 : vector<272x128xf32>
    %cst_42 = arith.constant dense<0.000000e+00> : vector<128xf32>
    %44 = vector.multi_reduction <add>, %43, %cst_42 [0] : vector<272x128xf32> to vector<128xf32>
    %45 = vector.shape_cast %44 : vector<128xf32> to vector<1x128xf32>
    %c0_43 = arith.constant 0 : index
    %c0_44 = arith.constant 0 : index
    %c0_45 = arith.constant 0 : index
    %46 = vector.load %arg8[%c0_43, %c0_44, %c0_45] : memref<1x2x128xf32, #tpu.memory_space<vmem>>, vector<1x1x128xf32>
    %47 = vector.shape_cast %46 : vector<1x1x128xf32> to vector<1x128xf32>
    %48 = vector.shape_cast %45 : vector<1x128xf32> to vector<1x1x128xf32>
    tpu.vector_store %arg8[%c0_43, %c0_44, %c0_45], %48 {strides = array<i32>} : memref<1x2x128xf32, #tpu.memory_space<vmem>>, vector<1x1x128xf32>,
    %49 = arith.mulf %43, %43 : vector<272x128xf32>
    %cst_46 = arith.constant dense<0.000000e+00> : vector<128xf32>
    %50 = vector.multi_reduction <add>, %49, %cst_46 [0] : vector<272x128xf32> to vector<128xf32>
    %51 = vector.shape_cast %50 : vector<128xf32> to vector<1x128xf32>
    %c0_47 = arith.constant 0 : index
    %c1 = arith.constant 1 : index
    %c0_48 = arith.constant 0 : index
    %52 = vector.load %arg8[%c0_47, %c1, %c0_48] : memref<1x2x128xf32, #tpu.memory_space<vmem>>, vector<1x1x128xf32>
    %53 = vector.shape_cast %52 : vector<1x1x128xf32> to vector<1x128xf32>
    %54 = vector.shape_cast %51 : vector<1x128xf32> to vector<1x1x128xf32>
    tpu.vector_store %arg8[%c0_47, %c1, %c0_48], %54 {strides = array<i32>} : memref<1x2x128xf32, #tpu.memory_space<vmem>>, vector<1x1x128xf32>,
    return
  }
  func.func @transform_0(%arg0: i32) -> (i32, i32) {
    %c0_i32 = arith.constant 0 : i32
    %c0_i32_0 = arith.constant 0 : i32
    return %arg0, %c0_i32 : i32, i32
  }
  func.func @transform_1(%arg0: i32) -> (i32, i32) {
    %c0_i32 = arith.constant 0 : i32
    %c0_i32_0 = arith.constant 0 : i32
    %c0_i32_1 = arith.constant 0 : i32
    return %c0_i32, %c0_i32_0 : i32, i32
  }
  func.func @transform_2(%arg0: i32) -> (i32, i32) {
    %c0_i32 = arith.constant 0 : i32
    %c0_i32_0 = arith.constant 0 : i32
    %c0_i32_1 = arith.constant 0 : i32
    return %c0_i32, %c0_i32_0 : i32, i32
  }
  func.func @transform_3(%arg0: i32) -> (i32, i32) {
    %c0_i32 = arith.constant 0 : i32
    %c0_i32_0 = arith.constant 0 : i32
    %c0_i32_1 = arith.constant 0 : i32
    return %c0_i32, %c0_i32_0 : i32, i32
  }
  func.func @transform_4(%arg0: i32) -> (i32, i32) {
    %c0_i32 = arith.constant 0 : i32
    %c0_i32_0 = arith.constant 0 : i32
    %c0_i32_1 = arith.constant 0 : i32
    return %c0_i32, %c0_i32_0 : i32, i32
  }
  func.func @transform_5(%arg0: i32) -> (i32, i32) {
    %c0_i32 = arith.constant 0 : i32
    %c0_i32_0 = arith.constant 0 : i32
    %c0_i32_1 = arith.constant 0 : i32
    return %c0_i32, %c0_i32_0 : i32, i32
  }
  func.func @transform_6(%arg0: i32) -> (i32, i32) {
    %c0_i32 = arith.constant 0 : i32
    %c0_i32_0 = arith.constant 0 : i32
    return %arg0, %c0_i32 : i32, i32
  }
  func.func @transform_7(%arg0: i32) -> (i32, i32, i32) {
    %c0_i32 = arith.constant 0 : i32
    %c0_i32_0 = arith.constant 0 : i32
    %c0_i32_1 = arith.constant 0 : i32
    return %arg0, %c0_i32, %c0_i32_0 : i32, i32, i32
  }
}

module attributes {stable_mosaic.version = 11 : i64} {
  func.func @_conv3_stats_kernel(%arg0: i32, %arg1: memref<544x128xbf16, #tpu.memory_space<vmem>>, %arg2: memref<544x1xf32, #tpu.memory_space<vmem>>, %arg3: memref<1x128xf32, #tpu.memory_space<vmem>>, %arg4: memref<1x128xf32, #tpu.memory_space<vmem>>, %arg5: memref<128x128xbf16, #tpu.memory_space<vmem>>, %arg6: memref<1x2x128xf32, #tpu.memory_space<vmem>>) attributes {dimension_semantics = [#tpu.dimension_semantics<parallel>], iteration_bounds = array<i64: 1>, scalar_prefetch = 0 : i64, scratch_operands = 0 : i64, tpu.core_type = #tpu.core_type<tc>, window_params = [{transform_indices = @transform_0, window_bounds = array<i64: 544, 128>}, {transform_indices = @transform_1, window_bounds = array<i64: 544, 1>}, {pipeline_mode = #tpu.pipeline_mode<synchronous>, transform_indices = @transform_2, window_bounds = array<i64: 1, 128>}, {pipeline_mode = #tpu.pipeline_mode<synchronous>, transform_indices = @transform_3, window_bounds = array<i64: 1, 128>}, {pipeline_mode = #tpu.pipeline_mode<synchronous>, transform_indices = @transform_4, window_bounds = array<i64: 128, 128>}, {transform_indices = @transform_5, window_bounds = array<i64: 1, 2, 128>}]} {
    %c0 = arith.constant 0 : index
    %c0_0 = arith.constant 0 : index
    %0 = vector.load %arg1[%c0, %c0_0] : memref<544x128xbf16, #tpu.memory_space<vmem>>, vector<544x128xbf16>
    %1 = arith.extf %0 : vector<544x128xbf16> to vector<544x128xf32>
    %c0_1 = arith.constant 0 : index
    %c0_2 = arith.constant 0 : index
    %2 = vector.load %arg3[%c0_1, %c0_2] : memref<1x128xf32, #tpu.memory_space<vmem>>, vector<1x128xf32>
    %3 = vector.broadcast %2 : vector<1x128xf32> to vector<544x128xf32>
    %4 = arith.mulf %1, %3 : vector<544x128xf32>
    %c0_3 = arith.constant 0 : index
    %c0_4 = arith.constant 0 : index
    %5 = vector.load %arg4[%c0_3, %c0_4] : memref<1x128xf32, #tpu.memory_space<vmem>>, vector<1x128xf32>
    %6 = vector.broadcast %5 : vector<1x128xf32> to vector<544x128xf32>
    %7 = arith.addf %4, %6 : vector<544x128xf32>
    %cst = arith.constant 0.000000e+00 : f32
    %8 = vector.broadcast %cst : f32 to vector<544x128xf32>
    %9 = arith.maximumf %7, %8 : vector<544x128xf32>
    %10 = arith.truncf %9 : vector<544x128xf32> to vector<544x128xbf16>
    %c0_5 = arith.constant 0 : index
    %c0_6 = arith.constant 0 : index
    %11 = vector.load %arg5[%c0_5, %c0_6] : memref<128x128xbf16, #tpu.memory_space<vmem>>, vector<128x128xbf16>
    %cst_7 = arith.constant dense<0.000000e+00> : vector<544x128xf32>
    %12 = tpu.matmul %10, %11, %cst_7 {dimension_numbers = #tpu.dot_dimension_numbers<[1], [0], [0], [1], [0, 0, 1, 1], [], []>} : vector<544x128xbf16>, vector<128x128xbf16>, vector<544x128xf32> -> vector<544x128xf32>
    %c0_8 = arith.constant 0 : index
    %c0_9 = arith.constant 0 : index
    %13 = vector.load %arg2[%c0_8, %c0_9] : memref<544x1xf32, #tpu.memory_space<vmem>>, vector<544x1xf32>
    %cst_10 = arith.constant 5.000000e-01 : f32
    %14 = vector.broadcast %cst_10 : f32 to vector<544x1xf32>
    %15 = arith.cmpf ogt, %13, %14 : vector<544x1xf32>
    %cst_11 = arith.constant 0.000000e+00 : f32
    %16 = vector.shape_cast %15 : vector<544x1xi1> to vector<544x1xi1>
    %17 = vector.broadcast %16 : vector<544x1xi1> to vector<544x128xi1>
    %18 = vector.broadcast %cst_11 : f32 to vector<544x128xf32>
    %19 = arith.select %17, %12, %18 : vector<544x128xi1>, vector<544x128xf32>
    %cst_12 = arith.constant dense<0.000000e+00> : vector<128xf32>
    %20 = vector.multi_reduction <add>, %19, %cst_12 [0] : vector<544x128xf32> to vector<128xf32>
    %21 = vector.shape_cast %20 : vector<128xf32> to vector<1x128xf32>
    %c0_13 = arith.constant 0 : index
    %c0_14 = arith.constant 0 : index
    %c0_15 = arith.constant 0 : index
    %22 = vector.load %arg6[%c0_13, %c0_14, %c0_15] : memref<1x2x128xf32, #tpu.memory_space<vmem>>, vector<1x1x128xf32>
    %23 = vector.shape_cast %22 : vector<1x1x128xf32> to vector<1x128xf32>
    %24 = vector.shape_cast %21 : vector<1x128xf32> to vector<1x1x128xf32>
    tpu.vector_store %arg6[%c0_13, %c0_14, %c0_15], %24 {strides = array<i32>} : memref<1x2x128xf32, #tpu.memory_space<vmem>>, vector<1x1x128xf32>,
    %25 = arith.mulf %19, %19 : vector<544x128xf32>
    %cst_16 = arith.constant dense<0.000000e+00> : vector<128xf32>
    %26 = vector.multi_reduction <add>, %25, %cst_16 [0] : vector<544x128xf32> to vector<128xf32>
    %27 = vector.shape_cast %26 : vector<128xf32> to vector<1x128xf32>
    %c0_17 = arith.constant 0 : index
    %c1 = arith.constant 1 : index
    %c0_18 = arith.constant 0 : index
    %28 = vector.load %arg6[%c0_17, %c1, %c0_18] : memref<1x2x128xf32, #tpu.memory_space<vmem>>, vector<1x1x128xf32>
    %29 = vector.shape_cast %28 : vector<1x1x128xf32> to vector<1x128xf32>
    %30 = vector.shape_cast %27 : vector<1x128xf32> to vector<1x1x128xf32>
    tpu.vector_store %arg6[%c0_17, %c1, %c0_18], %30 {strides = array<i32>} : memref<1x2x128xf32, #tpu.memory_space<vmem>>, vector<1x1x128xf32>,
    return
  }
  func.func @transform_0(%arg0: i32) -> (i32, i32) {
    %c0_i32 = arith.constant 0 : i32
    %c0_i32_0 = arith.constant 0 : i32
    return %arg0, %c0_i32 : i32, i32
  }
  func.func @transform_1(%arg0: i32) -> (i32, i32) {
    %c0_i32 = arith.constant 0 : i32
    %c0_i32_0 = arith.constant 0 : i32
    return %arg0, %c0_i32 : i32, i32
  }
  func.func @transform_2(%arg0: i32) -> (i32, i32) {
    %c0_i32 = arith.constant 0 : i32
    %c0_i32_0 = arith.constant 0 : i32
    %c0_i32_1 = arith.constant 0 : i32
    return %c0_i32, %c0_i32_0 : i32, i32
  }
  func.func @transform_3(%arg0: i32) -> (i32, i32) {
    %c0_i32 = arith.constant 0 : i32
    %c0_i32_0 = arith.constant 0 : i32
    %c0_i32_1 = arith.constant 0 : i32
    return %c0_i32, %c0_i32_0 : i32, i32
  }
  func.func @transform_4(%arg0: i32) -> (i32, i32) {
    %c0_i32 = arith.constant 0 : i32
    %c0_i32_0 = arith.constant 0 : i32
    %c0_i32_1 = arith.constant 0 : i32
    return %c0_i32, %c0_i32_0 : i32, i32
  }
  func.func @transform_5(%arg0: i32) -> (i32, i32, i32) {
    %c0_i32 = arith.constant 0 : i32
    %c0_i32_0 = arith.constant 0 : i32
    %c0_i32_1 = arith.constant 0 : i32
    return %arg0, %c0_i32, %c0_i32_0 : i32, i32, i32
  }
}

module attributes {stable_mosaic.version = 11 : i64} {
  func.func @_finalize_kernel(%arg0: i32, %arg1: memref<544x128xbf16, #tpu.memory_space<vmem>>, %arg2: memref<544x128xbf16, #tpu.memory_space<vmem>>, %arg3: memref<1x128xf32, #tpu.memory_space<vmem>>, %arg4: memref<1x128xf32, #tpu.memory_space<vmem>>, %arg5: memref<128x128xbf16, #tpu.memory_space<vmem>>, %arg6: memref<1x128xf32, #tpu.memory_space<vmem>>, %arg7: memref<1x128xf32, #tpu.memory_space<vmem>>, %arg8: memref<544x128xf32, #tpu.memory_space<vmem>>) attributes {dimension_semantics = [#tpu.dimension_semantics<parallel>], iteration_bounds = array<i64: 1>, scalar_prefetch = 0 : i64, scratch_operands = 0 : i64, tpu.core_type = #tpu.core_type<tc>, window_params = [{transform_indices = @transform_0, window_bounds = array<i64: 544, 128>}, {transform_indices = @transform_1, window_bounds = array<i64: 544, 128>}, {pipeline_mode = #tpu.pipeline_mode<synchronous>, transform_indices = @transform_2, window_bounds = array<i64: 1, 128>}, {pipeline_mode = #tpu.pipeline_mode<synchronous>, transform_indices = @transform_3, window_bounds = array<i64: 1, 128>}, {pipeline_mode = #tpu.pipeline_mode<synchronous>, transform_indices = @transform_4, window_bounds = array<i64: 128, 128>}, {pipeline_mode = #tpu.pipeline_mode<synchronous>, transform_indices = @transform_5, window_bounds = array<i64: 1, 128>}, {pipeline_mode = #tpu.pipeline_mode<synchronous>, transform_indices = @transform_6, window_bounds = array<i64: 1, 128>}, {transform_indices = @transform_7, window_bounds = array<i64: 544, 128>}]} {
    %c0 = arith.constant 0 : index
    %c0_0 = arith.constant 0 : index
    %0 = vector.load %arg1[%c0, %c0_0] : memref<544x128xbf16, #tpu.memory_space<vmem>>, vector<544x128xbf16>
    %1 = arith.extf %0 : vector<544x128xbf16> to vector<544x128xf32>
    %c0_1 = arith.constant 0 : index
    %c0_2 = arith.constant 0 : index
    %2 = vector.load %arg3[%c0_1, %c0_2] : memref<1x128xf32, #tpu.memory_space<vmem>>, vector<1x128xf32>
    %3 = vector.broadcast %2 : vector<1x128xf32> to vector<544x128xf32>
    %4 = arith.mulf %1, %3 : vector<544x128xf32>
    %c0_3 = arith.constant 0 : index
    %c0_4 = arith.constant 0 : index
    %5 = vector.load %arg4[%c0_3, %c0_4] : memref<1x128xf32, #tpu.memory_space<vmem>>, vector<1x128xf32>
    %6 = vector.broadcast %5 : vector<1x128xf32> to vector<544x128xf32>
    %7 = arith.addf %4, %6 : vector<544x128xf32>
    %cst = arith.constant 0.000000e+00 : f32
    %8 = vector.broadcast %cst : f32 to vector<544x128xf32>
    %9 = arith.maximumf %7, %8 : vector<544x128xf32>
    %10 = arith.truncf %9 : vector<544x128xf32> to vector<544x128xbf16>
    %c0_5 = arith.constant 0 : index
    %c0_6 = arith.constant 0 : index
    %11 = vector.load %arg5[%c0_5, %c0_6] : memref<128x128xbf16, #tpu.memory_space<vmem>>, vector<128x128xbf16>
    %cst_7 = arith.constant dense<0.000000e+00> : vector<544x128xf32>
    %12 = tpu.matmul %10, %11, %cst_7 {dimension_numbers = #tpu.dot_dimension_numbers<[1], [0], [0], [1], [0, 0, 1, 1], [], []>} : vector<544x128xbf16>, vector<128x128xbf16>, vector<544x128xf32> -> vector<544x128xf32>
    %c0_8 = arith.constant 0 : index
    %c0_9 = arith.constant 0 : index
    %13 = vector.load %arg6[%c0_8, %c0_9] : memref<1x128xf32, #tpu.memory_space<vmem>>, vector<1x128xf32>
    %14 = vector.broadcast %13 : vector<1x128xf32> to vector<544x128xf32>
    %15 = arith.mulf %12, %14 : vector<544x128xf32>
    %c0_10 = arith.constant 0 : index
    %c0_11 = arith.constant 0 : index
    %16 = vector.load %arg7[%c0_10, %c0_11] : memref<1x128xf32, #tpu.memory_space<vmem>>, vector<1x128xf32>
    %17 = vector.broadcast %16 : vector<1x128xf32> to vector<544x128xf32>
    %18 = arith.addf %15, %17 : vector<544x128xf32>
    %c0_12 = arith.constant 0 : index
    %c0_13 = arith.constant 0 : index
    %19 = vector.load %arg2[%c0_12, %c0_13] : memref<544x128xbf16, #tpu.memory_space<vmem>>, vector<544x128xbf16>
    %20 = arith.extf %19 : vector<544x128xbf16> to vector<544x128xf32>
    %21 = arith.addf %18, %20 : vector<544x128xf32>
    %cst_14 = arith.constant 0.000000e+00 : f32
    %22 = vector.broadcast %cst_14 : f32 to vector<544x128xf32>
    %23 = arith.maximumf %21, %22 : vector<544x128xf32>
    %c0_15 = arith.constant 0 : index
    %c0_16 = arith.constant 0 : index
    %24 = vector.load %arg8[%c0_15, %c0_16] : memref<544x128xf32, #tpu.memory_space<vmem>>, vector<544x128xf32>
    tpu.vector_store %arg8[%c0_15, %c0_16], %23 {strides = array<i32>} : memref<544x128xf32, #tpu.memory_space<vmem>>, vector<544x128xf32>,
    return
  }
  func.func @transform_0(%arg0: i32) -> (i32, i32) {
    %c0_i32 = arith.constant 0 : i32
    %c0_i32_0 = arith.constant 0 : i32
    return %arg0, %c0_i32 : i32, i32
  }
  func.func @transform_1(%arg0: i32) -> (i32, i32) {
    %c0_i32 = arith.constant 0 : i32
    %c0_i32_0 = arith.constant 0 : i32
    return %arg0, %c0_i32 : i32, i32
  }
  func.func @transform_2(%arg0: i32) -> (i32, i32) {
    %c0_i32 = arith.constant 0 : i32
    %c0_i32_0 = arith.constant 0 : i32
    %c0_i32_1 = arith.constant 0 : i32
    return %c0_i32, %c0_i32_0 : i32, i32
  }
  func.func @transform_3(%arg0: i32) -> (i32, i32) {
    %c0_i32 = arith.constant 0 : i32
    %c0_i32_0 = arith.constant 0 : i32
    %c0_i32_1 = arith.constant 0 : i32
    return %c0_i32, %c0_i32_0 : i32, i32
  }
  func.func @transform_4(%arg0: i32) -> (i32, i32) {
    %c0_i32 = arith.constant 0 : i32
    %c0_i32_0 = arith.constant 0 : i32
    %c0_i32_1 = arith.constant 0 : i32
    return %c0_i32, %c0_i32_0 : i32, i32
  }
  func.func @transform_5(%arg0: i32) -> (i32, i32) {
    %c0_i32 = arith.constant 0 : i32
    %c0_i32_0 = arith.constant 0 : i32
    %c0_i32_1 = arith.constant 0 : i32
    return %c0_i32, %c0_i32_0 : i32, i32
  }
  func.func @transform_6(%arg0: i32) -> (i32, i32) {
    %c0_i32 = arith.constant 0 : i32
    %c0_i32_0 = arith.constant 0 : i32
    %c0_i32_1 = arith.constant 0 : i32
    return %c0_i32, %c0_i32_0 : i32, i32
  }
  func.func @transform_7(%arg0: i32) -> (i32, i32) {
    %c0_i32 = arith.constant 0 : i32
    %c0_i32_0 = arith.constant 0 : i32
    return %arg0, %c0_i32 : i32, i32
  }
}

</mosaic_0001>

<bundles_post_ra>
// kernel: bottleneck_forward.4
= control target key start
LH: loop header
LB: loop body
LE: loop exit
PB: predicated region body
PF: predicated region fallthrough
CT: control target
= control target key end

     0   :  { %s1406_s1 = inlined_call_operand.vmem [shape: bf16[128,128], index: 1, kind: input, shape index: {}]   ;;  %s1407_s0 = inlined_call_operand.vmem [shape: bf16[544,128], index: 0, kind: input, shape index: {}]   ;;  %s1408_s2 = inlined_call_operand.vmem [shape: f32[1,2,128], index: 2, kind: output, shape index: {}]  }
   0x1   :  { %v1057_v0 = vld [vmem:[%s1406_s1] sm:$0xff]   ;;  %v1058_v1 = vld [vmem:[%s1406_s1 + $0x8] sm:$0xff]   ;;  %v1059_v2 = vld [vmem:[%s1406_s1 + $0x10] sm:$0xff]  }
   0x2   :  { %957 = vmatprep.subr.bf16.mxu0 %v1057_v0  ;;  %1041 = vmatprep.subr.bf16.mxu1 %v1057_v0  ;;  %v1060_v3 = vld [vmem:[%s1406_s1 + $0x18] sm:$0xff]   ;;  %v1065_v4 = vld [vmem:[%s1407_s0] sm:$0xff]   ;;  %v1062_v6 = vld [vmem:[%s1406_s1 + $0x28] sm:$0xff]  }
   0x3   :  { %958 = vmatpush3.bf16.msra.mxu0 %v1057_v0  ;;  %1049 = vmatpush3.bf16.msra.mxu1 %v1057_v0  ;;  %v1061_v5 = vld [vmem:[%s1406_s1 + $0x20] sm:$0xff]   ;;  %v1063_v7 = vld [vmem:[%s1406_s1 + $0x30] sm:$0xff]   ;;  %v1064_v8 = vld [vmem:[%s1406_s1 + $0x38] sm:$0xff]  }
   0x4   :  { %959 = vmatprep.subr.bf16.mxu0 %v1058_v1  ;;  %1042 = vmatprep.subr.bf16.mxu1 %v1058_v1  ;;  %v1083_v9 = vld [vmem:[%s1407_s0 + $0x90] sm:$0xff]   ;;  %v1066_v10 = vld [vmem:[%s1407_s0 + $0x8] sm:$0xff]   ;;  %v1084_v12 = vld [vmem:[%s1407_s0 + $0x98] sm:$0xff]  }
   0x5   :  { %973 = vmatprep.mubr.bf16.mxu0 %v1065_v4  ;;  %v1067_v11 = vld [vmem:[%s1407_s0 + $0x10] sm:$0xff]   ;;  %1009 = vmatprep.mubr.bf16.mxu1 %v1083_v9  ;;  %v1085_v13 = vld [vmem:[%s1407_s0 + $0xa0] sm:$0xff]   ;;  %v1068_v14 = vld [vmem:[%s1407_s0 + $0x18] sm:$0xff]  }
   0x6   :  { %v1069_v15 = vld [vmem:[%s1407_s0 + $0x20] sm:$0xff]   ;;  %v1086_v16 = vld [vmem:[%s1407_s0 + $0xa8] sm:$0xff]   ;;  %v1087_v17 = vld [vmem:[%s1407_s0 + $0xb0] sm:$0xff]  }
   0x7   :  { %960 = vmatpush3.bf16.msra.mxu0 %v1058_v1  ;;  %1050 = vmatpush3.bf16.msra.mxu1 %v1058_v1  ;;  %v1070_v18 = vld [vmem:[%s1407_s0 + $0x28] sm:$0xff]   ;;  %v1088_v19 = vld [vmem:[%s1407_s0 + $0xb8] sm:$0xff]   ;;  %v1071_v20 = vld [vmem:[%s1407_s0 + $0x30] sm:$0xff]  }
   0x8   :  { %961 = vmatprep.subr.bf16.mxu0 %v1059_v2  ;;  %1043 = vmatprep.subr.bf16.mxu1 %v1059_v2  ;;  %v1089_v21 = vld [vmem:[%s1407_s0 + $0xc0] sm:$0xff]   ;;  %v1072_v22 = vld [vmem:[%s1407_s0 + $0x38] sm:$0xff]   ;;  %v1090_v23 = vld [vmem:[%s1407_s0 + $0xc8] sm:$0xff]  }
   0x9   :  { %v1073_v24 = vld [vmem:[%s1407_s0 + $0x40] sm:$0xff]   ;;  %v1091_v25 = vld [vmem:[%s1407_s0 + $0xd0] sm:$0xff]   ;;  %v1074_v26 = vld [vmem:[%s1407_s0 + $0x48] sm:$0xff]  }
   0xa   :  { %v1092_v27 = vld [vmem:[%s1407_s0 + $0xd8] sm:$0xff]   ;;  %v1075_v28 = vld [vmem:[%s1407_s0 + $0x50] sm:$0xff]   ;;  %v1093_v29 = vld [vmem:[%s1407_s0 + $0xe0] sm:$0xff]  }
   0xb   :  { %962 = vmatpush3.bf16.msra.mxu0 %v1059_v2  ;;  %1051 = vmatpush3.bf16.msra.mxu1 %v1059_v2  ;;  %v1076_v30 = vld [vmem:[%s1407_s0 + $0x58] sm:$0xff]   ;;  %v1094_v31 = vld [vmem:[%s1407_s0 + $0xe8] sm:$0xff]   ;;  %v1077_v32 = vld [vmem:[%s1407_s0 + $0x60] sm:$0xff]  }
   0xc   :  { %963 = vmatprep.subr.bf16.mxu0 %v1060_v3  ;;  %1044 = vmatprep.subr.bf16.mxu1 %v1060_v3  ;;  %v1095_v33 = vld [vmem:[%s1407_s0 + $0xf0] sm:$0xff]   ;;  %v1078_v34 = vld [vmem:[%s1407_s0 + $0x68] sm:$0xff]   ;;  %v1096_v35 = vld [vmem:[%s1407_s0 + $0xf8] sm:$0xff]  }
   0xd   :  { %v1079_v36 = vld [vmem:[%s1407_s0 + $0x70] sm:$0xff]   ;;  %v1097_v37 = vld [vmem:[%s1407_s0 + $0x100] sm:$0xff]   ;;  %v1080_v38 = vld [vmem:[%s1407_s0 + $0x78] sm:$0xff]  }
   0xe   :  { %v1098_v39 = vld [vmem:[%s1407_s0 + $0x108] sm:$0xff]   ;;  %v1081_v40 = vld [vmem:[%s1407_s0 + $0x80] sm:$0xff]  }
   0xf   :  { %964 = vmatpush3.bf16.msra.mxu0 %v1060_v3  ;;  %1052 = vmatpush3.bf16.msra.mxu1 %v1060_v3  ;;  %v1082_v41 = vld [vmem:[%s1407_s0 + $0x88] sm:$0xff]  }
  0x10   :  { %965 = vmatprep.subr.bf16.mxu0 %v1061_v5  ;;  %1045 = vmatprep.subr.bf16.mxu1 %v1061_v5 }
  0x13   :  { %966 = vmatpush3.bf16.msra.mxu0 %v1061_v5  ;;  %1053 = vmatpush3.bf16.msra.mxu1 %v1061_v5 }
  0x14   :  { %967 = vmatprep.subr.bf16.mxu0 %v1062_v6  ;;  %1046 = vmatprep.subr.bf16.mxu1 %v1062_v6 }
  0x17   :  { %968 = vmatpush3.bf16.msra.mxu0 %v1062_v6  ;;  %1054 = vmatpush3.bf16.msra.mxu1 %v1062_v6 }
  0x18   :  { %969 = vmatprep.subr.bf16.mxu0 %v1063_v7  ;;  %1047 = vmatprep.subr.bf16.mxu1 %v1063_v7 }
  0x1b   :  { %970 = vmatpush3.bf16.msra.mxu0 %v1063_v7  ;;  %1055 = vmatpush3.bf16.msra.mxu1 %v1063_v7 }
  0x1c   :  { %971 = vmatprep.subr.bf16.mxu0 %v1064_v8  ;;  %1048 = vmatprep.subr.bf16.mxu1 %v1064_v8 }
  0x1f   :  { %972 = vmatpush3.bf16.msra.mxu0 %v1064_v8  ;;  %1056 = vmatpush3.bf16.msra.mxu1 %v1064_v8 }
  0x22   :  { %974 = vmatmul.mubr.bf16.vlgmr.msra.gmra.mrb[0].mxu0 %v1066_v10  ;;  %1010 = vmatmul.mubr.bf16.vlgmr.msra.gmra.mrb[0].mxu1 %v1084_v12 }
  0x23   :  { %977 = vmatprep.mubr.bf16.mxu0 %v1067_v11  ;;  %1013 = vmatprep.mubr.bf16.mxu1 %v1085_v13 }
  0x2a   :  { %978 = vmatmul.mubr.bf16.gmra.mrb[4].mxu0 %v1068_v14  ;;  %1014 = vmatmul.mubr.bf16.gmra.mrb[4].mxu1 %v1086_v16 }
  0x2b   :  { %981 = vmatprep.mubr.bf16.mxu0 %v1069_v15  ;;  %1017 = vmatprep.mubr.bf16.mxu1 %v1087_v17 }
  0x32   :  { %982 = vmatmul.mubr.bf16.gmra.mrb[8].mxu0 %v1070_v18  ;;  %1018 = vmatmul.mubr.bf16.gmra.mrb[8].mxu1 %v1088_v19 }
  0x33   :  { %985 = vmatprep.mubr.bf16.mxu0 %v1071_v20  ;;  %1021 = vmatprep.mubr.bf16.mxu1 %v1089_v21 }
  0x3a   :  { %986 = vmatmul.mubr.bf16.gmra.mrb[12].mxu0 %v1072_v22  ;;  %1022 = vmatmul.mubr.bf16.gmra.mrb[12].mxu1 %v1090_v23 }
  0x3b   :  { %989 = vmatprep.mubr.bf16.mxu0 %v1073_v24  ;;  %1025 = vmatprep.mubr.bf16.mxu1 %v1091_v25 }
  0x42   :  { %990 = vmatmul.mubr.bf16.gmra.mrb[16].mxu0 %v1074_v26  ;;  %1026 = vmatmul.mubr.bf16.gmra.mrb[16].mxu1 %v1092_v27 }
  0x43   :  { %993 = vmatprep.mubr.bf16.mxu0 %v1075_v28  ;;  %1029 = vmatprep.mubr.bf16.mxu1 %v1093_v29 }
  0x4a   :  { %994 = vmatmul.mubr.bf16.gmra.mrb[20].mxu0 %v1076_v30  ;;  %1030 = vmatmul.mubr.bf16.gmra.mrb[20].mxu1 %v1094_v31 }
  0x4b   :  { %997 = vmatprep.mubr.bf16.mxu0 %v1077_v32  ;;  %1033 = vmatprep.mubr.bf16.mxu1 %v1095_v33 }
  0x52   :  { %998 = vmatmul.mubr.bf16.gmra.mrb[24].mxu0 %v1078_v34  ;;  %1034 = vmatmul.mubr.bf16.gmra.mrb[24].mxu1 %v1096_v35 }
  0x53   :  { %1001 = vmatprep.mubr.bf16.mxu0 %v1079_v36  ;;  %1037 = vmatprep.mubr.bf16.mxu1 %v1097_v37 }
  0x5a   :  { %1002 = vmatmul.mubr.bf16.gmra.mrb[28].mxu0 %v1080_v38  ;;  %1038 = vmatmul.mubr.bf16.gmra.mrb[28].mxu1 %v1098_v39 }
  0x5b   :  { %1005 = vmatprep.mubr.bf16.mxu0 %v1081_v40 }
  0x62   :  { %1006 = vmatmul.mubr.bf16.gmra.mrb[32].mxu0 %v1082_v41 }
  0xf5   :  { %v975_v42 = vpop.f32.mrb[0].mxu0  ;;  %v1240_v43 = vpop.f32.mrb[0].mxu1 }
  0xf6   :  { %v382_v44 = vpop.f32.mrb[1].mxu0  ;;  %v1242_v45 = vpop.f32.mrb[1].mxu1  ;;  %v729_v53 = vmul.f32 %v975_v42, %v975_v42 }
  0xf7   :  { %v976_v46 = vpop.f32.mrb[2].mxu0  ;;  %v1244_v47 = vpop.f32.mrb[2].mxu1  ;;  %v727_v50 = vmul.f32 %v382_v44, %v382_v44 }
  0xf8   :  { %v385_v48 = vpop.f32.mrb[3].mxu0  ;;  %v1246_v49 = vpop.f32.mrb[3].mxu1  ;;  %v730_v56 = vmul.f32 %v976_v46, %v976_v46 }
  0xf9   :  { %v653_v51 = vadd.f32 %v385_v48, %v382_v44  ;;  %v728_v52 = vmul.f32 %v385_v48, %v385_v48 }
  0xfb   :  { %v654_v54 = vadd.f32 %v975_v42, %v653_v51  ;;  %v795_v55 = vadd.f32 %v728_v52, %v727_v50 }
  0xfd   :  { %v796_v57 = vadd.f32 %v795_v55, %v729_v53  ;;  %v979_v58 = vpop.f32.mrb[4].mxu0  ;;  %v655_v59 = vadd.f32 %v976_v46, %v654_v54  ;;  %v1248_v60 = vpop.f32.mrb[4].mxu1 }
  0xfe   :  { %v398_v61 = vpop.f32.mrb[5].mxu0  ;;  %v1250_v62 = vpop.f32.mrb[5].mxu1  ;;  %v733_v9 = vmul.f32 %v979_v58, %v979_v58 }
  0xff   :  { %v656_v63 = vadd.f32 %v655_v59, %v398_v61  ;;  %v731_v0 = vmul.f32 %v398_v61, %v398_v61  ;;  %v797_v1 = vadd.f32 %v796_v57, %v730_v56  ;;  %v980_v2 = vpop.f32.mrb[6].mxu0  ;;  %v1252_v3 = vpop.f32.mrb[6].mxu1 }
 0x100   :  { %v401_v4 = vpop.f32.mrb[7].mxu0  ;;  %v1254_v5 = vpop.f32.mrb[7].mxu1  ;;  %v734_v12 = vmul.f32 %v980_v2, %v980_v2 }
 0x101   :  { %v798_v6 = vadd.f32 %v797_v1, %v731_v0  ;;  %v657_v7 = vadd.f32 %v656_v63, %v401_v4  ;;  %v732_v8 = vmul.f32 %v401_v4, %v401_v4 }
 0x103   :  { %v658_v10 = vadd.f32 %v979_v58, %v657_v7  ;;  %v799_v11 = vadd.f32 %v798_v6, %v732_v8 }
 0x105   :  { %v800_v13 = vadd.f32 %v799_v11, %v733_v9  ;;  %v983_v14 = vpop.f32.mrb[8].mxu0  ;;  %v659_v15 = vadd.f32 %v980_v2, %v658_v10  ;;  %v1256_v16 = vpop.f32.mrb[8].mxu1 }
 0x106   :  { %v414_v17 = vpop.f32.mrb[9].mxu0  ;;  %v1258_v18 = vpop.f32.mrb[9].mxu1  ;;  %v737_v29 = vmul.f32 %v983_v14, %v983_v14 }
 0x107   :  { %v660_v19 = vadd.f32 %v659_v15, %v414_v17  ;;  %v735_v20 = vmul.f32 %v414_v17, %v414_v17  ;;  %v801_v21 = vadd.f32 %v800_v13, %v734_v12  ;;  %v984_v22 = vpop.f32.mrb[10].mxu0  ;;  %v1260_v23 = vpop.f32.mrb[10].mxu1 }
 0x108   :  { %v417_v24 = vpop.f32.mrb[11].mxu0  ;;  %v1262_v25 = vpop.f32.mrb[11].mxu1  ;;  %v738_v32 = vmul.f32 %v984_v22, %v984_v22 }
 0x109   :  { %v802_v26 = vadd.f32 %v801_v21, %v735_v20  ;;  %v661_v27 = vadd.f32 %v660_v19, %v417_v24  ;;  %v736_v28 = vmul.f32 %v417_v24, %v417_v24 }
 0x10b   :  { %v662_v30 = vadd.f32 %v983_v14, %v661_v27  ;;  %v803_v31 = vadd.f32 %v802_v26, %v736_v28 }
 0x10d   :  { %v804_v33 = vadd.f32 %v803_v31, %v737_v29  ;;  %v987_v34 = vpop.f32.mrb[12].mxu0  ;;  %v663_v35 = vadd.f32 %v984_v22, %v662_v30  ;;  %v1264_v36 = vpop.f32.mrb[12].mxu1 }
 0x10e   :  { %v430_v37 = vpop.f32.mrb[13].mxu0  ;;  %v1266_v38 = vpop.f32.mrb[13].mxu1  ;;  %v741_v53 = vmul.f32 %v987_v34, %v987_v34 }
 0x10f   :  { %v664_v39 = vadd.f32 %v663_v35, %v430_v37  ;;  %v739_v40 = vmul.f32 %v430_v37, %v430_v37  ;;  %v805_v41 = vadd.f32 %v804_v33, %v738_v32  ;;  %v988_v42 = vpop.f32.mrb[14].mxu0  ;;  %v1268_v44 = vpop.f32.mrb[14].mxu1 }
 0x110   :  { %v433_v46 = vpop.f32.mrb[15].mxu0  ;;  %v1270_v48 = vpop.f32.mrb[15].mxu1  ;;  %v742_v56 = vmul.f32 %v988_v42, %v988_v42 }
 0x111   :  { %v806_v50 = vadd.f32 %v805_v41, %v739_v40  ;;  %v665_v51 = vadd.f32 %v664_v39, %v433_v46  ;;  %v740_v52 = vmul.f32 %v433_v46, %v433_v46 }
 0x113   :  { %v666_v54 = vadd.f32 %v987_v34, %v665_v51  ;;  %v807_v55 = vadd.f32 %v806_v50, %v740_v52 }
 0x115   :  { %v808_v57 = vadd.f32 %v807_v55, %v741_v53  ;;  %v991_v58 = vpop.f32.mrb[16].mxu0  ;;  %v667_v59 = vadd.f32 %v988_v42, %v666_v54  ;;  %v1272_v61 = vpop.f32.mrb[16].mxu1 }
 0x116   :  { %v446_v63 = vpop.f32.mrb[17].mxu0  ;;  %v1274_v0 = vpop.f32.mrb[17].mxu1  ;;  %v745_v13 = vmul.f32 %v991_v58, %v991_v58 }
 0x117   :  { %v668_v1 = vadd.f32 %v667_v59, %v446_v63  ;;  %v743_v2 = vmul.f32 %v446_v63, %v446_v63  ;;  %v809_v4 = vadd.f32 %v808_v57, %v742_v56  ;;  %v992_v6 = vpop.f32.mrb[18].mxu0  ;;  %v1276_v7 = vpop.f32.mrb[18].mxu1 }
 0x118   :  { %v449_v8 = vpop.f32.mrb[19].mxu0  ;;  %v1278_v9 = vpop.f32.mrb[19].mxu1  ;;  %v746_v17 = vmul.f32 %v992_v6, %v992_v6 }
 0x119   :  { %v810_v10 = vadd.f32 %v809_v4, %v743_v2  ;;  %v669_v11 = vadd.f32 %v668_v1, %v449_v8  ;;  %v744_v12 = vmul.f32 %v449_v8, %v449_v8 }
 0x11b   :  { %v670_v14 = vadd.f32 %v991_v58, %v669_v11  ;;  %v811_v15 = vadd.f32 %v810_v10, %v744_v12 }
 0x11d   :  { %v812_v19 = vadd.f32 %v811_v15, %v745_v13  ;;  %v995_v20 = vpop.f32.mrb[20].mxu0  ;;  %v671_v21 = vadd.f32 %v992_v6, %v670_v14  ;;  %v1280_v22 = vpop.f32.mrb[20].mxu1 }
 0x11e   :  { %v462_v24 = vpop.f32.mrb[21].mxu0  ;;  %v1282_v26 = vpop.f32.mrb[21].mxu1  ;;  %v749_v39 = vmul.f32 %v995_v20, %v995_v20 }
 0x11f   :  { %v672_v27 = vadd.f32 %v671_v21, %v462_v24  ;;  %v747_v28 = vmul.f32 %v462_v24, %v462_v24  ;;  %v813_v29 = vadd.f32 %v812_v19, %v746_v17  ;;  %v996_v30 = vpop.f32.mrb[22].mxu0  ;;  %v1284_v31 = vpop.f32.mrb[22].mxu1 }
 0x120   :  { %v465_v32 = vpop.f32.mrb[23].mxu0  ;;  %v1286_v33 = vpop.f32.mrb[23].mxu1  ;;  %v750_v42 = vmul.f32 %v996_v30, %v996_v30 }
 0x121   :  { %v814_v34 = vadd.f32 %v813_v29, %v747_v28  ;;  %v673_v35 = vadd.f32 %v672_v27, %v465_v32  ;;  %v748_v37 = vmul.f32 %v465_v32, %v465_v32 }
 0x123   :  { %v674_v40 = vadd.f32 %v995_v20, %v673_v35  ;;  %v815_v41 = vadd.f32 %v814_v34, %v748_v37 }
 0x125   :  { %v816_v46 = vadd.f32 %v815_v41, %v749_v39  ;;  %v999_v50 = vpop.f32.mrb[24].mxu0  ;;  %v675_v51 = vadd.f32 %v996_v30, %v674_v40  ;;  %v1288_v52 = vpop.f32.mrb[24].mxu1 }
 0x126   :  { %v478_v53 = vpop.f32.mrb[25].mxu0  ;;  %v1290_v54 = vpop.f32.mrb[25].mxu1  ;;  %v753_v8 = vmul.f32 %v999_v50, %v999_v50 }
 0x127   :  { %v676_v55 = vadd.f32 %v675_v51, %v478_v53  ;;  %v751_v56 = vmul.f32 %v478_v53, %v478_v53  ;;  %v817_v57 = vadd.f32 %v816_v46, %v750_v42  ;;  %v1000_v58 = vpop.f32.mrb[26].mxu0  ;;  %v1292_v59 = vpop.f32.mrb[26].mxu1 }
 0x128   :  { %v481_v63 = vpop.f32.mrb[27].mxu0  ;;  %v1294_v1 = vpop.f32.mrb[27].mxu1  ;;  %v754_v12 = vmul.f32 %v1000_v58, %v1000_v58 }
 0x129   :  { %v818_v2 = vadd.f32 %v817_v57, %v751_v56  ;;  %v677_v4 = vadd.f32 %v676_v55, %v481_v63  ;;  %v752_v6 = vmul.f32 %v481_v63, %v481_v63 }
 0x12b   :  { %v678_v10 = vadd.f32 %v999_v50, %v677_v4  ;;  %v819_v11 = vadd.f32 %v818_v2, %v752_v6 }
 0x12d   :  { %v820_v13 = vadd.f32 %v819_v11, %v753_v8  ;;  %v1003_v14 = vpop.f32.mrb[28].mxu0  ;;  %v679_v15 = vadd.f32 %v1000_v58, %v678_v10  ;;  %v1296_v17 = vpop.f32.mrb[28].mxu1 }
 0x12e   :  { %v494_v19 = vpop.f32.mrb[29].mxu0  ;;  %v1298_v20 = vpop.f32.mrb[29].mxu1  ;;  %v757_v39 = vmul.f32 %v1003_v14, %v1003_v14 }
 0x12f   :  { %v680_v21 = vadd.f32 %v679_v15, %v494_v19  ;;  %v755_v24 = vmul.f32 %v494_v19, %v494_v19  ;;  %v821_v27 = vadd.f32 %v820_v13, %v754_v12  ;;  %v1004_v28 = vpop.f32.mrb[30].mxu0  ;;  %v1300_v29 = vpop.f32.mrb[30].mxu1  ;;  %v763_v15 = vmul.f32 %v1242_v45, %v1242_v45 }
 0x130   :  { %v497_v30 = vpop.f32.mrb[31].mxu0  ;;  %v1302_v32 = vpop.f32.mrb[31].mxu1  ;;  %v758_v42 = vmul.f32 %v1004_v28, %v1004_v28 }
 0x131   :  { %v822_v34 = vadd.f32 %v821_v27, %v755_v24  ;;  %v681_v35 = vadd.f32 %v680_v21, %v497_v30  ;;  %v756_v37 = vmul.f32 %v497_v30, %v497_v30  ;;  %v765_v30 = vmul.f32 %v1240_v43, %v1240_v43 }
 0x133   :  { %v682_v40 = vadd.f32 %v1003_v14, %v681_v35  ;;  %v823_v41 = vadd.f32 %v822_v34, %v756_v37  ;;  %v766_v37 = vmul.f32 %v1244_v47, %v1244_v47 }
 0x135   :  { %v824_v46 = vadd.f32 %v823_v41, %v757_v39  ;;  %v1007_v50 = vpop.f32.mrb[32].mxu0  ;;  %v683_v51 = vadd.f32 %v1004_v28, %v682_v40  ;;  %v764_v28 = vmul.f32 %v1246_v49, %v1246_v49 }
 0x136   :  { %v510_v53 = vpop.f32.mrb[33].mxu0  ;;  %v761_v8 = vmul.f32 %v1007_v50, %v1007_v50 }
 0x137   :  { %v684_v55 = vadd.f32 %v683_v51, %v510_v53  ;;  %v759_v56 = vmul.f32 %v510_v53, %v510_v53  ;;  %v825_v57 = vadd.f32 %v824_v46, %v758_v42  ;;  %v1008_v58 = vpop.f32.mrb[34].mxu0 }
 0x138   :  { %v513_v63 = vpop.f32.mrb[35].mxu0  ;;  %v762_v12 = vmul.f32 %v1008_v58, %v1008_v58 }
 0x139   :  { %v826_v2 = vadd.f32 %v825_v57, %v759_v56  ;;  %v685_v4 = vadd.f32 %v684_v55, %v513_v63  ;;  %v760_v6 = vmul.f32 %v513_v63, %v513_v63 }
 0x13b   :  { %v686_v10 = vadd.f32 %v1007_v50, %v685_v4  ;;  %v827_v11 = vadd.f32 %v826_v2, %v760_v6  ;;  %v768_v50 = vmul.f32 %v1254_v5, %v1254_v5  ;;  %v772_v2 = vmul.f32 %v1262_v25, %v1262_v25 }
 0x13d   :  { %v828_v13 = vadd.f32 %v827_v11, %v761_v8  ;;  %v687_v14 = vadd.f32 %v1008_v58, %v686_v10 }
 0x13f   :  { %v688_v19 = vadd.f32 %v687_v14, %v1242_v45  ;;  %v829_v21 = vadd.f32 %v828_v13, %v762_v12  ;;  %v767_v45 = vmul.f32 %v1250_v62, %v1250_v62  ;;  %v776_v14 = vmul.f32 %v1270_v48, %v1270_v48 }
 0x141   :  { %v830_v24 = vadd.f32 %v829_v21, %v763_v15  ;;  %v689_v27 = vadd.f32 %v688_v19, %v1246_v49 }
 0x143   :  { %v690_v34 = vadd.f32 %v1240_v43, %v689_v27  ;;  %v831_v35 = vadd.f32 %v830_v24, %v764_v28  ;;  %v769_v43 = vmul.f32 %v1248_v60, %v1248_v60 }
 0x145   :  { %v832_v39 = vadd.f32 %v831_v35, %v765_v30  ;;  %v691_v40 = vadd.f32 %v1244_v47, %v690_v34  ;;  %v770_v47 = vmul.f32 %v1252_v3, %v1252_v3  ;;  %v780_v34 = vmul.f32 %v1278_v9, %v1278_v9 }
 0x147   :  { %v692_v41 = vadd.f32 %v691_v40, %v1250_v62  ;;  %v833_v42 = vadd.f32 %v832_v39, %v766_v37  ;;  %v771_v62 = vmul.f32 %v1258_v18, %v1258_v18 }
 0x149   :  { %v834_v46 = vadd.f32 %v833_v42, %v767_v45  ;;  %v693_v49 = vadd.f32 %v692_v41, %v1254_v5 }
 0x14b   :  { %v694_v51 = vadd.f32 %v1248_v60, %v693_v49  ;;  %v835_v53 = vadd.f32 %v834_v46, %v768_v50  ;;  %v773_v60 = vmul.f32 %v1256_v16, %v1256_v16  ;;  %v784_v46 = vmul.f32 %v1286_v33, %v1286_v33 }
 0x14d   :  { %v836_v55 = vadd.f32 %v835_v53, %v769_v43  ;;  %v695_v56 = vadd.f32 %v1252_v3, %v694_v51  ;;  %v774_v3 = vmul.f32 %v1260_v23, %v1260_v23 }
 0x14f   :  { %v696_v57 = vadd.f32 %v695_v56, %v1258_v18  ;;  %v837_v58 = vadd.f32 %v836_v55, %v770_v47  ;;  %v775_v18 = vmul.f32 %v1266_v38, %v1266_v38  ;;  %v788_v56 = vmul.f32 %v1294_v1, %v1294_v1 }
 0x151   :  { %v838_v63 = vadd.f32 %v837_v58, %v771_v62  ;;  %v697_v5 = vadd.f32 %v696_v57, %v1262_v25 }
 0x153   :  { %v698_v4 = vadd.f32 %v1256_v16, %v697_v5  ;;  %v839_v6 = vadd.f32 %v838_v63, %v772_v2  ;;  %v777_v16 = vmul.f32 %v1264_v36, %v1264_v36 }
 0x155   :  { %v840_v8 = vadd.f32 %v839_v6, %v773_v60  ;;  %v699_v10 = vadd.f32 %v1260_v23, %v698_v4  ;;  %v778_v23 = vmul.f32 %v1268_v44, %v1268_v44  ;;  %v792_v4 = vmul.f32 %v1302_v32, %v1302_v32 }
 0x157   :  { %v700_v11 = vadd.f32 %v699_v10, %v1266_v38  ;;  %v841_v12 = vadd.f32 %v840_v8, %v774_v3  ;;  %v779_v38 = vmul.f32 %v1274_v0, %v1274_v0 }
 0x159   :  { %v842_v13 = vadd.f32 %v841_v12, %v775_v18  ;;  %v701_v25 = vadd.f32 %v700_v11, %v1270_v48 }
 0x15b   :  { %v702_v15 = vadd.f32 %v1264_v36, %v701_v25  ;;  %v843_v19 = vadd.f32 %v842_v13, %v776_v14  ;;  %v781_v36 = vmul.f32 %v1272_v61, %v1272_v61 }
 0x15d   :  { %v844_v21 = vadd.f32 %v843_v19, %v777_v16  ;;  %v703_v24 = vadd.f32 %v1268_v44, %v702_v15  ;;  %v782_v44 = vmul.f32 %v1276_v7, %v1276_v7 }
 0x15f   :  { %v704_v27 = vadd.f32 %v703_v24, %v1274_v0  ;;  %v845_v28 = vadd.f32 %v844_v21, %v778_v23  ;;  %v783_v0 = vmul.f32 %v1282_v26, %v1282_v26 }
 0x161   :  { %v846_v30 = vadd.f32 %v845_v28, %v779_v38  ;;  %v705_v48 = vadd.f32 %v704_v27, %v1278_v9 }
 0x163   :  { %v706_v35 = vadd.f32 %v1272_v61, %v705_v48  ;;  %v847_v37 = vadd.f32 %v846_v30, %v780_v34  ;;  %v785_v61 = vmul.f32 %v1280_v22, %v1280_v22 }
 0x165   :  { %v848_v39 = vadd.f32 %v847_v37, %v781_v36  ;;  %v707_v40 = vadd.f32 %v1276_v7, %v706_v35  ;;  %v786_v7 = vmul.f32 %v1284_v31, %v1284_v31 }
 0x167   :  { %v708_v45 = vadd.f32 %v707_v40, %v1282_v26  ;;  %v849_v41 = vadd.f32 %v848_v39, %v782_v44  ;;  %v787_v26 = vmul.f32 %v1290_v54, %v1290_v54 }
 0x169   :  { %v850_v42 = vadd.f32 %v849_v41, %v783_v0  ;;  %v709_v9 = vadd.f32 %v708_v45, %v1286_v33 }
 0x16b   :  { %v710_v49 = vadd.f32 %v1280_v22, %v709_v9  ;;  %v851_v50 = vadd.f32 %v850_v42, %v784_v46  ;;  %v789_v22 = vmul.f32 %v1288_v52, %v1288_v52 }
 0x16d   :  { %v852_v43 = vadd.f32 %v851_v50, %v785_v61  ;;  %v711_v51 = vadd.f32 %v1284_v31, %v710_v49  ;;  %v790_v31 = vmul.f32 %v1292_v59, %v1292_v59 }
 0x16f   :  { %v712_v53 = vadd.f32 %v711_v51, %v1290_v54  ;;  %v853_v47 = vadd.f32 %v852_v43, %v786_v7  ;;  %v791_v54 = vmul.f32 %v1298_v20, %v1298_v20 }
 0x171   :  { %v854_v55 = vadd.f32 %v853_v47, %v787_v26  ;;  %v713_v33 = vadd.f32 %v712_v53, %v1294_v1 }
 0x173   :  { %v714_v62 = vadd.f32 %v1288_v52, %v713_v33  ;;  %v855_v57 = vadd.f32 %v854_v55, %v788_v56  ;;  %v793_v52 = vmul.f32 %v1296_v17, %v1296_v17 }
 0x175   :  { %v856_v58 = vadd.f32 %v855_v57, %v789_v22  ;;  %v715_v63 = vadd.f32 %v1292_v59, %v714_v62  ;;  %v794_v59 = vmul.f32 %v1300_v29, %v1300_v29 }
 0x177   :  { %v716_v5 = vadd.f32 %v715_v63, %v1298_v20  ;;  %v857_v2 = vadd.f32 %v856_v58, %v790_v31 }
 0x179   :  { %v858_v60 = vadd.f32 %v857_v2, %v791_v54  ;;  %v717_v1 = vadd.f32 %v716_v5, %v1302_v32 }
 0x17b   :  { %v718_v6 = vadd.f32 %v1296_v17, %v717_v1  ;;  %v859_v3 = vadd.f32 %v858_v60, %v792_v4 }
 0x17d   :  { %v719_v8 = vadd.f32 %v1300_v29, %v718_v6  ;;  %v860_v10 = vadd.f32 %v859_v3, %v793_v52 }
 0x17f   :  { %v720_v20 = vrot.slane %v719_v8, 4  ;;  %v861_v18 = vadd.f32 %v860_v10, %v794_v59 }
 0x181   :  { %v721_v11 = vadd.f32 %v720_v20, %v719_v8  ;;  %v862_v12 = vrot.slane %v861_v18, 4 }
 0x183   :  { %v722_v13 = vrot.slane %v721_v11, 2  ;;  %v863_v25 = vadd.f32 %v862_v12, %v861_v18 }
 0x185   :  { %v723_v14 = vadd.f32 %v722_v13, %v721_v11  ;;  %v864_v32 = vrot.slane %v863_v25, 2 }
 0x187   :  { %v724_v16 = vrot.slane %v723_v14, 1  ;;  %v865_v15 = vadd.f32 %v864_v32, %v863_v25 }
 0x189   :  { %v725_v19 = vadd.f32 %v724_v16, %v723_v14  ;;  %v866_v23 = vrot.slane %v865_v15, 1 }
 0x18b   :  { %726 = vst [vmem:[%s1408_s2] sm:$0x1] %v725_v19  ;;  %v867_v17 = vadd.f32 %v866_v23, %v865_v15 }
 0x18d   :  { %868 = vst [vmem:[%s1408_s2 + $0x1] sm:$0x1] %v867_v17 }

// kernel: bottleneck_forward.6
= control target key start
LH: loop header
LB: loop body
LE: loop exit
PB: predicated region body
PF: predicated region fallthrough
CT: control target
= control target key end

     0   :  { %v1876_v0 = vmov 0   ;;  %s2729_s4 = inlined_call_operand.vmem [shape: bf16[128,128], index: 4, kind: input, shape index: {}]   ;;  %s2730_s1 = inlined_call_operand.vmem [shape: f32[544,1], index: 1, kind: input, shape index: {}]   ;;  %s2731_s0 = inlined_call_operand.vmem [shape: bf16[544,128], index: 0, kind: input, shape index: {}]   ;;  %s2732_s2 = inlined_call_operand.vmem [shape: f32[1,128], index: 2, kind: input, shape index: {}]   ;;  %s2733_s3 = inlined_call_operand.vmem [shape: f32[1,128], index: 3, kind: input, shape index: {}]   ;;  %s2734_s5 = inlined_call_operand.vmem [shape: f32[1,2,128], index: 5, kind: output, shape index: {}]  }
   0x1   :  { %1865 = vset.pattern.permute.xlu1 %v1876_v0  ;;  %1864 = vset.pattern.permute.xlu0 %v1876_v0  ;;  %v1866_v1 = vld [vmem:[%s2729_s4] sm:$0xff]   ;;  %v780_v2 = vld [vmem:[%s2730_s1 + $0x10] sm:$0xff]  ;;  %v1867_v4 = vld [vmem:[%s2729_s4 + $0x8] sm:$0xff]  }
   0x2   :  { %v778_v3 = vld [vmem:[%s2730_s1] sm:$0xff]  ;;  %1763 = vmatprep.subr.bf16.mxu0 %v1866_v1  ;;  %1847 = vmatprep.subr.bf16.mxu1 %v1866_v1  ;;  %vm848_vm0 = vcmp.gt.f32.partialorder %v780_v2, 0.5  ;;  %v781_v5 = vld [vmem:[%s2730_s1 + $0x18] sm:$0xff]  ;;  %v779_v8 = vld [vmem:[%s2730_s1 + $0x8] sm:$0xff] }
   0x3   :  { %vm846_vm1 = vcmp.gt.f32.partialorder %v778_v3, 0.5  ;;  %v916_v6 = vsel %vm848_vm0, 1, %v1876_v0  ;;  %1764 = vmatpush3.bf16.msra.mxu0 %v1866_v1  ;;  %1855 = vmatpush3.bf16.msra.mxu1 %v1866_v1  ;;  %vm849_vm2 = vcmp.gt.f32.partialorder %v781_v5, 0.5  ;;  %vm847_vm3 = vcmp.gt.f32.partialorder %v779_v8, 0.5  ;;  %v783_v10 = vld [vmem:[%s2730_s1 + $0x28] sm:$0xff]  ;;  %v1868_v12 = vld [vmem:[%s2729_s4 + $0x10] sm:$0xff]  }
   0x4   :  { %v914_v7 = vsel %vm846_vm1, 1, %v1876_v0  ;;  %989 = vperm.xlu1 %1865, %v916_v6   ;;  %v917_v9 = vsel %vm849_vm2, 1, %v1876_v0  ;;  %1765 = vmatprep.subr.bf16.mxu0 %v1867_v4  ;;  %v915_v11 = vsel %vm847_vm3, 1, %v1876_v0  ;;  %vm851_vm4 = vcmp.gt.f32.partialorder %v783_v10, 0.5  ;;  %v782_v13 = vld [vmem:[%s2730_s1 + $0x20] sm:$0xff]  ;;  %v785_v14 = vld [vmem:[%s2730_s1 + $0x38] sm:$0xff] }
   0x5   :  { %983 = vperm.xlu0 %1864, %v914_v7   ;;  %1848 = vmatprep.subr.bf16.mxu1 %v1867_v4  ;;  %vm850_vm5 = vcmp.gt.f32.partialorder %v782_v13, 0.5  ;;  %v784_v15 = vld [vmem:[%s2730_s1 + $0x30] sm:$0xff]  ;;  %v919_v16 = vsel %vm851_vm4, 1, %v1876_v0  ;;  %v1869_v18 = vld [vmem:[%s2729_s4 + $0x18] sm:$0xff]   ;;  %vm853_vm6 = vcmp.gt.f32.partialorder %v785_v14, 0.5  ;;  %v787_v19 = vld [vmem:[%s2730_s1 + $0x48] sm:$0xff] }
   0x6   :  { %v918_v17 = vsel %vm850_vm5, 1, %v1876_v0  ;;  %vm852_vm7 = vcmp.gt.f32.partialorder %v784_v15, 0.5  ;;  %v786_v20 = vld [vmem:[%s2730_s1 + $0x40] sm:$0xff]  ;;  %vm855_vm8 = vcmp.gt.f32.partialorder %v787_v19, 0.5  ;;  %v789_v21 = vld [vmem:[%s2730_s1 + $0x58] sm:$0xff]  ;;  %v788_v22 = vld [vmem:[%s2730_s1 + $0x50] sm:$0xff] }
   0x7   :  { %1766 = vmatpush3.bf16.msra.mxu0 %v1867_v4  ;;  %1856 = vmatpush3.bf16.msra.mxu1 %v1867_v4  ;;  %vm854_vm9 = vcmp.gt.f32.partialorder %v786_v20, 0.5  ;;  %v1870_v23 = vld [vmem:[%s2729_s4 + $0x20] sm:$0xff]   ;;  %vm857_vm10 = vcmp.gt.f32.partialorder %v789_v21, 0.5  ;;  %vm856_vm11 = vcmp.gt.f32.partialorder %v788_v22, 0.5  ;;  %v921_v24 = vsel %vm853_vm6, 1, %v1876_v0  ;;  %v791_v28 = vld [vmem:[%s2730_s1 + $0x68] sm:$0xff] }
   0x8   :  { %992 = vperm.xlu1 %1865, %v917_v9   ;;  %1767 = vmatprep.subr.bf16.mxu0 %v1868_v12  ;;  %v920_v25 = vsel %vm852_vm7, 1, %v1876_v0  ;;  %v923_v26 = vsel %vm855_vm8, 1, %v1876_v0  ;;  %v922_v27 = vsel %vm854_vm9, 1, %v1876_v0  ;;  %v790_v29 = vld [vmem:[%s2730_s1 + $0x60] sm:$0xff]  ;;  %vm859_vm12 = vcmp.gt.f32.partialorder %v791_v28, 0.5  ;;  %v793_v34 = vld [vmem:[%s2730_s1 + $0x78] sm:$0xff] }
   0x9   :  { %986 = vperm.xlu0 %1864, %v915_v11   ;;  %1849 = vmatprep.subr.bf16.mxu1 %v1868_v12  ;;  %vm858_vm13 = vcmp.gt.f32.partialorder %v790_v29, 0.5  ;;  %v1980_v30 = vsel %vm857_vm10, 1, %v1876_v0  ;;  %v1984_v31 = vsel %vm856_vm11, 1, %v1876_v0  ;;  %v1987_v32 = vsel %vm859_vm12, 1, %v1876_v0  ;;  %v792_v35 = vld [vmem:[%s2730_s1 + $0x70] sm:$0xff]  ;;  %v1553_v36 = vld [vmem:[%s2731_s0] sm:$0xff]  }
   0xa   :  { %v1990_v33 = vsel %vm858_vm13, 1, %v1876_v0  ;;  %vm861_vm14 = vcmp.gt.f32.partialorder %v793_v34, 0.5  ;;  %vm860_vm15 = vcmp.gt.f32.partialorder %v792_v35, 0.5  ;;  %v2004_v37 = vld [vmem:[%s2732_s2] ss:$0 sm:$0xff]  ;;  %v1705_v38 = vld [vmem:[%s2731_s0 + $0x90] sm:$0xff]   ;;  %v1554_v42 = vunpack.c.l.bf16 %v1553_v36 }
   0xb   :  { %1768 = vmatpush3.bf16.msra.mxu0 %v1868_v12  ;;  %1857 = vmatpush3.bf16.msra.mxu1 %v1868_v12  ;;  %v1871_v39 = vld [vmem:[%s2729_s4 + $0x28] sm:$0xff]   ;;  %v2013_v40 = vsel %vm861_vm14, 1, %v1876_v0  ;;  %v2016_v41 = vsel %vm860_vm15, 1, %v1876_v0  ;;  %v1555_v43 = vunpack.c.h.bf16 %v1553_v36  ;;  %v794_v45 = vld [vmem:[%s2730_s1 + $0x80] sm:$0xff]  ;;  %v1626_v47 = vunpack.c.l.bf16 %v1705_v38  ;;  %v1706_v50 = vld [vmem:[%s2731_s0 + $0x98] sm:$0xff]  }
   0xc   :  { %998 = vperm.xlu1 %1865, %v919_v16   ;;  %1769 = vmatprep.subr.bf16.mxu0 %v1869_v18  ;;  %v795_v44 = vld [vmem:[%s2730_s1 + $0x88] sm:$0xff]  ;;  %v2027_v46 = vld [vmem:[%s2733_s3] ss:$0 sm:$0xff]  ;;  %v1627_v48 = vunpack.c.h.bf16 %v1705_v38  ;;  %vm862_vm1 = vcmp.gt.f32.partialorder %v794_v45, 0.5  ;;  %v164_v51 = vmul.f32 %v1554_v42, %v2004_v37  ;;  %v797_v55 = vld [vmem:[%s2730_s1 + $0x98] sm:$0xff]  ;;  %v1630_v62 = vunpack.c.l.bf16 %v1706_v50 }
   0xd   :  { %995 = vperm.xlu0 %1864, %v918_v17   ;;  %1850 = vmatprep.subr.bf16.mxu1 %v1869_v18  ;;  %vm863_vm0 = vcmp.gt.f32.partialorder %v795_v44, 0.5  ;;  %v1688_v49 = vld [vmem:[%s2731_s0 + $0x8] sm:$0xff]   ;;  %v165_v52 = vmul.f32 %v1555_v43, %v2004_v37  ;;  %v2041_v54 = vsel %vm862_vm1, 1, %v1876_v0  ;;  %v200_v56 = vmul.f32 %v1626_v47, %v2004_v37  ;;  %v1872_v1 = vld [vmem:[%s2729_s4 + $0x30] sm:$0xff]   ;;  %v1707_v19 = vld [vmem:[%s2731_s0 + $0xa0] sm:$0xff]  }
   0xe   :  { %v2038_v53 = vsel %vm863_vm0, 1, %v1876_v0  ;;  %v201_v57 = vmul.f32 %v1627_v48, %v2004_v37  ;;  %v1558_v58 = vunpack.c.l.bf16 %v1688_v49  ;;  %v1559_v59 = vunpack.c.h.bf16 %v1688_v49  ;;  %v796_v9 = vld [vmem:[%s2730_s1 + $0x90] sm:$0xff]  ;;  %v1873_v20 = vld [vmem:[%s2729_s4 + $0x38] sm:$0xff]   ;;  %v1708_v42 = vld [vmem:[%s2731_s0 + $0xa8] sm:$0xff]  }
   0xf   :  { %1770 = vmatpush3.bf16.msra.mxu0 %v1869_v18  ;;  %1858 = vmatpush3.bf16.msra.mxu1 %v1869_v18  ;;  %v239_v60 = vadd.f32 %v2027_v46, %v164_v51  ;;  %v240_v61 = vadd.f32 %v2027_v46, %v165_v52  ;;  %v1631_v63 = vunpack.c.h.bf16 %v1706_v50  ;;  %v275_v2 = vadd.f32 %v2027_v46, %v200_v56  ;;  %v1689_v14 = vld [vmem:[%s2731_s0 + $0x10] sm:$0xff]   ;;  %v1690_v36 = vld [vmem:[%s2731_s0 + $0x18] sm:$0xff]  }
  0x10   :  { %1004 = vperm.xlu1 %1865, %v921_v24   ;;  %1771 = vmatprep.subr.bf16.mxu0 %v1870_v23  ;;  %v276_v3 = vadd.f32 %v2027_v46, %v201_v57  ;;  %v166_v4 = vmul.f32 %v1558_v58, %v2004_v37  ;;  %vm865_vm2 = vcmp.gt.f32.partialorder %v797_v55, 0.5  ;;  %v167_v7 = vmul.f32 %v1559_v59, %v2004_v37  ;;  %v799_v24 = vld [vmem:[%s2730_s1 + $0xa8] sm:$0xff]  ;;  %v801_v56 = vld [vmem:[%s2730_s1 + $0xb8] sm:$0xff] }
  0x11   :  { %1001 = vperm.xlu0 %1864, %v920_v25   ;;  %1851 = vmatprep.subr.bf16.mxu1 %v1870_v23  ;;  %v307_v5 = vmax.f32 %v239_v60, 0.0  ;;  %v308_v6 = vmax.f32 %v240_v61, 0.0  ;;  %v202_v8 = vmul.f32 %v1630_v62, %v2004_v37  ;;  %v343_v10 = vmax.f32 %v275_v2, 0.0  ;;  %v798_v25 = vld [vmem:[%s2730_s1 + $0xa0] sm:$0xff]  ;;  %v800_v2 = vld [vmem:[%s2730_s1 + $0xb0] sm:$0xff] }
  0x12   :  { %v344_v11 = vmax.f32 %v276_v3, 0.0  ;;  %v241_v12 = vadd.f32 %v2027_v46, %v166_v4  ;;  %v203_v13 = vmul.f32 %v1631_v63, %v2004_v37  ;;  %v242_v16 = vadd.f32 %v2027_v46, %v167_v7  ;;  %v1691_v4 = vld [vmem:[%s2731_s0 + $0x20] sm:$0xff]  }
  0x13   :  { %1772 = vmatpush3.bf16.msra.mxu0 %v1870_v23  ;;  %1859 = vmatpush3.bf16.msra.mxu1 %v1870_v23  ;;  %v375_v15 = vpack.c.bf16 %v308_v6, %v307_v5  ;;  %v277_v17 = vadd.f32 %v2027_v46, %v202_v8  ;;  %v2072_v18 = vsel %vm865_vm2, 1, %v1876_v0  ;;  %vm864_vm3 = vcmp.gt.f32.partialorder %v796_v9, 0.5  ;;  %v1709_v9 = vld [vmem:[%s2731_s0 + $0xb0] sm:$0xff]  }
  0x14   :  { %1010 = vperm.xlu1 %1865, %v923_v26   ;;  %1773 = vmatprep.subr.bf16.mxu0 %v1871_v39  ;;  %v393_v21 = vpack.c.bf16 %v344_v11, %v343_v10  ;;  %v309_v22 = vmax.f32 %v241_v12, 0.0  ;;  %v278_v23 = vadd.f32 %v2027_v46, %v203_v13  ;;  %v310_v26 = vmax.f32 %v242_v16, 0.0  ;;  %v803_v13 = vld [vmem:[%s2730_s1 + $0xc8] sm:$0xff] }
  0x15   :  { %1007 = vperm.xlu0 %1864, %v922_v27   ;;  %1852 = vmatprep.subr.bf16.mxu1 %v1871_v39  ;;  %v345_v27 = vmax.f32 %v277_v17, 0.0  ;;  %v2088_v28 = vsel %vm864_vm3, 1, %v1876_v0  ;;  %v1562_v29 = vunpack.c.l.bf16 %v1689_v14  ;;  %v1634_v34 = vunpack.c.l.bf16 %v1707_v19 }
  0x16   :  { %1779 = vmatprep.mubr.bf16.mxu0 %v375_v15  ;;  %v1635_v35 = vunpack.c.h.bf16 %v1707_v19  ;;  %v376_v38 = vpack.c.bf16 %v310_v26, %v309_v22  ;;  %vm867_vm4 = vcmp.gt.f32.partialorder %v799_v24, 0.5  ;;  %vm866_vm5 = vcmp.gt.f32.partialorder %v798_v25, 0.5  ;;  %1815 = vmatprep.mubr.bf16.mxu1 %v393_v21  ;;  %v1692_v22 = vld [vmem:[%s2731_s0 + $0x28] sm:$0xff]   ;;  %v1710_v25 = vld [vmem:[%s2731_s0 + $0xb8] sm:$0xff]  }
  0x17   :  { %1774 = vmatpush3.bf16.msra.mxu0 %v1871_v39  ;;  %1860 = vmatpush3.bf16.msra.mxu1 %v1871_v39  ;;  %v168_v39 = vmul.f32 %v1562_v29, %v2004_v37  ;;  %v204_v45 = vmul.f32 %v1634_v34, %v2004_v37  ;;  %v2107_v48 = vsel %vm866_vm5, 1, %v1876_v0  ;;  %v1566_v49 = vunpack.c.l.bf16 %v1690_v36 }
  0x18   :  { %1016 = vperm.xlu1 %1865, %v1980_v30   ;;  %1775 = vmatprep.subr.bf16.mxu0 %v1872_v1  ;;  %v346_v30 = vmax.f32 %v278_v23, 0.0  ;;  %v205_v47 = vmul.f32 %v1635_v35, %v2004_v37  ;;  %v1567_v52 = vunpack.c.h.bf16 %v1690_v36  ;;  %v1638_v55 = vunpack.c.l.bf16 %v1708_v42 }
  0x19   :  { %1013 = vperm.xlu0 %1864, %v1984_v31   ;;  %1853 = vmatprep.subr.bf16.mxu1 %v1872_v1  ;;  %v1563_v31 = vunpack.c.h.bf16 %v1689_v14  ;;  %v279_v51 = vadd.f32 %v2027_v46, %v204_v45  ;;  %v170_v59 = vmul.f32 %v1566_v49, %v2004_v37  ;;  %v1639_v60 = vunpack.c.h.bf16 %v1708_v42  ;;  %v802_v14 = vld [vmem:[%s2730_s1 + $0xc0] sm:$0xff]  ;;  %v805_v42 = vld [vmem:[%s2730_s1 + $0xd8] sm:$0xff] }
  0x1a   :  { %v394_v43 = vpack.c.bf16 %v346_v30, %v345_v27  ;;  %v280_v58 = vadd.f32 %v2027_v46, %v205_v47  ;;  %v171_v63 = vmul.f32 %v1567_v52, %v2004_v37  ;;  %vm869_vm6 = vcmp.gt.f32.partialorder %v801_v56, 0.5  ;;  %v804_v52 = vld [vmem:[%s2730_s1 + $0xd0] sm:$0xff] }
  0x1b   :  { %1776 = vmatpush3.bf16.msra.mxu0 %v1872_v1  ;;  %1861 = vmatpush3.bf16.msra.mxu1 %v1872_v1  ;;  %v169_v44 = vmul.f32 %v1563_v31, %v2004_v37  ;;  %v347_v62 = vmax.f32 %v279_v51, 0.0  ;;  %v206_v1 = vmul.f32 %v1638_v55, %v2004_v37  ;;  %v207_v3 = vmul.f32 %v1639_v60, %v2004_v37 }
  0x1c   :  { %1022 = vperm.xlu1 %1865, %v1987_v32   ;;  %1777 = vmatprep.subr.bf16.mxu0 %v1873_v20  ;;  %v2102_v32 = vsel %vm867_vm4, 1, %v1876_v0  ;;  %v246_v6 = vadd.f32 %v2027_v46, %v171_v63  ;;  %v2131_v8 = vsel %vm869_vm6, 1, %v1876_v0  ;;  %vm868_vm7 = vcmp.gt.f32.partialorder %v800_v2, 0.5  ;;  %v807_v2 = vld [vmem:[%s2730_s1 + $0xe8] sm:$0xff] }
  0x1d   :  { %1019 = vperm.xlu0 %1864, %v1990_v33   ;;  %1854 = vmatprep.subr.bf16.mxu1 %v1873_v20  ;;  %v243_v33 = vadd.f32 %v2027_v46, %v168_v39  ;;  %v244_v50 = vadd.f32 %v2027_v46, %v169_v44  ;;  %v281_v7 = vadd.f32 %v2027_v46, %v206_v1  ;;  %v1570_v17 = vunpack.c.l.bf16 %v1691_v4 }
  0x1e   :  { %v282_v12 = vadd.f32 %v2027_v46, %v207_v3  ;;  %v314_v15 = vmax.f32 %v246_v6, 0.0  ;;  %v1571_v19 = vunpack.c.h.bf16 %v1691_v4  ;;  %v1643_v21 = vunpack.c.h.bf16 %v1709_v9 }
  0x1f   :  { %1778 = vmatpush3.bf16.msra.mxu0 %v1873_v20  ;;  %1862 = vmatpush3.bf16.msra.mxu1 %v1873_v20  ;;  %v311_v57 = vmax.f32 %v243_v33, 0.0  ;;  %v312_v61 = vmax.f32 %v244_v50, 0.0  ;;  %v349_v16 = vmax.f32 %v281_v7, 0.0  ;;  %v1642_v20 = vunpack.c.l.bf16 %v1709_v9 }
  0x20   :  { %1028 = vperm.xlu1 %1865, %v2013_v40   ;;  %v348_v40 = vmax.f32 %v280_v58, 0.0  ;;  %v172_v24 = vmul.f32 %v1570_v17, %v2004_v37  ;;  %vm871_vm8 = vcmp.gt.f32.partialorder %v803_v13, 0.5  ;;  %vm870_vm9 = vcmp.gt.f32.partialorder %v802_v14, 0.5 }
  0x21   :  { %1025 = vperm.xlu0 %1864, %v2016_v41   ;;  %v245_v41 = vadd.f32 %v2027_v46, %v170_v59  ;;  %v377_v5 = vpack.c.bf16 %v312_v61, %v311_v57  ;;  %v173_v27 = vmul.f32 %v1571_v19, %v2004_v37  ;;  %v208_v29 = vmul.f32 %v1642_v20, %v2004_v37  ;;  %v1711_v61 = vld [vmem:[%s2731_s0 + $0xc0] sm:$0xff]  }
  0x22   :  { %1780 = vmatmul.mubr.bf16.vlgmr.msra.gmra.mrb[0].mxu0 %v376_v38  ;;  %1816 = vmatmul.mubr.bf16.vlgmr.msra.gmra.mrb[0].mxu1 %v394_v43  ;;  %v395_v10 = vpack.c.bf16 %v348_v40, %v347_v62  ;;  %v939_v30 = vsel %vm871_vm8, 1, %v1876_v0  ;;  %v247_v31 = vadd.f32 %v2027_v46, %v172_v24  ;;  %v209_v34 = vmul.f32 %v1643_v21, %v2004_v37  ;;  %v806_v40 = vld [vmem:[%s2730_s1 + $0xe0] sm:$0xff] }
  0x23   :  { %v313_v11 = vmax.f32 %v245_v41, 0.0  ;;  %1783 = vmatprep.mubr.bf16.mxu0 %v377_v5  ;;  %v938_v35 = vsel %vm870_vm9, 1, %v1876_v0  ;;  %v1574_v36 = vunpack.c.l.bf16 %v1692_v22  ;;  %v1575_v38 = vunpack.c.h.bf16 %v1692_v22 }
  0x24   :  { %1034 = vperm.xlu1 %1865, %v2038_v53   ;;  %v936_v53 = vsel %vm868_vm7, 1, %v1876_v0  ;;  %1819 = vmatprep.mubr.bf16.mxu1 %v395_v10  ;;  %v1646_v39 = vunpack.c.l.bf16 %v1710_v25  ;;  %v315_v43 = vmax.f32 %v247_v31, 0.0  ;;  %v284_v44 = vadd.f32 %v2027_v46, %v209_v34 }
  0x25   :  { %1031 = vperm.xlu0 %1864, %v2041_v54   ;;  %v350_v54 = vmax.f32 %v282_v12, 0.0  ;;  %v378_v23 = vpack.c.bf16 %v314_v15, %v313_v11  ;;  %v174_v45 = vmul.f32 %v1574_v36, %v2004_v37  ;;  %v1647_v33 = vunpack.c.h.bf16 %v1710_v25  ;;  %v1694_v11 = vld [vmem:[%s2731_s0 + $0x38] sm:$0xff]  }
  0x26   :  { %v175_v50 = vmul.f32 %v1575_v38, %v2004_v37  ;;  %v210_v51 = vmul.f32 %v1646_v39, %v2004_v37  ;;  %v352_v55 = vmax.f32 %v284_v44, 0.0  ;;  %vm873_vm10 = vcmp.gt.f32.partialorder %v805_v42, 0.5  ;;  %v809_v25 = vld [vmem:[%s2730_s1 + $0xf8] sm:$0xff]  ;;  %v1695_v42 = vld [vmem:[%s2731_s0 + $0x40] sm:$0xff]  }
  0x27   :  { %v396_v26 = vpack.c.bf16 %v350_v54, %v349_v16  ;;  %v249_v56 = vadd.f32 %v2027_v46, %v174_v45  ;;  %v211_v57 = vmul.f32 %v1647_v33, %v2004_v37  ;;  %v941_v60 = vsel %vm873_vm10, 1, %v1876_v0 }
  0x28   :  { %1040 = vperm.xlu1 %1865, %v2072_v18   ;;  %v248_v18 = vadd.f32 %v2027_v46, %v173_v27  ;;  %v250_v58 = vadd.f32 %v2027_v46, %v175_v50  ;;  %v285_v59 = vadd.f32 %v2027_v46, %v210_v51  ;;  %vm872_vm11 = vcmp.gt.f32.partialorder %v804_v52, 0.5  ;;  %v811_v52 = vld [vmem:[%s2730_s1 + $0x108] sm:$0xff] }
  0x29   :  { %1037 = vperm.xlu0 %1864, %v2088_v28   ;;  %v283_v28 = vadd.f32 %v2027_v46, %v208_v29  ;;  %v317_v63 = vmax.f32 %v249_v56, 0.0  ;;  %v286_v1 = vadd.f32 %v2027_v46, %v211_v57  ;;  %v940_v4 = vsel %vm872_vm11, 1, %v1876_v0 }
  0x2a   :  { %1784 = vmatmul.mubr.bf16.gmra.mrb[4].mxu0 %v378_v23  ;;  %1820 = vmatmul.mubr.bf16.gmra.mrb[4].mxu1 %v396_v26  ;;  %v316_v47 = vmax.f32 %v248_v18, 0.0  ;;  %v318_v41 = vmax.f32 %v250_v58, 0.0  ;;  %v353_v3 = vmax.f32 %v285_v59, 0.0  ;;  %v1650_v9 = vunpack.c.l.bf16 %v1711_v61  ;;  %v808_v18 = vld [vmem:[%s2730_s1 + $0xf0] sm:$0xff] }
  0x2b   :  { %v351_v49 = vmax.f32 %v283_v28, 0.0  ;;  %v354_v6 = vmax.f32 %v286_v1, 0.0  ;;  %v1651_v10 = vunpack.c.h.bf16 %v1711_v61  ;;  %vm875_vm12 = vcmp.gt.f32.partialorder %v807_v2, 0.5  ;;  %v810_v61 = vld [vmem:[%s2730_s1 + $0x100] sm:$0xff] }
  0x2c   :  { %1046 = vperm.xlu1 %1865, %v2102_v32   ;;  %v1693_v32 = vld [vmem:[%s2731_s0 + $0x30] sm:$0xff]   ;;  %v380_v12 = vpack.c.bf16 %v318_v41, %v317_v63  ;;  %vm874_vm13 = vcmp.gt.f32.partialorder %v806_v40, 0.5  ;;  %v212_v15 = vmul.f32 %v1650_v9, %v2004_v37  ;;  %v943_v54 = vsel %vm875_vm12, 1, %v1876_v0 }
  0x2d   :  { %1043 = vperm.xlu0 %1864, %v2107_v48   ;;  %v379_v48 = vpack.c.bf16 %v316_v47, %v315_v43  ;;  %v397_v62 = vpack.c.bf16 %v352_v55, %v351_v49  ;;  %v1578_v5 = vunpack.c.l.bf16 %v1693_v32  ;;  %v1579_v7 = vunpack.c.h.bf16 %v1693_v32  ;;  %v1713_v47 = vld [vmem:[%s2731_s0 + $0xd0] sm:$0xff]  }
  0x2e   :  { %v213_v16 = vmul.f32 %v1651_v10, %v2004_v37  ;;  %v942_v19 = vsel %vm874_vm13, 1, %v1876_v0  ;;  %v1582_v20 = vunpack.c.l.bf16 %v1694_v11  ;;  %v287_v22 = vadd.f32 %v2027_v46, %v212_v15 }
  0x2f   :  { %1787 = vmatprep.mubr.bf16.mxu0 %v379_v48  ;;  %1823 = vmatprep.mubr.bf16.mxu1 %v397_v62  ;;  %v176_v13 = vmul.f32 %v1578_v5, %v2004_v37  ;;  %v177_v14 = vmul.f32 %v1579_v7, %v2004_v37  ;;  %v1583_v24 = vunpack.c.h.bf16 %v1694_v11  ;;  %vm877_vm14 = vcmp.gt.f32.partialorder %v809_v25, 0.5  ;;  %v1696_v62 = vld [vmem:[%s2731_s0 + $0x48] sm:$0xff]   ;;  %v1714_v5 = vld [vmem:[%s2731_s0 + $0xd8] sm:$0xff]  }
  0x30   :  { %1052 = vperm.xlu1 %1865, %v2131_v8   ;;  %v398_v8 = vpack.c.bf16 %v354_v6, %v353_v3  ;;  %v288_v23 = vadd.f32 %v2027_v46, %v213_v16  ;;  %v178_v27 = vmul.f32 %v1582_v20, %v2004_v37  ;;  %v355_v34 = vmax.f32 %v287_v22, 0.0  ;;  %v1697_v22 = vld [vmem:[%s2731_s0 + $0x50] sm:$0xff]  }
  0x31   :  { %1049 = vperm.xlu0 %1864, %v936_v53   ;;  %v1712_v53 = vld [vmem:[%s2731_s0 + $0xc8] sm:$0xff]   ;;  %v251_v17 = vadd.f32 %v2027_v46, %v176_v13  ;;  %v252_v21 = vadd.f32 %v2027_v46, %v177_v14  ;;  %v179_v36 = vmul.f32 %v1583_v24, %v2004_v37  ;;  %v945_v33 = vsel %vm877_vm14, 1, %v1876_v0 }
  0x32   :  { %1788 = vmatmul.mubr.bf16.gmra.mrb[8].mxu0 %v380_v12  ;;  %1824 = vmatmul.mubr.bf16.gmra.mrb[8].mxu1 %v398_v8  ;;  %v1654_v29 = vunpack.c.l.bf16 %v1712_v53  ;;  %v253_v28 = vadd.f32 %v2027_v46, %v178_v27  ;;  %vm876_vm15 = vcmp.gt.f32.partialorder %v808_v18, 0.5  ;;  %v1586_v57 = vunpack.c.l.bf16 %v1695_v42  ;;  %v813_v8 = vld [vmem:[%s2730_s1 + $0x118] sm:$0xff]  ;;  %v815_v18 = vld [vmem:[%s2730_s1 + $0x128] sm:$0xff] }
  0x33   :  { %v319_v26 = vmax.f32 %v251_v17, 0.0  ;;  %v320_v31 = vmax.f32 %v252_v21, 0.0  ;;  %v254_v45 = vadd.f32 %v2027_v46, %v179_v36  ;;  %v944_v56 = vsel %vm876_vm15, 1, %v1876_v0  ;;  %v812_v21 = vld [vmem:[%s2730_s1 + $0x110] sm:$0xff] }
  0x34   :  { %1058 = vperm.xlu1 %1865, %v939_v30   ;;  %v1655_v30 = vunpack.c.h.bf16 %v1712_v53  ;;  %v214_v38 = vmul.f32 %v1654_v29, %v2004_v37  ;;  %v321_v49 = vmax.f32 %v253_v28, 0.0  ;;  %v1587_v32 = vunpack.c.h.bf16 %v1695_v42 }
  0x35   :  { %1055 = vperm.xlu0 %1864, %v938_v35   ;;  %v356_v35 = vmax.f32 %v288_v23, 0.0  ;;  %v381_v43 = vpack.c.bf16 %v320_v31, %v319_v26  ;;  %v322_v55 = vmax.f32 %v254_v45, 0.0  ;;  %v1658_v59 = vunpack.c.l.bf16 %v1713_v47  ;;  %v1715_v31 = vld [vmem:[%s2731_s0 + $0xe0] sm:$0xff]  }
  0x36   :  { %v215_v39 = vmul.f32 %v1655_v30, %v2004_v37  ;;  %v289_v50 = vadd.f32 %v2027_v46, %v214_v38  ;;  %v180_v1 = vmul.f32 %v1586_v57, %v2004_v37  ;;  %v181_v2 = vmul.f32 %v1587_v32, %v2004_v37 }
  0x37   :  { %v399_v44 = vpack.c.bf16 %v356_v35, %v355_v34  ;;  %1791 = vmatprep.mubr.bf16.mxu0 %v381_v43  ;;  %v382_v63 = vpack.c.bf16 %v322_v55, %v321_v49  ;;  %vm879_vm0 = vcmp.gt.f32.partialorder %v811_v52, 0.5  ;;  %v216_v41 = vmul.f32 %v1658_v59, %v2004_v37  ;;  %v1698_v49 = vld [vmem:[%s2731_s0 + $0x58] sm:$0xff]  }
  0x38   :  { %1064 = vperm.xlu1 %1865, %v941_v60   ;;  %v290_v51 = vadd.f32 %v2027_v46, %v215_v39  ;;  %v357_v48 = vmax.f32 %v289_v50, 0.0  ;;  %v1659_v60 = vunpack.c.h.bf16 %v1713_v47  ;;  %v255_v6 = vadd.f32 %v2027_v46, %v180_v1  ;;  %v814_v47 = vld [vmem:[%s2730_s1 + $0x120] sm:$0xff] }
  0x39   :  { %1061 = vperm.xlu0 %1864, %v940_v4   ;;  %1827 = vmatprep.mubr.bf16.mxu1 %v399_v44  ;;  %v947_v4 = vsel %vm879_vm0, 1, %v1876_v0  ;;  %v256_v7 = vadd.f32 %v2027_v46, %v181_v2  ;;  %vm878_vm1 = vcmp.gt.f32.partialorder %v810_v61, 0.5  ;;  %v1590_v9 = vunpack.c.l.bf16 %v1696_v62  ;;  %v817_v61 = vld [vmem:[%s2730_s1 + $0x138] sm:$0xff] }
  0x3a   :  { %v358_v58 = vmax.f32 %v290_v51, 0.0  ;;  %v217_v3 = vmul.f32 %v1659_v60, %v2004_v37  ;;  %1792 = vmatmul.mubr.bf16.gmra.mrb[12].mxu0 %v382_v63  ;;  %v291_v10 = vadd.f32 %v2027_v46, %v216_v41  ;;  %v946_v12 = vsel %vm878_vm1, 1, %v1876_v0 }
  0x3b   :  { %v1591_v13 = vunpack.c.h.bf16 %v1696_v62  ;;  %v323_v14 = vmax.f32 %v255_v6, 0.0  ;;  %v324_v15 = vmax.f32 %v256_v7, 0.0  ;;  %v182_v16 = vmul.f32 %v1590_v9, %v2004_v37 }
  0x3c   :  { %1070 = vperm.xlu1 %1865, %v943_v54   ;;  %v400_v40 = vpack.c.bf16 %v358_v58, %v357_v48  ;;  %v292_v11 = vadd.f32 %v2027_v46, %v217_v3  ;;  %v1662_v53 = vunpack.c.l.bf16 %v1714_v5  ;;  %v359_v17 = vmax.f32 %v291_v10, 0.0  ;;  %v1716_v48 = vld [vmem:[%s2731_s0 + $0xe8] sm:$0xff]  }
  0x3d   :  { %1067 = vperm.xlu0 %1864, %v942_v19   ;;  %v183_v19 = vmul.f32 %v1591_v13, %v2004_v37  ;;  %v1663_v20 = vunpack.c.h.bf16 %v1714_v5  ;;  %v383_v23 = vpack.c.bf16 %v324_v15, %v323_v14  ;;  %v257_v24 = vadd.f32 %v2027_v46, %v182_v16  ;;  %v816_v5 = vld [vmem:[%s2730_s1 + $0x130] sm:$0xff] }
  0x3e   :  { %1828 = vmatmul.mubr.bf16.gmra.mrb[12].mxu1 %v400_v40  ;;  %v360_v54 = vmax.f32 %v292_v11, 0.0  ;;  %v218_v25 = vmul.f32 %v1662_v53, %v2004_v37  ;;  %vm881_vm2 = vcmp.gt.f32.partialorder %v813_v8, 0.5  ;;  %vm880_vm3 = vcmp.gt.f32.partialorder %v812_v21, 0.5  ;;  %v1699_v8 = vld [vmem:[%s2731_s0 + $0x60] sm:$0xff]   ;;  %v1717_v14 = vld [vmem:[%s2731_s0 + $0xf0] sm:$0xff]  }
  0x3f   :  { %v258_v27 = vadd.f32 %v2027_v46, %v183_v19  ;;  %v219_v29 = vmul.f32 %v1663_v20, %v2004_v37  ;;  %v949_v30 = vsel %vm881_vm2, 1, %v1876_v0  ;;  %1795 = vmatprep.mubr.bf16.mxu0 %v383_v23  ;;  %v325_v34 = vmax.f32 %v257_v24, 0.0 }
  0x40   :  { %1076 = vperm.xlu1 %1865, %v945_v33   ;;  %v401_v26 = vpack.c.bf16 %v360_v54, %v359_v17  ;;  %v293_v35 = vadd.f32 %v2027_v46, %v218_v25  ;;  %v1594_v36 = vunpack.c.l.bf16 %v1697_v22  ;;  %v948_v39 = vsel %vm880_vm3, 1, %v1876_v0  ;;  %v819_v17 = vld [vmem:[%s2730_s1 + $0x148] sm:$0xff] }
  0x41   :  { %1073 = vperm.xlu0 %1864, %v944_v56   ;;  %v326_v28 = vmax.f32 %v258_v27, 0.0  ;;  %v294_v38 = vadd.f32 %v2027_v46, %v219_v29  ;;  %v1595_v42 = vunpack.c.h.bf16 %v1697_v22  ;;  %v1666_v45 = vunpack.c.l.bf16 %v1715_v31 }
  0x42   :  { %1831 = vmatprep.mubr.bf16.mxu1 %v401_v26  ;;  %v361_v43 = vmax.f32 %v293_v35, 0.0  ;;  %v184_v44 = vmul.f32 %v1594_v36, %v2004_v37  ;;  %v1667_v33 = vunpack.c.h.bf16 %v1715_v31  ;;  %vm883_vm4 = vcmp.gt.f32.partialorder %v815_v18, 0.5  ;;  %v818_v26 = vld [vmem:[%s2730_s1 + $0x140] sm:$0xff]  ;;  %v1700_v18 = vld [vmem:[%s2731_s0 + $0x68] sm:$0xff]  }
  0x43   :  { %v384_v50 = vpack.c.bf16 %v326_v28, %v325_v34  ;;  %v362_v51 = vmax.f32 %v294_v38, 0.0  ;;  %v185_v52 = vmul.f32 %v1595_v42, %v2004_v37  ;;  %v220_v56 = vmul.f32 %v1666_v45, %v2004_v37  ;;  %v1718_v42 = vld [vmem:[%s2731_s0 + $0xf8] sm:$0xff]  }
  0x44   :  { %1082 = vperm.xlu1 %1865, %v947_v4   ;;  %v259_v55 = vadd.f32 %v2027_v46, %v184_v44  ;;  %v221_v57 = vmul.f32 %v1667_v33, %v2004_v37  ;;  %v951_v32 = vsel %vm883_vm4, 1, %v1876_v0  ;;  %vm882_vm5 = vcmp.gt.f32.partialorder %v814_v47, 0.5 }
  0x45   :  { %1079 = vperm.xlu0 %1864, %v946_v12   ;;  %1796 = vmatmul.mubr.bf16.gmra.mrb[16].mxu0 %v384_v50  ;;  %v402_v58 = vpack.c.bf16 %v362_v51, %v361_v43  ;;  %v260_v59 = vadd.f32 %v2027_v46, %v185_v52  ;;  %v1598_v60 = vunpack.c.l.bf16 %v1698_v49  ;;  %v295_v63 = vadd.f32 %v2027_v46, %v220_v56  ;;  %v821_v52 = vld [vmem:[%s2730_s1 + $0x158] sm:$0xff] }
  0x46   :  { %v327_v62 = vmax.f32 %v259_v55, 0.0  ;;  %v296_v1 = vadd.f32 %v2027_v46, %v221_v57  ;;  %v950_v2 = vsel %vm882_vm5, 1, %v1876_v0  ;;  %v1599_v41 = vunpack.c.h.bf16 %v1698_v49  ;;  %v820_v55 = vld [vmem:[%s2730_s1 + $0x150] sm:$0xff] }
  0x47   :  { %1832 = vmatmul.mubr.bf16.gmra.mrb[16].mxu1 %v402_v58  ;;  %v328_v40 = vmax.f32 %v260_v59, 0.0  ;;  %v186_v3 = vmul.f32 %v1598_v60, %v2004_v37  ;;  %v1670_v4 = vunpack.c.l.bf16 %v1716_v48  ;;  %v363_v6 = vmax.f32 %v295_v63, 0.0 }
  0x48   :  { %1088 = vperm.xlu1 %1865, %v949_v30   ;;  %v364_v7 = vmax.f32 %v296_v1, 0.0  ;;  %v1671_v9 = vunpack.c.h.bf16 %v1716_v48  ;;  %vm885_vm6 = vcmp.gt.f32.partialorder %v817_v61, 0.5  ;;  %v187_v11 = vmul.f32 %v1599_v41, %v2004_v37 }
  0x49   :  { %1085 = vperm.xlu0 %1864, %v948_v39   ;;  %v385_v10 = vpack.c.bf16 %v328_v40, %v327_v62  ;;  %v261_v12 = vadd.f32 %v2027_v46, %v186_v3  ;;  %v222_v13 = vmul.f32 %v1670_v4, %v2004_v37  ;;  %v953_v53 = vsel %vm885_vm6, 1, %v1876_v0  ;;  %v1701_v62 = vld [vmem:[%s2731_s0 + $0x70] sm:$0xff]   ;;  %v1719_v4 = vld [vmem:[%s2731_s0 + $0x100] sm:$0xff]  }
  0x4a   :  { %v403_v15 = vpack.c.bf16 %v364_v7, %v363_v6  ;;  %v223_v16 = vmul.f32 %v1671_v9, %v2004_v37  ;;  %vm884_vm7 = vcmp.gt.f32.partialorder %v816_v5, 0.5  ;;  %v262_v54 = vadd.f32 %v2027_v46, %v187_v11 }
  0x4b   :  { %1799 = vmatprep.mubr.bf16.mxu0 %v385_v10  ;;  %v329_v19 = vmax.f32 %v261_v12, 0.0  ;;  %v297_v20 = vadd.f32 %v2027_v46, %v222_v13  ;;  %v952_v21 = vsel %vm884_vm7, 1, %v1876_v0  ;;  %v1602_v23 = vunpack.c.l.bf16 %v1699_v8  ;;  %v823_v10 = vld [vmem:[%s2730_s1 + $0x168] sm:$0xff] }
  0x4c   :  { %1094 = vperm.xlu1 %1865, %v951_v32   ;;  %1835 = vmatprep.mubr.bf16.mxu1 %v403_v15  ;;  %v298_v22 = vadd.f32 %v2027_v46, %v223_v16  ;;  %v1603_v24 = vunpack.c.h.bf16 %v1699_v8  ;;  %v1674_v25 = vunpack.c.l.bf16 %v1717_v14  ;;  %v330_v27 = vmax.f32 %v262_v54, 0.0  ;;  %v1702_v54 = vld [vmem:[%s2731_s0 + $0x78] sm:$0xff]  }
  0x4d   :  { %1091 = vperm.xlu0 %1864, %v950_v2   ;;  %v365_v29 = vmax.f32 %v297_v20, 0.0  ;;  %v1675_v30 = vunpack.c.h.bf16 %v1717_v14  ;;  %vm887_vm8 = vcmp.gt.f32.partialorder %v819_v17, 0.5  ;;  %v188_v34 = vmul.f32 %v1602_v23, %v2004_v37  ;;  %v822_v17 = vld [vmem:[%s2730_s1 + $0x160] sm:$0xff] }
  0x4e   :  { %v366_v31 = vmax.f32 %v298_v22, 0.0  ;;  %v189_v35 = vmul.f32 %v1603_v24, %v2004_v37  ;;  %v224_v36 = vmul.f32 %v1674_v25, %v2004_v37  ;;  %v386_v28 = vpack.c.bf16 %v330_v27, %v329_v19 }
  0x4f   :  { %v225_v38 = vmul.f32 %v1675_v30, %v2004_v37  ;;  %v955_v39 = vsel %vm887_vm8, 1, %v1876_v0  ;;  %vm886_vm9 = vcmp.gt.f32.partialorder %v818_v26, 0.5  ;;  %v263_v44 = vadd.f32 %v2027_v46, %v188_v34  ;;  %v1720_v26 = vld [vmem:[%s2731_s0 + $0x108] sm:$0xff]  }
  0x50   :  { %1100 = vperm.xlu1 %1865, %v953_v53   ;;  %v404_v43 = vpack.c.bf16 %v366_v31, %v365_v29  ;;  %v264_v45 = vadd.f32 %v2027_v46, %v189_v35  ;;  %v299_v33 = vadd.f32 %v2027_v46, %v224_v36  ;;  %1800 = vmatmul.mubr.bf16.gmra.mrb[20].mxu0 %v386_v28  ;;  %v954_v49 = vsel %vm886_vm9, 1, %v1876_v0  ;;  %v825_v31 = vld [vmem:[%s2730_s1 + $0x178] sm:$0xff] }
  0x51   :  { %1097 = vperm.xlu0 %1864, %v952_v21   ;;  %v300_v47 = vadd.f32 %v2027_v46, %v225_v38  ;;  %v1606_v50 = vunpack.c.l.bf16 %v1700_v18  ;;  %v1607_v51 = vunpack.c.h.bf16 %v1700_v18  ;;  %v331_v56 = vmax.f32 %v263_v44, 0.0 }
  0x52   :  { %1836 = vmatmul.mubr.bf16.gmra.mrb[20].mxu1 %v404_v43  ;;  %v332_v57 = vmax.f32 %v264_v45, 0.0  ;;  %v367_v32 = vmax.f32 %v299_v33, 0.0  ;;  %v1678_v48 = vunpack.c.l.bf16 %v1718_v42  ;;  %v1679_v61 = vunpack.c.h.bf16 %v1718_v42  ;;  %v824_v43 = vld [vmem:[%s2730_s1 + $0x170] sm:$0xff] }
  0x53   :  { %v368_v58 = vmax.f32 %v300_v47, 0.0  ;;  %v190_v59 = vmul.f32 %v1606_v50, %v2004_v37  ;;  %v191_v60 = vmul.f32 %v1607_v51, %v2004_v37  ;;  %vm889_vm10 = vcmp.gt.f32.partialorder %v821_v52, 0.5  ;;  %v1703_v52 = vld [vmem:[%s2731_s0 + $0x80] sm:$0xff]  }
  0x54   :  { %1106 = vperm.xlu1 %1865, %v955_v39   ;;  %v387_v63 = vpack.c.bf16 %v332_v57, %v331_v56  ;;  %v226_v1 = vmul.f32 %v1678_v48, %v2004_v37  ;;  %vm888_vm11 = vcmp.gt.f32.partialorder %v820_v55, 0.5  ;;  %v227_v3 = vmul.f32 %v1679_v61, %v2004_v37  ;;  %v827_v55 = vld [vmem:[%s2730_s1 + $0x188] sm:$0xff]  ;;  %v826_v48 = vld [vmem:[%s2730_s1 + $0x180] sm:$0xff] }
  0x55   :  { %1103 = vperm.xlu0 %1864, %v954_v49   ;;  %v405_v2 = vpack.c.bf16 %v368_v58, %v367_v32  ;;  %v265_v40 = vadd.f32 %v2027_v46, %v190_v59  ;;  %v266_v41 = vadd.f32 %v2027_v46, %v191_v60  ;;  %v957_v6 = vsel %vm889_vm10, 1, %v1876_v0 }
  0x56   :  { %1803 = vmatprep.mubr.bf16.mxu0 %v387_v63  ;;  %v301_v5 = vadd.f32 %v2027_v46, %v226_v1  ;;  %v956_v7 = vsel %vm888_vm11, 1, %v1876_v0  ;;  %v1610_v9 = vunpack.c.l.bf16 %v1701_v62  ;;  %v302_v13 = vadd.f32 %v2027_v46, %v227_v3  ;;  %v1704_v1 = vld [vmem:[%s2731_s0 + $0x88] sm:$0xff]  }
  0x57   :  { %1839 = vmatprep.mubr.bf16.mxu1 %v405_v2  ;;  %v333_v11 = vmax.f32 %v265_v40, 0.0  ;;  %v334_v12 = vmax.f32 %v266_v41, 0.0  ;;  %v1611_v8 = vunpack.c.h.bf16 %v1701_v62  ;;  %v1682_v16 = vunpack.c.l.bf16 %v1719_v4  ;;  %v829_v2 = vld [vmem:[%s2730_s1 + $0x198] sm:$0xff] }
  0x58   :  { %1112 = vperm.xlu1 %1865, %v957_v6   ;;  %v369_v14 = vmax.f32 %v301_v5, 0.0  ;;  %v192_v15 = vmul.f32 %v1610_v9, %v2004_v37  ;;  %v1683_v53 = vunpack.c.h.bf16 %v1719_v4  ;;  %v370_v20 = vmax.f32 %v302_v13, 0.0  ;;  %v828_v9 = vld [vmem:[%s2730_s1 + $0x190] sm:$0xff] }
  0x59   :  { %1109 = vperm.xlu0 %1864, %v956_v7   ;;  %v388_v19 = vpack.c.bf16 %v334_v12, %v333_v11  ;;  %v193_v21 = vmul.f32 %v1611_v8, %v2004_v37  ;;  %vm891_vm12 = vcmp.gt.f32.partialorder %v823_v10, 0.5  ;;  %v228_v23 = vmul.f32 %v1682_v16, %v2004_v37  ;;  %v831_v10 = vld [vmem:[%s2730_s1 + $0x1a8] sm:$0xff] }
  0x5a   :  { %v267_v22 = vadd.f32 %v2027_v46, %v192_v15  ;;  %v229_v24 = vmul.f32 %v1683_v53, %v2004_v37  ;;  %v959_v25 = vsel %vm891_vm12, 1, %v1876_v0  ;;  %v406_v27 = vpack.c.bf16 %v370_v20, %v369_v14  ;;  %v1875_v14 = vld [vmem:[%s2733_s3] ss:$0 sm:$0xff] }
  0x5b   :  { %1804 = vmatmul.mubr.bf16.gmra.mrb[24].mxu0 %v388_v19  ;;  %v268_v29 = vadd.f32 %v2027_v46, %v193_v21  ;;  %vm890_vm13 = vcmp.gt.f32.partialorder %v822_v17, 0.5  ;;  %v1614_v30 = vunpack.c.l.bf16 %v1702_v54  ;;  %v303_v35 = vadd.f32 %v2027_v46, %v228_v23  ;;  %v830_v17 = vld [vmem:[%s2730_s1 + $0x1a0] sm:$0xff]  ;;  %v833_v23 = vld [vmem:[%s2730_s1 + $0x1b8] sm:$0xff] }
  0x5c   :  { %1118 = vperm.xlu1 %1865, %v959_v25   ;;  %v335_v34 = vmax.f32 %v267_v22, 0.0  ;;  %v304_v36 = vadd.f32 %v2027_v46, %v229_v24  ;;  %v958_v18 = vsel %vm890_vm13, 1, %v1876_v0  ;;  %1840 = vmatmul.mubr.bf16.gmra.mrb[24].mxu1 %v406_v27  ;;  %v1615_v38 = vunpack.c.h.bf16 %v1702_v54 }
  0x5d   :  { %v336_v28 = vmax.f32 %v268_v29, 0.0  ;;  %1115 = vperm.xlu0 %1864, %v958_v18   ;;  %v194_v39 = vmul.f32 %v1614_v30, %v2004_v37  ;;  %v1686_v42 = vunpack.c.l.bf16 %v1720_v26  ;;  %v371_v44 = vmax.f32 %v303_v35, 0.0  ;;  %v835_v35 = vld [vmem:[%s2730_s1 + $0x1c8] sm:$0xff]  ;;  %v834_v18 = vld [vmem:[%s2730_s1 + $0x1c0] sm:$0xff] }
  0x5e   :  { %v372_v45 = vmax.f32 %v304_v36, 0.0  ;;  %v1687_v33 = vunpack.c.h.bf16 %v1720_v26  ;;  %vm893_vm14 = vcmp.gt.f32.partialorder %v825_v31, 0.5  ;;  %v195_v49 = vmul.f32 %v1615_v38, %v2004_v37  ;;  %v832_v26 = vld [vmem:[%s2730_s1 + $0x1b0] sm:$0xff] }
  0x5f   :  { %v389_v47 = vpack.c.bf16 %v336_v28, %v335_v34  ;;  %v269_v50 = vadd.f32 %v2027_v46, %v194_v39  ;;  %v230_v51 = vmul.f32 %v1686_v42, %v2004_v37  ;;  %v961_v32 = vsel %vm893_vm14, 1, %v1876_v0  ;;  %v837_v39 = vld [vmem:[%s2730_s1 + $0x1d8] sm:$0xff]  ;;  %v836_v42 = vld [vmem:[%s2730_s1 + $0x1d0] sm:$0xff] }
  0x60   :  { %v407_v56 = vpack.c.bf16 %v372_v45, %v371_v44  ;;  %v231_v57 = vmul.f32 %v1687_v33, %v2004_v37  ;;  %vm892_vm15 = vcmp.gt.f32.partialorder %v824_v43, 0.5  ;;  %v270_v58 = vadd.f32 %v2027_v46, %v195_v49  ;;  %1124 = vperm.xlu1 %1865, %v961_v32   ;;  %v839_v45 = vld [vmem:[%s2730_s1 + $0x1e8] sm:$0xff]  ;;  %v838_v33 = vld [vmem:[%s2730_s1 + $0x1e0] sm:$0xff] }
  0x61   :  { %1807 = vmatprep.mubr.bf16.mxu0 %v389_v47  ;;  %v337_v59 = vmax.f32 %v269_v50, 0.0  ;;  %v305_v60 = vadd.f32 %v2027_v46, %v230_v51  ;;  %v960_v61 = vsel %vm892_vm15, 1, %v1876_v0  ;;  %v1618_v37 = vunpack.c.l.bf16 %v1703_v52  ;;  %v841_v50 = vld [vmem:[%s2730_s1 + $0x1f8] sm:$0xff]  ;;  %v840_v51 = vld [vmem:[%s2730_s1 + $0x1f0] sm:$0xff] }
  0x62   :  { %1843 = vmatprep.mubr.bf16.mxu1 %v407_v56  ;;  %v306_v62 = vadd.f32 %v2027_v46, %v231_v57  ;;  %1121 = vperm.xlu0 %1864, %v960_v61   ;;  %v1619_v63 = vunpack.c.h.bf16 %v1703_v52  ;;  %vm895_vm0 = vcmp.gt.f32.partialorder %v827_v55, 0.5  ;;  %v338_v40 = vmax.f32 %v270_v58, 0.0  ;;  %v1874_v46 = vld [vmem:[%s2732_s2] ss:$0 sm:$0xff]  ;;  %v843_v56 = vld [vmem:[%s2730_s1 + $0x208] sm:$0xff]  ;;  %v845_v58 = vld [vmem:[%s2730_s1 + $0x218] sm:$0xff] }
  0x63   :  { %v373_v41 = vmax.f32 %v305_v60, 0.0  ;;  %v963_v3 = vsel %vm895_vm0, 1, %v1876_v0  ;;  %vm894_vm1 = vcmp.gt.f32.partialorder %v826_v48, 0.5  ;;  %v196_v5 = vmul.f32 %v1874_v46, %v1618_v37  ;;  %v842_v57 = vld [vmem:[%s2730_s1 + $0x200] sm:$0xff] }
  0x64   :  { %v374_v4 = vmax.f32 %v306_v62, 0.0  ;;  %v197_v6 = vmul.f32 %v1874_v46, %v1619_v63  ;;  %v962_v7 = vsel %vm894_vm1, 1, %v1876_v0  ;;  %v390_v11 = vpack.c.bf16 %v338_v40, %v337_v59  ;;  %1130 = vperm.xlu1 %1865, %v963_v3   ;;  %v844_v59 = vld [vmem:[%s2730_s1 + $0x210] sm:$0xff] }
  0x65   :  { %v1622_v12 = vunpack.c.l.bf16 %v1704_v1  ;;  %v1623_v13 = vunpack.c.h.bf16 %v1704_v1  ;;  %vm897_vm2 = vcmp.gt.f32.partialorder %v829_v2, 0.5  ;;  %v271_v15 = vadd.f32 %v1875_v14, %v196_v5 }
  0x66   :  { %v408_v8 = vpack.c.bf16 %v374_v4, %v373_v41  ;;  %v272_v16 = vadd.f32 %v1875_v14, %v197_v6  ;;  %1127 = vperm.xlu0 %1864, %v962_v7   ;;  %v965_v53 = vsel %vm897_vm2, 1, %v1876_v0  ;;  %1808 = vmatmul.mubr.bf16.gmra.mrb[28].mxu0 %v390_v11  ;;  %vm896_vm3 = vcmp.gt.f32.partialorder %v828_v9, 0.5 }
  0x67   :  { %v198_v54 = vmul.f32 %v1874_v46, %v1622_v12  ;;  %v199_v19 = vmul.f32 %v1874_v46, %v1623_v13  ;;  %vm899_vm4 = vcmp.gt.f32.partialorder %v831_v10, 0.5  ;;  %v339_v20 = vmax.f32 %v271_v15, 0.0 }
  0x68   :  { %1844 = vmatmul.mubr.bf16.gmra.mrb[28].mxu1 %v408_v8  ;;  %v340_v21 = vmax.f32 %v272_v16, 0.0  ;;  %v964_v22 = vsel %vm896_vm3, 1, %v1876_v0  ;;  %1136 = vperm.xlu1 %1865, %v965_v53   ;;  %vm898_vm5 = vcmp.gt.f32.partialorder %v830_v17, 0.5  ;;  %v967_v29 = vsel %vm899_vm4, 1, %v1876_v0 }
  0x69   :  { %v273_v24 = vadd.f32 %v1875_v14, %v198_v54  ;;  %v274_v25 = vadd.f32 %v1875_v14, %v199_v19  ;;  %v966_v34 = vsel %vm898_vm5, 1, %v1876_v0  ;;  %vm901_vm6 = vcmp.gt.f32.partialorder %v833_v23, 0.5 }
  0x6a   :  { %v391_v27 = vpack.c.bf16 %v340_v21, %v339_v20  ;;  %1133 = vperm.xlu0 %1864, %v964_v22   ;;  %vm900_vm7 = vcmp.gt.f32.partialorder %v832_v26, 0.5  ;;  %v969_v28 = vsel %vm901_vm6, 1, %v1876_v0  ;;  %vm903_vm8 = vcmp.gt.f32.partialorder %v835_v35, 0.5 }
  0x6b   :  { %v341_v30 = vmax.f32 %v273_v24, 0.0  ;;  %v342_v31 = vmax.f32 %v274_v25, 0.0  ;;  %v968_v38 = vsel %vm900_vm7, 1, %v1876_v0  ;;  %vm902_vm9 = vcmp.gt.f32.partialorder %v834_v18, 0.5 }
  0x6c   :  { %1811 = vmatprep.mubr.bf16.mxu0 %v391_v27  ;;  %1142 = vperm.xlu1 %1865, %v967_v29   ;;  %v971_v43 = vsel %vm903_vm8, 1, %v1876_v0  ;;  %v970_v44 = vsel %vm902_vm9, 1, %v1876_v0  ;;  %vm905_vm10 = vcmp.gt.f32.partialorder %v837_v39, 0.5  ;;  %vm904_vm11 = vcmp.gt.f32.partialorder %v836_v42, 0.5 }
  0x6d   :  { %v392_v36 = vpack.c.bf16 %v342_v31, %v341_v30  ;;  %v973_v47 = vsel %vm905_vm10, 1, %v1876_v0  ;;  %v972_v49 = vsel %vm904_vm11, 1, %v1876_v0  ;;  %vm907_vm12 = vcmp.gt.f32.partialorder %v839_v45, 0.5 }
  0x6e   :  { %1139 = vperm.xlu0 %1864, %v966_v34   ;;  %vm906_vm13 = vcmp.gt.f32.partialorder %v838_v33, 0.5  ;;  %v975_v52 = vsel %vm907_vm12, 1, %v1876_v0  ;;  %vm909_vm14 = vcmp.gt.f32.partialorder %v841_v50, 0.5  ;;  %vm908_vm15 = vcmp.gt.f32.partialorder %v840_v51, 0.5 }
  0x6f   :  { %1812 = vmatmul.mubr.bf16.gmra.mrb[32].mxu0 %v392_v36  ;;  %v974_v55 = vsel %vm906_vm13, 1, %v1876_v0  ;;  %v977_v32 = vsel %vm909_vm14, 1, %v1876_v0  ;;  %v976_v48 = vsel %vm908_vm15, 1, %v1876_v0  ;;  %vm911_vm0 = vcmp.gt.f32.partialorder %v843_v56, 0.5 }
  0x70   :  { %1148 = vperm.xlu1 %1865, %v969_v28   ;;  %vm910_vm1 = vcmp.gt.f32.partialorder %v842_v57, 0.5  ;;  %v979_v60 = vsel %vm911_vm0, 1, %v1876_v0  ;;  %vm913_vm2 = vcmp.gt.f32.partialorder %v845_v58, 0.5  ;;  %vm912_vm3 = vcmp.gt.f32.partialorder %v844_v59, 0.5 }
  0x71   :  { %v978_v61 = vsel %vm910_vm1, 1, %v1876_v0  ;;  %v981_v62 = vsel %vm913_vm2, 1, %v1876_v0  ;;  %v980_v37 = vsel %vm912_vm3, 1, %v1876_v0 }
  0x72   :  { %1145 = vperm.xlu0 %1864, %v968_v38  }
  0x74   :  { %1154 = vperm.xlu1 %1865, %v971_v43  }
  0x76   :  { %1151 = vperm.xlu0 %1864, %v970_v44  }
  0x78   :  { %1160 = vperm.xlu1 %1865, %v973_v47  }
  0x7a   :  { %1157 = vperm.xlu0 %1864, %v972_v49  }
  0x7c   :  { %1166 = vperm.xlu1 %1865, %v975_v52  }
  0x7e   :  { %1163 = vperm.xlu0 %1864, %v974_v55  }
  0x80   :  { %1172 = vperm.xlu1 %1865, %v977_v32  }
  0x82   :  { %1169 = vperm.xlu0 %1864, %v976_v48  }
  0x83   :  { %v990_v63 = vpop.permute.xlu1 %989 }
  0x84   :  { %1178 = vperm.xlu1 %1865, %v979_v60   ;;  %v984_v1 = vpop.permute.xlu0 %983  ;;  %vm1188_vm4 = vcmp.eq.s32.totalorder %v990_v63, 1 }
  0x85   :  { %vm1186_vm5 = vcmp.eq.s32.totalorder %v984_v1, 1 }
  0x86   :  { %1175 = vperm.xlu0 %1864, %v978_v61  }
  0x87   :  { %v993_v2 = vpop.permute.xlu1 %992 }
  0x88   :  { %1184 = vperm.xlu1 %1865, %v981_v62   ;;  %v987_v40 = vpop.permute.xlu0 %986  ;;  %vm1189_vm6 = vcmp.eq.s32.totalorder %v993_v2, 1 }
  0x89   :  { %vm1187_vm7 = vcmp.eq.s32.totalorder %v987_v40, 1 }
  0x8a   :  { %1181 = vperm.xlu0 %1864, %v980_v37  }
  0x8b   :  { %v2495_v41 = vpop.permute.xlu1 %998 }
  0x8c   :  { %v996_v3 = vpop.permute.xlu0 %995  ;;  %vm1191_vm9 = vcmp.eq.s32.totalorder %v2495_v41, 1 }
  0x8d   :  { %vm1190_vm8 = vcmp.eq.s32.totalorder %v996_v3, 1 }
  0x8f   :  { %v2497_v4 = vpop.permute.xlu1 %1004 }
  0x90   :  { %v1002_v46 = vpop.permute.xlu0 %1001  ;;  %vm1193_vm11 = vcmp.eq.s32.totalorder %v2497_v4, 1 }
  0x91   :  { %vm1192_vm10 = vcmp.eq.s32.totalorder %v1002_v46, 1 }
  0x93   :  { %v2499_v5 = vpop.permute.xlu1 %1010 }
  0x94   :  { %v2501_v6 = vpop.permute.xlu0 %1007  ;;  %vm1195_vm13 = vcmp.eq.s32.totalorder %v2499_v5, 1 }
  0x95   :  { %vm1194_vm12 = vcmp.eq.s32.totalorder %v2501_v6, 1 }
  0x97   :  { %v2503_v7 = vpop.permute.xlu1 %1016 }
  0x98   :  { %v2505_v9 = vpop.permute.xlu0 %1013  ;;  %vm1197_vm15 = vcmp.eq.s32.totalorder %v2503_v7, 1 }
  0x99   :  { %vm1196_vm14 = vcmp.eq.s32.totalorder %v2505_v9, 1 }
  0x9b   :  { %v2507_v0 = vpop.permute.xlu1 %1022 }
  0x9c   :  { %v2509_v10 = vpop.permute.xlu0 %1019  ;;  %vm1199_vm1 = vcmp.eq.s32.totalorder %v2507_v0, 1 }
  0x9d   :  { %vm1198_vm0 = vcmp.eq.s32.totalorder %v2509_v10, 1 }
  0x9f   :  { %v2511_v11 = vpop.permute.xlu1 %1028 }
  0xa0   :  { %v2513_v12 = vpop.permute.xlu0 %1025  ;;  %vm1201_vm3 = vcmp.eq.s32.totalorder %v2511_v11, 1 }
  0xa1   :  { %vm1200_vm2 = vcmp.eq.s32.totalorder %v2513_v12, 1 }
  0xa3   :  { %v2515_v13 = vpop.permute.xlu1 %1034 }
  0xa4   :  { %v2517_v8 = vpop.permute.xlu0 %1031 }
  0xa7   :  { %v2519_v14 = vpop.permute.xlu1 %1040 }
  0xa8   :  { %v2521_v15 = vpop.permute.xlu0 %1037 }
  0xab   :  { %v2523_v16 = vpop.permute.xlu1 %1046 }
  0xac   :  { %v2525_v17 = vpop.permute.xlu0 %1043 }
  0xaf   :  { %v2535_v35 = vpop.permute.xlu1 %1052 }
  0xb0   :  { %v2537_v39 = vpop.permute.xlu0 %1049 }
  0xb3   :  { %v2548_v48 = vpop.permute.xlu1 %1058 }
  0xb4   :  { %v2550_v61 = vpop.permute.xlu0 %1055 }
  0xf5   :  { %v1781_v53 = vpop.f32.mrb[0].mxu0  ;;  %v2527_v54 = vpop.f32.mrb[0].mxu1 }
  0xf6   :  { %v507_v19 = vpop.f32.mrb[1].mxu0  ;;  %v2529_v20 = vpop.f32.mrb[1].mxu1  ;;  %v1256_v25 = vsel %vm1188_vm4, %v1781_v53, 0.0  ;;  %vm1202_vm4 = vcmp.eq.s32.totalorder %v2517_v8, 1 }
  0xf7   :  { %v1254_v21 = vsel %vm1186_vm5, %v507_v19, 0.0  ;;  %v1782_v22 = vpop.f32.mrb[2].mxu0  ;;  %v2531_v23 = vpop.f32.mrb[2].mxu1  ;;  %v1398_v36 = vmul.f32 %v1256_v25, %v1256_v25  ;;  %vm1203_vm5 = vcmp.eq.s32.totalorder %v2515_v13, 1 }
  0xf8   :  { %v510_v24 = vpop.f32.mrb[3].mxu0  ;;  %v2533_v27 = vpop.f32.mrb[3].mxu1  ;;  %v1396_v29 = vmul.f32 %v1254_v21, %v1254_v21  ;;  %v1257_v34 = vsel %vm1189_vm6, %v1782_v22, 0.0  ;;  %vm1204_vm6 = vcmp.eq.s32.totalorder %v2521_v15, 1 }
  0xf9   :  { %v1255_v26 = vsel %vm1187_vm7, %v510_v24, 0.0  ;;  %v1399_v43 = vmul.f32 %v1257_v34, %v1257_v34  ;;  %v2556_v19 = vpop.permute.xlu1 %1064  ;;  %v2558_v24 = vpop.permute.xlu0 %1061  ;;  %vm1205_vm7 = vcmp.eq.s32.totalorder %v2519_v14, 1 }
  0xfa   :  { %v1322_v30 = vadd.f32 %v1255_v26, %v1254_v21  ;;  %v1397_v31 = vmul.f32 %v1255_v26, %v1255_v26 }
  0xfc   :  { %v1323_v18 = vadd.f32 %v1322_v30, %v1256_v25  ;;  %v1464_v28 = vadd.f32 %v1397_v31, %v1396_v29 }
  0xfd   :  { %v1785_v38 = vpop.f32.mrb[4].mxu0  ;;  %v2539_v42 = vpop.f32.mrb[4].mxu1 }
  0xfe   :  { %v1465_v44 = vadd.f32 %v1464_v28, %v1398_v36  ;;  %v523_v45 = vpop.f32.mrb[5].mxu0  ;;  %v2541_v33 = vpop.f32.mrb[5].mxu1  ;;  %v1324_v49 = vadd.f32 %v1323_v18, %v1257_v34  ;;  %v1260_v58 = vsel %vm1192_vm10, %v1785_v38, 0.0  ;;  %vm1208_vm10 = vcmp.eq.s32.totalorder %v2537_v39, 1 }
  0xff   :  { %v1258_v47 = vsel %vm1190_vm8, %v523_v45, 0.0  ;;  %v1786_v50 = vpop.f32.mrb[6].mxu0  ;;  %v2543_v51 = vpop.f32.mrb[6].mxu1  ;;  %v1402_v63 = vmul.f32 %v1260_v58, %v1260_v58  ;;  %vm1206_vm8 = vcmp.eq.s32.totalorder %v2525_v17, 1 }
 0x100   :  { %v1400_v52 = vmul.f32 %v1258_v47, %v1258_v47  ;;  %v1466_v55 = vadd.f32 %v1465_v44, %v1399_v43  ;;  %v526_v56 = vpop.f32.mrb[7].mxu0  ;;  %v1325_v57 = vadd.f32 %v1324_v49, %v1258_v47  ;;  %v2546_v32 = vpop.f32.mrb[7].mxu1  ;;  %v1261_v1 = vsel %vm1193_vm11, %v1786_v50, 0.0 }
 0x101   :  { %v1259_v60 = vsel %vm1191_vm9, %v526_v56, 0.0  ;;  %v1403_v21 = vmul.f32 %v1261_v1, %v1261_v1  ;;  %v2569_v47 = vpop.permute.xlu1 %1070  ;;  %vm1207_vm9 = vcmp.eq.s32.totalorder %v2523_v16, 1  ;;  %vm1209_vm11 = vcmp.eq.s32.totalorder %v2535_v35, 1 }
 0x102   :  { %v1467_v59 = vadd.f32 %v1466_v55, %v1400_v52  ;;  %v1326_v62 = vadd.f32 %v1325_v57, %v1259_v60  ;;  %v1401_v37 = vmul.f32 %v1259_v60, %v1259_v60  ;;  %v2571_v55 = vpop.permute.xlu0 %1067 }
 0x104   :  { %v1327_v2 = vadd.f32 %v1326_v62, %v1260_v58  ;;  %v1468_v40 = vadd.f32 %v1467_v59, %v1401_v37 }
 0x105   :  { %v1789_v3 = vpop.f32.mrb[8].mxu0  ;;  %v2553_v46 = vpop.f32.mrb[8].mxu1 }
 0x106   :  { %v1469_v41 = vadd.f32 %v1468_v40, %v1402_v63  ;;  %v1328_v53 = vadd.f32 %v1327_v2, %v1261_v1  ;;  %v539_v22 = vpop.f32.mrb[9].mxu0  ;;  %v2560_v26 = vpop.f32.mrb[9].mxu1  ;;  %v1264_v28 = vsel %vm1196_vm14, %v1789_v3, 0.0  ;;  %vm1212_vm14 = vcmp.eq.s32.totalorder %v2558_v24, 1 }
 0x107   :  { %v1262_v25 = vsel %vm1194_vm12, %v539_v22, 0.0  ;;  %v1790_v31 = vpop.f32.mrb[10].mxu0  ;;  %v2562_v34 = vpop.f32.mrb[10].mxu1  ;;  %v1406_v49 = vmul.f32 %v1264_v28, %v1264_v28  ;;  %vm1210_vm12 = vcmp.eq.s32.totalorder %v2550_v61, 1 }
 0x108   :  { %v1329_v4 = vadd.f32 %v1328_v53, %v1262_v25  ;;  %v1404_v29 = vmul.f32 %v1262_v25, %v1262_v25  ;;  %v1470_v30 = vadd.f32 %v1469_v41, %v1403_v21  ;;  %v542_v36 = vpop.f32.mrb[11].mxu0  ;;  %v2564_v18 = vpop.f32.mrb[11].mxu1  ;;  %v1265_v45 = vsel %vm1197_vm15, %v1790_v31, 0.0 }
 0x109   :  { %v1263_v38 = vsel %vm1195_vm13, %v542_v36, 0.0  ;;  %v1407_v5 = vmul.f32 %v1265_v45, %v1265_v45  ;;  %v2584_v3 = vpop.permute.xlu1 %1076  ;;  %v2587_v31 = vpop.permute.xlu0 %1073  ;;  %vm1211_vm13 = vcmp.eq.s32.totalorder %v2548_v48, 1  ;;  %vm1213_vm15 = vcmp.eq.s32.totalorder %v2556_v19, 1 }
 0x10a   :  { %v1471_v6 = vadd.f32 %v1470_v30, %v1404_v29  ;;  %v1330_v43 = vadd.f32 %v1329_v4, %v1263_v38  ;;  %v1405_v44 = vmul.f32 %v1263_v38, %v1263_v38 }
 0x10c   :  { %v1331_v50 = vadd.f32 %v1330_v43, %v1264_v28  ;;  %v1472_v52 = vadd.f32 %v1471_v6, %v1405_v44 }
 0x10d   :  { %v1793_v56 = vpop.f32.mrb[12].mxu0  ;;  %v2589_v28 = vpop.permute.xlu1 %1082 }
 0x10e   :  { %v1473_v9 = vadd.f32 %v1472_v52, %v1406_v49  ;;  %v555_v58 = vpop.f32.mrb[13].mxu0  ;;  %v1332_v59 = vadd.f32 %v1331_v50, %v1265_v45  ;;  %v1268_v53 = vsel %vm1200_vm2, %v1793_v56, 0.0  ;;  %vm1216_vm2 = vcmp.eq.s32.totalorder %v2587_v31, 1 }
 0x10f   :  { %v1266_v7 = vsel %vm1198_vm0, %v555_v58, 0.0  ;;  %v1794_v62 = vpop.f32.mrb[14].mxu0  ;;  %v1410_v4 = vmul.f32 %v1268_v53, %v1268_v53  ;;  %vm1214_vm0 = vcmp.eq.s32.totalorder %v2571_v55, 1 }
 0x110   :  { %v1333_v37 = vadd.f32 %v1332_v59, %v1266_v7  ;;  %v1408_v63 = vmul.f32 %v1266_v7, %v1266_v7  ;;  %v1474_v1 = vadd.f32 %v1473_v9, %v1407_v5  ;;  %v558_v40 = vpop.f32.mrb[15].mxu0  ;;  %v1269_v0 = vsel %vm1201_vm3, %v1794_v62, 0.0  ;;  %v2598_v9 = vpop.permute.xlu0 %1079 }
 0x111   :  { %v2574_v57 = vpop.f32.mrb[12].mxu1  ;;  %v1267_v10 = vsel %vm1199_vm1, %v558_v40, 0.0  ;;  %v1411_v36 = vmul.f32 %v1269_v0, %v1269_v0  ;;  %v2605_v13 = vpop.permute.xlu1 %1088  ;;  %vm1215_vm1 = vcmp.eq.s32.totalorder %v2569_v47, 1  ;;  %vm1217_vm3 = vcmp.eq.s32.totalorder %v2584_v3, 1 }
 0x112   :  { %v2576_v60 = vpop.f32.mrb[13].mxu1  ;;  %v1475_v21 = vadd.f32 %v1474_v1, %v1408_v63  ;;  %v1334_v22 = vadd.f32 %v1333_v37, %v1267_v10  ;;  %v1409_v25 = vmul.f32 %v1267_v10, %v1267_v10 }
 0x113   :  { %v2579_v2 = vpop.f32.mrb[14].mxu1 }
 0x114   :  { %v2582_v41 = vpop.f32.mrb[15].mxu1  ;;  %v1335_v29 = vadd.f32 %v1334_v22, %v1268_v53  ;;  %v1476_v30 = vadd.f32 %v1475_v21, %v1409_v25  ;;  %v2607_v21 = vpop.permute.xlu0 %1085 }
 0x116   :  { %v1477_v6 = vadd.f32 %v1476_v30, %v1410_v4  ;;  %v1336_v12 = vadd.f32 %v1335_v29, %v1269_v0  ;;  %v2609_v0 = vpop.permute.xlu1 %1094 }
 0x118   :  { %v1797_v38 = vpop.f32.mrb[16].mxu0  ;;  %v1478_v44 = vadd.f32 %v1477_v6, %v1411_v36 }
 0x119   :  { %v571_v43 = vpop.f32.mrb[17].mxu0  ;;  %v1272_v59 = vsel %vm1204_vm6, %v1797_v38, 0.0  ;;  %vm1220_vm6 = vcmp.eq.s32.totalorder %v2607_v21, 1 }
 0x11a   :  { %v2592_v45 = vpop.f32.mrb[16].mxu1  ;;  %v1270_v11 = vsel %vm1202_vm4, %v571_v43, 0.0  ;;  %v1798_v49 = vpop.f32.mrb[18].mxu0  ;;  %v1414_v10 = vmul.f32 %v1272_v59, %v1272_v59  ;;  %vm1218_vm4 = vcmp.eq.s32.totalorder %v2598_v9, 1 }
 0x11b   :  { %v1337_v50 = vadd.f32 %v1336_v12, %v1270_v11  ;;  %v1412_v52 = vmul.f32 %v1270_v11, %v1270_v11  ;;  %v2595_v56 = vpop.f32.mrb[17].mxu1  ;;  %v574_v5 = vpop.f32.mrb[19].mxu0  ;;  %v1273_v1 = vsel %vm1205_vm7, %v1798_v49, 0.0  ;;  %vm1221_vm7 = vcmp.eq.s32.totalorder %v2605_v13, 1 }
 0x11c   :  { %v2600_v58 = vpop.f32.mrb[18].mxu1  ;;  %v1271_v8 = vsel %vm1203_vm5, %v574_v5, 0.0  ;;  %v1415_v22 = vmul.f32 %v1273_v1, %v1273_v1  ;;  %v2620_v49 = vpop.permute.xlu0 %1091  ;;  %vm1219_vm5 = vcmp.eq.s32.totalorder %v2589_v28, 1 }
 0x11d   :  { %v1479_v7 = vadd.f32 %v1478_v44, %v1412_v52  ;;  %v1338_v62 = vadd.f32 %v1337_v50, %v1271_v8  ;;  %v2602_v37 = vpop.f32.mrb[19].mxu1  ;;  %v1413_v63 = vmul.f32 %v1271_v8, %v1271_v8 }
 0x11f   :  { %v1339_v40 = vadd.f32 %v1338_v62, %v1272_v59  ;;  %v1480_v53 = vadd.f32 %v1479_v7, %v1413_v63 }
 0x121   :  { %v1340_v15 = vadd.f32 %v1339_v40, %v1273_v1  ;;  %v1481_v25 = vadd.f32 %v1480_v53, %v1414_v10  ;;  %v2625_v1 = vpop.permute.xlu1 %1100  ;;  %v2627_v10 = vpop.permute.xlu0 %1097 }
 0x123   :  { %v1801_v4 = vpop.f32.mrb[20].mxu0  ;;  %v1482_v29 = vadd.f32 %v1481_v25, %v1415_v22 }
 0x124   :  { %v587_v14 = vpop.f32.mrb[21].mxu0  ;;  %v1276_v52 = vsel %vm1208_vm10, %v1801_v4, 0.0  ;;  %vm1224_vm10 = vcmp.eq.s32.totalorder %v2627_v10, 1 }
 0x125   :  { %v2612_v30 = vpop.f32.mrb[20].mxu1  ;;  %v1274_v36 = vsel %vm1206_vm8, %v587_v14, 0.0  ;;  %v1802_v12 = vpop.f32.mrb[22].mxu0  ;;  %v1418_v62 = vmul.f32 %v1276_v52, %v1276_v52  ;;  %vm1223_vm8 = vcmp.eq.s32.totalorder %v2609_v0, 1 }
 0x126   :  { %v2614_v6 = vpop.f32.mrb[21].mxu1  ;;  %v1341_v38 = vadd.f32 %v1340_v15, %v1274_v36  ;;  %v1416_v43 = vmul.f32 %v1274_v36, %v1274_v36  ;;  %v590_v11 = vpop.f32.mrb[23].mxu0  ;;  %v1277_v7 = vsel %vm1209_vm11, %v1802_v12, 0.0  ;;  %v1291_v13 = vsel %vm1223_vm8, %v2533_v27, 0.0 }
 0x127   :  { %v2617_v44 = vpop.f32.mrb[22].mxu1  ;;  %v1275_v50 = vsel %vm1207_vm9, %v590_v11, 0.0  ;;  %v1419_v39 = vmul.f32 %v1277_v7, %v1277_v7  ;;  %v2643_v48 = vpop.permute.xlu0 %1103  ;;  %vm1222_vm9 = vcmp.eq.s32.totalorder %v2620_v49, 1  ;;  %vm1225_vm11 = vcmp.eq.s32.totalorder %v2625_v1, 1 }
 0x128   :  { %v2622_v17 = vpop.f32.mrb[23].mxu1  ;;  %v1483_v5 = vadd.f32 %v1482_v29, %v1416_v43  ;;  %v1342_v8 = vadd.f32 %v1341_v38, %v1275_v50  ;;  %v1417_v59 = vmul.f32 %v1275_v50, %v1275_v50  ;;  %v2638_v50 = vpop.permute.xlu1 %1106  ;;  %v1292_v49 = vsel %vm1224_vm10, %v2527_v54, 0.0 }
 0x129   :  { %v1293_v10 = vsel %vm1225_vm11, %v2531_v23, 0.0 }
 0x12a   :  { %v1343_v16 = vadd.f32 %v1342_v8, %v1276_v52  ;;  %v1484_v63 = vadd.f32 %v1483_v5, %v1417_v59 }
 0x12c   :  { %v1344_v40 = vadd.f32 %v1343_v16, %v1277_v7  ;;  %v1485_v53 = vadd.f32 %v1484_v63, %v1418_v62 }
 0x12e   :  { %v1805_v15 = vpop.f32.mrb[24].mxu0  ;;  %v1486_v35 = vadd.f32 %v1485_v53, %v1419_v39  ;;  %v2645_v53 = vpop.permute.xlu1 %1112 }
 0x12f   :  { %v603_v22 = vpop.f32.mrb[25].mxu0  ;;  %v2630_v25 = vpop.f32.mrb[24].mxu1  ;;  %v1280_v61 = vsel %vm1212_vm14, %v1805_v15, 0.0 }
 0x130   :  { %v1278_v4 = vsel %vm1210_vm12, %v603_v22, 0.0  ;;  %v1806_v29 = vpop.f32.mrb[26].mxu0  ;;  %v2633_v12 = vpop.f32.mrb[25].mxu1  ;;  %v1422_v62 = vmul.f32 %v1280_v61, %v1280_v61  ;;  %vm1226_vm12 = vcmp.eq.s32.totalorder %v2643_v48, 1 }
 0x131   :  { %v1345_v14 = vadd.f32 %v1344_v40, %v1278_v4  ;;  %v1420_v36 = vmul.f32 %v1278_v4, %v1278_v4  ;;  %v606_v38 = vpop.f32.mrb[27].mxu0  ;;  %v2636_v43 = vpop.f32.mrb[26].mxu1  ;;  %v1281_v7 = vsel %vm1213_vm15, %v1806_v29, 0.0  ;;  %vm1229_vm15 = vcmp.eq.s32.totalorder %v2645_v53, 1 }
 0x132   :  { %v1279_v11 = vsel %vm1211_vm13, %v606_v38, 0.0  ;;  %v2640_v8 = vpop.f32.mrb[27].mxu1  ;;  %v1423_v40 = vmul.f32 %v1281_v7, %v1281_v7  ;;  %v2647_v22 = vpop.permute.xlu0 %1109  ;;  %vm1227_vm13 = vcmp.eq.s32.totalorder %v2638_v50, 1  ;;  %v1297_v50 = vsel %vm1229_vm15, %v2543_v51, 0.0 }
 0x133   :  { %v1487_v52 = vadd.f32 %v1486_v35, %v1420_v36  ;;  %v1346_v5 = vadd.f32 %v1345_v14, %v1279_v11  ;;  %v1421_v59 = vmul.f32 %v1279_v11, %v1279_v11  ;;  %v1295_v54 = vsel %vm1227_vm13, %v2546_v32, 0.0 }
 0x134   :  { %vm1228_vm14 = vcmp.eq.s32.totalorder %v2647_v22, 1 }
 0x135   :  { %v1347_v16 = vadd.f32 %v1346_v5, %v1280_v61  ;;  %v1488_v63 = vadd.f32 %v1487_v52, %v1421_v59  ;;  %v1296_v48 = vsel %vm1228_vm14, %v2539_v42, 0.0  ;;  %v1439_v42 = vmul.f32 %v1297_v50, %v1297_v50 }
 0x137   :  { %v1348_v24 = vadd.f32 %v1347_v16, %v1281_v7  ;;  %v1489_v39 = vadd.f32 %v1488_v63, %v1422_v62  ;;  %v2661_v63 = vpop.permute.xlu0 %1115 }
 0x139   :  { %v1809_v15 = vpop.f32.mrb[28].mxu0  ;;  %v1490_v4 = vadd.f32 %v1489_v39, %v1423_v40 }
 0x13a   :  { %v619_v19 = vpop.f32.mrb[29].mxu0  ;;  %v1284_v55 = vsel %vm1216_vm2, %v1809_v15, 0.0 }
 0x13b   :  { %v2650_v35 = vpop.f32.mrb[28].mxu1  ;;  %v1282_v14 = vsel %vm1214_vm0, %v619_v19, 0.0  ;;  %v1810_v29 = vpop.f32.mrb[30].mxu0  ;;  %vm1230_vm0 = vcmp.eq.s32.totalorder %v2661_v63, 1 }
 0x13c   :  { %v2652_v36 = vpop.f32.mrb[29].mxu1  ;;  %v1349_v38 = vadd.f32 %v1348_v24, %v1282_v14  ;;  %v1424_v11 = vmul.f32 %v1282_v14, %v1282_v14  ;;  %v622_v52 = vpop.f32.mrb[31].mxu0  ;;  %v1285_v40 = vsel %vm1217_vm3, %v1810_v29, 0.0  ;;  %v1426_v24 = vmul.f32 %v1284_v55, %v1284_v55 }
 0x13d   :  { %v2655_v61 = vpop.f32.mrb[30].mxu1  ;;  %v1283_v5 = vsel %vm1215_vm1, %v622_v52, 0.0  ;;  %v2664_v14 = vpop.permute.xlu1 %1118  ;;  %v1298_v22 = vsel %vm1230_vm0, %v2560_v26, 0.0 }
 0x13e   :  { %2735 = vst [vmem:[#allocation2_spill] sm:$0xff] %v2655_v61  ;;  %v2658_v59 = vpop.f32.mrb[31].mxu1  ;;  %v1491_v7 = vadd.f32 %v1490_v4, %v1424_v11  ;;  %v1350_v16 = vadd.f32 %v1349_v38, %v1283_v5  ;;  %v1425_v62 = vmul.f32 %v1283_v5, %v1283_v5  ;;  %v1427_v61 = vmul.f32 %v1285_v40, %v1285_v40 }
 0x13f   :  { %vm1231_vm1 = vcmp.eq.s32.totalorder %v2664_v14, 1 }
 0x140   :  { %v1351_v47 = vadd.f32 %v1350_v16, %v1284_v55  ;;  %v1492_v39 = vadd.f32 %v1491_v7, %v1425_v62  ;;  %v2668_v7 = vpop.permute.xlu0 %1121  ;;  %v1299_v53 = vsel %vm1231_vm1, %v2564_v18, 0.0 }
 0x141   :  { %vm1232_vm2 = vcmp.eq.s32.totalorder %v2668_v7, 1 }
 0x142   :  { %v1813_v19 = vpop.f32.mrb[32].mxu0  ;;  %v1352_v52 = vadd.f32 %v1351_v47, %v1285_v40  ;;  %v1493_v15 = vadd.f32 %v1492_v39, %v1426_v24  ;;  %v2671_v47 = vpop.permute.xlu1 %1124  ;;  %v1300_v63 = vsel %vm1232_vm2, %v2553_v46, 0.0 }
 0x143   :  { %v635_v31 = vpop.f32.mrb[33].mxu0  ;;  %v1288_v9 = vsel %vm1220_vm6, %v1813_v19, 0.0  ;;  %vm1233_vm3 = vcmp.eq.s32.totalorder %v2671_v47, 1  ;;  %v1442_v18 = vmul.f32 %v1300_v63, %v1300_v63 }
 0x144   :  { %v1286_v4 = vsel %vm1218_vm4, %v635_v31, 0.0  ;;  %v1814_v38 = vpop.f32.mrb[34].mxu0  ;;  %v1494_v29 = vadd.f32 %v1493_v15, %v1427_v61  ;;  %v1430_v28 = vmul.f32 %v1288_v9, %v1288_v9  ;;  %v1290_v61 = vsel %vm1222_vm9, %v2529_v20, 0.0  ;;  %v2677_v15 = vpop.permute.xlu0 %1127 }
 0x145   :  { %v1353_v3 = vadd.f32 %v1352_v52, %v1286_v4  ;;  %v1428_v11 = vmul.f32 %v1286_v4, %v1286_v4  ;;  %v638_v5 = vpop.f32.mrb[35].mxu0  ;;  %v1289_v24 = vsel %vm1221_vm7, %v1814_v38, 0.0  ;;  %v1432_v38 = vmul.f32 %v1290_v61, %v1290_v61 }
 0x146   :  { %v1287_v55 = vsel %vm1219_vm5, %v638_v5, 0.0  ;;  %v1431_v19 = vmul.f32 %v1289_v24, %v1289_v24  ;;  %v1433_v20 = vmul.f32 %v1291_v13, %v1291_v13  ;;  %v1301_v14 = vsel %vm1233_vm3, %v2562_v34, 0.0 }
 0x147   :  { %v1354_v16 = vadd.f32 %v1353_v3, %v1287_v55  ;;  %v1429_v62 = vmul.f32 %v1287_v55, %v1287_v55  ;;  %v1495_v40 = vadd.f32 %v1494_v29, %v1428_v11  ;;  %v2681_v3 = vpop.permute.xlu1 %1130  ;;  %v1434_v55 = vmul.f32 %v1292_v49, %v1292_v49 }
 0x148   :  { %v1134_v27 = vpop.permute.xlu0 %1133  ;;  %vm1234_vm4 = vcmp.eq.s32.totalorder %v2677_v15, 1  ;;  %vm1235_vm5 = vcmp.eq.s32.totalorder %v2681_v3, 1 }
 0x149   :  { %v1355_v39 = vadd.f32 %v1354_v16, %v1288_v9  ;;  %v1496_v21 = vadd.f32 %v1495_v40, %v1429_v62  ;;  %v1294_v16 = vsel %vm1226_vm12, %v2541_v33, 0.0  ;;  %v1435_v62 = vmul.f32 %v1293_v10, %v1293_v10 }
 0x14a   :  { %v1436_v23 = vmul.f32 %v1294_v16, %v1294_v16  ;;  %v1302_v7 = vsel %vm1234_vm4, %v2576_v60, 0.0  ;;  %v1303_v47 = vsel %vm1235_vm5, %v2582_v41, 0.0  ;;  %vm1236_vm6 = vcmp.eq.s32.totalorder %v1134_v27, 1 }
 0x14b   :  { %v1356_v31 = vadd.f32 %v1355_v39, %v1289_v24  ;;  %v1497_v52 = vadd.f32 %v1496_v21, %v1430_v28  ;;  %v1137_v24 = vpop.permute.xlu1 %1136 }
 0x14c   :  { %vm1237_vm7 = vcmp.eq.s32.totalorder %v1137_v24, 1 }
 0x14d   :  { %v1357_v4 = vadd.f32 %v1356_v31, %v1290_v61  ;;  %v1498_v0 = vadd.f32 %v1497_v52, %v1431_v19  ;;  %v1437_v61 = vmul.f32 %v1295_v54, %v1295_v54  ;;  %v1140_v31 = vpop.permute.xlu0 %1139  ;;  %v1438_v52 = vmul.f32 %v1296_v48, %v1296_v48 }
 0x14e   :  { %v1305_v60 = vsel %vm1237_vm7, %v2579_v2, 0.0  ;;  %vm1238_vm8 = vcmp.eq.s32.totalorder %v1140_v31, 1 }
 0x14f   :  { %v1358_v11 = vadd.f32 %v1357_v4, %v1291_v13  ;;  %v1499_v5 = vadd.f32 %v1498_v0, %v1432_v38  ;;  %v1143_v13 = vpop.permute.xlu1 %1142  ;;  %v1306_v41 = vsel %vm1238_vm8, %v2595_v56, 0.0  ;;  %v1447_v27 = vmul.f32 %v1305_v60, %v1305_v60 }
 0x150   :  { %vm1239_vm9 = vcmp.eq.s32.totalorder %v1143_v13, 1  ;;  %v1448_v24 = vmul.f32 %v1306_v41, %v1306_v41 }
 0x151   :  { %v1359_v29 = vadd.f32 %v1358_v11, %v1292_v49  ;;  %v1500_v9 = vadd.f32 %v1499_v5, %v1433_v20  ;;  %v1440_v49 = vmul.f32 %v1298_v22, %v1298_v22  ;;  %v1146_v11 = vpop.permute.xlu0 %1145  ;;  %v1441_v5 = vmul.f32 %v1299_v53, %v1299_v53 }
 0x152   :  { %vm1240_vm10 = vcmp.eq.s32.totalorder %v1146_v11, 1 }
 0x153   :  { %v1360_v1 = vadd.f32 %v1359_v29, %v1293_v10  ;;  %v1501_v40 = vadd.f32 %v1500_v9, %v1434_v55  ;;  %v1149_v10 = vpop.permute.xlu1 %1148  ;;  %v1308_v2 = vsel %vm1240_vm10, %v2592_v45, 0.0 }
 0x154   :  { %vm1241_vm11 = vcmp.eq.s32.totalorder %v1149_v10, 1  ;;  %v1450_v13 = vmul.f32 %v1308_v2, %v1308_v2 }
 0x155   :  { %v1361_v39 = vadd.f32 %v1360_v1, %v1294_v16  ;;  %v1502_v28 = vadd.f32 %v1501_v40, %v1435_v62  ;;  %v1443_v16 = vmul.f32 %v1301_v14, %v1301_v14  ;;  %v1152_v1 = vpop.permute.xlu0 %1151  ;;  %v1444_v40 = vmul.f32 %v1302_v7, %v1302_v7 }
 0x156   :  { %v1309_v56 = vsel %vm1241_vm11, %v2600_v58, 0.0  ;;  %vm1242_vm12 = vcmp.eq.s32.totalorder %v1152_v1, 1 }
 0x157   :  { %v1362_v21 = vadd.f32 %v1361_v39, %v1295_v54  ;;  %v1503_v33 = vadd.f32 %v1502_v28, %v1436_v23  ;;  %v1155_v34 = vpop.permute.xlu1 %1154  ;;  %v1304_v39 = vsel %vm1236_vm6, %v2574_v57, 0.0  ;;  %v1445_v23 = vmul.f32 %v1303_v47, %v1303_v47 }
 0x158   :  { %v1446_v3 = vmul.f32 %v1304_v39, %v1304_v39  ;;  %v1307_v57 = vsel %vm1239_vm9, %v2602_v37, 0.0  ;;  %v1310_v37 = vsel %vm1242_vm12, %v2614_v6, 0.0  ;;  %vm1243_vm13 = vcmp.eq.s32.totalorder %v1155_v34, 1 }
 0x159   :  { %v1363_v19 = vadd.f32 %v1362_v21, %v1296_v48  ;;  %v1504_v32 = vadd.f32 %v1503_v33, %v1437_v61  ;;  %v1158_v61 = vpop.permute.xlu0 %1157  ;;  %v1449_v31 = vmul.f32 %v1307_v57, %v1307_v57  ;;  %v1311_v45 = vsel %vm1243_vm13, %v2622_v17, 0.0 }
 0x15a   :  { %vm1244_vm14 = vcmp.eq.s32.totalorder %v1158_v61, 1 }
 0x15b   :  { %v1364_v4 = vadd.f32 %v1363_v19, %v1297_v50  ;;  %v1505_v38 = vadd.f32 %v1504_v32, %v1438_v52  ;;  %v1161_v19 = vpop.permute.xlu1 %1160  ;;  %v1312_v58 = vsel %vm1244_vm14, %v2612_v30, 0.0 }
 0x15c   :  { %vm1245_vm15 = vcmp.eq.s32.totalorder %v1161_v19, 1 }
 0x15d   :  { %v1365_v0 = vadd.f32 %v1364_v4, %v1298_v22  ;;  %v1506_v51 = vadd.f32 %v1505_v38, %v1439_v42  ;;  %v1164_v42 = vpop.permute.xlu0 %1163  ;;  %v1313_v6 = vsel %vm1245_vm15, %v2617_v44, 0.0 }
 0x15e   :  { %vm1246_vm0 = vcmp.eq.s32.totalorder %v1164_v42, 1 }
 0x15f   :  { %v1366_v20 = vadd.f32 %v1365_v0, %v1299_v53  ;;  %v1507_v26 = vadd.f32 %v1506_v51, %v1440_v49  ;;  %v1167_v0 = vpop.permute.xlu1 %1166  ;;  %v1451_v51 = vmul.f32 %v1309_v56, %v1309_v56  ;;  %v1314_v17 = vsel %vm1246_vm0, %v2633_v12, 0.0 }
 0x160   :  { %vm1247_vm1 = vcmp.eq.s32.totalorder %v1167_v0, 1 }
 0x161   :  { %v1367_v29 = vadd.f32 %v1366_v20, %v1300_v63  ;;  %v1508_v55 = vadd.f32 %v1507_v26, %v1441_v5  ;;  %v1452_v20 = vmul.f32 %v1310_v37, %v1310_v37  ;;  %v1170_v26 = vpop.permute.xlu0 %1169  ;;  %v1315_v30 = vsel %vm1247_vm1, %v2640_v8, 0.0 }
 0x162   :  { %vm1248_vm2 = vcmp.eq.s32.totalorder %v1170_v26, 1 }
 0x163   :  { %v1368_v9 = vadd.f32 %v1367_v29, %v1301_v14  ;;  %v1509_v46 = vadd.f32 %v1508_v55, %v1442_v18  ;;  %v1453_v14 = vmul.f32 %v1311_v45, %v1311_v45  ;;  %v1173_v18 = vpop.permute.xlu1 %1172  ;;  %v1316_v44 = vsel %vm1248_vm2, %v2630_v25, 0.0 }
 0x164   :  { %vm1249_vm3 = vcmp.eq.s32.totalorder %v1173_v18, 1 }
 0x165   :  { %v1369_v62 = vadd.f32 %v1368_v9, %v1302_v7  ;;  %v1510_v54 = vadd.f32 %v1509_v46, %v1443_v16  ;;  %v1454_v7 = vmul.f32 %v1312_v58, %v1312_v58  ;;  %v1455_v46 = vmul.f32 %v1313_v6, %v1313_v6 }
 0x166   :  { %v1317_v12 = vsel %vm1249_vm3, %v2636_v43, 0.0 }
 0x167   :  { %v1370_v15 = vadd.f32 %v1369_v62, %v1303_v47  ;;  %v1511_v28 = vadd.f32 %v1510_v54, %v1444_v40  ;;  %v1176_v47 = vpop.permute.xlu0 %1175  ;;  %v1456_v40 = vmul.f32 %v1314_v17, %v1314_v17  ;;  %v1179_v34 = vpop.permute.xlu1 %1178  ;;  %v1459_v61 = vmul.f32 %v1317_v12, %v1317_v12 }
 0x168   :  { %vm1250_vm4 = vcmp.eq.s32.totalorder %v1176_v47, 1  ;;  %vm1251_vm5 = vcmp.eq.s32.totalorder %v1179_v34, 1 }
 0x169   :  { %v1371_v48 = vadd.f32 %v1370_v15, %v1304_v39  ;;  %v1512_v21 = vadd.f32 %v1511_v28, %v1445_v23  ;;  %v1457_v15 = vmul.f32 %v1315_v30, %v1315_v30  ;;  %v1318_v8 = vsel %vm1250_vm4, %v2652_v36, 0.0 }
 0x16a   :  { %v1319_v25 = vsel %vm1251_vm5, %v2658_v59, 0.0 }
 0x16b   :  { %v1372_v33 = vadd.f32 %v1371_v48, %v1305_v60  ;;  %v1513_v50 = vadd.f32 %v1512_v21, %v1446_v3  ;;  %v1458_v60 = vmul.f32 %v1316_v44, %v1316_v44  ;;  %v1182_v3 = vpop.permute.xlu0 %1181 }
 0x16c   :  { %vm1252_vm6 = vcmp.eq.s32.totalorder %v1182_v3, 1 }
 0x16d   :  { %v1373_v52 = vadd.f32 %v1372_v33, %v1306_v41  ;;  %v1514_v32 = vadd.f32 %v1513_v50, %v1447_v27  ;;  %v1185_v33 = vpop.permute.xlu1 %1184  ;;  %v1460_v50 = vmul.f32 %v1318_v8, %v1318_v8  ;;  %v1320_v43 = vsel %vm1252_vm6, %v2650_v35, 0.0 }
 0x16e   :  { %vm1253_vm7 = vcmp.eq.s32.totalorder %v1185_v33, 1 }
 0x16f   :  { %v1374_v22 = vadd.f32 %v1373_v52, %v1307_v57  ;;  %v1515_v4 = vadd.f32 %v1514_v32, %v1448_v24  ;;  %v1461_v52 = vmul.f32 %v1319_v25, %v1319_v25  ;;  %v2736_v32 = vld [vmem:[#allocation2_spill] sm:$0xff] }
 0x171   :  { %v1375_v38 = vadd.f32 %v1374_v22, %v1308_v2  ;;  %v1516_v53 = vadd.f32 %v1515_v4, %v1449_v31  ;;  %v1321_v2 = vsel %vm1253_vm7, %v2736_v32, 0.0  ;;  %v1462_v22 = vmul.f32 %v1320_v43, %v1320_v43 }
 0x172   :  { %v1463_v42 = vmul.f32 %v1321_v2, %v1321_v2 }
 0x173   :  { %v1376_v49 = vadd.f32 %v1375_v38, %v1309_v56  ;;  %v1517_v11 = vadd.f32 %v1516_v53, %v1450_v13 }
 0x175   :  { %v1377_v63 = vadd.f32 %v1376_v49, %v1310_v37  ;;  %v1518_v5 = vadd.f32 %v1517_v11, %v1451_v51 }
 0x177   :  { %v1378_v10 = vadd.f32 %v1377_v63, %v1311_v45  ;;  %v1519_v29 = vadd.f32 %v1518_v5, %v1452_v20 }
 0x179   :  { %v1379_v55 = vadd.f32 %v1378_v10, %v1312_v58  ;;  %v1520_v9 = vadd.f32 %v1519_v29, %v1453_v14 }
 0x17b   :  { %v1380_v16 = vadd.f32 %v1379_v55, %v1313_v6  ;;  %v1521_v1 = vadd.f32 %v1520_v9, %v1454_v7 }
 0x17d   :  { %v1381_v62 = vadd.f32 %v1380_v16, %v1314_v17  ;;  %v1522_v54 = vadd.f32 %v1521_v1, %v1455_v46 }
 0x17f   :  { %v1382_v39 = vadd.f32 %v1381_v62, %v1315_v30  ;;  %v1523_v23 = vadd.f32 %v1522_v54, %v1456_v40 }
 0x181   :  { %v1383_v28 = vadd.f32 %v1382_v39, %v1316_v44  ;;  %v1524_v48 = vadd.f32 %v1523_v23, %v1457_v15 }
 0x183   :  { %v1384_v21 = vadd.f32 %v1383_v28, %v1317_v12  ;;  %v1525_v41 = vadd.f32 %v1524_v48, %v1458_v60 }
 0x185   :  { %v1385_v27 = vadd.f32 %v1384_v21, %v1318_v8  ;;  %v1526_v19 = vadd.f32 %v1525_v41, %v1459_v61 }
 0x187   :  { %v1386_v57 = vadd.f32 %v1385_v27, %v1319_v25  ;;  %v1527_v24 = vadd.f32 %v1526_v19, %v1460_v50 }
 0x189   :  { %v1387_v36 = vadd.f32 %v1386_v57, %v1320_v43  ;;  %v1528_v31 = vadd.f32 %v1527_v24, %v1461_v52 }
 0x18b   :  { %v1388_v4 = vadd.f32 %v1387_v36, %v1321_v2  ;;  %v1529_v56 = vadd.f32 %v1528_v31, %v1462_v22 }
 0x18d   :  { %v1389_v38 = vrot.slane %v1388_v4, 4  ;;  %v1530_v59 = vadd.f32 %v1529_v56, %v1463_v42 }
 0x18f   :  { %v1390_v13 = vadd.f32 %v1389_v38, %v1388_v4  ;;  %v1531_v53 = vrot.slane %v1530_v59, 4 }
 0x191   :  { %v1391_v0 = vrot.slane %v1390_v13, 2  ;;  %v1532_v37 = vadd.f32 %v1531_v53, %v1530_v59 }
 0x193   :  { %v1392_v49 = vadd.f32 %v1391_v0, %v1390_v13  ;;  %v1533_v35 = vrot.slane %v1532_v37, 2 }
 0x195   :  { %v1393_v51 = vrot.slane %v1392_v49, 1  ;;  %v1534_v11 = vadd.f32 %v1533_v35, %v1532_v37 }
 0x197   :  { %v1394_v45 = vadd.f32 %v1393_v51, %v1392_v49  ;;  %v1535_v63 = vrot.slane %v1534_v11, 1 }
 0x199   :  { %1395 = vst [vmem:[%s2734_s5] sm:$0x1] %v1394_v45  ;;  %v1536_v20 = vadd.f32 %v1535_v63, %v1534_v11 }
 0x19b   :  { %1537 = vst [vmem:[%s2734_s5 + $0x1] sm:$0x1] %v1536_v20 }

// kernel: bottleneck_forward.7
= control target key start
LH: loop header
LB: loop body
LE: loop exit
PB: predicated region body
PF: predicated region fallthrough
CT: control target
= control target key end

     0   :  { %s2810_s4 = inlined_call_operand.vmem [shape: bf16[128,128], index: 4, kind: input, shape index: {}]   ;;  %s2811_s0 = inlined_call_operand.vmem [shape: bf16[544,128], index: 0, kind: input, shape index: {}]   ;;  %s2812_s2 = inlined_call_operand.vmem [shape: f32[1,128], index: 2, kind: input, shape index: {}]   ;;  %s2813_s3 = inlined_call_operand.vmem [shape: f32[1,128], index: 3, kind: input, shape index: {}]   ;;  %s2814_s1 = inlined_call_operand.vmem [shape: bf16[544,128], index: 1, kind: input, shape index: {}]   ;;  %s2815_s5 = inlined_call_operand.vmem [shape: f32[1,128], index: 5, kind: input, shape index: {}]   ;;  %s2816_s6 = inlined_call_operand.vmem [shape: f32[1,128], index: 6, kind: input, shape index: {}]   ;;  %s2817_s7 = inlined_call_operand.vmem [shape: f32[544,128], index: 7, kind: output, shape index: {}]  }
   0x1   :  { %v1770_v0 = vld [vmem:[%s2810_s4] sm:$0xff]   ;;  %v1771_v1 = vld [vmem:[%s2810_s4 + $0x8] sm:$0xff]   ;;  %v1772_v2 = vld [vmem:[%s2810_s4 + $0x10] sm:$0xff]  }
   0x2   :  { %1670 = vmatprep.subr.bf16.mxu0 %v1770_v0  ;;  %1754 = vmatprep.subr.bf16.mxu1 %v1770_v0  ;;  %v1773_v3 = vld [vmem:[%s2810_s4 + $0x18] sm:$0xff]   ;;  %v1291_v4 = vld [vmem:[%s2811_s0] sm:$0xff]   ;;  %v1562_v8 = vld [vmem:[%s2811_s0 + $0x8] sm:$0xff]  }
   0x3   :  { %1671 = vmatpush3.bf16.msra.mxu0 %v1770_v0  ;;  %1762 = vmatpush3.bf16.msra.mxu1 %v1770_v0  ;;  %v1836_v5 = vld [vmem:[%s2812_s2] ss:$0 sm:$0xff]  ;;  %v1292_v6 = vunpack.c.l.bf16 %v1291_v4  ;;  %v1293_v7 = vunpack.c.h.bf16 %v1291_v4  ;;  %v1579_v9 = vld [vmem:[%s2811_s0 + $0x90] sm:$0xff]   ;;  %v1580_v10 = vld [vmem:[%s2811_s0 + $0x98] sm:$0xff]   ;;  %v1296_v12 = vunpack.c.l.bf16 %v1562_v8  ;;  %v1297_v13 = vunpack.c.h.bf16 %v1562_v8 }
   0x4   :  { %1672 = vmatprep.subr.bf16.mxu0 %v1771_v1  ;;  %1755 = vmatprep.subr.bf16.mxu1 %v1771_v1  ;;  %v1850_v11 = vld [vmem:[%s2813_s3] ss:$0 sm:$0xff]  ;;  %v1364_v14 = vunpack.c.l.bf16 %v1579_v9  ;;  %v1365_v15 = vunpack.c.h.bf16 %v1579_v9  ;;  %v1563_v16 = vld [vmem:[%s2811_s0 + $0x10] sm:$0xff]   ;;  %v1368_v19 = vunpack.c.l.bf16 %v1580_v10  ;;  %v1369_v20 = vunpack.c.h.bf16 %v1580_v10  ;;  %v1564_v38 = vld [vmem:[%s2811_s0 + $0x18] sm:$0xff]  }
   0x5   :  { %v170_v17 = vmul.f32 %v1292_v6, %v1836_v5  ;;  %v171_v18 = vmul.f32 %v1293_v7, %v1836_v5  ;;  %v1774_v21 = vld [vmem:[%s2810_s4 + $0x20] sm:$0xff]   ;;  %v172_v22 = vmul.f32 %v1296_v12, %v1836_v5  ;;  %v173_v23 = vmul.f32 %v1297_v13, %v1836_v5  ;;  %v1775_v39 = vld [vmem:[%s2810_s4 + $0x28] sm:$0xff]   ;;  %v1776_v58 = vld [vmem:[%s2810_s4 + $0x30] sm:$0xff]  }
   0x6   :  { %v206_v24 = vmul.f32 %v1364_v14, %v1836_v5  ;;  %v1300_v25 = vunpack.c.l.bf16 %v1563_v16  ;;  %v207_v28 = vmul.f32 %v1365_v15, %v1836_v5  ;;  %v208_v29 = vmul.f32 %v1368_v19, %v1836_v5  ;;  %v1581_v44 = vld [vmem:[%s2811_s0 + $0xa0] sm:$0xff]   ;;  %v1582_v53 = vld [vmem:[%s2811_s0 + $0xa8] sm:$0xff]   ;;  %v1777_v14 = vld [vmem:[%s2810_s4 + $0x38] sm:$0xff]  }
   0x7   :  { %1673 = vmatpush3.bf16.msra.mxu0 %v1771_v1  ;;  %1763 = vmatpush3.bf16.msra.mxu1 %v1771_v1  ;;  %v245_v26 = vadd.f32 %v1850_v11, %v170_v17  ;;  %v246_v27 = vadd.f32 %v1850_v11, %v171_v18  ;;  %v247_v30 = vadd.f32 %v1850_v11, %v172_v22  ;;  %v1301_v48 = vunpack.c.h.bf16 %v1563_v16  ;;  %v1566_v19 = vld [vmem:[%s2811_s0 + $0x28] sm:$0xff]  }
   0x8   :  { %1674 = vmatprep.subr.bf16.mxu0 %v1772_v2  ;;  %1756 = vmatprep.subr.bf16.mxu1 %v1772_v2  ;;  %v248_v31 = vadd.f32 %v1850_v11, %v173_v23  ;;  %v281_v32 = vadd.f32 %v1850_v11, %v206_v24  ;;  %v209_v33 = vmul.f32 %v1369_v20, %v1836_v5  ;;  %v1304_v52 = vunpack.c.l.bf16 %v1564_v38 }
   0x9   :  { %v313_v34 = vmax.f32 %v245_v26, 0.0  ;;  %v314_v35 = vmax.f32 %v246_v27, 0.0  ;;  %v282_v36 = vadd.f32 %v1850_v11, %v207_v28  ;;  %v283_v37 = vadd.f32 %v1850_v11, %v208_v29  ;;  %v1583_v28 = vld [vmem:[%s2811_s0 + $0xb0] sm:$0xff]  }
   0xa   :  { %v315_v40 = vmax.f32 %v247_v30, 0.0  ;;  %v316_v41 = vmax.f32 %v248_v31, 0.0  ;;  %v349_v42 = vmax.f32 %v281_v32, 0.0  ;;  %v284_v43 = vadd.f32 %v1850_v11, %v209_v33  ;;  %v1584_v33 = vld [vmem:[%s2811_s0 + $0xb8] sm:$0xff]  }
   0xb   :  { %1675 = vmatpush3.bf16.msra.mxu0 %v1772_v2  ;;  %1764 = vmatpush3.bf16.msra.mxu1 %v1772_v2  ;;  %v381_v45 = vpack.c.bf16 %v314_v35, %v313_v34  ;;  %v350_v46 = vmax.f32 %v282_v36, 0.0  ;;  %v351_v47 = vmax.f32 %v283_v37, 0.0  ;;  %v174_v51 = vmul.f32 %v1300_v25, %v1836_v5 }
   0xc   :  { %1676 = vmatprep.subr.bf16.mxu0 %v1773_v3  ;;  %1757 = vmatprep.subr.bf16.mxu1 %v1773_v3  ;;  %v1883_v49 = vpack.c.bf16 %v316_v41, %v315_v40  ;;  %v352_v50 = vmax.f32 %v284_v43, 0.0  ;;  %v175_v55 = vmul.f32 %v1301_v48, %v1836_v5  ;;  %v1305_v56 = vunpack.c.h.bf16 %v1564_v38 }
   0xd   :  { %v399_v54 = vpack.c.bf16 %v350_v46, %v349_v42  ;;  %v1372_v57 = vunpack.c.l.bf16 %v1581_v44  ;;  %v249_v60 = vadd.f32 %v1850_v11, %v174_v51  ;;  %v176_v61 = vmul.f32 %v1304_v52, %v1836_v5  ;;  %1686 = vmatprep.mubr.bf16.mxu0 %v381_v45  ;;  %v1567_v42 = vld [vmem:[%s2811_s0 + $0x30] sm:$0xff]  }
   0xe   :  { %v1893_v59 = vpack.c.bf16 %v352_v50, %v351_v47  ;;  %v1373_v62 = vunpack.c.h.bf16 %v1581_v44  ;;  %v250_v63 = vadd.f32 %v1850_v11, %v175_v55  ;;  %v177_v0 = vmul.f32 %v1305_v56, %v1836_v5 }
   0xf   :  { %1677 = vmatpush3.bf16.msra.mxu0 %v1773_v3  ;;  %1765 = vmatpush3.bf16.msra.mxu1 %v1773_v3  ;;  %v210_v1 = vmul.f32 %v1372_v57, %v1836_v5  ;;  %v1376_v2 = vunpack.c.l.bf16 %v1582_v53  ;;  %v1565_v3 = vld [vmem:[%s2811_s0 + $0x20] sm:$0xff]   ;;  %v317_v4 = vmax.f32 %v249_v60, 0.0  ;;  %v251_v6 = vadd.f32 %v1850_v11, %v176_v61  ;;  %v1568_v61 = vld [vmem:[%s2811_s0 + $0x38] sm:$0xff]  }
  0x10   :  { %1678 = vmatprep.subr.bf16.mxu0 %v1774_v21  ;;  %1758 = vmatprep.subr.bf16.mxu1 %v1774_v21  ;;  %v211_v7 = vmul.f32 %v1373_v62, %v1836_v5  ;;  %v1377_v8 = vunpack.c.h.bf16 %v1582_v53  ;;  %v318_v9 = vmax.f32 %v250_v63, 0.0  ;;  %v252_v10 = vadd.f32 %v1850_v11, %v177_v0 }
  0x11   :  { %1722 = vmatprep.mubr.bf16.mxu1 %v399_v54  ;;  %v285_v12 = vadd.f32 %v1850_v11, %v210_v1  ;;  %v212_v13 = vmul.f32 %v1376_v2, %v1836_v5  ;;  %v319_v15 = vmax.f32 %v251_v6, 0.0  ;;  %v1308_v18 = vunpack.c.l.bf16 %v1565_v3  ;;  %v1585_v2 = vld [vmem:[%s2811_s0 + $0xc0] sm:$0xff]  }
  0x12   :  { %v286_v16 = vadd.f32 %v1850_v11, %v211_v7  ;;  %v213_v17 = vmul.f32 %v1377_v8, %v1836_v5  ;;  %v383_v20 = vpack.c.bf16 %v318_v9, %v317_v4  ;;  %v1309_v26 = vunpack.c.h.bf16 %v1565_v3 }
  0x13   :  { %1679 = vmatpush3.bf16.msra.mxu0 %v1774_v21  ;;  %1766 = vmatpush3.bf16.msra.mxu1 %v1774_v21  ;;  %v320_v21 = vmax.f32 %v252_v10, 0.0  ;;  %v353_v22 = vmax.f32 %v285_v12, 0.0  ;;  %v287_v23 = vadd.f32 %v1850_v11, %v212_v13  ;;  %v178_v27 = vmul.f32 %v1308_v18, %v1836_v5 }
  0x14   :  { %1680 = vmatprep.subr.bf16.mxu0 %v1775_v39  ;;  %1759 = vmatprep.subr.bf16.mxu1 %v1775_v39  ;;  %v354_v24 = vmax.f32 %v286_v16, 0.0  ;;  %v288_v25 = vadd.f32 %v1850_v11, %v213_v17  ;;  %v1312_v31 = vunpack.c.l.bf16 %v1566_v19  ;;  %v1313_v32 = vunpack.c.h.bf16 %v1566_v19 }
  0x15   :  { %v1922_v29 = vpack.c.bf16 %v320_v21, %v319_v15  ;;  %v355_v30 = vmax.f32 %v287_v23, 0.0  ;;  %v179_v36 = vmul.f32 %v1309_v26, %v1836_v5  ;;  %v253_v37 = vadd.f32 %v1850_v11, %v178_v27  ;;  %v1586_v15 = vld [vmem:[%s2811_s0 + $0xc8] sm:$0xff]  }
  0x16   :  { %v401_v34 = vpack.c.bf16 %v354_v24, %v353_v22  ;;  %v356_v35 = vmax.f32 %v288_v25, 0.0  ;;  %v180_v38 = vmul.f32 %v1312_v31, %v1836_v5  ;;  %v1380_v40 = vunpack.c.l.bf16 %v1583_v28 }
  0x17   :  { %1681 = vmatpush3.bf16.msra.mxu0 %v1775_v39  ;;  %1767 = vmatpush3.bf16.msra.mxu1 %v1775_v39  ;;  %v181_v39 = vmul.f32 %v1313_v32, %v1836_v5  ;;  %v1381_v41 = vunpack.c.h.bf16 %v1583_v28  ;;  %v254_v44 = vadd.f32 %v1850_v11, %v179_v36  ;;  %v321_v45 = vmax.f32 %v253_v37, 0.0 }
  0x18   :  { %1682 = vmatprep.subr.bf16.mxu0 %v1776_v58  ;;  %1760 = vmatprep.subr.bf16.mxu1 %v1776_v58  ;;  %v402_v43 = vpack.c.bf16 %v356_v35, %v355_v30  ;;  %v1384_v46 = vunpack.c.l.bf16 %v1584_v33  ;;  %v255_v47 = vadd.f32 %v1850_v11, %v180_v38  ;;  %v214_v50 = vmul.f32 %v1380_v40, %v1836_v5 }
  0x19   :  { %v256_v48 = vadd.f32 %v1850_v11, %v181_v39  ;;  %v1385_v51 = vunpack.c.h.bf16 %v1584_v33  ;;  %v322_v52 = vmax.f32 %v254_v44, 0.0  ;;  %v215_v53 = vmul.f32 %v1381_v41, %v1836_v5 }
  0x1a   :  { %v216_v54 = vmul.f32 %v1384_v46, %v1836_v5  ;;  %v1316_v55 = vunpack.c.l.bf16 %v1567_v42  ;;  %v323_v56 = vmax.f32 %v255_v47, 0.0  ;;  %v1317_v1 = vunpack.c.h.bf16 %v1567_v42 }
  0x1b   :  { %1683 = vmatpush3.bf16.msra.mxu0 %v1776_v58  ;;  %1768 = vmatpush3.bf16.msra.mxu1 %v1776_v58  ;;  %v324_v57 = vmax.f32 %v256_v48, 0.0  ;;  %v289_v58 = vadd.f32 %v1850_v11, %v214_v50  ;;  %v217_v60 = vmul.f32 %v1385_v51, %v1836_v5  ;;  %v385_v62 = vpack.c.bf16 %v322_v52, %v321_v45  ;;  %v1588_v51 = vld [vmem:[%s2811_s0 + $0xd8] sm:$0xff]  }
  0x1c   :  { %1684 = vmatprep.subr.bf16.mxu0 %v1777_v14  ;;  %1761 = vmatprep.subr.bf16.mxu1 %v1777_v14  ;;  %v290_v63 = vadd.f32 %v1850_v11, %v215_v53  ;;  %v291_v0 = vadd.f32 %v1850_v11, %v216_v54  ;;  %v183_v8 = vmul.f32 %v1317_v1, %v1836_v5  ;;  %v1320_v9 = vunpack.c.l.bf16 %v1568_v61  ;;  %v1571_v1 = vld [vmem:[%s2811_s0 + $0x50] sm:$0xff]  }
  0x1d   :  { %v1952_v3 = vpack.c.bf16 %v324_v57, %v323_v56  ;;  %v357_v4 = vmax.f32 %v289_v58, 0.0  ;;  %v292_v6 = vadd.f32 %v1850_v11, %v217_v60  ;;  %v1321_v13 = vunpack.c.h.bf16 %v1568_v61 }
  0x1e   :  { %v359_v7 = vmax.f32 %v291_v0, 0.0  ;;  %v258_v17 = vadd.f32 %v1850_v11, %v183_v8  ;;  %v184_v18 = vmul.f32 %v1320_v9, %v1836_v5  ;;  %v1389_v19 = vunpack.c.h.bf16 %v1585_v2 }
  0x1f   :  { %1685 = vmatpush3.bf16.msra.mxu0 %v1777_v14  ;;  %1769 = vmatpush3.bf16.msra.mxu1 %v1777_v14  ;;  %v360_v10 = vmax.f32 %v292_v6, 0.0  ;;  %v1388_v14 = vunpack.c.l.bf16 %v1585_v2  ;;  %v185_v23 = vmul.f32 %v1321_v13, %v1836_v5  ;;  %v1392_v28 = vunpack.c.l.bf16 %v1586_v15 }
  0x20   :  { %v326_v25 = vmax.f32 %v258_v17, 0.0  ;;  %v259_v26 = vadd.f32 %v1850_v11, %v184_v18  ;;  %v219_v27 = vmul.f32 %v1389_v19, %v1836_v5  ;;  %v1393_v32 = vunpack.c.h.bf16 %v1586_v15  ;;  %v1589_v19 = vld [vmem:[%s2811_s0 + $0xe0] sm:$0xff]  }
  0x21   :  { %v404_v21 = vpack.c.bf16 %v360_v10, %v359_v7  ;;  %v218_v24 = vmul.f32 %v1388_v14, %v1836_v5  ;;  %v260_v30 = vadd.f32 %v1850_v11, %v185_v23  ;;  %v220_v37 = vmul.f32 %v1392_v28, %v1836_v5  ;;  %v1572_v10 = vld [vmem:[%s2811_s0 + $0x58] sm:$0xff]  }
  0x22   :  { %1687 = vmatmul.mubr.bf16.vlgmr.msra.gmra.mrb[0].mxu0 %v1883_v49  ;;  %1723 = vmatmul.mubr.bf16.vlgmr.msra.gmra.mrb[0].mxu1 %v1893_v59  ;;  %v182_v49 = vmul.f32 %v1316_v55, %v1836_v5  ;;  %v358_v59 = vmax.f32 %v290_v63, 0.0  ;;  %v294_v36 = vadd.f32 %v1850_v11, %v219_v27  ;;  %v327_v38 = vmax.f32 %v259_v26, 0.0 }
  0x23   :  { %1690 = vmatprep.mubr.bf16.mxu0 %v383_v20  ;;  %1726 = vmatprep.mubr.bf16.mxu1 %v401_v34  ;;  %v1569_v20 = vld [vmem:[%s2811_s0 + $0x40] sm:$0xff]   ;;  %v293_v31 = vadd.f32 %v1850_v11, %v218_v24  ;;  %v1570_v34 = vld [vmem:[%s2811_s0 + $0x48] sm:$0xff]   ;;  %v221_v40 = vmul.f32 %v1393_v32, %v1836_v5  ;;  %v295_v44 = vadd.f32 %v1850_v11, %v220_v37  ;;  %v1400_v0 = vunpack.c.l.bf16 %v1588_v51 }
  0x24   :  { %v257_v12 = vadd.f32 %v1850_v11, %v182_v49  ;;  %v403_v16 = vpack.c.bf16 %v358_v59, %v357_v4  ;;  %v1324_v33 = vunpack.c.l.bf16 %v1569_v20  ;;  %v1325_v41 = vunpack.c.h.bf16 %v1569_v20 }
  0x25   :  { %v361_v39 = vmax.f32 %v293_v31, 0.0  ;;  %v362_v42 = vmax.f32 %v294_v36, 0.0  ;;  %v1328_v46 = vunpack.c.l.bf16 %v1570_v34  ;;  %v296_v47 = vadd.f32 %v1850_v11, %v221_v40 }
  0x26   :  { %v325_v22 = vmax.f32 %v257_v12, 0.0  ;;  %v186_v45 = vmul.f32 %v1324_v33, %v1836_v5  ;;  %v187_v48 = vmul.f32 %v1325_v41, %v1836_v5  ;;  %v1329_v50 = vunpack.c.h.bf16 %v1570_v34  ;;  %v1590_v33 = vld [vmem:[%s2811_s0 + $0xe8] sm:$0xff]  }
  0x27   :  { %v405_v52 = vpack.c.bf16 %v362_v42, %v361_v39  ;;  %v363_v53 = vmax.f32 %v295_v44, 0.0  ;;  %v188_v55 = vmul.f32 %v1328_v46, %v1836_v5  ;;  %v364_v56 = vmax.f32 %v296_v47, 0.0  ;;  %v1573_v42 = vld [vmem:[%s2811_s0 + $0x60] sm:$0xff]  }
  0x28   :  { %v387_v35 = vpack.c.bf16 %v326_v25, %v325_v22  ;;  %v261_v54 = vadd.f32 %v1850_v11, %v186_v45  ;;  %v262_v57 = vadd.f32 %v1850_v11, %v187_v48  ;;  %v189_v58 = vmul.f32 %v1329_v50, %v1836_v5 }
  0x29   :  { %v406_v59 = vpack.c.bf16 %v364_v56, %v363_v53  ;;  %v1401_v8 = vunpack.c.h.bf16 %v1588_v51  ;;  %v224_v9 = vmul.f32 %v1400_v0, %v1836_v5  ;;  %v1332_v15 = vunpack.c.l.bf16 %v1571_v1  ;;  %v1574_v51 = vld [vmem:[%s2811_s0 + $0x68] sm:$0xff]  }
  0x2a   :  { %1691 = vmatmul.mubr.bf16.gmra.mrb[4].mxu0 %v1922_v29  ;;  %1727 = vmatmul.mubr.bf16.gmra.mrb[4].mxu1 %v402_v43  ;;  %v1587_v29 = vld [vmem:[%s2811_s0 + $0xd0] sm:$0xff]   ;;  %v328_v43 = vmax.f32 %v260_v30, 0.0  ;;  %v329_v61 = vmax.f32 %v261_v54, 0.0  ;;  %v330_v4 = vmax.f32 %v262_v57, 0.0  ;;  %v264_v6 = vadd.f32 %v1850_v11, %v189_v58 }
  0x2b   :  { %1694 = vmatprep.mubr.bf16.mxu0 %v385_v62  ;;  %1730 = vmatprep.mubr.bf16.mxu1 %v403_v16  ;;  %v1396_v60 = vunpack.c.l.bf16 %v1587_v29  ;;  %v263_v62 = vadd.f32 %v1850_v11, %v188_v55  ;;  %v1397_v63 = vunpack.c.h.bf16 %v1587_v29  ;;  %v225_v16 = vmul.f32 %v1401_v8, %v1836_v5 }
  0x2c   :  { %v388_v2 = vpack.c.bf16 %v328_v43, %v327_v38  ;;  %v389_v12 = vpack.c.bf16 %v330_v4, %v329_v61  ;;  %v299_v17 = vadd.f32 %v1850_v11, %v224_v9  ;;  %v1333_v18 = vunpack.c.h.bf16 %v1571_v1  ;;  %v1591_v1 = vld [vmem:[%s2811_s0 + $0xf0] sm:$0xff]  }
  0x2d   :  { %v222_v49 = vmul.f32 %v1396_v60, %v1836_v5  ;;  %v223_v7 = vmul.f32 %v1397_v63, %v1836_v5  ;;  %v331_v13 = vmax.f32 %v263_v62, 0.0  ;;  %v332_v20 = vmax.f32 %v264_v6, 0.0 }
  0x2e   :  { %v190_v22 = vmul.f32 %v1332_v15, %v1836_v5  ;;  %v1336_v23 = vunpack.c.l.bf16 %v1572_v10  ;;  %v300_v25 = vadd.f32 %v1850_v11, %v225_v16  ;;  %v367_v26 = vmax.f32 %v299_v17, 0.0 }
  0x2f   :  { %v297_v14 = vadd.f32 %v1850_v11, %v222_v49  ;;  %v191_v27 = vmul.f32 %v1333_v18, %v1836_v5  ;;  %v1337_v30 = vunpack.c.h.bf16 %v1572_v10  ;;  %v1404_v32 = vunpack.c.l.bf16 %v1589_v19 }
  0x30   :  { %v265_v28 = vadd.f32 %v1850_v11, %v190_v22  ;;  %v192_v31 = vmul.f32 %v1336_v23, %v1836_v5  ;;  %v1405_v37 = vunpack.c.h.bf16 %v1589_v19  ;;  %v390_v44 = vpack.c.bf16 %v332_v20, %v331_v13  ;;  %v1575_v19 = vld [vmem:[%s2811_s0 + $0x70] sm:$0xff]  }
  0x31   :  { %v266_v36 = vadd.f32 %v1850_v11, %v191_v27  ;;  %v193_v39 = vmul.f32 %v1337_v30, %v1836_v5  ;;  %v226_v41 = vmul.f32 %v1404_v32, %v1836_v5  ;;  %v1408_v29 = vunpack.c.l.bf16 %v1590_v33 }
  0x32   :  { %1695 = vmatmul.mubr.bf16.gmra.mrb[8].mxu0 %v1952_v3  ;;  %1731 = vmatmul.mubr.bf16.gmra.mrb[8].mxu1 %v404_v21  ;;  %v298_v3 = vadd.f32 %v1850_v11, %v223_v7  ;;  %v365_v21 = vmax.f32 %v297_v14, 0.0  ;;  %v333_v38 = vmax.f32 %v265_v28, 0.0  ;;  %v267_v40 = vadd.f32 %v1850_v11, %v192_v31  ;;  %v1576_v28 = vld [vmem:[%s2811_s0 + $0x78] sm:$0xff]  }
  0x33   :  { %1698 = vmatprep.mubr.bf16.mxu0 %v387_v35  ;;  %1734 = vmatprep.mubr.bf16.mxu1 %v405_v52  ;;  %v368_v35 = vmax.f32 %v300_v25, 0.0  ;;  %v334_v45 = vmax.f32 %v266_v36, 0.0  ;;  %v227_v46 = vmul.f32 %v1405_v37, %v1836_v5  ;;  %v268_v47 = vadd.f32 %v1850_v11, %v193_v39 }
  0x34   :  { %v366_v24 = vmax.f32 %v298_v3, 0.0  ;;  %v301_v48 = vadd.f32 %v1850_v11, %v226_v41  ;;  %v1409_v50 = vunpack.c.h.bf16 %v1590_v33  ;;  %v335_v52 = vmax.f32 %v267_v40, 0.0 }
  0x35   :  { %v408_v43 = vpack.c.bf16 %v368_v35, %v367_v26  ;;  %v302_v53 = vadd.f32 %v1850_v11, %v227_v46  ;;  %v228_v54 = vmul.f32 %v1408_v29, %v1836_v5  ;;  %v1340_v55 = vunpack.c.l.bf16 %v1573_v42 }
  0x36   :  { %v407_v34 = vpack.c.bf16 %v366_v24, %v365_v21  ;;  %v391_v56 = vpack.c.bf16 %v334_v45, %v333_v38  ;;  %v369_v57 = vmax.f32 %v301_v48, 0.0  ;;  %v229_v58 = vmul.f32 %v1409_v50, %v1836_v5  ;;  %v1593_v38 = vld [vmem:[%s2811_s0 + $0x100] sm:$0xff]  }
  0x37   :  { %v1341_v60 = vunpack.c.h.bf16 %v1573_v42  ;;  %v370_v61 = vmax.f32 %v302_v53, 0.0  ;;  %v303_v62 = vadd.f32 %v1850_v11, %v228_v54  ;;  %v194_v63 = vmul.f32 %v1340_v55, %v1836_v5 }
  0x38   :  { %v1344_v0 = vunpack.c.l.bf16 %v1574_v51  ;;  %v304_v4 = vadd.f32 %v1850_v11, %v229_v58  ;;  %v1345_v49 = vunpack.c.h.bf16 %v1574_v51  ;;  %v1412_v15 = vunpack.c.l.bf16 %v1591_v1  ;;  %v1594_v51 = vld [vmem:[%s2811_s0 + $0x108] sm:$0xff]  }
  0x39   :  { %v195_v6 = vmul.f32 %v1341_v60, %v1836_v5  ;;  %v409_v7 = vpack.c.bf16 %v370_v61, %v369_v57  ;;  %v371_v8 = vmax.f32 %v303_v62, 0.0  ;;  %v269_v9 = vadd.f32 %v1850_v11, %v194_v63  ;;  %v1577_v61 = vld [vmem:[%s2811_s0 + $0x80] sm:$0xff]  }
  0x3a   :  { %1699 = vmatmul.mubr.bf16.gmra.mrb[12].mxu0 %v388_v2  ;;  %1735 = vmatmul.mubr.bf16.gmra.mrb[12].mxu1 %v406_v59  ;;  %v336_v2 = vmax.f32 %v268_v47, 0.0  ;;  %v1592_v59 = vld [vmem:[%s2811_s0 + $0xf8] sm:$0xff]   ;;  %v196_v10 = vmul.f32 %v1344_v0, %v1836_v5  ;;  %v197_v14 = vmul.f32 %v1345_v49, %v1836_v5  ;;  %v1413_v17 = vunpack.c.h.bf16 %v1591_v1 }
  0x3b   :  { %1702 = vmatprep.mubr.bf16.mxu0 %v389_v12  ;;  %1738 = vmatprep.mubr.bf16.mxu1 %v407_v34  ;;  %v372_v12 = vmax.f32 %v304_v4, 0.0  ;;  %v270_v13 = vadd.f32 %v1850_v11, %v195_v6  ;;  %v337_v3 = vmax.f32 %v269_v9, 0.0  ;;  %v1416_v18 = vunpack.c.l.bf16 %v1592_v59 }
  0x3c   :  { %v271_v16 = vadd.f32 %v1850_v11, %v196_v10  ;;  %v392_v20 = vpack.c.bf16 %v336_v2, %v335_v52  ;;  %v272_v22 = vadd.f32 %v1850_v11, %v197_v14  ;;  %v230_v23 = vmul.f32 %v1412_v15, %v1836_v5 }
  0x3d   :  { %v338_v21 = vmax.f32 %v270_v13, 0.0  ;;  %v410_v24 = vpack.c.bf16 %v372_v12, %v371_v8  ;;  %v231_v25 = vmul.f32 %v1413_v17, %v1836_v5  ;;  %v1417_v26 = vunpack.c.h.bf16 %v1592_v59  ;;  %v1578_v59 = vld [vmem:[%s2811_s0 + $0x88] sm:$0xff]  }
  0x3e   :  { %v232_v27 = vmul.f32 %v1416_v18, %v1836_v5  ;;  %v339_v31 = vmax.f32 %v271_v16, 0.0  ;;  %v305_v32 = vadd.f32 %v1850_v11, %v230_v23  ;;  %v1348_v33 = vunpack.c.l.bf16 %v1575_v19 }
  0x3f   :  { %v393_v30 = vpack.c.bf16 %v338_v21, %v337_v3  ;;  %v306_v34 = vadd.f32 %v1850_v11, %v231_v25  ;;  %v233_v35 = vmul.f32 %v1417_v26, %v1836_v5  ;;  %v1349_v37 = vunpack.c.h.bf16 %v1575_v19 }
  0x40   :  { %v307_v36 = vadd.f32 %v1850_v11, %v232_v27  ;;  %v340_v39 = vmax.f32 %v272_v22, 0.0  ;;  %v373_v40 = vmax.f32 %v305_v32, 0.0  ;;  %v198_v41 = vmul.f32 %v1348_v33, %v1836_v5 }
  0x41   :  { %v1352_v42 = vunpack.c.l.bf16 %v1576_v28  ;;  %v308_v45 = vadd.f32 %v1850_v11, %v233_v35  ;;  %v199_v29 = vmul.f32 %v1349_v37, %v1836_v5  ;;  %v1353_v47 = vunpack.c.h.bf16 %v1576_v28 }
  0x42   :  { %1703 = vmatmul.mubr.bf16.gmra.mrb[16].mxu0 %v390_v44  ;;  %1739 = vmatmul.mubr.bf16.gmra.mrb[16].mxu1 %v408_v43  ;;  %v374_v44 = vmax.f32 %v306_v34, 0.0  ;;  %v375_v46 = vmax.f32 %v307_v36, 0.0  ;;  %v273_v43 = vadd.f32 %v1850_v11, %v198_v41  ;;  %v1420_v50 = vunpack.c.l.bf16 %v1593_v38  ;;  %v2110_v41 = vld [vmem:[%s2814_s1] sm:$0xff]  }
  0x43   :  { %1706 = vmatprep.mubr.bf16.mxu0 %v391_v56  ;;  %1742 = vmatprep.mubr.bf16.mxu1 %v409_v7  ;;  %v200_v48 = vmul.f32 %v1352_v42, %v1836_v5  ;;  %v376_v53 = vmax.f32 %v308_v45, 0.0  ;;  %v274_v54 = vadd.f32 %v1850_v11, %v199_v29  ;;  %v1421_v55 = vunpack.c.h.bf16 %v1593_v38  ;;  %v2120_v42 = vld [vmem:[%s2814_s1 + $0x90] sm:$0xff]  }
  0x44   :  { %v411_v52 = vpack.c.bf16 %v374_v44, %v373_v40  ;;  %v341_v56 = vmax.f32 %v273_v43, 0.0  ;;  %v201_v57 = vmul.f32 %v1353_v47, %v1836_v5  ;;  %v234_v60 = vmul.f32 %v1420_v50, %v1836_v5  ;;  %v2125_v44 = vld [vmem:[%s2814_s1 + $0x18] sm:$0xff]   ;;  %v2130_v45 = vld [vmem:[%s2814_s1 + $0x10] sm:$0xff]   ;;  %v2144_v50 = vld [vmem:[%s2814_s1 + $0xa0] sm:$0xff]  }
  0x45   :  { %v275_v58 = vadd.f32 %v1850_v11, %v200_v48  ;;  %v394_v62 = vpack.c.bf16 %v340_v39, %v339_v31  ;;  %v342_v63 = vmax.f32 %v274_v54, 0.0  ;;  %v235_v0 = vmul.f32 %v1421_v55, %v1836_v5  ;;  %v2139_v48 = vld [vmem:[%s2814_s1 + $0xa8] sm:$0xff]  }
  0x46   :  { %v1424_v1 = vunpack.c.l.bf16 %v1594_v51  ;;  %v412_v2 = vpack.c.bf16 %v376_v53, %v375_v46  ;;  %v276_v4 = vadd.f32 %v1850_v11, %v201_v57  ;;  %v309_v6 = vadd.f32 %v1850_v11, %v234_v60 }
  0x47   :  { %v1425_v49 = vunpack.c.h.bf16 %v1594_v51  ;;  %v343_v7 = vmax.f32 %v275_v58, 0.0  ;;  %v310_v8 = vadd.f32 %v1850_v11, %v235_v0  ;;  %v1356_v10 = vunpack.c.l.bf16 %v1577_v61  ;;  %v2149_v51 = vld [vmem:[%s2814_s1 + $0x28] sm:$0xff]   ;;  %v2177_v0 = vld [vmem:[%s2814_s1 + $0x38] sm:$0xff]  }
  0x48   :  { %v236_v9 = vmul.f32 %v1424_v1, %v1836_v5  ;;  %v395_v12 = vpack.c.bf16 %v342_v63, %v341_v56  ;;  %v377_v13 = vmax.f32 %v309_v6, 0.0  ;;  %v1357_v15 = vunpack.c.h.bf16 %v1577_v61  ;;  %v2158_v56 = vld [vmem:[%s2814_s1 + $0x20] sm:$0xff]   ;;  %v2172_v63 = vld [vmem:[%s2814_s1 + $0xb0] sm:$0xff]  }
  0x49   :  { %v237_v14 = vmul.f32 %v1425_v49, %v1836_v5  ;;  %v378_v3 = vmax.f32 %v310_v8, 0.0  ;;  %v202_v17 = vmul.f32 %v1356_v10, %v1836_v5  ;;  %v1360_v18 = vunpack.c.l.bf16 %v1578_v59  ;;  %v2186_v49 = vld [vmem:[%s2814_s1 + $0x30] sm:$0xff]   ;;  %v2195_v10 = vld [vmem:[%s2814_s1 + $0xc8] sm:$0xff]  }
  0x4a   :  { %1707 = vmatmul.mubr.bf16.gmra.mrb[20].mxu0 %v392_v20  ;;  %1743 = vmatmul.mubr.bf16.gmra.mrb[20].mxu1 %v410_v24  ;;  %v311_v16 = vadd.f32 %v1850_v11, %v236_v9  ;;  %v344_v19 = vmax.f32 %v276_v4, 0.0  ;;  %v203_v21 = vmul.f32 %v1357_v15, %v1836_v5  ;;  %v1361_v22 = vunpack.c.h.bf16 %v1578_v59 }
  0x4b   :  { %1710 = vmatprep.mubr.bf16.mxu0 %v393_v30  ;;  %1746 = vmatprep.mubr.bf16.mxu1 %v411_v52  ;;  %v312_v20 = vadd.f32 %v1850_v11, %v237_v14  ;;  %v413_v23 = vpack.c.bf16 %v378_v3, %v377_v13  ;;  %v277_v25 = vadd.f32 %v1850_v11, %v202_v17  ;;  %v1428_v29 = vunpack.c.l.bf16 %v2110_v41  ;;  %v2205_v13 = vld [vmem:[%s2814_s1 + $0x48] sm:$0xff]   ;;  %v2214_v17 = vld [vmem:[%s2814_s1 + $0x40] sm:$0xff]  }
  0x4c   :  { %v379_v24 = vmax.f32 %v311_v16, 0.0  ;;  %v204_v26 = vmul.f32 %v1360_v18, %v1836_v5  ;;  %v278_v28 = vadd.f32 %v1850_v11, %v203_v21  ;;  %v205_v30 = vmul.f32 %v1361_v22, %v1836_v5  ;;  %v2105_v5 = vld [vmem:[%s2814_s1 + $0x8] sm:$0xff]   ;;  %v2223_v22 = vld [vmem:[%s2814_s1 + $0xd8] sm:$0xff]   ;;  %v2326_v21 = vld [vmem:[%s2816_s6] ss:$0 sm:$0xff] }
  0x4d   :  { %v380_v27 = vmax.f32 %v312_v20, 0.0  ;;  %v345_v31 = vmax.f32 %v277_v25, 0.0  ;;  %v396_v33 = vpack.c.bf16 %v344_v19, %v343_v7  ;;  %v1432_v46 = vunpack.c.l.bf16 %v2105_v5 }
  0x4e   :  { %v346_v32 = vmax.f32 %v278_v28, 0.0  ;;  %v279_v35 = vadd.f32 %v1850_v11, %v204_v26  ;;  %v280_v36 = vadd.f32 %v1850_v11, %v205_v30  ;;  %v2115_v11 = vld [vmem:[%s2814_s1 + $0x98] sm:$0xff]   ;;  %v1433_v43 = vunpack.c.h.bf16 %v2105_v5  ;;  %v2242_v30 = vld [vmem:[%s2814_s1 + $0x50] sm:$0xff]   ;;  %v2317_v26 = vld [vmem:[%s2814_s1 + $0x100] sm:$0xff]  }
  0x4f   :  { %v414_v34 = vpack.c.bf16 %v380_v27, %v379_v24  ;;  %v1429_v47 = vunpack.c.h.bf16 %v2110_v41  ;;  %v1504_v52 = vunpack.c.l.bf16 %v2115_v11  ;;  %v1500_v53 = vunpack.c.l.bf16 %v2120_v42  ;;  %v2233_v24 = vld [vmem:[%s2814_s1 + $0x58] sm:$0xff]   ;;  %v2303_v27 = vld [vmem:[%s2815_s5] ss:$0 sm:$0xff] }
  0x50   :  { %v397_v37 = vpack.c.bf16 %v346_v32, %v345_v31  ;;  %v347_v38 = vmax.f32 %v279_v35, 0.0  ;;  %v348_v39 = vmax.f32 %v280_v36, 0.0  ;;  %v1505_v54 = vunpack.c.h.bf16 %v2115_v11  ;;  %v2251_v35 = vld [vmem:[%s2814_s1 + $0xe8] sm:$0xff]   ;;  %v2256_v36 = vld [vmem:[%s2814_s1 + $0xe0] sm:$0xff]   ;;  %v2289_v32 = vld [vmem:[%s2814_s1 + $0x78] sm:$0xff]  }
  0x51   :  { %v1440_v55 = vunpack.c.l.bf16 %v2125_v44  ;;  %v1501_v57 = vunpack.c.h.bf16 %v2120_v42  ;;  %v1436_v58 = vunpack.c.l.bf16 %v2130_v45  ;;  %v1441_v60 = vunpack.c.h.bf16 %v2125_v44 }
  0x52   :  { %1711 = vmatmul.mubr.bf16.gmra.mrb[24].mxu0 %v394_v62  ;;  %1747 = vmatmul.mubr.bf16.gmra.mrb[24].mxu1 %v412_v2  ;;  %v398_v40 = vpack.c.bf16 %v348_v39, %v347_v38  ;;  %v2167_v62 = vld [vmem:[%s2814_s1 + $0xb8] sm:$0xff]   ;;  %v1512_v1 = vunpack.c.l.bf16 %v2139_v48  ;;  %v1508_v2 = vunpack.c.l.bf16 %v2144_v50  ;;  %v2298_v38 = vld [vmem:[%s2814_s1 + $0x70] sm:$0xff]  }
  0x53   :  { %1714 = vmatprep.mubr.bf16.mxu0 %v395_v12  ;;  %1750 = vmatprep.mubr.bf16.mxu1 %v413_v23  ;;  %v2200_v12 = vld [vmem:[%s2814_s1 + $0xc0] sm:$0xff]   ;;  %v2228_v23 = vld [vmem:[%s2814_s1 + $0xd0] sm:$0xff]   ;;  %v2279_v39 = vld [vmem:[%s2814_s1 + $0xf8] sm:$0xff]  }
  0x5a   :  { %1715 = vmatmul.mubr.bf16.gmra.mrb[28].mxu0 %v396_v33  ;;  %1751 = vmatmul.mubr.bf16.gmra.mrb[28].mxu1 %v414_v34  ;;  %v2270_v33 = vld [vmem:[%s2814_s1 + $0x60] sm:$0xff]   ;;  %v2284_v34 = vld [vmem:[%s2814_s1 + $0xf0] sm:$0xff]  }
  0x5b   :  { %1718 = vmatprep.mubr.bf16.mxu0 %v397_v37  ;;  %v2261_v37 = vld [vmem:[%s2814_s1 + $0x68] sm:$0xff]  }
  0x62   :  { %1719 = vmatmul.mubr.bf16.gmra.mrb[32].mxu0 %v398_v40  ;;  %v2312_v40 = vld [vmem:[%s2814_s1 + $0x108] sm:$0xff]  }
  0xf5   :  { %v1688_v25 = vpop.f32.mrb[0].mxu0  ;;  %v1724_v16 = vpop.f32.mrb[0].mxu1 }
  0xf6   :  { %v793_v20 = vmul.f32 %v1688_v25, %v2303_v27  ;;  %v513_v28 = vpop.f32.mrb[1].mxu0  ;;  %v829_v31 = vmul.f32 %v1724_v16, %v2303_v27  ;;  %v657_v8 = vpop.f32.mrb[1].mxu1 }
  0xf7   :  { %v791_v14 = vmul.f32 %v2303_v27, %v513_v28  ;;  %v1689_v6 = vpop.f32.mrb[2].mxu0  ;;  %v827_v18 = vmul.f32 %v2303_v27, %v657_v8  ;;  %v1725_v9 = vpop.f32.mrb[2].mxu1 }
  0xf8   :  { %v868_v25 = vadd.f32 %v2326_v21, %v793_v20  ;;  %v794_v59 = vmul.f32 %v1689_v6, %v2303_v27  ;;  %v516_v16 = vpop.f32.mrb[3].mxu0  ;;  %v904_v61 = vadd.f32 %v2326_v21, %v829_v31  ;;  %v830_v15 = vmul.f32 %v1725_v9, %v2303_v27  ;;  %v660_v7 = vpop.f32.mrb[3].mxu1 }
  0xf9   :  { %v866_v28 = vadd.f32 %v2326_v21, %v791_v14  ;;  %v792_v4 = vmul.f32 %v2303_v27, %v516_v16  ;;  %v902_v8 = vadd.f32 %v2326_v21, %v827_v18  ;;  %v828_v3 = vmul.f32 %v2303_v27, %v660_v7 }
  0xfa   :  { %v1072_v19 = vadd.f32 %v1432_v46, %v868_v25  ;;  %v869_v20 = vadd.f32 %v2326_v21, %v794_v59  ;;  %v1108_v6 = vadd.f32 %v1504_v52, %v904_v61  ;;  %v905_v31 = vadd.f32 %v2326_v21, %v830_v15 }
  0xfb   :  { %v1070_v9 = vadd.f32 %v1428_v29, %v866_v28  ;;  %v867_v14 = vadd.f32 %v2326_v21, %v792_v4  ;;  %v1106_v18 = vadd.f32 %v1500_v53, %v902_v8  ;;  %v903_v7 = vadd.f32 %v2326_v21, %v828_v3 }
  0xfc   :  { %v1140_v16 = vmax.f32 %v1072_v19, 0.0  ;;  %v1073_v46 = vadd.f32 %v1433_v43, %v869_v20  ;;  %v1176_v59 = vmax.f32 %v1108_v6, 0.0  ;;  %v1109_v52 = vadd.f32 %v1505_v54, %v905_v31 }
  0xfd   :  { %v1138_v61 = vmax.f32 %v1070_v9, 0.0  ;;  %v1071_v15 = vadd.f32 %v1429_v47, %v867_v14  ;;  %v1174_v29 = vmax.f32 %v1106_v18, 0.0  ;;  %v1692_v25 = vpop.f32.mrb[4].mxu0  ;;  %v1107_v4 = vadd.f32 %v1501_v57, %v903_v7  ;;  %v1728_v53 = vpop.f32.mrb[4].mxu1 }
  0xfe   :  { %1208 = vst [vmem:[%s2817_s7 + $0x10] sm:$0xff] %v1140_v16  ;;  %v1141_v5 = vmax.f32 %v1073_v46, 0.0  ;;  %1244 = vst [vmem:[%s2817_s7 + $0x130] sm:$0xff] %v1176_v59  ;;  %v1177_v11 = vmax.f32 %v1109_v52, 0.0  ;;  %v797_v43 = vmul.f32 %v1692_v25, %v2303_v27  ;;  %v529_v41 = vpop.f32.mrb[5].mxu0  ;;  %v833_v47 = vmul.f32 %v1728_v53, %v2303_v27  ;;  %v673_v54 = vpop.f32.mrb[5].mxu1 }
  0xff   :  { %1206 = vst [vmem:[%s2817_s7] sm:$0xff] %v1138_v61  ;;  %v1139_v42 = vmax.f32 %v1071_v15, 0.0  ;;  %1242 = vst [vmem:[%s2817_s7 + $0x120] sm:$0xff] %v1174_v29  ;;  %v1175_v57 = vmax.f32 %v1107_v4, 0.0  ;;  %v795_v3 = vmul.f32 %v2303_v27, %v529_v41  ;;  %v1693_v19 = vpop.f32.mrb[6].mxu0  ;;  %v831_v28 = vmul.f32 %v2303_v27, %v673_v54  ;;  %v1729_v8 = vpop.f32.mrb[6].mxu1 }
 0x100   :  { %1209 = vst [vmem:[%s2817_s7 + $0x18] sm:$0xff] %v1141_v5  ;;  %1245 = vst [vmem:[%s2817_s7 + $0x138] sm:$0xff] %v1177_v11  ;;  %v872_v20 = vadd.f32 %v2326_v21, %v797_v43  ;;  %v798_v6 = vmul.f32 %v1693_v19, %v2303_v27  ;;  %v532_v31 = vpop.f32.mrb[7].mxu0  ;;  %v908_v9 = vadd.f32 %v2326_v21, %v833_v47  ;;  %v676_v18 = vpop.f32.mrb[7].mxu1  ;;  %v2818_v41 = vunpack.c.h.bf16 %v2139_v48 }
 0x101   :  { %v834_v14 = vmul.f32 %v1729_v8, %v2303_v27  ;;  %1207 = vst [vmem:[%s2817_s7 + $0x8] sm:$0xff] %v1139_v42  ;;  %1243 = vst [vmem:[%s2817_s7 + $0x128] sm:$0xff] %v1175_v57  ;;  %v870_v7 = vadd.f32 %v2326_v21, %v795_v3  ;;  %v796_v16 = vmul.f32 %v2303_v27, %v532_v31  ;;  %v2819_v54 = vunpack.c.h.bf16 %v2130_v45 }
 0x102   :  { %v906_v46 = vadd.f32 %v2326_v21, %v831_v28  ;;  %v832_v59 = vmul.f32 %v2303_v27, %v676_v18  ;;  %v1076_v52 = vadd.f32 %v1440_v55, %v872_v20  ;;  %v873_v61 = vadd.f32 %v2326_v21, %v798_v6 }
 0x103   :  { %v1112_v15 = vadd.f32 %v1512_v1, %v908_v9  ;;  %v909_v29 = vadd.f32 %v2326_v21, %v834_v14  ;;  %v1074_v25 = vadd.f32 %v1436_v58, %v870_v7  ;;  %v871_v4 = vadd.f32 %v2326_v21, %v796_v16 }
 0x104   :  { %v1110_v53 = vadd.f32 %v1508_v2, %v906_v46  ;;  %v907_v5 = vadd.f32 %v2326_v21, %v832_v59  ;;  %v1144_v11 = vmax.f32 %v1076_v52, 0.0  ;;  %v1077_v55 = vadd.f32 %v1441_v60, %v873_v61 }
 0x105   :  { %v1180_v43 = vmax.f32 %v1112_v15, 0.0  ;;  %v1113_v1 = vadd.f32 %v2818_v41, %v909_v29  ;;  %v1142_v47 = vmax.f32 %v1074_v25, 0.0  ;;  %v1075_v42 = vadd.f32 %v2819_v54, %v871_v4  ;;  %v1696_v57 = vpop.f32.mrb[8].mxu0  ;;  %v1732_v2 = vpop.f32.mrb[8].mxu1 }
 0x106   :  { %v1178_v58 = vmax.f32 %v1110_v53, 0.0  ;;  %v2820_v3 = vunpack.c.h.bf16 %v2144_v50  ;;  %1212 = vst [vmem:[%s2817_s7 + $0x30] sm:$0xff] %v1144_v11  ;;  %v1145_v44 = vmax.f32 %v1077_v55, 0.0  ;;  %v801_v60 = vmul.f32 %v1696_v57, %v2303_v27  ;;  %v545_v45 = vpop.f32.mrb[9].mxu0  ;;  %v689_v8 = vpop.f32.mrb[9].mxu1 }
 0x107   :  { %1248 = vst [vmem:[%s2817_s7 + $0x150] sm:$0xff] %v1180_v43  ;;  %v1181_v48 = vmax.f32 %v1113_v1, 0.0  ;;  %v837_v28 = vmul.f32 %v1732_v2, %v2303_v27  ;;  %1210 = vst [vmem:[%s2817_s7 + $0x20] sm:$0xff] %v1142_v47  ;;  %v1143_v50 = vmax.f32 %v1075_v42, 0.0  ;;  %v799_v6 = vmul.f32 %v2303_v27, %v545_v45  ;;  %v1697_v31 = vpop.f32.mrb[10].mxu0  ;;  %v1733_v14 = vpop.f32.mrb[10].mxu1 }
 0x108   :  { %v1111_v19 = vadd.f32 %v2820_v3, %v907_v5  ;;  %1246 = vst [vmem:[%s2817_s7 + $0x140] sm:$0xff] %v1178_v58  ;;  %v835_v9 = vmul.f32 %v2303_v27, %v689_v8  ;;  %1213 = vst [vmem:[%s2817_s7 + $0x38] sm:$0xff] %v1145_v44  ;;  %v876_v18 = vadd.f32 %v2326_v21, %v801_v60  ;;  %v548_v16 = vpop.f32.mrb[11].mxu0  ;;  %v692_v52 = vpop.f32.mrb[11].mxu1  ;;  %v2821_v4 = vunpack.c.l.bf16 %v2149_v51 }
 0x109   :  { %1249 = vst [vmem:[%s2817_s7 + $0x158] sm:$0xff] %v1181_v48  ;;  %v802_v7 = vmul.f32 %v1697_v31, %v2303_v27  ;;  %v912_v46 = vadd.f32 %v2326_v21, %v837_v28  ;;  %v838_v59 = vmul.f32 %v1733_v14, %v2303_v27  ;;  %1211 = vst [vmem:[%s2817_s7 + $0x28] sm:$0xff] %v1143_v50  ;;  %v2822_v11 = vunpack.c.l.bf16 %v2167_v62 }
 0x10a   :  { %v1179_v20 = vmax.f32 %v1111_v19, 0.0  ;;  %v874_v61 = vadd.f32 %v2326_v21, %v799_v6  ;;  %v800_v15 = vmul.f32 %v2303_v27, %v548_v16  ;;  %v910_v29 = vadd.f32 %v2326_v21, %v835_v9 }
 0x10b   :  { %v836_v25 = vmul.f32 %v2303_v27, %v692_v52  ;;  %v1080_v53 = vadd.f32 %v2821_v4, %v876_v18  ;;  %v877_v5 = vadd.f32 %v2326_v21, %v802_v7  ;;  %v1116_v55 = vadd.f32 %v2822_v11, %v912_v46 }
 0x10c   :  { %1247 = vst [vmem:[%s2817_s7 + $0x148] sm:$0xff] %v1179_v20  ;;  %v913_v43 = vadd.f32 %v2326_v21, %v838_v59  ;;  %v2823_v41 = vunpack.c.l.bf16 %v2158_v56  ;;  %v875_v47 = vadd.f32 %v2326_v21, %v800_v15  ;;  %v2824_v54 = vunpack.c.l.bf16 %v2172_v63 }
 0x10d   :  { %v911_v58 = vadd.f32 %v2326_v21, %v836_v25  ;;  %v1148_v57 = vmax.f32 %v1080_v53, 0.0  ;;  %v2825_v3 = vunpack.c.h.bf16 %v2149_v51  ;;  %v1184_v2 = vmax.f32 %v1116_v55, 0.0  ;;  %v1700_v50 = vpop.f32.mrb[12].mxu0  ;;  %v1736_v31 = vpop.f32.mrb[12].mxu1 }
 0x10e   :  { %v1078_v1 = vadd.f32 %v2823_v41, %v874_v61  ;;  %v1114_v42 = vadd.f32 %v2824_v54, %v910_v29  ;;  %v2826_v44 = vunpack.c.h.bf16 %v2167_v62  ;;  %v2827_v45 = vunpack.c.h.bf16 %v2158_v56  ;;  %v561_v56 = vpop.f32.mrb[13].mxu0  ;;  %v705_v18 = vpop.f32.mrb[13].mxu1 }
 0x10f   :  { %v1081_v19 = vadd.f32 %v2825_v3, %v877_v5  ;;  %v2828_v20 = vunpack.c.h.bf16 %v2172_v63  ;;  %1216 = vst [vmem:[%s2817_s7 + $0x50] sm:$0xff] %v1148_v57  ;;  %1252 = vst [vmem:[%s2817_s7 + $0x170] sm:$0xff] %v1184_v2  ;;  %v805_v9 = vmul.f32 %v1700_v50, %v2303_v27  ;;  %v841_v14 = vmul.f32 %v1736_v31, %v2303_v27  ;;  %v1701_v46 = vpop.f32.mrb[14].mxu0  ;;  %v1737_v52 = vpop.f32.mrb[14].mxu1 }
 0x110   :  { %v1117_v48 = vadd.f32 %v2826_v44, %v913_v43  ;;  %v1146_v60 = vmax.f32 %v1078_v1, 0.0  ;;  %v1079_v28 = vadd.f32 %v2827_v45, %v875_v47  ;;  %v1182_v8 = vmax.f32 %v1114_v42, 0.0  ;;  %v564_v29 = vpop.f32.mrb[15].mxu0  ;;  %v708_v53 = vpop.f32.mrb[15].mxu1 }
 0x111   :  { %v1115_v6 = vadd.f32 %v2828_v20, %v911_v58  ;;  %v1149_v51 = vmax.f32 %v1081_v19, 0.0  ;;  %v803_v16 = vmul.f32 %v2303_v27, %v561_v56  ;;  %v839_v59 = vmul.f32 %v2303_v27, %v705_v18 }
 0x112   :  { %v1185_v62 = vmax.f32 %v1117_v48, 0.0  ;;  %1214 = vst [vmem:[%s2817_s7 + $0x40] sm:$0xff] %v1146_v60  ;;  %v1147_v63 = vmax.f32 %v1079_v28, 0.0  ;;  %1250 = vst [vmem:[%s2817_s7 + $0x160] sm:$0xff] %v1182_v8  ;;  %v880_v61 = vadd.f32 %v2326_v21, %v805_v9  ;;  %v806_v15 = vmul.f32 %v1701_v46, %v2303_v27 }
 0x113   :  { %v1183_v7 = vmax.f32 %v1115_v6, 0.0  ;;  %1217 = vst [vmem:[%s2817_s7 + $0x58] sm:$0xff] %v1149_v51  ;;  %v916_v25 = vadd.f32 %v2326_v21, %v841_v14  ;;  %v842_v4 = vmul.f32 %v1737_v52, %v2303_v27  ;;  %v878_v5 = vadd.f32 %v2326_v21, %v803_v16 }
 0x114   :  { %1253 = vst [vmem:[%s2817_s7 + $0x178] sm:$0xff] %v1185_v62  ;;  %1215 = vst [vmem:[%s2817_s7 + $0x48] sm:$0xff] %v1147_v63  ;;  %v804_v11 = vmul.f32 %v2303_v27, %v564_v29  ;;  %v914_v55 = vadd.f32 %v2326_v21, %v839_v59  ;;  %v840_v43 = vmul.f32 %v2303_v27, %v708_v53  ;;  %v2829_v41 = vunpack.c.l.bf16 %v2177_v0 }
 0x115   :  { %1251 = vst [vmem:[%s2817_s7 + $0x168] sm:$0xff] %v1183_v7  ;;  %v881_v47 = vadd.f32 %v2326_v21, %v806_v15  ;;  %v2830_v54 = vunpack.c.l.bf16 %v2195_v10  ;;  %v917_v58 = vadd.f32 %v2326_v21, %v842_v4  ;;  %v2831_v57 = vunpack.c.l.bf16 %v2186_v49  ;;  %v1704_v9 = vpop.f32.mrb[16].mxu0  ;;  %v1740_v18 = vpop.f32.mrb[16].mxu1 }
 0x116   :  { %v1084_v1 = vadd.f32 %v2829_v41, %v880_v61  ;;  %v879_v19 = vadd.f32 %v2326_v21, %v804_v11  ;;  %v2832_v2 = vunpack.c.l.bf16 %v2200_v12  ;;  %v915_v48 = vadd.f32 %v2326_v21, %v840_v43  ;;  %v721_v16 = vpop.f32.mrb[17].mxu1 }
 0x117   :  { %v1120_v42 = vadd.f32 %v2830_v54, %v916_v25  ;;  %v1082_v3 = vadd.f32 %v2831_v57, %v878_v5  ;;  %v2833_v45 = vunpack.c.h.bf16 %v2177_v0  ;;  %v2834_v50 = vunpack.c.h.bf16 %v2195_v10  ;;  %v1741_v15 = vpop.f32.mrb[18].mxu1 }
 0x118   :  { %v1118_v44 = vadd.f32 %v2832_v2, %v914_v55  ;;  %v1152_v60 = vmax.f32 %v1084_v1, 0.0  ;;  %v2835_v31 = vunpack.c.h.bf16 %v2186_v49  ;;  %v2836_v56 = vunpack.c.h.bf16 %v2200_v12  ;;  %v577_v49 = vpop.f32.mrb[17].mxu0  ;;  %v724_v11 = vpop.f32.mrb[19].mxu1 }
 0x119   :  { %v1085_v28 = vadd.f32 %v2833_v45, %v881_v47  ;;  %v1188_v8 = vmax.f32 %v1120_v42, 0.0  ;;  %v1121_v20 = vadd.f32 %v2834_v50, %v917_v58  ;;  %v1150_v6 = vmax.f32 %v1082_v3, 0.0  ;;  %v1705_v52 = vpop.f32.mrb[18].mxu0 }
 0x11a   :  { %v1083_v51 = vadd.f32 %v2835_v31, %v879_v19  ;;  %v1186_v62 = vmax.f32 %v1118_v44, 0.0  ;;  %v1119_v14 = vadd.f32 %v2836_v56, %v915_v48  ;;  %1220 = vst [vmem:[%s2817_s7 + $0x70] sm:$0xff] %v1152_v60  ;;  %v809_v63 = vmul.f32 %v1704_v9, %v2303_v27  ;;  %v580_v4 = vpop.f32.mrb[19].mxu0 }
 0x11b   :  { %v1153_v0 = vmax.f32 %v1085_v28, 0.0  ;;  %1256 = vst [vmem:[%s2817_s7 + $0x190] sm:$0xff] %v1188_v8  ;;  %v1189_v10 = vmax.f32 %v1121_v20, 0.0  ;;  %v845_v7 = vmul.f32 %v1740_v18, %v2303_v27  ;;  %1218 = vst [vmem:[%s2817_s7 + $0x60] sm:$0xff] %v1150_v6  ;;  %v807_v59 = vmul.f32 %v2303_v27, %v577_v49 }
 0x11c   :  { %v1151_v12 = vmax.f32 %v1083_v51, 0.0  ;;  %1254 = vst [vmem:[%s2817_s7 + $0x180] sm:$0xff] %v1186_v62  ;;  %v1187_v46 = vmax.f32 %v1119_v14, 0.0  ;;  %v843_v61 = vmul.f32 %v2303_v27, %v721_v16  ;;  %v884_v29 = vadd.f32 %v2326_v21, %v809_v63 }
 0x11d   :  { %1221 = vst [vmem:[%s2817_s7 + $0x78] sm:$0xff] %v1153_v0  ;;  %1257 = vst [vmem:[%s2817_s7 + $0x198] sm:$0xff] %v1189_v10  ;;  %v810_v25 = vmul.f32 %v1705_v52, %v2303_v27  ;;  %v920_v53 = vadd.f32 %v2326_v21, %v845_v7  ;;  %v846_v5 = vmul.f32 %v1741_v15, %v2303_v27  ;;  %v2837_v47 = vunpack.c.l.bf16 %v2205_v13  ;;  %v1708_v14 = vpop.f32.mrb[20].mxu0  ;;  %v1744_v10 = vpop.f32.mrb[20].mxu1 }
 0x11e   :  { %1219 = vst [vmem:[%s2817_s7 + $0x68] sm:$0xff] %v1151_v12  ;;  %1255 = vst [vmem:[%s2817_s7 + $0x188] sm:$0xff] %v1187_v46  ;;  %v882_v55 = vadd.f32 %v2326_v21, %v807_v59  ;;  %v808_v43 = vmul.f32 %v2303_v27, %v580_v4  ;;  %v918_v41 = vadd.f32 %v2326_v21, %v843_v61  ;;  %v2838_v58 = vunpack.c.l.bf16 %v2223_v22  ;;  %v737_v7 = vpop.f32.mrb[21].mxu1 }
 0x11f   :  { %v844_v1 = vmul.f32 %v2303_v27, %v724_v11  ;;  %v1088_v54 = vadd.f32 %v2837_v47, %v884_v29  ;;  %v885_v42 = vadd.f32 %v2326_v21, %v810_v25  ;;  %v921_v3 = vadd.f32 %v2326_v21, %v846_v5  ;;  %v1745_v52 = vpop.f32.mrb[22].mxu1 }
 0x120   :  { %v1124_v57 = vadd.f32 %v2838_v58, %v920_v53  ;;  %v2839_v19 = vunpack.c.l.bf16 %v2214_v17  ;;  %v883_v44 = vadd.f32 %v2326_v21, %v808_v43  ;;  %v2840_v48 = vunpack.c.l.bf16 %v2228_v23  ;;  %v740_v53 = vpop.f32.mrb[23].mxu1 }
 0x121   :  { %v919_v45 = vadd.f32 %v2326_v21, %v844_v1  ;;  %v1156_v28 = vmax.f32 %v1088_v54, 0.0  ;;  %v2841_v8 = vunpack.c.h.bf16 %v2205_v13  ;;  %v2842_v6 = vunpack.c.h.bf16 %v2223_v22 }
 0x122   :  { %v1086_v2 = vadd.f32 %v2839_v19, %v882_v55  ;;  %v1122_v60 = vadd.f32 %v2840_v48, %v918_v41  ;;  %v1192_v20 = vmax.f32 %v1124_v57, 0.0  ;;  %v2843_v62 = vunpack.c.h.bf16 %v2214_v17  ;;  %v593_v17 = vpop.f32.mrb[21].mxu0 }
 0x123   :  { %v1089_v50 = vadd.f32 %v2841_v8, %v885_v42  ;;  %v1125_v31 = vadd.f32 %v2842_v6, %v921_v3  ;;  %v2844_v18 = vunpack.c.h.bf16 %v2228_v23  ;;  %1224 = vst [vmem:[%s2817_s7 + $0x90] sm:$0xff] %v1156_v28  ;;  %v813_v63 = vmul.f32 %v1708_v14, %v2303_v27  ;;  %v1709_v46 = vpop.f32.mrb[22].mxu0 }
 0x124   :  { %v1154_v51 = vmax.f32 %v1086_v2, 0.0  ;;  %v1087_v9 = vadd.f32 %v2843_v62, %v883_v44  ;;  %v1190_v56 = vmax.f32 %v1122_v60, 0.0  ;;  %1260 = vst [vmem:[%s2817_s7 + $0x1b0] sm:$0xff] %v1192_v20  ;;  %v849_v49 = vmul.f32 %v1744_v10, %v2303_v27  ;;  %v596_v29 = vpop.f32.mrb[23].mxu0 }
 0x125   :  { %v1123_v0 = vadd.f32 %v2844_v18, %v919_v45  ;;  %v1157_v13 = vmax.f32 %v1089_v50, 0.0  ;;  %v1193_v22 = vmax.f32 %v1125_v31, 0.0  ;;  %v811_v12 = vmul.f32 %v2303_v27, %v593_v17  ;;  %v1748_v18 = vpop.f32.mrb[24].mxu1 }
 0x126   :  { %1222 = vst [vmem:[%s2817_s7 + $0x80] sm:$0xff] %v1154_v51  ;;  %v1155_v23 = vmax.f32 %v1087_v9, 0.0  ;;  %1258 = vst [vmem:[%s2817_s7 + $0x1a0] sm:$0xff] %v1190_v56  ;;  %v847_v59 = vmul.f32 %v2303_v27, %v737_v7  ;;  %v888_v61 = vadd.f32 %v2326_v21, %v813_v63  ;;  %v814_v15 = vmul.f32 %v1709_v46, %v2303_v27  ;;  %v1712_v9 = vpop.f32.mrb[24].mxu0 }
 0x127   :  { %v1191_v16 = vmax.f32 %v1123_v0, 0.0  ;;  %1225 = vst [vmem:[%s2817_s7 + $0x98] sm:$0xff] %v1157_v13  ;;  %1261 = vst [vmem:[%s2817_s7 + $0x1b8] sm:$0xff] %v1193_v22  ;;  %v924_v25 = vadd.f32 %v2326_v21, %v849_v49  ;;  %v850_v4 = vmul.f32 %v1745_v52, %v2303_v27  ;;  %v886_v5 = vadd.f32 %v2326_v21, %v811_v12  ;;  %v753_v13 = vpop.f32.mrb[25].mxu1 }
 0x128   :  { %1223 = vst [vmem:[%s2817_s7 + $0x88] sm:$0xff] %v1155_v23  ;;  %v812_v11 = vmul.f32 %v2303_v27, %v596_v29  ;;  %v922_v55 = vadd.f32 %v2326_v21, %v847_v59  ;;  %v848_v43 = vmul.f32 %v2303_v27, %v740_v53  ;;  %v2845_v41 = vunpack.c.l.bf16 %v2233_v24  ;;  %v1749_v7 = vpop.f32.mrb[26].mxu1 }
 0x129   :  { %1259 = vst [vmem:[%s2817_s7 + $0x1a8] sm:$0xff] %v1191_v16  ;;  %v889_v47 = vadd.f32 %v2326_v21, %v814_v15  ;;  %v2846_v54 = vunpack.c.l.bf16 %v2251_v35  ;;  %v925_v58 = vadd.f32 %v2326_v21, %v850_v4  ;;  %v2847_v57 = vunpack.c.l.bf16 %v2242_v30  ;;  %v756_v52 = vpop.f32.mrb[27].mxu1 }
 0x12a   :  { %v1092_v1 = vadd.f32 %v2845_v41, %v888_v61  ;;  %v887_v19 = vadd.f32 %v2326_v21, %v812_v11  ;;  %v2848_v2 = vunpack.c.l.bf16 %v2256_v36  ;;  %v923_v48 = vadd.f32 %v2326_v21, %v848_v43 }
 0x12b   :  { %v1128_v42 = vadd.f32 %v2846_v54, %v924_v25  ;;  %v1090_v3 = vadd.f32 %v2847_v57, %v886_v5  ;;  %v2849_v45 = vunpack.c.h.bf16 %v2233_v24  ;;  %v2850_v50 = vunpack.c.h.bf16 %v2251_v35 }
 0x12c   :  { %v1126_v44 = vadd.f32 %v2848_v2, %v922_v55  ;;  %v1160_v60 = vmax.f32 %v1092_v1, 0.0  ;;  %v2851_v31 = vunpack.c.h.bf16 %v2242_v30  ;;  %v2852_v56 = vunpack.c.h.bf16 %v2256_v36  ;;  %v609_v30 = vpop.f32.mrb[25].mxu0 }
 0x12d   :  { %v1093_v28 = vadd.f32 %v2849_v45, %v889_v47  ;;  %v1196_v8 = vmax.f32 %v1128_v42, 0.0  ;;  %v1129_v20 = vadd.f32 %v2850_v50, %v925_v58  ;;  %v1158_v6 = vmax.f32 %v1090_v3, 0.0  ;;  %v1713_v17 = vpop.f32.mrb[26].mxu0 }
 0x12e   :  { %v1091_v51 = vadd.f32 %v2851_v31, %v887_v19  ;;  %v1194_v62 = vmax.f32 %v1126_v44, 0.0  ;;  %v1127_v14 = vadd.f32 %v2852_v56, %v923_v48  ;;  %1228 = vst [vmem:[%s2817_s7 + $0xb0] sm:$0xff] %v1160_v60  ;;  %v817_v0 = vmul.f32 %v1712_v9, %v2303_v27  ;;  %v612_v12 = vpop.f32.mrb[27].mxu0  ;;  %v1752_v31 = vpop.f32.mrb[28].mxu1 }
 0x12f   :  { %v1161_v24 = vmax.f32 %v1093_v28, 0.0  ;;  %1264 = vst [vmem:[%s2817_s7 + $0x1d0] sm:$0xff] %v1196_v8  ;;  %v1197_v35 = vmax.f32 %v1129_v20, 0.0  ;;  %v853_v10 = vmul.f32 %v1748_v18, %v2303_v27  ;;  %1226 = vst [vmem:[%s2817_s7 + $0xa0] sm:$0xff] %v1158_v6  ;;  %v815_v63 = vmul.f32 %v2303_v27, %v609_v30  ;;  %v1716_v50 = vpop.f32.mrb[28].mxu0  ;;  %v769_v9 = vpop.f32.mrb[29].mxu1 }
 0x130   :  { %v1159_v36 = vmax.f32 %v1091_v51, 0.0  ;;  %1262 = vst [vmem:[%s2817_s7 + $0x1c0] sm:$0xff] %v1194_v62  ;;  %v1195_v22 = vmax.f32 %v1127_v14, 0.0  ;;  %v851_v49 = vmul.f32 %v2303_v27, %v753_v13  ;;  %v892_v23 = vadd.f32 %v2326_v21, %v817_v0 }
 0x131   :  { %1229 = vst [vmem:[%s2817_s7 + $0xb8] sm:$0xff] %v1161_v24  ;;  %1265 = vst [vmem:[%s2817_s7 + $0x1d8] sm:$0xff] %v1197_v35  ;;  %v818_v16 = vmul.f32 %v1713_v17, %v2303_v27  ;;  %v928_v46 = vadd.f32 %v2326_v21, %v853_v10  ;;  %v854_v59 = vmul.f32 %v1749_v7, %v2303_v27  ;;  %v2853_v4 = vunpack.c.l.bf16 %v2261_v37  ;;  %v1753_v35 = vpop.f32.mrb[30].mxu1 }
 0x132   :  { %1227 = vst [vmem:[%s2817_s7 + $0xa8] sm:$0xff] %v1159_v36  ;;  %1263 = vst [vmem:[%s2817_s7 + $0x1c8] sm:$0xff] %v1195_v22  ;;  %v890_v61 = vadd.f32 %v2326_v21, %v815_v63  ;;  %v816_v15 = vmul.f32 %v2303_v27, %v612_v12  ;;  %v926_v29 = vadd.f32 %v2326_v21, %v851_v49  ;;  %v2854_v11 = vunpack.c.l.bf16 %v2279_v39  ;;  %v772_v22 = vpop.f32.mrb[31].mxu1 }
 0x133   :  { %v852_v25 = vmul.f32 %v2303_v27, %v756_v52  ;;  %v1096_v53 = vadd.f32 %v2853_v4, %v892_v23  ;;  %v893_v5 = vadd.f32 %v2326_v21, %v818_v16  ;;  %v929_v43 = vadd.f32 %v2326_v21, %v854_v59 }
 0x134   :  { %v1132_v55 = vadd.f32 %v2854_v11, %v928_v46  ;;  %v2855_v41 = vunpack.c.l.bf16 %v2270_v33  ;;  %v891_v47 = vadd.f32 %v2326_v21, %v816_v15  ;;  %v2856_v54 = vunpack.c.l.bf16 %v2284_v34 }
 0x135   :  { %v927_v58 = vadd.f32 %v2326_v21, %v852_v25  ;;  %v1164_v57 = vmax.f32 %v1096_v53, 0.0  ;;  %v2857_v3 = vunpack.c.h.bf16 %v2261_v37  ;;  %v2858_v44 = vunpack.c.h.bf16 %v2279_v39  ;;  %v1611_v53 = vld [vmem:[%s2814_s1 + $0x88] sm:$0xff]  }
 0x136   :  { %v1094_v1 = vadd.f32 %v2855_v41, %v890_v61  ;;  %v1130_v42 = vadd.f32 %v2856_v54, %v926_v29  ;;  %v1200_v2 = vmax.f32 %v1132_v55, 0.0  ;;  %v2859_v45 = vunpack.c.h.bf16 %v2270_v33  ;;  %v625_v33 = vpop.f32.mrb[29].mxu0  ;;  %v1610_v54 = vld [vmem:[%s2814_s1 + $0x80] sm:$0xff]  }
 0x137   :  { %v1097_v19 = vadd.f32 %v2857_v3, %v893_v5  ;;  %v1133_v48 = vadd.f32 %v2858_v44, %v929_v43  ;;  %v2860_v20 = vunpack.c.h.bf16 %v2284_v34  ;;  %1232 = vst [vmem:[%s2817_s7 + $0xd0] sm:$0xff] %v1164_v57  ;;  %v821_v51 = vmul.f32 %v1716_v50, %v2303_v27  ;;  %v1717_v18 = vpop.f32.mrb[30].mxu0 }
 0x138   :  { %v1162_v60 = vmax.f32 %v1094_v1, 0.0  ;;  %v1095_v28 = vadd.f32 %v2859_v45, %v891_v47  ;;  %v1198_v8 = vmax.f32 %v1130_v42, 0.0  ;;  %1268 = vst [vmem:[%s2817_s7 + $0x1f0] sm:$0xff] %v1200_v2  ;;  %v857_v62 = vmul.f32 %v1752_v31, %v2303_v27  ;;  %v628_v10 = vpop.f32.mrb[31].mxu0 }
 0x139   :  { %v1131_v6 = vadd.f32 %v2860_v20, %v927_v58  ;;  %v1165_v37 = vmax.f32 %v1097_v19, 0.0  ;;  %v1201_v39 = vmax.f32 %v1133_v48, 0.0  ;;  %v819_v14 = vmul.f32 %v2303_v27, %v625_v33  ;;  %v1720_v19 = vpop.f32.mrb[32].mxu0 }
 0x13a   :  { %1230 = vst [vmem:[%s2817_s7 + $0xc0] sm:$0xff] %v1162_v60  ;;  %v1163_v34 = vmax.f32 %v1095_v28, 0.0  ;;  %1266 = vst [vmem:[%s2817_s7 + $0x1e0] sm:$0xff] %v1198_v8  ;;  %v855_v24 = vmul.f32 %v2303_v27, %v769_v9  ;;  %v896_v0 = vadd.f32 %v2326_v21, %v821_v51  ;;  %v822_v30 = vmul.f32 %v1717_v18, %v2303_v27 }
 0x13b   :  { %v1199_v56 = vmax.f32 %v1131_v6, 0.0  ;;  %1233 = vst [vmem:[%s2817_s7 + $0xd8] sm:$0xff] %v1165_v37  ;;  %1269 = vst [vmem:[%s2817_s7 + $0x1f8] sm:$0xff] %v1201_v39  ;;  %v932_v13 = vadd.f32 %v2326_v21, %v857_v62  ;;  %v858_v36 = vmul.f32 %v1753_v35, %v2303_v27  ;;  %v894_v63 = vadd.f32 %v2326_v21, %v819_v14 }
 0x13c   :  { %1231 = vst [vmem:[%s2817_s7 + $0xc8] sm:$0xff] %v1163_v34  ;;  %v820_v17 = vmul.f32 %v2303_v27, %v628_v10  ;;  %v930_v49 = vadd.f32 %v2326_v21, %v855_v24  ;;  %v856_v7 = vmul.f32 %v2303_v27, %v772_v22  ;;  %v2861_v23 = vunpack.c.l.bf16 %v2289_v32 }
 0x13d   :  { %1267 = vst [vmem:[%s2817_s7 + $0x1e8] sm:$0xff] %v1199_v56  ;;  %v897_v12 = vadd.f32 %v2326_v21, %v822_v30  ;;  %v2862_v46 = vunpack.c.l.bf16 %v2312_v40  ;;  %v933_v52 = vadd.f32 %v2326_v21, %v858_v36  ;;  %v2863_v61 = vunpack.c.l.bf16 %v2298_v38 }
 0x13e   :  { %v1100_v16 = vadd.f32 %v2861_v23, %v896_v0  ;;  %v895_v29 = vadd.f32 %v2326_v21, %v820_v17  ;;  %v2864_v25 = vunpack.c.l.bf16 %v2317_v26  ;;  %v931_v5 = vadd.f32 %v2326_v21, %v856_v7 }
 0x13f   :  { %v1136_v59 = vadd.f32 %v2862_v46, %v932_v13  ;;  %v1098_v15 = vadd.f32 %v2863_v61, %v894_v63  ;;  %v2865_v55 = vunpack.c.h.bf16 %v2289_v32  ;;  %v2866_v1 = vunpack.c.h.bf16 %v2312_v40 }
 0x140   :  { %v1134_v4 = vadd.f32 %v2864_v25, %v930_v49  ;;  %v1168_v11 = vmax.f32 %v1100_v16, 0.0  ;;  %v2867_v58 = vunpack.c.h.bf16 %v2298_v38  ;;  %v2868_v2 = vunpack.c.h.bf16 %v2317_v26  ;;  %v641_v38 = vpop.f32.mrb[33].mxu0 }
 0x141   :  { %v1101_v43 = vadd.f32 %v2865_v55, %v897_v12  ;;  %v1204_v41 = vmax.f32 %v1136_v59, 0.0  ;;  %v1137_v47 = vadd.f32 %v2866_v1, %v933_v52  ;;  %v1166_v42 = vmax.f32 %v1098_v15, 0.0  ;;  %v1721_v50 = vpop.f32.mrb[34].mxu0 }
 0x142   :  { %v1099_v57 = vadd.f32 %v2867_v58, %v895_v29  ;;  %v1202_v3 = vmax.f32 %v1134_v4, 0.0  ;;  %v1135_v44 = vadd.f32 %v2868_v2, %v931_v5  ;;  %1236 = vst [vmem:[%s2817_s7 + $0xf0] sm:$0xff] %v1168_v11  ;;  %v825_v48 = vmul.f32 %v1720_v19, %v2303_v27  ;;  %v644_v37 = vpop.f32.mrb[35].mxu0 }
 0x143   :  { %v1169_v32 = vmax.f32 %v1101_v43, 0.0  ;;  %1272 = vst [vmem:[%s2817_s7 + $0x210] sm:$0xff] %v1204_v41  ;;  %v1205_v40 = vmax.f32 %v1137_v47, 0.0  ;;  %v1496_v60 = vunpack.c.l.bf16 %v1611_v53  ;;  %1234 = vst [vmem:[%s2817_s7 + $0xe0] sm:$0xff] %v1166_v42  ;;  %v823_v28 = vmul.f32 %v2303_v27, %v641_v38 }
 0x144   :  { %v1167_v26 = vmax.f32 %v1099_v57, 0.0  ;;  %1270 = vst [vmem:[%s2817_s7 + $0x200] sm:$0xff] %v1202_v3  ;;  %v1203_v45 = vmax.f32 %v1135_v44, 0.0  ;;  %v1492_v8 = vunpack.c.l.bf16 %v1610_v54  ;;  %v900_v20 = vadd.f32 %v2326_v21, %v825_v48 }
 0x145   :  { %1237 = vst [vmem:[%s2817_s7 + $0xf8] sm:$0xff] %v1169_v32  ;;  %1273 = vst [vmem:[%s2817_s7 + $0x218] sm:$0xff] %v1205_v40  ;;  %v826_v6 = vmul.f32 %v1721_v50, %v2303_v27  ;;  %v1497_v31 = vunpack.c.h.bf16 %v1611_v53  ;;  %v898_v39 = vadd.f32 %v2326_v21, %v823_v28  ;;  %v824_v51 = vmul.f32 %v2303_v27, %v644_v37 }
 0x146   :  { %1235 = vst [vmem:[%s2817_s7 + $0xe8] sm:$0xff] %v1167_v26  ;;  %1271 = vst [vmem:[%s2817_s7 + $0x208] sm:$0xff] %v1203_v45  ;;  %v1493_v33 = vunpack.c.h.bf16 %v1610_v54  ;;  %v1104_v62 = vadd.f32 %v1496_v60, %v900_v20 }
 0x147   :  { %v901_v9 = vadd.f32 %v2326_v21, %v826_v6  ;;  %v1102_v34 = vadd.f32 %v1492_v8, %v898_v39  ;;  %v899_v56 = vadd.f32 %v2326_v21, %v824_v51 }
 0x148   :  { %v1172_v14 = vmax.f32 %v1104_v62, 0.0 }
 0x149   :  { %v1105_v18 = vadd.f32 %v1497_v31, %v901_v9  ;;  %v1170_v24 = vmax.f32 %v1102_v34, 0.0  ;;  %v1103_v35 = vadd.f32 %v1493_v33, %v899_v56 }
 0x14a   :  { %1240 = vst [vmem:[%s2817_s7 + $0x110] sm:$0xff] %v1172_v14 }
 0x14b   :  { %v1173_v0 = vmax.f32 %v1105_v18, 0.0  ;;  %1238 = vst [vmem:[%s2817_s7 + $0x100] sm:$0xff] %v1170_v24  ;;  %v1171_v27 = vmax.f32 %v1103_v35, 0.0 }
 0x14d   :  { %1241 = vst [vmem:[%s2817_s7 + $0x118] sm:$0xff] %v1173_v0  ;;  %1239 = vst [vmem:[%s2817_s7 + $0x108] sm:$0xff] %v1171_v27 }

// kernel: bottleneck_forward.5
= control target key start
LH: loop header
LB: loop body
LE: loop exit
PB: predicated region body
PF: predicated region fallthrough
CT: control target
= control target key end

     0   :  { %s5432_s24 = smov 0   ;;  %s6940_s0 = inlined_call_operand.vmem [shape: bf16[544,128], index: 0, kind: input, shape index: {}]   ;;  %s6941_s1 = inlined_call_operand.vmem [shape: f32[272,1], index: 1, kind: input, shape index: {}]   ;;  %s6942_s2 = inlined_call_operand.vmem [shape: bf16[128,128], index: 2, kind: input, shape index: {}]   ;;  %s6943_s3 = inlined_call_operand.vmem [shape: f32[1,128], index: 3, kind: input, shape index: {}]   ;;  %s6944_s4 = inlined_call_operand.vmem [shape: f32[1,128], index: 4, kind: input, shape index: {}]   ;;  %s6945_s5 = inlined_call_operand.vmem [shape: bf16[1152,128], index: 5, kind: input, shape index: {}]   ;;  %s6946_s6 = inlined_call_operand.vmem [shape: bf16[544,128], index: 6, kind: output, shape index: {0}]   ;;  %s6947_s7 = inlined_call_operand.vmem [shape: f32[2,2,128], index: 7, kind: output, shape index: {1}]  }
   0x1 LB: > { %s5438_s25 = sadd.s32 4294967295, %s5387_s24   ;;  %p4489_p0 = scmp.ge.s32.totalorder %s5387_s24, 1  ;;  %s5387_s24 = sphi %s5432_s24, %s18_s24  }
   0x2   : > { %p241_p1 = scmp.lt.s32.totalorder %s5387_s24, 3 }
   0x4   : > { %p242_p2 = pnand %p4489_p0, %p241_p1 }
   0x6   : > { %245 = sbr.rel (%p242_p2) target bundleno = 924 (0x39c), region = 44 }
   0xd   : > { %v5264_v0 = vld [vmem:[%s6942_s2] sm:$0xff]   ;;  %v6949_v1 = vmov 0.0   ;;  %v5265_v2 = vld [vmem:[%s6942_s2 + $0x8] sm:$0xff]   ;;  %vm5390_vm0 = vmmov 0   ;;  %s277_s30 = smul.u32 34, %s5438_s25  ;;  %v5391_v3 = vmov 0  }
   0xe   : > { %4813 = vmatprep.subr.bf16.mxu0 %v6949_v1  ;;  %4829 = vmatprep.mubr.msk.bf16.mxu0 %vm5390_vm0, %v6949_v1  ;;  %1017 = vst [vmem:[#allocation2] sm:$0xff] %v5391_v3  ;;  %1018 = vst [vmem:[#allocation2 + $0x8] sm:$0xf] %v5391_v3  ;;  %v5266_v4 = vld [vmem:[%s6942_s2 + $0x10] sm:$0xff]   ;;  %v667_v5 = vld [vmem:[%s6941_s1 + $0x20] sm:$0xff]  ;;  %vm1055_vm1 = vcmask 1043456  }
   0xf   : > { %4814 = vmatpush3.bf16.msra.mxu0 %v5264_v0  ;;  %p278_p3 = scmp.lt.s32.totalorder %s277_s30, 67  ;;  %5263 = vset.pattern.permute.xlu1 %v5391_v3  ;;  %1019 = vst [vmem:[#allocation2 + $0x90] sm:$0xf0] %v5391_v3  ;;  %1020 = vst [vmem:[#allocation2 + $0x98] sm:$0xff] %v5391_v3  ;;  %v665_v6 = vld [vmem:[%s6941_s1 + $0x10] sm:$0xff]  ;;  %v5267_v7 = vld [vmem:[%s6942_s2 + $0x18] sm:$0xff]  }
  0x10   : > { %4815 = vmatprep.subr.bf16.mxu0 %v6949_v1  ;;  %5262 = vset.pattern.permute.xlu0 %v5391_v3  ;;  %v668_v8 = vld [vmem:[%s6941_s1 + $0x28] sm:$0xff]  ;;  %v666_v9 = vld [vmem:[%s6941_s1 + $0x18] sm:$0xff]  ;;  %v5268_v10 = vld [vmem:[%s6942_s2 + $0x20] sm:$0xff]   ;;  %vm1249_vm2 = vsmask.f32 4352  ;;  %vm1161_vm3 = vcmask 1044480  }
  0x11   : > { %4981 = vmatprep.subr.bf16.mxu1 %v5391_v3  ;;  %s7037_s30 = smov (!%p278_p3, %s277_s30), 67  ;;  %835 = vperm.xlu1 %5263, %v667_v5   ;;  %v670_v11 = vld [vmem:[%s6941_s1 + $0x38] sm:$0xff]  ;;  %v669_v12 = vld [vmem:[%s6941_s1 + $0x30] sm:$0xff]  ;;  %v5269_v13 = vld [vmem:[%s6942_s2 + $0x28] sm:$0xff]   ;;  %vm1886_vm4 = vsmask.f32 3328 }
  0x12   : > { %s4490_s10 = sshll.u32 %s7037_s30, 2  ;;  %825 = vperm.xlu0 %5262, %v665_v6   ;;  %v672_v14 = vld [vmem:[%s6941_s1 + $0x48] sm:$0xff]  ;;  %v671_v15 = vld [vmem:[%s6941_s1 + $0x40] sm:$0xff]  ;;  %v5270_v16 = vld [vmem:[%s6942_s2 + $0x30] sm:$0xff]   ;;  %vm2436_vm5 = vcmask 1042432   ;;  %p289_p4 = scmp.lt.s32.totalorder %s5438_s25, 1 }
  0x13   : > { %4816 = vmatpush3.bf16.msra.mxu0 %v5265_v2  ;;  %s5481_s19 = scalar_lea.vmem %s6940_s0, %s4490_s10  ;;  %v674_v17 = vld [vmem:[%s6941_s1 + $0x58] sm:$0xff]  ;;  %v673_v18 = vld [vmem:[%s6941_s1 + $0x50] sm:$0xff]  ;;  %v676_v20 = vld [vmem:[%s6941_s1 + $0x68] sm:$0xff]  ;;  %s6850_s18 = scalar_lea.vmem %s6946_s6, %s4490_s10 }
  0x14   : > { %4817 = vmatprep.subr.bf16.mxu0 %v6949_v1  ;;  %v5271_v19 = vld [vmem:[%s6942_s2 + $0x38] sm:$0xff]   ;;  %v675_v21 = vld [vmem:[%s6941_s1 + $0x60] sm:$0xff]  ;;  %v677_v24 = vld [vmem:[%s6941_s1 + $0x70] sm:$0xff]  ;;  %s7039_s25 = smov (!%p289_p4, %s5438_s25), 1 }
  0x15   : > { %840 = vperm.xlu1 %5263, %v668_v8   ;;  %v5272_v22 = vld [vmem:[%s5481_s19] sm:$0xff]   ;;  %v678_v23 = vld [vmem:[%s6941_s1 + $0x78] sm:$0xff]  ;;  %v680_v25 = vld [vmem:[%s6941_s1 + $0x88] sm:$0xff]  ;;  %s4492_s30 = sshll.u32 %s7039_s25, 1 }
  0x16   : > { %830 = vperm.xlu0 %5262, %v666_v9   ;;  %v5273_v26 = vld [vmem:[%s5481_s19 + $0x8] sm:$0xff]   ;;  %v679_v27 = vld [vmem:[%s6941_s1 + $0x80] sm:$0xff]  ;;  %v682_v32 = vld [vmem:[%s6941_s1 + $0x98] sm:$0xff]  ;;  %s292_s21 = scalar_lea.vmem %s6947_s7, %s4492_s30 }
  0x17   : > { %4818 = vmatpush3.bf16.msra.mxu0 %v5266_v4  ;;  %v664_v28 = vld [vmem:[%s6941_s1 + $0x8] sm:$0xff]  ;;  %v5289_v29 = vld [vmem:[%s6945_s5] sm:$0xff]   ;;  %v681_v33 = vld [vmem:[%s6941_s1 + $0x90] sm:$0xff] }
  0x18   : > { %4819 = vmatprep.subr.bf16.mxu0 %v6949_v1  ;;  %v663_v30 = vld [vmem:[%s6941_s1] sm:$0xff]  ;;  %v5290_v31 = vld [vmem:[%s6945_s5 + $0x8] sm:$0xff]   ;;  %v5291_v34 = vld [vmem:[%s6945_s5 + $0x10] sm:$0xff]  }
  0x19   : > { %850 = vperm.xlu1 %5263, %v670_v11   ;;  %v5274_v35 = vld [vmem:[%s5481_s19 + $0x10] sm:$0xff]   ;;  %v5295_v36 = vld [vmem:[%s6945_s5 + $0x100] sm:$0xff]   ;;  %v684_v37 = vld [vmem:[%s6941_s1 + $0xa8] sm:$0xff] }
  0x1a   : > { %845 = vperm.xlu0 %5262, %v669_v12   ;;  %v683_v38 = vld [vmem:[%s6941_s1 + $0xa0] sm:$0xff]  ;;  %4997 = vmatpush1.bf16.msra.mxu1 %v5295_v36  ;;  %v5292_v39 = vld [vmem:[%s6945_s5 + $0x18] sm:$0xff]   ;;  %v5297_v40 = vld [vmem:[%s6945_s5 + $0x108] sm:$0xff]  }
  0x1b   : > { %4820 = vmatpush3.bf16.msra.mxu0 %v5267_v7  ;;  %4982 = vmatprep.subr.bf16.mxu1 %v5391_v3  ;;  %v686_v41 = vld [vmem:[%s6941_s1 + $0xb8] sm:$0xff]  ;;  %v685_v42 = vld [vmem:[%s6941_s1 + $0xb0] sm:$0xff]  ;;  %v5293_v43 = vld [vmem:[%s6945_s5 + $0x20] sm:$0xff]  }
  0x1c   : > { %4821 = vmatprep.subr.bf16.mxu0 %v6949_v1  ;;  %v5299_v44 = vld [vmem:[%s6945_s5 + $0x110] sm:$0xff]   ;;  %v5275_v45 = vld [vmem:[%s5481_s19 + $0x18] sm:$0xff]   ;;  %v688_v46 = vld [vmem:[%s6941_s1 + $0xc8] sm:$0xff] }
  0x1d   : > { %860 = vperm.xlu1 %5263, %v672_v14   ;;  %v687_v47 = vld [vmem:[%s6941_s1 + $0xc0] sm:$0xff]  ;;  %v5294_v48 = vld [vmem:[%s6945_s5 + $0x28] sm:$0xff]   ;;  %v690_v49 = vld [vmem:[%s6941_s1 + $0xd8] sm:$0xff] }
  0x1e   : > { %855 = vperm.xlu0 %5262, %v671_v15   ;;  %4998 = vmatpush1.bf16.msra.mxu1 %v5297_v40  ;;  %v689_v50 = vld [vmem:[%s6941_s1 + $0xd0] sm:$0xff]  ;;  %v5276_v52 = vld [vmem:[%s5481_s19 + $0x20] sm:$0xff]   ;;  %v692_v53 = vld [vmem:[%s6941_s1 + $0xe8] sm:$0xff] }
  0x1f   : > { %4822 = vmatpush3.bf16.msra.mxu0 %v5268_v10  ;;  %4983 = vmatprep.subr.bf16.mxu1 %v5391_v3  ;;  %v5296_v51 = vld [vmem:[%s6945_s5 + $0x30] sm:$0xff]   ;;  %v691_v54 = vld [vmem:[%s6941_s1 + $0xe0] sm:$0xff]  ;;  %v5298_v55 = vld [vmem:[%s6945_s5 + $0x38] sm:$0xff]  }
  0x20   : > { %4823 = vmatprep.subr.bf16.mxu0 %v6949_v1  ;;  %v694_v56 = vld [vmem:[%s6941_s1 + $0xf8] sm:$0xff]  ;;  %v693_v57 = vld [vmem:[%s6941_s1 + $0xf0] sm:$0xff]  ;;  %v5277_v58 = vld [vmem:[%s5481_s19 + $0x28] sm:$0xff]  }
  0x21   : > { %870 = vperm.xlu1 %5263, %v674_v17   ;;  %v696_v59 = vld [vmem:[%s6941_s1 + $0x108] sm:$0xff]  ;;  %v695_v60 = vld [vmem:[%s6941_s1 + $0x100] sm:$0xff]  ;;  %v5278_v61 = vld [vmem:[%s5481_s19 + $0x30] sm:$0xff]  }
  0x22   : > { %865 = vperm.xlu0 %5262, %v673_v18   ;;  %4999 = vmatpush1.bf16.msra.mxu1 %v5299_v44  ;;  %v5279_v62 = vld [vmem:[%s5481_s19 + $0x38] sm:$0xff]   ;;  %v5280_v63 = vld [vmem:[%s5481_s19 + $0x40] sm:$0xff]   ;;  %v5281_v0 = vld [vmem:[%s5481_s19 + $0x48] sm:$0xff]  }
  0x23   : > { %4824 = vmatpush3.bf16.msra.mxu0 %v5269_v13  ;;  %4984 = vmatprep.subr.bf16.mxu1 %v5391_v3  ;;  %v5282_v2 = vld [vmem:[%s5481_s19 + $0x50] sm:$0xff]   ;;  %v5301_v4 = vld [vmem:[%s6945_s5 + $0x118] sm:$0xff]   ;;  %v5300_v5 = vld [vmem:[%s6945_s5 + $0x40] sm:$0xff]  }
  0x24   : > { %4825 = vmatprep.subr.bf16.mxu0 %v6949_v1  ;;  %v5303_v6 = vld [vmem:[%s6945_s5 + $0x120] sm:$0xff]   ;;  %v5283_v7 = vld [vmem:[%s5481_s19 + $0x58] sm:$0xff]   ;;  %v5302_v8 = vld [vmem:[%s6945_s5 + $0x48] sm:$0xff]  }
  0x25   : > { %880 = vperm.xlu1 %5263, %v676_v20   ;;  %v5305_v9 = vld [vmem:[%s6945_s5 + $0x128] sm:$0xff]   ;;  %v5304_v10 = vld [vmem:[%s6945_s5 + $0x50] sm:$0xff]   ;;  %v5284_v12 = vld [vmem:[%s5481_s19 + $0x60] sm:$0xff]  }
  0x26   : > { %875 = vperm.xlu0 %5262, %v675_v21   ;;  %5000 = vmatpush1.bf16.msra.mxu1 %v5301_v4  ;;  %v5307_v11 = vld [vmem:[%s6945_s5 + $0x130] sm:$0xff]   ;;  %v5306_v13 = vld [vmem:[%s6945_s5 + $0x58] sm:$0xff]   ;;  %v5308_v15 = vld [vmem:[%s6945_s5 + $0x60] sm:$0xff]  }
  0x27   : > { %4826 = vmatpush3.bf16.msra.mxu0 %v5270_v16  ;;  %4985 = vmatprep.subr.bf16.mxu1 %v5391_v3  ;;  %v5309_v14 = vld [vmem:[%s6945_s5 + $0x138] sm:$0xff]   ;;  %v5311_v16 = vld [vmem:[%s6945_s5 + $0x140] sm:$0xff]   ;;  %v5285_v17 = vld [vmem:[%s5481_s19 + $0x68] sm:$0xff]  }
  0x28   : > { %4827 = vmatprep.subr.bf16.mxu0 %v6949_v1  ;;  %v5310_v18 = vld [vmem:[%s6945_s5 + $0x68] sm:$0xff]   ;;  %v5312_v20 = vld [vmem:[%s6945_s5 + $0x70] sm:$0xff]   ;;  %v5805_v44 = vld [vmem:[%s6943_s3] ss:$0 sm:$0xff] }
  0x29   : > { %890 = vperm.xlu1 %5263, %v678_v23   ;;  %v5315_v21 = vld [vmem:[%s6945_s5 + $0x150] sm:$0xff]   ;;  %v5313_v23 = vld [vmem:[%s6945_s5 + $0x78] sm:$0xff]  }
  0x2a   : > { %885 = vperm.xlu0 %5262, %v677_v24   ;;  %5001 = vmatpush1.bf16.msra.mxu1 %v5303_v6  ;;  %v5316_v24 = vld [vmem:[%s6945_s5 + $0x158] sm:$0xff]  }
  0x2b   : > { %4828 = vmatpush3.bf16.msra.mxu0 %v5271_v19  ;;  %4986 = vmatprep.subr.bf16.mxu1 %v5391_v3  ;;  %v5314_v19 = vld [vmem:[%s6945_s5 + $0x148] sm:$0xff]  }
  0x2c   : > { %3235 = vmatprep.subr.bf16.mxu0 %v5391_v3 }
  0x2d   : > { %900 = vperm.xlu1 %5263, %v680_v25   ;;  %v5317_v25 = vld [vmem:[%s6945_s5 + $0x160] sm:$0xff]  }
  0x2e   : > { %4830 = vmatmul.mubr.bf16.vlgmr.msra.gmra.mrb[0].mxu0 %v5272_v22  ;;  %895 = vperm.xlu0 %5262, %v679_v27   ;;  %v5286_v22 = vld [vmem:[%s5481_s19 + $0x70] sm:$0xff]   ;;  %v5318_v27 = vld [vmem:[%s6945_s5 + $0x168] sm:$0xff]  }
  0x2f   : > { %4833 = vmatprep.mubr.msk.bf16.mxu0 %vm5390_vm0, %v6949_v1  ;;  %3236 = vmatpush1.bf16.msra.mxu0 %v5289_v29  ;;  %v5288_v29 = vld [vmem:[%s5481_s19 + $0x80] sm:$0xff]  }
  0x30   : > { %3237 = vmatprep.subr.bf16.mxu0 %v5391_v3  ;;  %5002 = vmatpush1.bf16.msra.mxu1 %v5305_v9 }
  0x31   : > { %820 = vperm.xlu1 %5263, %v664_v28   ;;  %4987 = vmatprep.subr.bf16.mxu1 %v5391_v3  ;;  %v5319_v28 = vld [vmem:[%s6945_s5 + $0x170] sm:$0xff]  }
  0x32   : > { %815 = vperm.xlu0 %5262, %v663_v30   ;;  %v5320_v30 = vld [vmem:[%s6945_s5 + $0x178] sm:$0xff]  }
  0x33   : > { %3238 = vmatpush1.bf16.msra.mxu0 %v5290_v31 }
  0x34   : > { %3239 = vmatprep.subr.bf16.mxu0 %v5391_v3  ;;  %5003 = vmatpush1.bf16.msra.mxu1 %v5307_v11  ;;  %v1231_v11 = vld [vmem:[#allocation2] sm:$0xf8] }
  0x35   : > { %910 = vperm.xlu1 %5263, %v682_v32   ;;  %4988 = vmatprep.subr.bf16.mxu1 %v5391_v3 }
  0x36   : > { %4834 = vmatmul.mubr.bf16.gmra.mrb[4].mxu0 %v5273_v26  ;;  %905 = vperm.xlu0 %5262, %v681_v33   ;;  %v5287_v26 = vld [vmem:[%s5481_s19 + $0x78] sm:$0xff]  }
  0x37   : > { %4837 = vmatprep.mubr.msk.bf16.mxu0 %vm5390_vm0, %v6949_v1  ;;  %3240 = vmatpush1.bf16.msra.mxu0 %v5291_v34 }
  0x38   : > { %3241 = vmatprep.subr.bf16.mxu0 %v5391_v3  ;;  %5004 = vmatpush1.bf16.msra.mxu1 %v5309_v14  ;;  %v1251_v14 = vshrl.u32 %v1231_v11, 16 }
  0x39   : > { %920 = vperm.xlu1 %5263, %v684_v37   ;;  %4989 = vmatprep.subr.bf16.mxu1 %v5391_v3 }
  0x3a   : > { %915 = vperm.xlu0 %5262, %v683_v38  }
  0x3b   : > { %3242 = vmatpush1.bf16.msra.mxu0 %v5292_v39 }
  0x3c   : > { %3243 = vmatprep.subr.bf16.mxu0 %v5391_v3  ;;  %5005 = vmatpush1.bf16.msra.mxu1 %v5311_v16 }
  0x3d   : > { %930 = vperm.xlu1 %5263, %v686_v41   ;;  %4990 = vmatprep.subr.bf16.mxu1 %v5391_v3 }
  0x3e   : > { %4838 = vmatmul.mubr.bf16.gmra.mrb[8].mxu0 %v5274_v35  ;;  %925 = vperm.xlu0 %5262, %v685_v42  }
  0x3f   : > { %4841 = vmatprep.mubr.msk.bf16.mxu0 %vm5390_vm0, %v6949_v1  ;;  %3244 = vmatpush1.bf16.msra.mxu0 %v5293_v43 }
  0x40   : > { %3245 = vmatprep.subr.bf16.mxu0 %v5391_v3  ;;  %5006 = vmatpush1.bf16.msra.mxu1 %v5314_v19 }
  0x41   : > { %940 = vperm.xlu1 %5263, %v688_v46   ;;  %4991 = vmatprep.subr.bf16.mxu1 %v5391_v3  ;;  %v5810_v46 = vld [vmem:[%s6944_s4] ss:$0 sm:$0xff] }
  0x42   : > { %935 = vperm.xlu0 %5262, %v687_v47  }
  0x43   : > { %3246 = vmatpush1.bf16.msra.mxu0 %v5294_v48 }
  0x44   : > { %3247 = vmatprep.subr.bf16.mxu0 %v5391_v3  ;;  %5007 = vmatpush1.bf16.msra.mxu1 %v5315_v21 }
  0x45   : > { %950 = vperm.xlu1 %5263, %v690_v49   ;;  %4992 = vmatprep.subr.bf16.mxu1 %v5391_v3 }
  0x46   : > { %4842 = vmatmul.mubr.bf16.gmra.mrb[12].mxu0 %v5275_v45  ;;  %945 = vperm.xlu0 %5262, %v689_v50  }
  0x47   : > { %4845 = vmatprep.mubr.msk.bf16.mxu0 %vm5390_vm0, %v6949_v1  ;;  %3248 = vmatpush1.bf16.msra.mxu0 %v5296_v51 }
  0x48   : > { %3249 = vmatprep.subr.bf16.mxu0 %v5391_v3  ;;  %5008 = vmatpush1.bf16.msra.mxu1 %v5316_v24 }
  0x49   : > { %960 = vperm.xlu1 %5263, %v692_v53   ;;  %4993 = vmatprep.subr.bf16.mxu1 %v5391_v3 }
  0x4a   : > { %955 = vperm.xlu0 %5262, %v691_v54  }
  0x4b   : > { %3250 = vmatpush1.bf16.msra.mxu0 %v5298_v55 }
  0x4c   : > { %3251 = vmatprep.subr.bf16.mxu0 %v5391_v3  ;;  %5009 = vmatpush1.bf16.msra.mxu1 %v5317_v25  ;;  %v1253_v25 = vrot.slane %v1251_v14, 3 }
  0x4d   : > { %970 = vperm.xlu1 %5263, %v694_v56   ;;  %4994 = vmatprep.subr.bf16.mxu1 %v5391_v3 }
  0x4e   : > { %4846 = vmatmul.mubr.bf16.gmra.mrb[16].mxu0 %v5276_v52  ;;  %965 = vperm.xlu0 %5262, %v693_v57  }
  0x4f   : > { %4849 = vmatprep.mubr.msk.bf16.mxu0 %vm5390_vm0, %v6949_v1  ;;  %3252 = vmatpush1.bf16.msra.mxu0 %v5300_v5 }
  0x50   : > { %3253 = vmatprep.subr.bf16.mxu0 %v5391_v3  ;;  %5010 = vmatpush1.bf16.msra.mxu1 %v5318_v27  ;;  %v1125_v27 = vld [vmem:[#allocation2] sm:$0xf8] }
  0x51   : > { %980 = vperm.xlu1 %5263, %v696_v59   ;;  %4995 = vmatprep.subr.bf16.mxu1 %v5391_v3 }
  0x52   : > { %975 = vperm.xlu0 %5262, %v695_v60  }
  0x53   : > { %3254 = vmatpush1.bf16.msra.mxu0 %v5302_v8 }
  0x54   : > { %3255 = vmatprep.subr.bf16.mxu0 %v5391_v3  ;;  %5011 = vmatpush1.bf16.msra.mxu1 %v5319_v28 }
  0x55   : > { %4996 = vmatprep.subr.bf16.mxu1 %v5391_v3 }
  0x56   : > { %4850 = vmatmul.mubr.bf16.gmra.mrb[20].mxu0 %v5277_v58 }
  0x57   : > { %4853 = vmatprep.mubr.msk.bf16.mxu0 %vm5390_vm0, %v6949_v1  ;;  %3256 = vmatpush1.bf16.msra.mxu0 %v5304_v10 }
  0x58   : > { %3257 = vmatprep.subr.bf16.mxu0 %v5391_v3  ;;  %5012 = vmatpush1.bf16.msra.mxu1 %v5320_v30 }
  0x59   : > { %3742 = vmatprep.subr.bf16.mxu1 %v5391_v3 }
  0x5b   : > { %3258 = vmatpush1.bf16.msra.mxu0 %v5306_v13 }
  0x5c   : > { %3259 = vmatprep.subr.bf16.mxu0 %v5391_v3 }
  0x5e   : > { %4854 = vmatmul.mubr.bf16.gmra.mrb[24].mxu0 %v5278_v61 }
  0x5f   : > { %4857 = vmatprep.mubr.msk.bf16.mxu0 %vm5390_vm0, %v6949_v1  ;;  %3260 = vmatpush1.bf16.msra.mxu0 %v5308_v15  ;;  %v1254_v15 = vshll.u32 %v1231_v11, 16 }
  0x60   : > { %3261 = vmatprep.subr.bf16.mxu0 %v5391_v3 }
  0x63   : > { %3262 = vmatpush1.bf16.msra.mxu0 %v5310_v18 }
  0x64   : > { %3263 = vmatprep.subr.bf16.mxu0 %v5391_v3 }
  0x66   : > { %4858 = vmatmul.mubr.bf16.gmra.mrb[28].mxu0 %v5279_v62 }
  0x67   : > { %4861 = vmatprep.mubr.msk.bf16.mxu0 %vm5390_vm0, %v6949_v1  ;;  %3264 = vmatpush1.bf16.msra.mxu0 %v5312_v20 }
  0x68   : > { %3265 = vmatprep.subr.bf16.mxu0 %v5391_v3 }
  0x6b   : > { %3266 = vmatpush1.bf16.msra.mxu0 %v5313_v23 }
  0x6c   : > { %3404 = vmatprep.subr.bf16.mxu0 %v5391_v3 }
  0x6e   : > { %4862 = vmatmul.mubr.bf16.gmra.mrb[32].mxu0 %v5280_v63 }
  0x6f   : > { %4865 = vmatprep.mubr.msk.bf16.mxu0 %vm5390_vm0, %v6949_v1 }
  0x76   : > { %4866 = vmatmul.mubr.bf16.gmra.mrb[36].mxu0 %v5281_v0 }
  0x77   : > { %4869 = vmatprep.mubr.msk.bf16.mxu0 %vm5390_vm0, %v6949_v1 }
  0x7e   : > { %4870 = vmatmul.mubr.bf16.gmra.mrb[40].mxu0 %v5282_v2 }
  0x7f   : > { %4873 = vmatprep.mubr.msk.bf16.mxu0 %vm5390_vm0, %v6949_v1 }
  0x86   : > { %4874 = vmatmul.mubr.bf16.gmra.mrb[44].mxu0 %v5283_v7 }
  0x87   : > { %4877 = vmatprep.mubr.msk.bf16.mxu0 %vm5390_vm0, %v6949_v1 }
  0x8e   : > { %4878 = vmatmul.mubr.bf16.gmra.mrb[48].mxu0 %v5284_v12 }
  0x8f   : > { %4881 = vmatprep.mubr.msk.bf16.mxu0 %vm5390_vm0, %v6949_v1 }
  0x90   : > { %v5774_v31 = vpop.permute.xlu1 %835 }
  0x91   : > { %v5776_v32 = vpop.permute.xlu0 %825 }
  0x94   : > { %v5778_v33 = vpop.permute.xlu1 %840 }
  0x95   : > { %v5780_v34 = vpop.permute.xlu0 %830 }
  0x96   : > { %4882 = vmatmul.mubr.bf16.gmra.mrb[52].mxu0 %v5285_v17 }
  0x97   : > { %4885 = vmatprep.mubr.msk.bf16.mxu0 %vm5390_vm0, %v6949_v1 }
  0x98   : > { %v5782_v35 = vpop.permute.xlu1 %850 }
  0x99   : > { %v5784_v36 = vpop.permute.xlu0 %845 }
  0x9c   : > { %v5786_v37 = vpop.permute.xlu1 %860 }
  0x9d   : > { %v5788_v38 = vpop.permute.xlu0 %855 }
  0x9e   : > { %4886 = vmatmul.mubr.bf16.gmra.mrb[56].mxu0 %v5286_v22 }
  0x9f   : > { %4889 = vmatprep.mubr.msk.bf16.mxu0 %vm5390_vm0, %v6949_v1 }
  0xa0   : > { %v5790_v39 = vpop.permute.xlu1 %870 }
  0xa1   : > { %v5792_v40 = vpop.permute.xlu0 %865 }
  0xa4   : > { %v5794_v3 = vpop.permute.xlu1 %880 }
  0xa5   : > { %6980 = vst [vmem:[#allocation4_spill] sm:$0xff] %v5794_v3  ;;  %v5796_v41 = vpop.permute.xlu0 %875 }
  0xa6   : > { %4890 = vmatmul.mubr.bf16.gmra.mrb[60].mxu0 %v5287_v26  ;;  %6981 = vst [vmem:[#allocation5_spill] sm:$0xff] %v5796_v41  ;;  %v1256_v26 = vrot.slane %v1254_v15, 4 }
  0xa7   : > { %4893 = vmatprep.mubr.msk.bf16.mxu0 %vm5390_vm0, %v6949_v1 }
  0xa8   : > { %v5798_v42 = vpop.permute.xlu1 %890 }
  0xa9   : > { %6982 = vst [vmem:[#allocation6_spill] sm:$0xff] %v5798_v42  ;;  %v5800_v43 = vpop.permute.xlu0 %885 }
  0xaa   : > { %6983 = vst [vmem:[#allocation7_spill] sm:$0xff] %v5800_v43 }
  0xac   : > { %v5812_v47 = vpop.permute.xlu1 %900 }
  0xad   : > { %6984 = vst [vmem:[#allocation8_spill] sm:$0xff] %v5812_v47  ;;  %v5815_v50 = vpop.permute.xlu0 %895 }
  0xae   : > { %4894 = vmatmul.mubr.bf16.gmra.mrb[64].mxu0 %v5288_v29  ;;  %6985 = vst [vmem:[#allocation9_spill] sm:$0xff] %v5815_v50 }
  0xb0   : > { %v5820_v57 = vpop.permute.xlu1 %820 }
  0xb1   : > { %v5822_v59 = vpop.permute.xlu0 %815 }
 0x101   : > { %v528_v45 = vpop.f32.mrb[0].mxu0 }
 0x102   : > { %v704_v48 = vmul.f32 %v5805_v44, %v528_v45  ;;  %v4831_v49 = vpop.f32.mrb[1].mxu0 }
 0x103   : > { %v531_v51 = vpop.f32.mrb[2].mxu0 }
 0x104   : > { %v745_v52 = vadd.f32 %v5810_v46, %v704_v48  ;;  %v705_v53 = vmul.f32 %v5805_v44, %v531_v51  ;;  %v4832_v54 = vpop.f32.mrb[3].mxu0 }
 0x105   : > { %v1257_v54 = vor.u32 %v1256_v26, %v1253_v25 }
 0x106   : > { %v779_v55 = vmax.f32 %v745_v52, 0.0  ;;  %v746_v56 = vadd.f32 %v5810_v46, %v705_v53  ;;  %v1162_v52 = vrot.slane %v1125_v27, 3 }
 0x108   : > { %v780_v58 = vmax.f32 %v746_v56, 0.0  ;;  %v983_v61 = vmul.f32 %v5822_v59, %v779_v55 }
 0x109   : > { %v536_v60 = vpop.f32.mrb[4].mxu0 }
 0x10a   : > { %v984_v62 = vmul.f32 %v5820_v57, %v780_v58  ;;  %v706_v63 = vmul.f32 %v5805_v44, %v536_v60  ;;  %v4835_v0 = vpop.f32.mrb[5].mxu0 }
 0x10b   : > { %v539_v2 = vpop.f32.mrb[6].mxu0 }
 0x10c   : > { %v1021_v4 = vpack.c.bf16 %v984_v62, %v983_v61  ;;  %v747_v5 = vadd.f32 %v5810_v46, %v706_v63  ;;  %v707_v6 = vmul.f32 %v5805_v44, %v539_v2  ;;  %v4836_v7 = vpop.f32.mrb[7].mxu0 }
 0x10e   : > { %v1056_v8 = vrot.slane %v1021_v4, 4  ;;  %v781_v9 = vmax.f32 %v747_v5, 0.0  ;;  %v748_v10 = vadd.f32 %v5810_v46, %v707_v6 }
 0x110   : > { %1107 = vst [vmem:[#allocation2 + $0x8] sm:$0xf0] %v1056_v8  ;;  %v782_v12 = vmax.f32 %v748_v10, 0.0  ;;  %v985_v16 = vmul.f32 %v5776_v32, %v781_v9 }
 0x111   : > { %v544_v13 = vpop.f32.mrb[8].mxu0 }
 0x112   : > { %v986_v17 = vmul.f32 %v5780_v34, %v782_v12  ;;  %v708_v18 = vmul.f32 %v5805_v44, %v544_v13  ;;  %v4839_v19 = vpop.f32.mrb[9].mxu0 }
 0x113   : > { %v547_v20 = vpop.f32.mrb[10].mxu0 }
 0x114   : > { %v1022_v21 = vpack.c.bf16 %v986_v17, %v985_v16  ;;  %v749_v22 = vadd.f32 %v5810_v46, %v708_v18  ;;  %v709_v23 = vmul.f32 %v5805_v44, %v547_v20  ;;  %v4840_v24 = vpop.f32.mrb[11].mxu0  ;;  %v5327_v17 = vld [vmem:[%s6945_s5 + $0x80] sm:$0xff]  }
 0x116   : > { %v1057_v28 = vrot.slane %v1022_v21, 4  ;;  %v783_v29 = vmax.f32 %v749_v22, 0.0  ;;  %v750_v30 = vadd.f32 %v5810_v46, %v709_v23 }
 0x117   : > { %v5836_v45 = vld [vmem:[#allocation2 + $0x8] sm:$0xff] }
 0x118   : > { %v5839_v48 = vsel %vm1055_vm1, %v1056_v8, %v1057_v28  ;;  %v784_v49 = vmax.f32 %v750_v30, 0.0  ;;  %v1259_v51 = vshrl.u32 %v5836_v45, 16  ;;  %v1262_v55 = vshll.u32 %v5836_v45, 16 }
 0x119   : > { %1108 = vst [vmem:[#allocation2 + $0x10] sm:$0xff] %v5839_v48  ;;  %v552_v53 = vpop.f32.mrb[12].mxu0  ;;  %v1268_v56 = vshrl.u32 %v5839_v48, 16  ;;  %v1271_v58 = vshll.u32 %v5839_v48, 16  ;;  %v987_v60 = vmul.f32 %v5774_v31, %v783_v29  ;;  %v1163_v11 = vrot.slane %v5836_v45, 3 }
 0x11a   : > { %v988_v61 = vmul.f32 %v5778_v33, %v784_v49  ;;  %v710_v62 = vmul.f32 %v5805_v44, %v552_v53  ;;  %v4843_v63 = vpop.f32.mrb[13].mxu0  ;;  %v1261_v0 = vrot.slane %v1259_v51, 3  ;;  %v1264_v4 = vrot.slane %v1262_v55, 4  ;;  %v5329_v49 = vld [vmem:[%s6945_s5 + $0x88] sm:$0xff]  }
 0x11b   : > { %v555_v2 = vpop.f32.mrb[14].mxu0  ;;  %v1270_v5 = vrot.slane %v1268_v56, 3  ;;  %v1273_v6 = vrot.slane %v1271_v58, 4  ;;  %v1164_v22 = vsel %vm1161_vm3, %v1162_v52, %v1163_v11  ;;  %v1165_v24 = vrot.slane %v5839_v48, 3 }
 0x11c   : > { %v1023_v7 = vpack.c.bf16 %v988_v61, %v987_v60  ;;  %v751_v8 = vadd.f32 %v5810_v46, %v710_v62  ;;  %v711_v9 = vmul.f32 %v5805_v44, %v555_v2  ;;  %v4844_v10 = vpop.f32.mrb[15].mxu0  ;;  %v1265_v12 = vor.u32 %v1264_v4, %v1261_v0  ;;  %v5331_v2 = vld [vmem:[%s6945_s5 + $0x90] sm:$0xff]  }
 0x11d   : > { %v1274_v13 = vor.u32 %v1273_v6, %v1270_v5 }
 0x11e   : > { %v1059_v14 = vrot.slane %v1023_v7, 4  ;;  %v785_v15 = vmax.f32 %v751_v8, 0.0  ;;  %v752_v16 = vadd.f32 %v5810_v46, %v711_v9  ;;  %v1266_v18 = vsel %vm1249_vm2, %v1257_v54, %v1265_v12  ;;  %v5876_v54 = vld [vmem:[#allocation2] sm:$0xff] }
 0x11f   : > { %v1275_v19 = vsel %vm1249_vm2, %v1265_v12, %v1274_v13  ;;  %3267 = vmatprep.mubr.bf16.mxu0 %v1266_v18  ;;  %v1166_v7 = vsel %vm1161_vm3, %v1163_v11, %v1165_v24 }
 0x120   : > { %v5859_v20 = vsel %vm1055_vm1, %v1057_v28, %v1059_v14  ;;  %v786_v21 = vmax.f32 %v752_v16, 0.0  ;;  %3268 = vmatmul.mubr.bf16.vlgmr.msra.gmra.mrb[68].mxu0 %v1164_v22  ;;  %v989_v29 = vmul.f32 %v5784_v36, %v785_v15 }
 0x121   : > { %1109 = vst [vmem:[#allocation2 + $0x18] sm:$0xff] %v5859_v20  ;;  %v560_v23 = vpop.f32.mrb[16].mxu0  ;;  %v1277_v25 = vshrl.u32 %v5859_v20, 16  ;;  %v1280_v26 = vshll.u32 %v5859_v20, 16  ;;  %v1167_v27 = vrot.slane %v5859_v20, 3  ;;  %3275 = vmatprep.mubr.bf16.mxu0 %v1275_v19  ;;  %3405 = vmatpush1.bf16.msra.mxu0 %v5327_v17  ;;  %v5333_v19 = vld [vmem:[%s6945_s5 + $0x98] sm:$0xff]  }
 0x122   : > { %v990_v28 = vmul.f32 %v5782_v35, %v786_v21  ;;  %v712_v30 = vmul.f32 %v5805_v44, %v560_v23  ;;  %v4847_v45 = vpop.f32.mrb[17].mxu0  ;;  %3406 = vmatprep.subr.bf16.mxu0 %v5876_v54 }
 0x123   : > { %v563_v48 = vpop.f32.mrb[18].mxu0  ;;  %v1279_v51 = vrot.slane %v1277_v25, 3  ;;  %v1282_v52 = vrot.slane %v1280_v26, 4  ;;  %v5874_v53 = vsel %vm1161_vm3, %v1165_v24, %v1167_v27  ;;  %v1907_v8 = vrot.slane %v1277_v25, 4 }
 0x124   : > { %v1024_v55 = vpack.c.bf16 %v990_v28, %v989_v29  ;;  %v753_v56 = vadd.f32 %v5810_v46, %v712_v30  ;;  %v713_v58 = vmul.f32 %v5805_v44, %v563_v48  ;;  %v4848_v60 = vpop.f32.mrb[19].mxu0  ;;  %v1910_v15 = vrot.slane %v1280_v26, 5 }
 0x125   : > { %v1283_v61 = vor.u32 %v1282_v52, %v1279_v51  ;;  %3407 = vmatpush1.bf16.msra.mxu0 %v5329_v49  ;;  %v5321_v60 = vld [vmem:[%s6945_s5 + $0x180] sm:$0xff]  }
 0x126   : > { %v1061_v62 = vrot.slane %v1024_v55, 4  ;;  %v787_v63 = vmax.f32 %v753_v56, 0.0  ;;  %v754_v0 = vadd.f32 %v5810_v46, %v713_v58  ;;  %3408 = vmatprep.subr.bf16.mxu0 %v5876_v54  ;;  %v5910_v48 = vor.u32 %v1910_v15, %v1907_v8 }
 0x127   : > { %v1284_v4 = vsel %vm1249_vm2, %v1274_v13, %v1283_v61  ;;  %v6948_v58 = vrot.slane %v5859_v20, 4 }
 0x128   : > { %v5888_v5 = vsel %vm1055_vm1, %v1059_v14, %v1061_v62  ;;  %v788_v6 = vmax.f32 %v754_v0, 0.0  ;;  %3276 = vmatmul.mubr.bf16.gmra.mrb[72].mxu0 %v1166_v7  ;;  %v991_v16 = vmul.f32 %v5788_v38, %v787_v63  ;;  %v5334_v0 = vld [vmem:[%s6945_s5 + $0xa0] sm:$0xff]  }
 0x129   : > { %1110 = vst [vmem:[#allocation2 + $0x20] sm:$0xff] %v5888_v5  ;;  %v568_v9 = vpop.f32.mrb[20].mxu0  ;;  %v1286_v10 = vshrl.u32 %v5888_v5, 16  ;;  %v1289_v12 = vshll.u32 %v5888_v5, 16  ;;  %v1169_v13 = vrot.slane %v5888_v5, 3  ;;  %3283 = vmatprep.mubr.bf16.mxu0 %v1284_v4  ;;  %v1804_v11 = vrot.slane %v5888_v5, 4  ;;  %3409 = vmatpush1.bf16.msra.mxu0 %v5331_v2 }
 0x12a   : > { %v992_v14 = vmul.f32 %v5786_v37, %v788_v6  ;;  %v714_v17 = vmul.f32 %v5805_v44, %v568_v9  ;;  %v4851_v18 = vpop.f32.mrb[21].mxu0  ;;  %3410 = vmatprep.subr.bf16.mxu0 %v5876_v54  ;;  %v5337_v5 = vld [vmem:[%s6945_s5 + $0xb0] sm:$0xff]  }
 0x12b   : > { %v571_v21 = vpop.f32.mrb[22].mxu0  ;;  %v1288_v22 = vrot.slane %v1286_v10, 3  ;;  %v1291_v23 = vrot.slane %v1289_v12, 4  ;;  %v1916_v24 = vrot.slane %v1286_v10, 4  ;;  %v1919_v25 = vrot.slane %v1289_v12, 5 }
 0x12c   : > { %v1025_v26 = vpack.c.bf16 %v992_v14, %v991_v16  ;;  %v755_v29 = vadd.f32 %v5810_v46, %v714_v17  ;;  %v715_v28 = vmul.f32 %v5805_v44, %v571_v21  ;;  %v4852_v30 = vpop.f32.mrb[23].mxu0  ;;  %v5908_v45 = vsel %vm1161_vm3, %v1167_v27, %v1169_v13 }
 0x12d   : > { %v1292_v49 = vor.u32 %v1291_v23, %v1288_v22  ;;  %v1920_v51 = vor.u32 %v1919_v25, %v1916_v24  ;;  %3411 = vmatpush1.bf16.msra.mxu0 %v5333_v19  ;;  %v5336_v22 = vld [vmem:[%s6945_s5 + $0xa8] sm:$0xff]  }
 0x12e   : > { %v1063_v52 = vrot.slane %v1025_v26, 4  ;;  %v789_v55 = vmax.f32 %v755_v29, 0.0  ;;  %v756_v56 = vadd.f32 %v5810_v46, %v715_v28  ;;  %3412 = vmatprep.subr.bf16.mxu0 %v5876_v54 }
 0x12f   : > { %v1293_v63 = vsel %vm1249_vm2, %v1283_v61, %v1292_v49  ;;  %v1921_v27 = vsel %vm1886_vm4, %v5910_v48, %v1920_v51  ;;  %v1805_v61 = vsel %vm1055_vm1, %v6948_v58, %v1804_v11 }
 0x130   : > { %v5925_v2 = vsel %vm1055_vm1, %v1061_v62, %v1063_v52  ;;  %v790_v4 = vmax.f32 %v756_v56, 0.0  ;;  %3621 = vmatprep.mubr.bf16.mxu1 %v1921_v27  ;;  %3284 = vmatmul.mubr.bf16.gmra.mrb[76].mxu0 %v5874_v53  ;;  %v993_v10 = vmul.f32 %v5792_v40, %v789_v55  ;;  %v5322_v53 = vld [vmem:[%s6945_s5 + $0x188] sm:$0xff]  }
 0x131   : > { %1111 = vst [vmem:[#allocation2 + $0x28] sm:$0xff] %v5925_v2  ;;  %v576_v6 = vpop.f32.mrb[24].mxu0  ;;  %3622 = vmatmul.mubr.bf16.vlgmr.msra.gmra.mrb[0].mxu1 %v1805_v61  ;;  %v1295_v7 = vshrl.u32 %v5925_v2, 16  ;;  %v1298_v8 = vshll.u32 %v5925_v2, 16  ;;  %v1171_v62 = vrot.slane %v5925_v2, 3  ;;  %v1806_v9 = vrot.slane %v5925_v2, 4  ;;  %3291 = vmatprep.mubr.bf16.mxu0 %v1293_v63 }
 0x132   : > { %v994_v12 = vmul.f32 %v5790_v39, %v790_v4  ;;  %v716_v15 = vmul.f32 %v5805_v44, %v576_v6  ;;  %v4855_v16 = vpop.f32.mrb[25].mxu0  ;;  %3743 = vmatpush1.bf16.msra.mxu1 %v5321_v60  ;;  %3413 = vmatpush1.bf16.msra.mxu0 %v5334_v0  ;;  %v5340_v2 = vld [vmem:[%s6945_s5 + $0xc0] sm:$0xff]  }
 0x133   : > { %v579_v14 = vpop.f32.mrb[26].mxu0  ;;  %v1297_v17 = vrot.slane %v1295_v7, 3  ;;  %v1300_v18 = vrot.slane %v1298_v8, 4  ;;  %v1925_v19 = vrot.slane %v1295_v7, 4  ;;  %v1928_v21 = vrot.slane %v1298_v8, 5  ;;  %3744 = vmatprep.subr.bf16.mxu1 %v5876_v54  ;;  %3414 = vmatprep.subr.bf16.mxu0 %v5876_v54 }
 0x134   : > { %v1026_v23 = vpack.c.bf16 %v994_v12, %v993_v10  ;;  %v757_v24 = vadd.f32 %v5810_v46, %v716_v15  ;;  %v717_v25 = vmul.f32 %v5805_v44, %v579_v14  ;;  %v4856_v26 = vpop.f32.mrb[27].mxu0  ;;  %v5955_v29 = vsel %vm1161_vm3, %v1169_v13, %v1171_v62  ;;  %v5323_v13 = vld [vmem:[%s6945_s5 + $0x190] sm:$0xff]  }
 0x135   : > { %v1301_v28 = vor.u32 %v1300_v18, %v1297_v17  ;;  %v1929_v30 = vor.u32 %v1928_v21, %v1925_v19  ;;  %v1807_v55 = vsel %vm1055_vm1, %v1804_v11, %v1806_v9  ;;  %v5339_v18 = vld [vmem:[%s6945_s5 + $0xb8] sm:$0xff]  }
 0x136   : > { %v1065_v56 = vrot.slane %v1026_v23, 4  ;;  %v791_v60 = vmax.f32 %v757_v24, 0.0  ;;  %v758_v63 = vadd.f32 %v5810_v46, %v717_v25  ;;  %3745 = vmatpush1.bf16.msra.mxu1 %v5322_v53  ;;  %3415 = vmatpush1.bf16.msra.mxu0 %v5336_v22 }
 0x137   : > { %v1302_v27 = vsel %vm1249_vm2, %v1292_v49, %v1301_v28  ;;  %v1930_v0 = vsel %vm1886_vm4, %v1920_v51, %v1929_v30  ;;  %3746 = vmatprep.subr.bf16.mxu1 %v5876_v54  ;;  %3416 = vmatprep.subr.bf16.mxu0 %v5876_v54 }
 0x138   : > { %v5974_v11 = vsel %vm1055_vm1, %v1063_v52, %v1065_v56  ;;  %v792_v4 = vmax.f32 %v758_v63, 0.0  ;;  %3629 = vmatprep.mubr.bf16.mxu1 %v1930_v0  ;;  %3292 = vmatmul.mubr.bf16.gmra.mrb[80].mxu0 %v5908_v45  ;;  %v995_v52 = vmul.f32 %v5796_v41, %v791_v60  ;;  %v5324_v45 = vld [vmem:[%s6945_s5 + $0x198] sm:$0xff]   ;;  %v5374_v41 = vld [vmem:[%s6945_s5 + $0x148] sm:$0xff]  }
 0x139   : > { %1112 = vst [vmem:[#allocation2 + $0x30] sm:$0xff] %v5974_v11  ;;  %v584_v61 = vpop.f32.mrb[28].mxu0  ;;  %3630 = vmatmul.mubr.bf16.gmra.mrb[4].mxu1 %v1807_v55  ;;  %v1304_v49 = vshrl.u32 %v5974_v11, 16  ;;  %v1307_v51 = vshll.u32 %v5974_v11, 16  ;;  %v1173_v6 = vrot.slane %v5974_v11, 3  ;;  %v1808_v7 = vrot.slane %v5974_v11, 4  ;;  %3299 = vmatprep.mubr.bf16.mxu0 %v1302_v27 }
 0x13a   : > { %v996_v8 = vmul.f32 %v5794_v3, %v792_v4  ;;  %v718_v10 = vmul.f32 %v5805_v44, %v584_v61  ;;  %v4859_v12 = vpop.f32.mrb[29].mxu0  ;;  %3747 = vmatpush1.bf16.msra.mxu1 %v5323_v13  ;;  %3417 = vmatpush1.bf16.msra.mxu0 %v5337_v5  ;;  %v5343_v11 = vld [vmem:[%s6945_s5 + $0xd0] sm:$0xff]  }
 0x13b   : > { %v587_v15 = vpop.f32.mrb[30].mxu0  ;;  %v1306_v16 = vrot.slane %v1304_v49, 3  ;;  %v1309_v53 = vrot.slane %v1307_v51, 4  ;;  %v1934_v14 = vrot.slane %v1304_v49, 4  ;;  %v1937_v17 = vrot.slane %v1307_v51, 5  ;;  %3748 = vmatprep.subr.bf16.mxu1 %v5876_v54  ;;  %3418 = vmatprep.subr.bf16.mxu0 %v5876_v54 }
 0x13c   : > { %v1027_v19 = vpack.c.bf16 %v996_v8, %v995_v52  ;;  %v759_v21 = vadd.f32 %v5810_v46, %v718_v10  ;;  %v719_v22 = vmul.f32 %v5805_v44, %v587_v15  ;;  %v4860_v23 = vpop.f32.mrb[31].mxu0  ;;  %v6000_v24 = vsel %vm1161_vm3, %v1171_v62, %v1173_v6  ;;  %v5325_v62 = vld [vmem:[%s6945_s5 + $0x1a0] sm:$0xff]  }
 0x13d   : > { %v1310_v25 = vor.u32 %v1309_v53, %v1306_v16  ;;  %v1938_v26 = vor.u32 %v1937_v17, %v1934_v14  ;;  %v1809_v55 = vsel %vm1055_vm1, %v1806_v9, %v1808_v7  ;;  %v5342_v53 = vld [vmem:[%s6945_s5 + $0xc8] sm:$0xff]  }
 0x13e   : > { %v1067_v60 = vrot.slane %v1027_v19, 4  ;;  %v793_v63 = vmax.f32 %v759_v21, 0.0  ;;  %v760_v13 = vadd.f32 %v5810_v46, %v719_v22  ;;  %3749 = vmatpush1.bf16.msra.mxu1 %v5324_v45  ;;  %3419 = vmatpush1.bf16.msra.mxu0 %v5339_v18 }
 0x13f   : > { %v1311_v27 = vsel %vm1249_vm2, %v1301_v28, %v1310_v25  ;;  %v1939_v0 = vsel %vm1886_vm4, %v1929_v30, %v1938_v26  ;;  %3750 = vmatprep.subr.bf16.mxu1 %v5876_v54  ;;  %3420 = vmatprep.subr.bf16.mxu0 %v5876_v54 }
 0x140   : > { %v6019_v9 = vsel %vm1055_vm1, %v1065_v56, %v1067_v60  ;;  %v794_v5 = vmax.f32 %v760_v13, 0.0  ;;  %3637 = vmatprep.mubr.bf16.mxu1 %v1939_v0  ;;  %3300 = vmatmul.mubr.bf16.gmra.mrb[84].mxu0 %v5955_v29  ;;  %v997_v56 = vmul.f32 %v5800_v43, %v793_v63  ;;  %v5326_v29 = vld [vmem:[%s6945_s5 + $0x1a8] sm:$0xff]  }
 0x141   : > { %1113 = vst [vmem:[#allocation2 + $0x38] sm:$0xff] %v6019_v9  ;;  %v592_v4 = vpop.f32.mrb[32].mxu0  ;;  %3638 = vmatmul.mubr.bf16.gmra.mrb[8].mxu1 %v1809_v55  ;;  %v1313_v28 = vshrl.u32 %v6019_v9, 16  ;;  %v1316_v30 = vshll.u32 %v6019_v9, 16  ;;  %v1175_v61 = vrot.slane %v6019_v9, 3  ;;  %v1810_v49 = vrot.slane %v6019_v9, 4  ;;  %3307 = vmatprep.mubr.bf16.mxu0 %v1311_v27 }
 0x142   : > { %v998_v51 = vmul.f32 %v5798_v42, %v794_v5  ;;  %v720_v52 = vmul.f32 %v5805_v44, %v592_v4  ;;  %v4863_v8 = vpop.f32.mrb[33].mxu0  ;;  %3751 = vmatpush1.bf16.msra.mxu1 %v5325_v62  ;;  %3421 = vmatpush1.bf16.msra.mxu0 %v5340_v2  ;;  %v5346_v9 = vld [vmem:[%s6945_s5 + $0xe0] sm:$0xff]  }
 0x143   : > { %v595_v10 = vpop.f32.mrb[34].mxu0  ;;  %v1315_v12 = vrot.slane %v1313_v28, 3  ;;  %v1318_v45 = vrot.slane %v1316_v30, 4  ;;  %v1943_v15 = vrot.slane %v1313_v28, 4  ;;  %v1946_v16 = vrot.slane %v1316_v30, 5  ;;  %3752 = vmatprep.subr.bf16.mxu1 %v5876_v54  ;;  %3422 = vmatprep.subr.bf16.mxu0 %v5876_v54 }
 0x144   : > { %v1028_v14 = vpack.c.bf16 %v998_v51, %v997_v56  ;;  %v761_v17 = vadd.f32 %v5810_v46, %v720_v52  ;;  %v721_v18 = vmul.f32 %v5805_v44, %v595_v10  ;;  %v4864_v19 = vpop.f32.mrb[35].mxu0  ;;  %v6045_v21 = vsel %vm1161_vm3, %v1173_v6, %v1175_v61  ;;  %v5328_v6 = vld [vmem:[%s6945_s5 + $0x1b0] sm:$0xff]  }
 0x145   : > { %v1319_v22 = vor.u32 %v1318_v45, %v1315_v12  ;;  %v1947_v23 = vor.u32 %v1946_v16, %v1943_v15  ;;  %v1811_v55 = vsel %vm1055_vm1, %v1808_v7, %v1810_v49  ;;  %v5345_v45 = vld [vmem:[%s6945_s5 + $0xd8] sm:$0xff]  }
 0x146   : > { %v1069_v63 = vrot.slane %v1028_v14, 4  ;;  %v795_v13 = vmax.f32 %v761_v17, 0.0  ;;  %v762_v62 = vadd.f32 %v5810_v46, %v721_v18  ;;  %3753 = vmatpush1.bf16.msra.mxu1 %v5326_v29  ;;  %3423 = vmatpush1.bf16.msra.mxu0 %v5342_v53 }
 0x147   : > { %v1320_v27 = vsel %vm1249_vm2, %v1310_v25, %v1319_v22  ;;  %v1948_v0 = vsel %vm1886_vm4, %v1938_v26, %v1947_v23  ;;  %3754 = vmatprep.subr.bf16.mxu1 %v5876_v54  ;;  %3424 = vmatprep.subr.bf16.mxu0 %v5876_v54 }
 0x148   : > { %v6064_v7 = vsel %vm1055_vm1, %v1067_v60, %v1069_v63  ;;  %v796_v2 = vmax.f32 %v762_v62, 0.0  ;;  %3645 = vmatprep.mubr.bf16.mxu1 %v1948_v0  ;;  %3308 = vmatmul.mubr.bf16.gmra.mrb[88].mxu0 %v6000_v24  ;;  %v999_v60 = vmul.f32 %v5815_v50, %v795_v13  ;;  %v5330_v24 = vld [vmem:[%s6945_s5 + $0x1b8] sm:$0xff]  }
 0x149   : > { %1114 = vst [vmem:[#allocation2 + $0x40] sm:$0xff] %v6064_v7  ;;  %v600_v5 = vpop.f32.mrb[36].mxu0  ;;  %3646 = vmatmul.mubr.bf16.gmra.mrb[12].mxu1 %v1811_v55  ;;  %v1322_v25 = vshrl.u32 %v6064_v7, 16  ;;  %v1325_v26 = vshll.u32 %v6064_v7, 16  ;;  %v1177_v4 = vrot.slane %v6064_v7, 3  ;;  %v1812_v28 = vrot.slane %v6064_v7, 4  ;;  %3315 = vmatprep.mubr.bf16.mxu0 %v1320_v27 }
 0x14a   : > { %v1000_v30 = vmul.f32 %v5812_v47, %v796_v2  ;;  %v722_v56 = vmul.f32 %v5805_v44, %v600_v5  ;;  %v4867_v51 = vpop.f32.mrb[37].mxu0  ;;  %3755 = vmatpush1.bf16.msra.mxu1 %v5328_v6  ;;  %3425 = vmatpush1.bf16.msra.mxu0 %v5343_v11  ;;  %v6114_v5 = vpop.permute.xlu0 %905  ;;  %v5349_v7 = vld [vmem:[%s6945_s5 + $0xf0] sm:$0xff]  }
 0x14b   : > { %v603_v52 = vpop.f32.mrb[38].mxu0  ;;  %v1324_v8 = vrot.slane %v1322_v25, 3  ;;  %v1327_v29 = vrot.slane %v1325_v26, 4  ;;  %v1952_v10 = vrot.slane %v1322_v25, 4  ;;  %v1955_v12 = vrot.slane %v1325_v26, 5  ;;  %3756 = vmatprep.subr.bf16.mxu1 %v5876_v54  ;;  %3426 = vmatprep.subr.bf16.mxu0 %v5876_v54  ;;  %6987 = vst [vmem:[#allocation11_spill] sm:$0xff] %v6114_v5 }
 0x14c   : > { %v1029_v15 = vpack.c.bf16 %v1000_v30, %v999_v60  ;;  %v763_v16 = vadd.f32 %v5810_v46, %v722_v56  ;;  %v723_v53 = vmul.f32 %v5805_v44, %v603_v52  ;;  %v4868_v14 = vpop.f32.mrb[39].mxu0  ;;  %v6090_v17 = vsel %vm1161_vm3, %v1175_v61, %v1177_v4  ;;  %v5332_v61 = vld [vmem:[%s6945_s5 + $0x1c0] sm:$0xff]  }
 0x14d   : > { %v1328_v18 = vor.u32 %v1327_v29, %v1324_v8  ;;  %v1956_v19 = vor.u32 %v1955_v12, %v1952_v10  ;;  %v1813_v55 = vsel %vm1055_vm1, %v1810_v49, %v1812_v28  ;;  %v6108_v49 = vpop.permute.xlu1 %910  ;;  %v5348_v12 = vld [vmem:[%s6945_s5 + $0xe8] sm:$0xff]  }
 0x14e   : > { %v1071_v13 = vrot.slane %v1029_v15, 4  ;;  %v797_v62 = vmax.f32 %v763_v16, 0.0  ;;  %v764_v6 = vadd.f32 %v5810_v46, %v723_v53  ;;  %3757 = vmatpush1.bf16.msra.mxu1 %v5330_v24  ;;  %3427 = vmatpush1.bf16.msra.mxu0 %v5345_v45  ;;  %6986 = vst [vmem:[#allocation10_spill] sm:$0xff] %v6108_v49 }
 0x14f   : > { %v1329_v27 = vsel %vm1249_vm2, %v1319_v22, %v1328_v18  ;;  %v1957_v0 = vsel %vm1886_vm4, %v1947_v23, %v1956_v19  ;;  %3758 = vmatprep.subr.bf16.mxu1 %v5876_v54  ;;  %3428 = vmatprep.subr.bf16.mxu0 %v5876_v54 }
 0x150   : > { %v6111_v11 = vsel %vm1055_vm1, %v1069_v63, %v1071_v13  ;;  %v798_v2 = vmax.f32 %v764_v6, 0.0  ;;  %3653 = vmatprep.mubr.bf16.mxu1 %v1957_v0  ;;  %3316 = vmatmul.mubr.bf16.gmra.mrb[92].mxu0 %v6045_v21  ;;  %v1001_v60 = vmul.f32 %v6114_v5, %v797_v62  ;;  %v5335_v21 = vld [vmem:[%s6945_s5 + $0x1c8] sm:$0xff]  }
 0x151   : > { %1115 = vst [vmem:[#allocation2 + $0x48] sm:$0xff] %v6111_v11  ;;  %v608_v22 = vpop.f32.mrb[40].mxu0  ;;  %3654 = vmatmul.mubr.bf16.gmra.mrb[16].mxu1 %v1813_v55  ;;  %v1331_v23 = vshrl.u32 %v6111_v11, 16  ;;  %v1334_v25 = vshll.u32 %v6111_v11, 16  ;;  %v1179_v26 = vrot.slane %v6111_v11, 3  ;;  %v1814_v63 = vrot.slane %v6111_v11, 4  ;;  %3323 = vmatprep.mubr.bf16.mxu0 %v1329_v27 }
 0x152   : > { %v1002_v30 = vmul.f32 %v6108_v49, %v798_v2  ;;  %v724_v56 = vmul.f32 %v5805_v44, %v608_v22  ;;  %v4871_v51 = vpop.f32.mrb[41].mxu0  ;;  %3759 = vmatpush1.bf16.msra.mxu1 %v5332_v61  ;;  %3429 = vmatpush1.bf16.msra.mxu0 %v5346_v9 }
 0x153   : > { %v611_v24 = vpop.f32.mrb[42].mxu0  ;;  %v1333_v52 = vrot.slane %v1331_v23, 3  ;;  %v1336_v8 = vrot.slane %v1334_v25, 4  ;;  %v1961_v29 = vrot.slane %v1331_v23, 4  ;;  %v1964_v10 = vrot.slane %v1334_v25, 5  ;;  %3760 = vmatprep.subr.bf16.mxu1 %v5876_v54  ;;  %3430 = vmatprep.subr.bf16.mxu0 %v5876_v54  ;;  %v6163_v25 = vpop.permute.xlu0 %915 }
 0x154   : > { %v1030_v45 = vpack.c.bf16 %v1002_v30, %v1001_v60  ;;  %v765_v15 = vadd.f32 %v5810_v46, %v724_v56  ;;  %v725_v16 = vmul.f32 %v5805_v44, %v611_v24  ;;  %v4872_v53 = vpop.f32.mrb[43].mxu0  ;;  %v6139_v14 = vsel %vm1161_vm3, %v1177_v4, %v1179_v26  ;;  %v5338_v4 = vld [vmem:[%s6945_s5 + $0x1d0] sm:$0xff]   ;;  %6989 = vst [vmem:[#allocation13_spill] sm:$0xff] %v6163_v25 }
 0x155   : > { %v1337_v55 = vor.u32 %v1336_v8, %v1333_v52  ;;  %v1965_v62 = vor.u32 %v1964_v10, %v1961_v29  ;;  %v1815_v6 = vsel %vm1055_vm1, %v1812_v28, %v1814_v63  ;;  %v6157_v28 = vpop.permute.xlu1 %920 }
 0x156   : > { %v1073_v61 = vrot.slane %v1030_v45, 4  ;;  %v799_v27 = vmax.f32 %v765_v15, 0.0  ;;  %v766_v0 = vadd.f32 %v5810_v46, %v725_v16  ;;  %3761 = vmatpush1.bf16.msra.mxu1 %v5335_v21  ;;  %3431 = vmatpush1.bf16.msra.mxu0 %v5348_v12  ;;  %6988 = vst [vmem:[#allocation12_spill] sm:$0xff] %v6157_v28  ;;  %v5351_v45 = vld [vmem:[%s6945_s5 + $0xf8] sm:$0xff]  }
 0x157   : > { %v1338_v9 = vsel %vm1249_vm2, %v1328_v18, %v1337_v55  ;;  %v1966_v2 = vsel %vm1886_vm4, %v1956_v19, %v1965_v62  ;;  %3762 = vmatprep.subr.bf16.mxu1 %v5876_v54  ;;  %3432 = vmatprep.subr.bf16.mxu0 %v5876_v54 }
 0x158   : > { %v6160_v22 = vsel %vm1055_vm1, %v1071_v13, %v1073_v61  ;;  %v800_v23 = vmax.f32 %v766_v0, 0.0  ;;  %3661 = vmatprep.mubr.bf16.mxu1 %v1966_v2  ;;  %3324 = vmatmul.mubr.bf16.gmra.mrb[96].mxu0 %v6090_v17  ;;  %v1003_v56 = vmul.f32 %v6163_v25, %v799_v27  ;;  %v5341_v17 = vld [vmem:[%s6945_s5 + $0x1d8] sm:$0xff]  }
 0x159   : > { %1116 = vst [vmem:[#allocation2 + $0x50] sm:$0xff] %v6160_v22  ;;  %v616_v18 = vpop.f32.mrb[44].mxu0  ;;  %3662 = vmatmul.mubr.bf16.gmra.mrb[20].mxu1 %v1815_v6  ;;  %v1340_v19 = vshrl.u32 %v6160_v22, 16  ;;  %v1343_v60 = vshll.u32 %v6160_v22, 16  ;;  %v1181_v30 = vrot.slane %v6160_v22, 3  ;;  %v1816_v13 = vrot.slane %v6160_v22, 4  ;;  %3331 = vmatprep.mubr.bf16.mxu0 %v1338_v9 }
 0x15a   : > { %v1004_v51 = vmul.f32 %v6157_v28, %v800_v23  ;;  %v726_v21 = vmul.f32 %v5805_v44, %v616_v18  ;;  %v4875_v24 = vpop.f32.mrb[45].mxu0  ;;  %3763 = vmatpush1.bf16.msra.mxu1 %v5338_v4  ;;  %3433 = vmatpush1.bf16.msra.mxu0 %v5349_v7 }
 0x15b   : > { %v619_v52 = vpop.f32.mrb[46].mxu0  ;;  %v1342_v8 = vrot.slane %v1340_v19, 3  ;;  %v1345_v29 = vrot.slane %v1343_v60, 4  ;;  %v1970_v10 = vrot.slane %v1340_v19, 4  ;;  %v1973_v12 = vrot.slane %v1343_v60, 5  ;;  %3764 = vmatprep.subr.bf16.mxu1 %v5876_v54  ;;  %3434 = vmatprep.subr.bf16.mxu0 %v5876_v54  ;;  %v6203_v60 = vpop.permute.xlu1 %930 }
 0x15c   : > { %v1031_v15 = vpack.c.bf16 %v1004_v51, %v1003_v56  ;;  %v767_v16 = vadd.f32 %v5810_v46, %v726_v21  ;;  %v727_v53 = vmul.f32 %v5805_v44, %v619_v52  ;;  %v4876_v6 = vpop.f32.mrb[47].mxu0  ;;  %v6188_v27 = vsel %vm1161_vm3, %v1179_v26, %v1181_v30  ;;  %v5344_v26 = vld [vmem:[%s6945_s5 + $0x1e0] sm:$0xff]   ;;  %6990 = vst [vmem:[#allocation14_spill] sm:$0xff] %v6203_v60  ;;  %v6209_v56 = vpop.permute.xlu0 %925 }
 0x15d   : > { %v1346_v0 = vor.u32 %v1345_v29, %v1342_v8  ;;  %v1974_v4 = vor.u32 %v1973_v12, %v1970_v10  ;;  %v1817_v9 = vsel %vm1055_vm1, %v1814_v63, %v1816_v13  ;;  %6991 = vst [vmem:[#allocation15_spill] sm:$0xff] %v6209_v56 }
 0x15e   : > { %v1075_v2 = vrot.slane %v1031_v15, 4  ;;  %v801_v7 = vmax.f32 %v767_v16, 0.0  ;;  %v768_v23 = vadd.f32 %v5810_v46, %v727_v53  ;;  %3765 = vmatpush1.bf16.msra.mxu1 %v5341_v17  ;;  %3435 = vmatpush1.bf16.msra.mxu0 %v5351_v45 }
 0x15f   : > { %v1347_v18 = vsel %vm1249_vm2, %v1337_v55, %v1346_v0  ;;  %v1975_v19 = vsel %vm1886_vm4, %v1965_v62, %v1974_v4  ;;  %3766 = vmatprep.subr.bf16.mxu1 %v5876_v54  ;;  %3573 = vmatprep.subr.bf16.mxu0 %v5876_v54 }
 0x160   : > { %v6206_v11 = vsel %vm1055_vm1, %v1073_v61, %v1075_v2  ;;  %v802_v63 = vmax.f32 %v768_v23, 0.0  ;;  %3669 = vmatprep.mubr.bf16.mxu1 %v1975_v19  ;;  %3332 = vmatmul.mubr.bf16.gmra.mrb[100].mxu0 %v6139_v14  ;;  %v1005_v24 = vmul.f32 %v6209_v56, %v801_v7  ;;  %v5347_v14 = vld [vmem:[%s6945_s5 + $0x1e8] sm:$0xff]  }
 0x161   : > { %1117 = vst [vmem:[#allocation2 + $0x58] sm:$0xff] %v6206_v11  ;;  %v624_v51 = vpop.f32.mrb[48].mxu0  ;;  %3670 = vmatmul.mubr.bf16.gmra.mrb[24].mxu1 %v1817_v9  ;;  %v1349_v55 = vshrl.u32 %v6206_v11, 16  ;;  %v1352_v62 = vshll.u32 %v6206_v11, 16  ;;  %v1183_v21 = vrot.slane %v6206_v11, 3  ;;  %v1818_v61 = vrot.slane %v6206_v11, 4  ;;  %3339 = vmatprep.mubr.bf16.mxu0 %v1347_v18 }
 0x162   : > { %v1006_v17 = vmul.f32 %v6203_v60, %v802_v63  ;;  %v728_v52 = vmul.f32 %v5805_v44, %v624_v51  ;;  %v4879_v8 = vpop.f32.mrb[49].mxu0  ;;  %3767 = vmatpush1.bf16.msra.mxu1 %v5344_v26 }
 0x163   : > { %v627_v29 = vpop.f32.mrb[50].mxu0  ;;  %v1351_v10 = vrot.slane %v1349_v55, 3  ;;  %v1354_v12 = vrot.slane %v1352_v62, 4  ;;  %v1979_v45 = vrot.slane %v1349_v55, 4  ;;  %v1982_v15 = vrot.slane %v1352_v62, 5  ;;  %3768 = vmatprep.subr.bf16.mxu1 %v5876_v54  ;;  %v5350_v55 = vld [vmem:[%s6945_s5 + $0x1f0] sm:$0xff]  }
 0x164   : > { %v1032_v16 = vpack.c.bf16 %v1006_v17, %v1005_v24  ;;  %v769_v53 = vadd.f32 %v5810_v46, %v728_v52  ;;  %v729_v6 = vmul.f32 %v5805_v44, %v627_v29  ;;  %v4880_v9 = vpop.f32.mrb[51].mxu0  ;;  %v1184_v7 = vsel %vm1161_vm3, %v1181_v30, %v1183_v21  ;;  %v6243_v24 = vpop.permute.xlu1 %940 }
 0x165   : > { %v1355_v23 = vor.u32 %v1354_v12, %v1351_v10  ;;  %v1983_v26 = vor.u32 %v1982_v15, %v1979_v45  ;;  %v1819_v18 = vsel %vm1055_vm1, %v1816_v13, %v1818_v61  ;;  %6992 = vst [vmem:[#allocation16_spill] sm:$0xff] %v6243_v24  ;;  %v6248_v17 = vpop.permute.xlu0 %935  ;;  %v6266_v9 = vld [vmem:[%s6944_s4] ss:$0 sm:$0xff] }
 0x166   : > { %v1077_v19 = vrot.slane %v1032_v16, 4  ;;  %v803_v63 = vmax.f32 %v769_v53, 0.0  ;;  %v770_v51 = vadd.f32 %v5810_v46, %v729_v6  ;;  %3769 = vmatpush1.bf16.msra.mxu1 %v5347_v14  ;;  %6993 = vst [vmem:[#allocation17_spill] sm:$0xff] %v6248_v17 }
 0x167   : > { %v1356_v62 = vsel %vm1249_vm2, %v1346_v0, %v1355_v23  ;;  %v1984_v30 = vsel %vm1886_vm4, %v1974_v4, %v1983_v26  ;;  %3770 = vmatprep.subr.bf16.mxu1 %v5876_v54 }
 0x168   : > { %v6246_v22 = vsel %vm1055_vm1, %v1075_v2, %v1077_v19  ;;  %v804_v13 = vmax.f32 %v770_v51, 0.0  ;;  %3677 = vmatprep.mubr.bf16.mxu1 %v1984_v30  ;;  %3340 = vmatmul.mubr.bf16.gmra.mrb[104].mxu0 %v6188_v27  ;;  %v1007_v2 = vmul.f32 %v6248_v17, %v803_v63  ;;  %v5352_v27 = vld [vmem:[%s6945_s5 + $0x1f8] sm:$0xff]  }
 0x169   : > { %1118 = vst [vmem:[#allocation2 + $0x60] sm:$0xff] %v6246_v22  ;;  %v632_v46 = vpop.f32.mrb[52].mxu0  ;;  %3678 = vmatmul.mubr.bf16.gmra.mrb[28].mxu1 %v1819_v18  ;;  %v1358_v0 = vshrl.u32 %v6246_v22, 16  ;;  %v1361_v4 = vshll.u32 %v6246_v22, 16  ;;  %v1185_v52 = vrot.slane %v6246_v22, 3  ;;  %v1820_v8 = vrot.slane %v6246_v22, 4  ;;  %3347 = vmatprep.mubr.bf16.mxu0 %v1356_v62  ;;  %v6290_v11 = vpop.permute.xlu0 %945 }
 0x16a   : > { %v1008_v14 = vmul.f32 %v6243_v24, %v804_v13  ;;  %v730_v29 = vmul.f32 %v5805_v44, %v632_v46  ;;  %v4883_v10 = vpop.f32.mrb[53].mxu0  ;;  %3771 = vmatpush1.bf16.msra.mxu1 %v5350_v55  ;;  %v6272_v18 = vld [vmem:[%s6943_s3] ss:$0 sm:$0xff]  ;;  %6995 = vst [vmem:[#allocation19_spill] sm:$0xff] %v6290_v11 }
 0x16b   : > { %v635_v12 = vpop.f32.mrb[54].mxu0  ;;  %v1360_v45 = vrot.slane %v1358_v0, 3  ;;  %v1363_v15 = vrot.slane %v1361_v4, 4  ;;  %v1988_v16 = vrot.slane %v1358_v0, 4  ;;  %v1991_v53 = vrot.slane %v1361_v4, 5  ;;  %3772 = vmatprep.subr.bf16.mxu1 %v5876_v54 }
 0x16c   : > { %v1033_v6 = vpack.c.bf16 %v1008_v14, %v1007_v2  ;;  %v771_v44 = vadd.f32 %v6266_v9, %v730_v29  ;;  %v731_v63 = vmul.f32 %v6272_v18, %v635_v12  ;;  %v4884_v51 = vpop.f32.mrb[55].mxu0  ;;  %v1186_v54 = vsel %vm1161_vm3, %v1183_v21, %v1185_v52  ;;  %v6285_v2 = vpop.permute.xlu1 %950 }
 0x16d   : > { %v1364_v55 = vor.u32 %v1363_v15, %v1360_v45  ;;  %v1992_v62 = vor.u32 %v1991_v53, %v1988_v16  ;;  %v1821_v30 = vsel %vm1055_vm1, %v1818_v61, %v1820_v8  ;;  %6994 = vst [vmem:[#allocation18_spill] sm:$0xff] %v6285_v2 }
 0x16e   : > { %v1079_v22 = vrot.slane %v1033_v6, 4  ;;  %v805_v13 = vmax.f32 %v771_v44, 0.0  ;;  %v772_v46 = vadd.f32 %v6266_v9, %v731_v63  ;;  %3773 = vmatpush1.bf16.msra.mxu1 %v5352_v27 }
 0x16f   : > { %v1365_v0 = vsel %vm1249_vm2, %v1355_v23, %v1364_v55  ;;  %v1993_v4 = vsel %vm1886_vm4, %v1983_v26, %v1992_v62  ;;  %4897 = vmatprep.subr.bf16.mxu1 %v6949_v1 }
 0x170   : > { %v6288_v21 = vsel %vm1055_vm1, %v1077_v19, %v1079_v22  ;;  %v806_v14 = vmax.f32 %v772_v46, 0.0  ;;  %3685 = vmatprep.mubr.bf16.mxu1 %v1993_v4  ;;  %3348 = vmatmul.mubr.bf16.gmra.mrb[108].mxu0 %v1184_v7  ;;  %v1009_v19 = vmul.f32 %v6290_v11, %v805_v13  ;;  %v6388_v11 = vld [vmem:[#allocation2 + $0x20] sm:$0xff] }
 0x171   : > { %1119 = vst [vmem:[#allocation2 + $0x68] sm:$0xff] %v6288_v21  ;;  %v640_v61 = vpop.f32.mrb[56].mxu0  ;;  %3686 = vmatmul.mubr.bf16.gmra.mrb[32].mxu1 %v1821_v30  ;;  %v1367_v23 = vshrl.u32 %v6288_v21, 16  ;;  %v1370_v26 = vshll.u32 %v6288_v21, 16  ;;  %v1187_v29 = vrot.slane %v6288_v21, 3  ;;  %v1822_v10 = vrot.slane %v6288_v21, 4  ;;  %3355 = vmatprep.mubr.bf16.mxu0 %v1365_v0 }
 0x172   : > { %v1010_v27 = vmul.f32 %v6285_v2, %v806_v14  ;;  %v732_v12 = vmul.f32 %v6272_v18, %v640_v61  ;;  %v4887_v45 = vpop.f32.mrb[57].mxu0 }
 0x173   : > { %v643_v15 = vpop.f32.mrb[58].mxu0  ;;  %v1369_v16 = vrot.slane %v1367_v23, 3  ;;  %v1372_v7 = vrot.slane %v1370_v26, 4  ;;  %v1997_v53 = vrot.slane %v1367_v23, 4  ;;  %v2000_v6 = vrot.slane %v1370_v26, 5  ;;  %v6307_v26 = vpop.permute.xlu1 %960 }
 0x174   : > { %v1034_v44 = vpack.c.bf16 %v1010_v27, %v1009_v19  ;;  %v773_v63 = vadd.f32 %v6266_v9, %v732_v12  ;;  %v733_v51 = vmul.f32 %v6272_v18, %v643_v15  ;;  %v4888_v30 = vpop.f32.mrb[59].mxu0  ;;  %v1188_v46 = vsel %vm1161_vm3, %v1185_v52, %v1187_v29  ;;  %6996 = vst [vmem:[#allocation20_spill] sm:$0xff] %v6307_v26  ;;  %v6312_v52 = vpop.permute.xlu0 %955 }
 0x175   : > { %v1373_v13 = vor.u32 %v1372_v7, %v1369_v16  ;;  %v2001_v4 = vor.u32 %v2000_v6, %v1997_v53  ;;  %v1823_v21 = vsel %vm1055_vm1, %v1820_v8, %v1822_v10  ;;  %6997 = vst [vmem:[#allocation21_spill] sm:$0xff] %v6312_v52 }
 0x176   : > { %v1081_v14 = vrot.slane %v1034_v44, 4  ;;  %v807_v61 = vmax.f32 %v773_v63, 0.0  ;;  %v774_v0 = vadd.f32 %v6266_v9, %v733_v51 }
 0x177   : > { %v1374_v45 = vsel %vm1249_vm2, %v1364_v55, %v1373_v13  ;;  %v2002_v23 = vsel %vm1886_vm4, %v1992_v62, %v2001_v4 }
 0x178   : > { %v6310_v19 = vsel %vm1055_vm1, %v1079_v22, %v1081_v14  ;;  %v808_v27 = vmax.f32 %v774_v0, 0.0  ;;  %3693 = vmatprep.mubr.bf16.mxu1 %v2002_v23  ;;  %3356 = vmatmul.mubr.bf16.gmra.mrb[112].mxu0 %v1186_v54  ;;  %v1011_v22 = vmul.f32 %v6312_v52, %v807_v61 }
 0x179   : > { %1120 = vst [vmem:[#allocation2 + $0x70] sm:$0xff] %v6310_v19  ;;  %v648_v8 = vpop.f32.mrb[60].mxu0  ;;  %3694 = vmatmul.mubr.bf16.gmra.mrb[36].mxu1 %v1823_v21  ;;  %v1376_v12 = vshrl.u32 %v6310_v19, 16  ;;  %v1379_v55 = vshll.u32 %v6310_v19, 16  ;;  %v1189_v62 = vrot.slane %v6310_v19, 3  ;;  %v1824_v15 = vrot.slane %v6310_v19, 4  ;;  %3363 = vmatprep.mubr.bf16.mxu0 %v1374_v45 }
 0x17a   : > { %v1012_v16 = vmul.f32 %v6307_v26, %v808_v27  ;;  %v734_v7 = vmul.f32 %v6272_v18, %v648_v8  ;;  %v4891_v53 = vpop.f32.mrb[61].mxu0 }
 0x17b   : > { %v651_v6 = vpop.f32.mrb[62].mxu0  ;;  %v1378_v44 = vrot.slane %v1376_v12, 3  ;;  %v1381_v54 = vrot.slane %v1379_v55, 4  ;;  %v2006_v63 = vrot.slane %v1376_v12, 4  ;;  %v2009_v51 = vrot.slane %v1379_v55, 5  ;;  %v6329_v55 = vpop.permute.xlu1 %970 }
 0x17c   : > { %v1035_v30 = vpack.c.bf16 %v1012_v16, %v1011_v22  ;;  %v775_v21 = vadd.f32 %v6266_v9, %v734_v7  ;;  %v735_v0 = vmul.f32 %v6272_v18, %v651_v6  ;;  %v4892_v23 = vpop.f32.mrb[63].mxu0  ;;  %v1190_v19 = vsel %vm1161_vm3, %v1187_v29, %v1189_v62  ;;  %6998 = vst [vmem:[#allocation22_spill] sm:$0xff] %v6329_v55  ;;  %v6332_v7 = vpop.permute.xlu0 %965 }
 0x17d   : > { %v1382_v61 = vor.u32 %v1381_v54, %v1378_v44  ;;  %v2010_v58 = vor.u32 %v2009_v51, %v2006_v63  ;;  %v1825_v27 = vsel %vm1055_vm1, %v1822_v10, %v1824_v15  ;;  %6999 = vst [vmem:[#allocation23_spill] sm:$0xff] %v6332_v7 }
 0x17e   : > { %v1083_v8 = vrot.slane %v1035_v30, 4  ;;  %v809_v53 = vmax.f32 %v775_v21, 0.0  ;;  %v776_v45 = vadd.f32 %v6266_v9, %v735_v0 }
 0x17f   : > { %v1383_v1 = vsel %vm1249_vm2, %v1373_v13, %v1382_v61  ;;  %v2011_v12 = vsel %vm1886_vm4, %v2001_v4, %v2010_v58 }
 0x180   : > { %v1084_v22 = vsel %vm1055_vm1, %v1081_v14, %v1083_v8  ;;  %v810_v16 = vmax.f32 %v776_v45, 0.0  ;;  %3701 = vmatprep.mubr.bf16.mxu1 %v2011_v12  ;;  %3364 = vmatmul.mubr.bf16.gmra.mrb[116].mxu0 %v1188_v46  ;;  %v1013_v13 = vmul.f32 %v6332_v7, %v809_v53 }
 0x181   : > { %1121 = vst [vmem:[#allocation2 + $0x78] sm:$0xff] %v1084_v22  ;;  %v656_v29 = vpop.f32.mrb[64].mxu0  ;;  %3702 = vmatmul.mubr.bf16.gmra.mrb[40].mxu1 %v1825_v27  ;;  %v1385_v10 = vshrl.u32 %v1084_v22, 16  ;;  %v1388_v6 = vshll.u32 %v1084_v22, 16  ;;  %v1191_v44 = vrot.slane %v1084_v22, 3  ;;  %v1826_v54 = vrot.slane %v1084_v22, 4  ;;  %3371 = vmatprep.mubr.bf16.mxu0 %v1383_v1 }
 0x182   : > { %v1014_v4 = vmul.f32 %v6329_v55, %v810_v16  ;;  %v736_v63 = vmul.f32 %v6272_v18, %v656_v29  ;;  %v4895_v51 = vpop.f32.mrb[65].mxu0 }
 0x183   : > { %v659_v14 = vpop.f32.mrb[66].mxu0  ;;  %v1387_v30 = vrot.slane %v1385_v10, 3  ;;  %v1390_v21 = vrot.slane %v1388_v6, 4  ;;  %v2015_v0 = vrot.slane %v1385_v10, 4  ;;  %v2018_v23 = vrot.slane %v1388_v6, 5 }
 0x184   : > { %v1036_v45 = vpack.c.bf16 %v1014_v4, %v1013_v13  ;;  %v777_v46 = vadd.f32 %v6266_v9, %v736_v63  ;;  %v737_v27 = vmul.f32 %v6272_v18, %v659_v14  ;;  %v4896_v12 = vpop.f32.mrb[67].mxu0  ;;  %v1192_v22 = vsel %vm1161_vm3, %v1189_v62, %v1191_v44  ;;  %v6347_v18 = vpop.permute.xlu1 %980 }
 0x185   : > { %v1391_v53 = vor.u32 %v1390_v21, %v1387_v30  ;;  %v2019_v7 = vor.u32 %v2018_v23, %v2015_v0  ;;  %v1827_v16 = vsel %vm1055_vm1, %v1824_v15, %v1826_v54  ;;  %7000 = vst [vmem:[#allocation24_spill] sm:$0xff] %v6347_v18  ;;  %v6349_v62 = vpop.permute.xlu0 %975 }
 0x186   : > { %v1085_v29 = vrot.slane %v1036_v45, 4  ;;  %v811_v51 = vmax.f32 %v777_v46, 0.0  ;;  %v778_v1 = vadd.f32 %v6266_v9, %v737_v27  ;;  %7001 = vst [vmem:[#allocation25_spill] sm:$0xff] %v6349_v62 }
 0x187   : > { %v1392_v55 = vsel %vm1249_vm2, %v1382_v61, %v1391_v53  ;;  %v2020_v10 = vsel %vm1886_vm4, %v2010_v58, %v2019_v7 }
 0x188   : > { %v6345_v6 = vsel %vm1055_vm1, %v1083_v8, %v1085_v29  ;;  %v812_v13 = vmax.f32 %v778_v1, 0.0  ;;  %3709 = vmatprep.mubr.bf16.mxu1 %v2020_v10  ;;  %3372 = vmatmul.mubr.bf16.gmra.mrb[120].mxu0 %v1190_v19  ;;  %v1015_v8 = vmul.f32 %v6349_v62, %v811_v51 }
 0x189   : > { %1122 = vst [vmem:[#allocation2 + $0x80] sm:$0xff] %v6345_v6  ;;  %3710 = vmatmul.mubr.bf16.gmra.mrb[44].mxu1 %v1827_v16  ;;  %v1394_v15 = vshrl.u32 %v6345_v6, 16  ;;  %v1397_v9 = vshll.u32 %v6345_v6, 16  ;;  %v6953_v61 = vrot.slane %v6345_v6, 3  ;;  %v1828_v58 = vrot.slane %v6345_v6, 4  ;;  %3379 = vmatprep.mubr.bf16.mxu0 %v1392_v55  ;;  %v6367_v16 = vld [vmem:[#allocation2 + $0x10] sm:$0xff] }
 0x18a   : > { %v1016_v4 = vmul.f32 %v6347_v18, %v812_v13 }
 0x18b   : > { %v1396_v63 = vrot.slane %v1394_v15, 3  ;;  %v1399_v14 = vrot.slane %v1397_v9, 4  ;;  %v2024_v30 = vrot.slane %v1394_v15, 4  ;;  %v2027_v21 = vrot.slane %v1397_v9, 5  ;;  %v1550_v15 = vld [vmem:[#allocation2 + $0x8] sm:$0xf8] }
 0x18c   : > { %v1037_v0 = vpack.c.bf16 %v1016_v4, %v1015_v8  ;;  %v1194_v19 = vsel %vm1161_vm3, %v1191_v44, %v6953_v61  ;;  %v1829_v23 = vsel %vm1055_vm1, %v1826_v54, %v1828_v58  ;;  %v6958_v9 = vshll.u32 %v6367_v16, 16  ;;  %v2187_v4 = vld [vmem:[#allocation2 + $0x10] sm:$0xf0] }
 0x18d   : > { %v6362_v45 = vor.u32 %v1399_v14, %v1396_v63  ;;  %v2028_v46 = vor.u32 %v2027_v21, %v2024_v30  ;;  %v1569_v14 = vshrl.u32 %v1550_v15, 16  ;;  %v1572_v30 = vshll.u32 %v1550_v15, 16 }
 0x18e   : > { %v1087_v27 = vrot.slane %v1037_v0, 4 }
 0x18f   : > { %v1401_v12 = vsel %vm1249_vm2, %v1391_v53, %v6362_v45  ;;  %v2029_v55 = vsel %vm1886_vm4, %v2019_v7, %v2028_v46  ;;  %v6376_v53 = vld [vmem:[#allocation2 + $0x18] sm:$0xff]  ;;  %v6954_v7 = vshrl.u32 %v6367_v16, 16  ;;  %v1571_v18 = vrot.slane %v1569_v14, 3 }
 0x190   : > { %v6370_v51 = vsel %vm1055_vm1, %v1085_v29, %v1087_v27  ;;  %1124 = vst [vmem:[#allocation2 + $0x90] sm:$0xf] %v1087_v27  ;;  %3717 = vmatprep.mubr.bf16.mxu1 %v2029_v55  ;;  %3380 = vmatmul.mubr.bf16.gmra.mrb[124].mxu0 %v1192_v22  ;;  %v1586_v22 = vshrl.u32 %v6376_v53, 16  ;;  %v1589_v8 = vshll.u32 %v6376_v53, 16  ;;  %v2206_v27 = vshrl.u32 %v2187_v4, 16 }
 0x191   : > { %1123 = vst [vmem:[#allocation2 + $0x88] sm:$0xff] %v6370_v51  ;;  %3718 = vmatmul.mubr.bf16.gmra.mrb[48].mxu1 %v1829_v23  ;;  %v2031_v44 = vshrl.u32 %v6370_v51, 16  ;;  %v2034_v54 = vshll.u32 %v6370_v51, 16  ;;  %v1830_v1 = vrot.slane %v6370_v51, 4  ;;  %3387 = vmatprep.mubr.bf16.mxu0 %v1401_v12  ;;  %v1579_v21 = vrot.slane %v6954_v7, 3 }
 0x192   : > { %v1582_v23 = vrot.slane %v6958_v9, 4  ;;  %v2209_v12 = vshll.u32 %v2187_v4, 16  ;;  %v2219_v61 = vrot.slane %v1589_v8, 5  ;;  %v2208_v2 = vrot.slane %v2206_v27, 4 }
 0x193   : > { %v2033_v10 = vrot.slane %v2031_v44, 4  ;;  %v2036_v29 = vrot.slane %v2034_v54, 5  ;;  %v1831_v13 = vsel %vm1055_vm1, %v1828_v58, %v1830_v1  ;;  %v2216_v54 = vrot.slane %v1586_v22, 4 }
 0x194   : > { %v2211_v4 = vrot.slane %v2209_v12, 5  ;;  %v1598_v14 = vshll.u32 %v6388_v11, 16  ;;  %v7002_v12 = vrot.slane %v6345_v6, 3  ;;  %v2082_v6 = vld [vmem:[#allocation2 + $0x10] sm:$0xf0] }
 0x195   : > { %v2037_v63 = vor.u32 %v2036_v29, %v2033_v10  ;;  %v2220_v60 = vor.u32 %v2219_v61, %v2216_v54  ;;  %v1591_v61 = vrot.slane %v1589_v8, 4  ;;  %v5353_v54 = vld [vmem:[%s6945_s5 + $0x200] sm:$0xff]  }
 0x196   : > { %v2212_v27 = vor.u32 %v2211_v4, %v2208_v2 }
 0x197   : > { %v2038_v0 = vsel %vm1886_vm4, %v2028_v46, %v2037_v63  ;;  %v1885_v58 = vld [vmem:[#allocation2 + $0x90] sm:$0x1f]  ;;  %v1574_v46 = vrot.slane %v1572_v30, 4 }
 0x198   : > { %v1248_v55 = vld [vmem:[#allocation2 + $0x88] sm:$0xf]  ;;  %3725 = vmatprep.mubr.bf16.mxu1 %v2038_v0  ;;  %v2040_v51 = vshrl.u32 %v1885_v58, 16  ;;  %v2043_v44 = vshll.u32 %v1885_v58, 16  ;;  %3388 = vmatmul.mubr.bf16.gmra.mrb[128].mxu0 %v1194_v19  ;;  %v1780_v7 = vld [vmem:[#allocation2 + $0x90] sm:$0xf]  ;;  %v1583_v19 = vor.u32 %v1582_v23, %v1579_v21 }
 0x199   : > { %v1403_v10 = vshrl.u32 %v1248_v55, 16  ;;  %v1406_v29 = vshll.u32 %v1248_v55, 16  ;;  %v1142_v15 = vld [vmem:[#allocation2 + $0x88] sm:$0x7]  ;;  %3726 = vmatmul.mubr.bf16.gmra.mrb[52].mxu1 %v1831_v13  ;;  %v1832_v24 = vrot.slane %v1780_v7, 4  ;;  %v1595_v13 = vshrl.u32 %v6388_v11, 16 }
 0x19a   : > { %v2042_v62 = vrot.slane %v2040_v51, 4  ;;  %v2045_v26 = vrot.slane %v2043_v44, 5  ;;  %v1195_v0 = vrot.slane %v1142_v15, 3  ;;  %v1575_v51 = vor.u32 %v1574_v46, %v1571_v18 }
 0x19b   : > { %v1405_v9 = vrot.slane %v1403_v10, 3  ;;  %v1408_v52 = vrot.slane %v1406_v29, 4  ;;  %v2225_v2 = vrot.slane %v1595_v13, 4  ;;  %v2228_v18 = vrot.slane %v1598_v14, 5 }
 0x19c   : > { %v2046_v58 = vor.u32 %v2045_v26, %v2042_v62  ;;  %v1196_v26 = vsel %vm1161_vm3, %v7002_v12, %v1195_v0  ;;  %v1588_v62 = vrot.slane %v1586_v22, 3  ;;  %v1584_v7 = vsel %vm1249_vm2, %v1575_v51, %v1583_v19  ;;  %v6416_v51 = vld [vmem:[#allocation2 + $0x30] sm:$0xff] }
 0x19d   : > { %v1409_v17 = vor.u32 %v1408_v52, %v1405_v9  ;;  %v1833_v52 = vsel %vm1055_vm1, %v1830_v1, %v1832_v24  ;;  %v1445_v9 = vld [vmem:[#allocation2] sm:$0xf0]  ;;  %v6404_v1 = vrot.slane %v6376_v53, 4  ;;  %v2118_v44 = vrot.slane %v2082_v6, 4  ;;  %v5366_v6 = vld [vmem:[%s6945_s5 + $0x108] sm:$0xff]  }
 0x19e   : > { %v2047_v55 = vsel %vm1886_vm4, %v2037_v63, %v2046_v58  ;;  %v1446_v63 = vld [vmem:[#allocation2 + $0x8] sm:$0xff]  ;;  %v1481_v21 = vrot.slane %v1445_v9, 4  ;;  %v1592_v24 = vor.u32 %v1591_v61, %v1588_v62  ;;  %v2229_v10 = vor.u32 %v2228_v18, %v2225_v2  ;;  %v6429_v61 = vld [vmem:[#allocation2] sm:$0xff]  ;;  %v5355_v9 = vld [vmem:[%s6945_s5 + $0x210] sm:$0xff]  }
 0x19f   : > { %v1410_v30 = vsel %vm1249_vm2, %v6362_v45, %v1409_v17  ;;  %3733 = vmatprep.mubr.bf16.mxu1 %v2047_v55  ;;  %v2221_v17 = vsel %vm1886_vm4, %v2212_v27, %v2220_v60  ;;  %v6401_v45 = vld [vmem:[#allocation2 + $0x28] sm:$0xff]  ;;  %v1482_v23 = vrot.slane %v1446_v63, 4  ;;  %v2120_v46 = vsel %vm1055_vm1, %v2118_v44, %v6404_v1 }
 0x1a0   : > { %3395 = vmatprep.mubr.bf16.mxu0 %v1410_v30  ;;  %v1604_v22 = vshrl.u32 %v6401_v45, 16  ;;  %v1607_v8 = vshll.u32 %v6401_v45, 16  ;;  %v1593_v15 = vsel %vm1249_vm2, %v1583_v19, %v1592_v24  ;;  %v1597_v4 = vrot.slane %v1595_v13, 3  ;;  %v5354_v27 = vld [vmem:[%s6945_s5 + $0x208] sm:$0xff]  }
 0x1a1   : > { %3396 = vmatmul.mubr.bf16.gmra.mrb[132].mxu0 %v1196_v26  ;;  %3734 = vmatmul.mubr.bf16.gmra.mrb[56].mxu1 %v1833_v52  ;;  %v1483_v29 = vsel %vm1055_vm1, %v1481_v21, %v1482_v23  ;;  %v1600_v0 = vrot.slane %v1598_v14, 4  ;;  %v2230_v30 = vsel %vm1886_vm4, %v2220_v60, %v2229_v10  ;;  %v7003_v19 = vmov 0.0   ;;  %v5364_v14 = vld [vmem:[%s6945_s5 + $0x100] sm:$0xff]  }
 0x1a2   : > { %3436 = vmatprep.mubr.bf16.mxu0 %v1584_v7  ;;  %3774 = vmatprep.mubr.bf16.mxu1 %v2221_v17  ;;  %v2234_v58 = vrot.slane %v1604_v22, 4  ;;  %v2237_v55 = vrot.slane %v1607_v8, 5  ;;  %v1484_v12 = vrot.slane %v6367_v16, 4  ;;  %v2121_v13 = vrot.slane %v6388_v11, 4  ;;  %v6432_v7 = vld [vmem:[#allocation2 + $0x38] sm:$0xff] }
 0x1a3   : > { %v1601_v26 = vor.u32 %v1600_v0, %v1597_v4  ;;  %v1613_v52 = vshrl.u32 %v6416_v51, 16  ;;  %v1616_v62 = vshll.u32 %v6416_v51, 16  ;;  %v1606_v2 = vrot.slane %v1604_v22, 3 }
 0x1a4   : > { %v2238_v60 = vor.u32 %v2237_v55, %v2234_v58  ;;  %v1485_v63 = vsel %vm1055_vm1, %v1482_v23, %v1484_v12  ;;  %v6441_v17 = vsel %vm1055_vm1, %v6404_v1, %v2121_v13  ;;  %v1609_v18 = vrot.slane %v1607_v8, 4  ;;  %v5356_v8 = vld [vmem:[%s6945_s5 + $0x218] sm:$0xff]  }
 0x1a5   : > { %v1602_v21 = vsel %vm1249_vm2, %v1592_v24, %v1601_v26  ;;  %v2246_v23 = vrot.slane %v1616_v62, 5  ;;  %v6965_v22 = vshll.u32 %v6432_v7, 16  ;;  %v1618_v4 = vrot.slane %v1616_v62, 4 }
 0x1a6   : > { %v2239_v44 = vsel %vm1886_vm4, %v2229_v10, %v2238_v60  ;;  %v6455_v24 = vor.u32 %v1609_v18, %v1606_v2  ;;  %v5367_v10 = vld [vmem:[%s6945_s5 + $0x110] sm:$0xff]   ;;  %v1487_v62 = vsel %vm1055_vm1, %v1484_v12, %v6404_v1  ;;  %v5368_v1 = vld [vmem:[%s6945_s5 + $0x118] sm:$0xff]  }
 0x1a7   : > { %v2255_v55 = vrot.slane %v6965_v22, 5 }
 0x1a9   : > { %3437 = vmatmul.mubr.bf16.vlgmr.msra.gmra.mrb[68].mxu0 %v1483_v29  ;;  %3775 = vmatmul.mubr.bf16.vlgmr.msra.gmra.mrb[60].mxu1 %v2120_v46  ;;  %v6966_v29 = vshrl.u32 %v6432_v7, 16  ;;  %v1615_v46 = vrot.slane %v1613_v52, 3 }
 0x1aa   : > { %3444 = vmatprep.mubr.bf16.mxu0 %v1593_v15  ;;  %4898 = vmatpush3.bf16.msra.mxu1 %v5353_v54  ;;  %v2243_v54 = vrot.slane %v1613_v52, 4  ;;  %v6968_v15 = vrot.slane %v6401_v45, 4  ;;  %v5357_v52 = vld [vmem:[%s6945_s5 + $0x220] sm:$0xff]  }
 0x1ab   : > { %3782 = vmatprep.mubr.bf16.mxu1 %v2230_v30  ;;  %4899 = vmatprep.subr.bf16.mxu1 %v7003_v19  ;;  %v2252_v58 = vrot.slane %v6966_v29, 4  ;;  %v6469_v30 = vld [vmem:[#allocation2 + $0x48] sm:$0xff]  ;;  %v6499_v12 = vor.u32 %v1618_v4, %v1615_v46  ;;  %v2417_v46 = vld [vmem:[#allocation2 + $0x98] sm:$0x1f] }
 0x1ac   : > { %3574 = vmatpush1.bf16.msra.mxu0 %v5364_v14  ;;  %v6462_v0 = vor.u32 %v2246_v23, %v2243_v54  ;;  %v6473_v14 = vld [vmem:[#allocation2 + $0x40] sm:$0xff]  ;;  %v6487_v2 = vsel %vm1055_vm1, %v2121_v13, %v6968_v15  ;;  %v6967_v23 = vrot.slane %v6469_v30, 5  ;;  %v6514_v4 = vld [vmem:[#allocation2 + $0x88] sm:$0xff]  ;;  %v2470_v5 = vrot.slane %v2417_v46, 5 }
 0x1ad   : > { %3575 = vmatprep.subr.bf16.mxu0 %v6429_v61  ;;  %v6507_v54 = vld [vmem:[#allocation2 + $0x80] sm:$0xff] }
 0x1ae   : > { %4900 = vmatpush3.bf16.msra.mxu1 %v5354_v27  ;;  %v6471_v27 = vld [vmem:[#allocation2 + $0x50] sm:$0xff]  ;;  %v2248_v13 = vsel %vm1886_vm4, %v2238_v60, %v6462_v0  ;;  %v2464_v15 = vrot.slane %v6507_v54, 5 }
 0x1af   : > { %4901 = vmatprep.subr.bf16.mxu1 %v7003_v19  ;;  %v1652_v3 = vshll.u32 %v6471_v27, 16 }
 0x1b0   : > { %3576 = vmatpush1.bf16.msra.mxu0 %v5366_v6  ;;  %v6490_v6 = vld [vmem:[#allocation2 + $0x60] sm:$0xff] }
 0x1b1   : > { %3445 = vmatmul.mubr.bf16.gmra.mrb[72].mxu0 %v1485_v63  ;;  %3783 = vmatmul.mubr.bf16.gmra.mrb[64].mxu1 %v6441_v17  ;;  %v1611_v63 = vsel %vm1249_vm2, %v1601_v26, %v6455_v24  ;;  %v6503_v26 = vld [vmem:[#allocation2 + $0x70] sm:$0xff] }
 0x1b2   : > { %3452 = vmatprep.mubr.bf16.mxu0 %v1602_v21  ;;  %3790 = vmatprep.mubr.bf16.mxu1 %v2239_v44  ;;  %v6493_v21 = vld [vmem:[#allocation2 + $0x68] sm:$0xff]  ;;  %v6505_v44 = vld [vmem:[#allocation2 + $0x78] sm:$0xff]  ;;  %v2460_v29 = vrot.slane %v6503_v26, 5 }
 0x1b3   : > { %4902 = vmatpush3.bf16.msra.mxu1 %v5355_v9  ;;  %3577 = vmatprep.subr.bf16.mxu0 %v6429_v61  ;;  %v6475_v9 = vld [vmem:[#allocation2 + $0x58] sm:$0xff] }
 0x1b4   : > { %4903 = vmatprep.subr.bf16.mxu1 %v7003_v19  ;;  %3578 = vmatpush1.bf16.msra.mxu0 %v5367_v10  ;;  %v6511_v10 = vor.u32 %v2255_v55, %v2252_v58  ;;  %v2454_v60 = vrot.slane %v6475_v9, 5  ;;  %v2456_v55 = vrot.slane %v6490_v6, 5 }
 0x1b5   : > { %3579 = vmatprep.subr.bf16.mxu0 %v6429_v61 }
 0x1b6   : > { %v6543_v18 = vsel %vm2436_vm5, %v2454_v60, %v2456_v55 }
 0x1b7   : > { %4904 = vmatpush3.bf16.msra.mxu1 %v5356_v8  ;;  %v2452_v8 = vrot.slane %v6471_v27, 5 }
 0x1b8   : > { %4905 = vmatprep.subr.bf16.mxu1 %v7003_v19  ;;  %3580 = vmatpush1.bf16.msra.mxu0 %v5368_v1  ;;  %v1634_v1 = vshll.u32 %v6473_v14, 16 }
 0x1b9   : > { %3453 = vmatmul.mubr.bf16.gmra.mrb[76].mxu0 %v1487_v62  ;;  %3791 = vmatmul.mubr.bf16.gmra.mrb[0].mxu1 %v6487_v2  ;;  %v6516_v62 = vld [vmem:[#allocation2 + $0x90] sm:$0xff]  ;;  %v6527_v58 = vsel %vm2436_vm5, %v6967_v23, %v2452_v8  ;;  %v6536_v22 = vsel %vm2436_vm5, %v2452_v8, %v2454_v60  ;;  %v2462_v23 = vrot.slane %v6505_v44, 5 }
 0x1ba   : > { %3460 = vmatprep.mubr.bf16.mxu0 %v1611_v63  ;;  %3798 = vmatprep.mubr.bf16.mxu1 %v2248_v13  ;;  %v5358_v63 = vld [vmem:[%s6945_s5 + $0x228] sm:$0xff]   ;;  %v2458_v13 = vrot.slane %v6493_v21, 5  ;;  %v2468_v28 = vrot.slane %v6516_v62, 5  ;;  %v5359_v60 = vld [vmem:[%s6945_s5 + $0x230] sm:$0xff]  }
 0x1bb   : > { %4906 = vmatpush3.bf16.msra.mxu1 %v5357_v52  ;;  %3581 = vmatprep.subr.bf16.mxu0 %v6429_v61  ;;  %v5369_v52 = vld [vmem:[%s6945_s5 + $0x120] sm:$0xff]   ;;  %v6554_v25 = vsel %vm2436_vm5, %v2460_v29, %v2462_v23  ;;  %v6557_v49 = vsel %vm2436_vm5, %v2462_v23, %v2464_v15  ;;  %v7006_v23 = vshrl.u32 %v6432_v7, 16 }
 0x1bc   : > { %3582 = vmatpush1.bf16.msra.mxu0 %v5369_v52  ;;  %4907 = vmatprep.subr.bf16.mxu1 %v7003_v19  ;;  %v6546_v56 = vsel %vm2436_vm5, %v2456_v55, %v2458_v13  ;;  %v2466_v52 = vrot.slane %v6514_v4, 5  ;;  %v6551_v8 = vsel %vm2436_vm5, %v2458_v13, %v2460_v29  ;;  %v7004_v13 = vrot.slane %v6416_v51, 4 }
 0x1bd   : > { %3583 = vmatprep.subr.bf16.mxu0 %v6429_v61  ;;  %v7005_v29 = vrot.slane %v6401_v45, 4  ;;  %v1624_v46 = vrot.slane %v7006_v23, 3  ;;  %v7008_v23 = vshrl.u32 %v6473_v14, 16 }
 0x1be   : > { %v6563_v55 = vsel %vm2436_vm5, %v2464_v15, %v2466_v52  ;;  %v6566_v47 = vsel %vm2436_vm5, %v2466_v52, %v2468_v28  ;;  %v5370_v15 = vld [vmem:[%s6945_s5 + $0x128] sm:$0xff]   ;;  %v6582_v52 = vsel %vm2436_vm5, %v2468_v28, %v2470_v5  ;;  %v5360_v5 = vld [vmem:[%s6945_s5 + $0x238] sm:$0xff]  }
 0x1bf   : > { %4908 = vmatpush3.bf16.msra.mxu1 %v5358_v63  ;;  %v2126_v50 = vsel %vm1055_vm1, %v7005_v29, %v7004_v13  ;;  %v7007_v63 = vshll.u32 %v6432_v7, 16  ;;  %v1620_v13 = vsel %vm1249_vm2, %v6455_v24, %v6499_v12  ;;  %v2257_v29 = vsel %vm1886_vm4, %v6462_v0, %v6511_v10  ;;  %v5371_v24 = vld [vmem:[%s6945_s5 + $0x130] sm:$0xff]  }
 0x1c0   : > { %3584 = vmatpush1.bf16.msra.mxu0 %v5370_v15  ;;  %4909 = vmatprep.subr.bf16.mxu1 %v7003_v19  ;;  %v2264_v15 = vrot.slane %v1634_v1, 5 }
 0x1c1   : > { %v1627_v42 = vrot.slane %v7007_v63, 4  ;;  %3461 = vmatmul.mubr.bf16.gmra.mrb[80].mxu0 %v6441_v17  ;;  %3799 = vmatmul.mubr.bf16.gmra.mrb[4].mxu1 %v2126_v50  ;;  %v2261_v63 = vrot.slane %v7008_v23, 4  ;;  %v2127_v17 = vrot.slane %v6432_v7, 4 }
 0x1c2   : > { %3468 = vmatprep.mubr.bf16.mxu0 %v1620_v13  ;;  %3806 = vmatprep.mubr.bf16.mxu1 %v2257_v29  ;;  %v1640_v13 = vshrl.u32 %v6469_v30, 16  ;;  %v1643_v29 = vshll.u32 %v6469_v30, 16 }
 0x1c3   : > { %3585 = vmatprep.subr.bf16.mxu0 %v6429_v61  ;;  %4910 = vmatpush3.bf16.msra.mxu1 %v5359_v60  ;;  %v1628_v28 = vor.u32 %v1627_v42, %v1624_v46  ;;  %v2265_v0 = vor.u32 %v2264_v15, %v2261_v63  ;;  %v7009_v60 = vrot.slane %v6416_v51, 4  ;;  %v5372_v63 = vld [vmem:[%s6945_s5 + $0x138] sm:$0xff]   ;;  %v1636_v15 = vrot.slane %v1634_v1, 4 }
 0x1c4   : > { %3586 = vmatpush1.bf16.msra.mxu0 %v5371_v24  ;;  %4911 = vmatprep.subr.bf16.mxu1 %v7003_v19  ;;  %v1633_v24 = vrot.slane %v7008_v23, 3  ;;  %v2273_v43 = vrot.slane %v1643_v29, 5  ;;  %v5373_v23 = vld [vmem:[%s6945_s5 + $0x140] sm:$0xff]   ;;  %v1649_v1 = vshrl.u32 %v6471_v27, 16 }
 0x1c5   : > { %3587 = vmatprep.subr.bf16.mxu0 %v6429_v61  ;;  %v1629_v42 = vsel %vm1249_vm2, %v6499_v12, %v1628_v28  ;;  %v2128_v46 = vsel %vm1055_vm1, %v7009_v60, %v2127_v17  ;;  %v2270_v12 = vrot.slane %v1640_v13, 4  ;;  %v2129_v60 = vrot.slane %v6473_v14, 4 }
 0x1c7   : > { %4912 = vmatpush3.bf16.msra.mxu1 %v5360_v5  ;;  %v2266_v5 = vsel %vm1886_vm4, %v6511_v10, %v2265_v0  ;;  %v2130_v10 = vsel %vm1055_vm1, %v2127_v17, %v2129_v60 }
 0x1c8   : > { %3588 = vmatpush1.bf16.msra.mxu0 %v5372_v63  ;;  %v1637_v63 = vor.u32 %v1636_v15, %v1633_v24  ;;  %v2279_v24 = vrot.slane %v1649_v1, 4  ;;  %v2282_v15 = vrot.slane %v1652_v3, 5 }
 0x1c9   : > { %3469 = vmatmul.mubr.bf16.gmra.mrb[84].mxu0 %v6487_v2  ;;  %3807 = vmatmul.mubr.bf16.gmra.mrb[8].mxu1 %v2128_v46  ;;  %v2274_v2 = vor.u32 %v2273_v43, %v2270_v12 }
 0x1ca   : > { %3476 = vmatprep.mubr.bf16.mxu0 %v1629_v42  ;;  %3814 = vmatprep.mubr.bf16.mxu1 %v2266_v5  ;;  %v1642_v42 = vrot.slane %v1640_v13, 3  ;;  %v1645_v5 = vrot.slane %v1643_v29, 4  ;;  %v2131_v13 = vrot.slane %v6469_v30, 4  ;;  %v5375_v29 = vld [vmem:[%s6945_s5 + $0x150] sm:$0xff]  }
 0x1cb   : > { %3589 = vmatprep.subr.bf16.mxu0 %v6429_v61  ;;  %v2275_v43 = vsel %vm1886_vm4, %v2265_v0, %v2274_v2 }
 0x1cc   : > { %3590 = vmatpush1.bf16.msra.mxu0 %v5373_v23  ;;  %v1638_v23 = vsel %vm1249_vm2, %v1628_v28, %v1637_v63  ;;  %v1646_v17 = vor.u32 %v1645_v5, %v1642_v42  ;;  %v1661_v28 = vshll.u32 %v6475_v9, 16  ;;  %v2132_v12 = vsel %vm1055_vm1, %v2129_v60, %v2131_v13  ;;  %v5376_v42 = vld [vmem:[%s6945_s5 + $0x158] sm:$0xff]   ;;  %v5377_v60 = vld [vmem:[%s6945_s5 + $0x160] sm:$0xff]  }
 0x1cd   : > { %3591 = vmatprep.subr.bf16.mxu0 %v6429_v61  ;;  %v1654_v5 = vrot.slane %v1652_v3, 4  ;;  %v1670_v3 = vshll.u32 %v6490_v6, 16 }
 0x1ce   : > { %v1647_v0 = vsel %vm1249_vm2, %v1637_v63, %v1646_v17  ;;  %v2133_v63 = vrot.slane %v6471_v27, 4  ;;  %v5378_v27 = vld [vmem:[%s6945_s5 + $0x168] sm:$0xff]  }
 0x1d0   : > { %3592 = vmatpush1.bf16.msra.mxu0 %v5374_v41  ;;  %v2283_v41 = vor.u32 %v2282_v15, %v2279_v24  ;;  %v2291_v15 = vrot.slane %v1661_v28, 5 }
 0x1d1   : > { %3477 = vmatmul.mubr.bf16.gmra.mrb[88].mxu0 %v2126_v50  ;;  %3815 = vmatmul.mubr.bf16.gmra.mrb[12].mxu1 %v2130_v10  ;;  %v1658_v50 = vshrl.u32 %v6475_v9, 16 }
 0x1d2   : > { %3484 = vmatprep.mubr.bf16.mxu0 %v1638_v23  ;;  %3822 = vmatprep.mubr.bf16.mxu1 %v2275_v43  ;;  %v1651_v23 = vrot.slane %v1649_v1, 3  ;;  %v2284_v43 = vsel %vm1886_vm4, %v2274_v2, %v2283_v41  ;;  %v2134_v2 = vsel %vm1055_vm1, %v2131_v13, %v2133_v63 }
 0x1d3   : > { %3593 = vmatprep.subr.bf16.mxu0 %v6429_v61  ;;  %v2288_v24 = vrot.slane %v1658_v50, 4 }
 0x1d4   : > { %3594 = vmatpush1.bf16.msra.mxu0 %v5375_v29  ;;  %v1655_v1 = vor.u32 %v1654_v5, %v1651_v23 }
 0x1d5   : > { %3595 = vmatprep.subr.bf16.mxu0 %v6429_v61  ;;  %v2292_v29 = vor.u32 %v2291_v15, %v2288_v24  ;;  %v2300_v24 = vrot.slane %v1670_v3, 5  ;;  %v1679_v15 = vshll.u32 %v6493_v21, 16 }
 0x1d7   : > { %v2293_v23 = vsel %vm1886_vm4, %v2283_v41, %v2292_v29 }
 0x1d8   : > { %3596 = vmatpush1.bf16.msra.mxu0 %v5376_v42  ;;  %v1663_v42 = vrot.slane %v1661_v28, 4  ;;  %v5379_v28 = vld [vmem:[%s6945_s5 + $0x170] sm:$0xff]  }
 0x1d9   : > { %3485 = vmatmul.mubr.bf16.gmra.mrb[92].mxu0 %v2128_v46  ;;  %3823 = vmatmul.mubr.bf16.gmra.mrb[16].mxu1 %v2132_v12  ;;  %v1667_v46 = vshrl.u32 %v6490_v6, 16 }
 0x1da   : > { %3492 = vmatprep.mubr.bf16.mxu0 %v1647_v0  ;;  %3830 = vmatprep.mubr.bf16.mxu1 %v2284_v43  ;;  %v1660_v0 = vrot.slane %v1658_v50, 3  ;;  %v1656_v43 = vsel %vm1249_vm2, %v1646_v17, %v1655_v1  ;;  %v2135_v50 = vrot.slane %v6475_v9, 4  ;;  %v1676_v17 = vshrl.u32 %v6493_v21, 16  ;;  %v5380_v9 = vld [vmem:[%s6945_s5 + $0x178] sm:$0xff]  }
 0x1db   : > { %3597 = vmatprep.subr.bf16.mxu0 %v6429_v61  ;;  %v2297_v5 = vrot.slane %v1667_v46, 4 }
 0x1dc   : > { %3598 = vmatpush1.bf16.msra.mxu0 %v5377_v60  ;;  %v1664_v13 = vor.u32 %v1663_v42, %v1660_v0  ;;  %v2136_v60 = vsel %vm1055_vm1, %v2133_v63, %v2135_v50  ;;  %v1672_v0 = vrot.slane %v1670_v3, 4  ;;  %v1685_v63 = vshrl.u32 %v6503_v26, 16 }
 0x1dd   : > { %3599 = vmatprep.subr.bf16.mxu0 %v6429_v61 }
 0x1de   : > { %v1665_v41 = vsel %vm1249_vm2, %v1655_v1, %v1664_v13 }
 0x1e0   : > { %3600 = vmatpush1.bf16.msra.mxu0 %v5378_v27  ;;  %v1669_v27 = vrot.slane %v1667_v46, 3  ;;  %v1688_v46 = vshll.u32 %v6503_v26, 16 }
 0x1e1   : > { %3493 = vmatmul.mubr.bf16.gmra.mrb[96].mxu0 %v2130_v10  ;;  %3831 = vmatmul.mubr.bf16.gmra.mrb[20].mxu1 %v2134_v2  ;;  %v2301_v10 = vor.u32 %v2300_v24, %v2297_v5 }
 0x1e2   : > { %3500 = vmatprep.mubr.bf16.mxu0 %v1656_v43  ;;  %3838 = vmatprep.mubr.bf16.mxu1 %v2293_v23  ;;  %v2306_v43 = vrot.slane %v1676_v17, 4  ;;  %v2309_v23 = vrot.slane %v1679_v15, 5  ;;  %v1673_v1 = vor.u32 %v1672_v0, %v1669_v27  ;;  %v2139_v27 = vrot.slane %v6493_v21, 4 }
 0x1e3   : > { %3601 = vmatprep.subr.bf16.mxu0 %v6429_v61  ;;  %v2302_v42 = vsel %vm1886_vm4, %v2292_v29, %v2301_v10  ;;  %v2141_v21 = vrot.slane %v6503_v26, 4  ;;  %v2143_v26 = vrot.slane %v6505_v44, 4 }
 0x1e4   : > { %3602 = vmatpush1.bf16.msra.mxu0 %v5379_v28  ;;  %v2310_v5 = vor.u32 %v2309_v23, %v2306_v43  ;;  %v1678_v28 = vrot.slane %v1676_v17, 3  ;;  %v1674_v3 = vsel %vm1249_vm2, %v1664_v13, %v1673_v1  ;;  %v1687_v13 = vrot.slane %v1685_v63, 3 }
 0x1e5   : > { %3603 = vmatprep.subr.bf16.mxu0 %v6429_v61  ;;  %v2137_v61 = vrot.slane %v6490_v6, 4 }
 0x1e6   : > { %v2311_v29 = vsel %vm1886_vm4, %v2301_v10, %v2310_v5  ;;  %v1690_v10 = vrot.slane %v1688_v46, 4 }
 0x1e7   : > { %v2138_v24 = vsel %vm1055_vm1, %v2135_v50, %v2137_v61  ;;  %v1697_v50 = vshll.u32 %v6505_v44, 16 }
 0x1e8   : > { %3604 = vmatpush1.bf16.msra.mxu0 %v5380_v9  ;;  %v2318_v9 = vrot.slane %v1688_v46, 5 }
 0x1e9   : > { %3501 = vmatmul.mubr.bf16.gmra.mrb[100].mxu0 %v2132_v12  ;;  %3839 = vmatmul.mubr.bf16.gmra.mrb[24].mxu1 %v2136_v60  ;;  %v1681_v12 = vrot.slane %v1679_v15, 4  ;;  %v2327_v23 = vrot.slane %v1697_v50, 5 }
 0x1ea   : > { %3508 = vmatprep.mubr.bf16.mxu0 %v1665_v41  ;;  %3846 = vmatprep.mubr.bf16.mxu1 %v2302_v42  ;;  %v2315_v41 = vrot.slane %v1685_v63, 4  ;;  %v1694_v42 = vshrl.u32 %v6505_v44, 16  ;;  %v2145_v44 = vrot.slane %v6507_v54, 4 }
 0x1eb   : > { %v1682_v6 = vor.u32 %v1681_v12, %v1678_v28  ;;  %v1691_v28 = vor.u32 %v1690_v10, %v1687_v13  ;;  %v1712_v13 = vshrl.u32 %v6514_v4, 16 }
 0x1ec   : > { %v2319_v0 = vor.u32 %v2318_v9, %v2315_v41  ;;  %v2324_v43 = vrot.slane %v1694_v42, 4  ;;  %v1696_v63 = vrot.slane %v1694_v42, 3  ;;  %v2144_v42 = vsel %vm1055_vm1, %v2141_v21, %v2143_v26 }
 0x1ed   : > { %v1683_v17 = vsel %vm1249_vm2, %v1673_v1, %v1682_v6  ;;  %v1706_v1 = vshll.u32 %v6507_v54, 16  ;;  %v1692_v46 = vsel %vm1249_vm2, %v1682_v6, %v1691_v28  ;;  %v2342_v10 = vrot.slane %v1712_v13, 4 }
 0x1ee   : > { %v2320_v15 = vsel %vm1886_vm4, %v2310_v5, %v2319_v0  ;;  %v2328_v12 = vor.u32 %v2327_v23, %v2324_v43 }
 0x1ef   : > { %v2336_v41 = vrot.slane %v1706_v1, 5 }
 0x1f0   : > { %v2329_v5 = vsel %vm1886_vm4, %v2319_v0, %v2328_v12 }
 0x1f1   : > { %3509 = vmatmul.mubr.bf16.gmra.mrb[104].mxu0 %v2134_v2  ;;  %3847 = vmatmul.mubr.bf16.gmra.mrb[28].mxu1 %v2138_v24  ;;  %v2140_v2 = vsel %vm1055_vm1, %v2137_v61, %v2139_v27  ;;  %v2142_v61 = vsel %vm1055_vm1, %v2139_v27, %v2141_v21  ;;  %v1715_v27 = vshll.u32 %v6514_v4, 16  ;;  %v2352_v21 = vshll.u32 %v6516_v62, 16 }
 0x1f2   : > { %3516 = vmatprep.mubr.bf16.mxu0 %v1674_v3  ;;  %3854 = vmatprep.mubr.bf16.mxu1 %v2311_v29  ;;  %v1703_v3 = vshrl.u32 %v6507_v54, 16  ;;  %v2204_v54 = vld [vmem:[#allocation2 + $0x98] sm:$0x1f] }
 0x1f4   : > { %v2333_v29 = vrot.slane %v1703_v3, 4 }
 0x1f9   : > { %3517 = vmatmul.mubr.bf16.gmra.mrb[108].mxu0 %v2136_v60  ;;  %3855 = vmatmul.mubr.bf16.gmra.mrb[32].mxu1 %v2140_v2  ;;  %v1699_v60 = vrot.slane %v1697_v50, 4  ;;  %v1708_v50 = vrot.slane %v1706_v1, 4  ;;  %v1717_v1 = vrot.slane %v1715_v27, 4 }
 0x1fa   : > { %3524 = vmatprep.mubr.bf16.mxu0 %v1683_v17  ;;  %3862 = vmatprep.mubr.bf16.mxu1 %v2320_v15  ;;  %v2337_v17 = vor.u32 %v2336_v41, %v2333_v29  ;;  %v2345_v15 = vrot.slane %v1715_v27, 5  ;;  %v2147_v41 = vrot.slane %v6514_v4, 4  ;;  %v2361_v27 = vshll.u32 %v2204_v54, 16 }
 0x1fb   : > { %v1700_v9 = vor.u32 %v1699_v60, %v1696_v63  ;;  %v2349_v63 = vshrl.u32 %v6516_v62, 16  ;;  %v1567_v60 = vld [vmem:[#allocation2 + $0x90] sm:$0xf]  ;;  %v2149_v4 = vrot.slane %v6516_v62, 4 }
 0x1fc   : > { %v2338_v0 = vsel %vm1886_vm4, %v2328_v12, %v2337_v17  ;;  %v2346_v23 = vor.u32 %v2345_v15, %v2342_v10  ;;  %v2363_v15 = vrot.slane %v2361_v27, 5 }
 0x1fd   : > { %v1701_v6 = vsel %vm1249_vm2, %v1691_v28, %v1700_v9 }
 0x1fe   : > { %v2347_v12 = vsel %vm1886_vm4, %v2337_v17, %v2346_v23 }
 0x201   : > { %3525 = vmatmul.mubr.bf16.gmra.mrb[112].mxu0 %v2138_v24  ;;  %3863 = vmatmul.mubr.bf16.gmra.mrb[36].mxu1 %v2142_v61  ;;  %v1705_v24 = vrot.slane %v1703_v3, 3  ;;  %v2146_v3 = vsel %vm1055_vm1, %v2143_v26, %v2145_v44 }
 0x202   : > { %3532 = vmatprep.mubr.bf16.mxu0 %v1692_v46  ;;  %3870 = vmatprep.mubr.bf16.mxu1 %v2329_v5  ;;  %v2351_v46 = vrot.slane %v2349_v63, 4  ;;  %v2354_v5 = vrot.slane %v2352_v21, 5  ;;  %v1868_v63 = vld [vmem:[#allocation2 + $0x8] sm:$0xf0] }
 0x203   : > { %v1709_v43 = vor.u32 %v1708_v50, %v1705_v24  ;;  %v1721_v24 = vshrl.u32 %v1567_v60, 16  ;;  %v1724_v50 = vshll.u32 %v1567_v60, 16 }
 0x204   : > { %v2355_v26 = vor.u32 %v2354_v5, %v2351_v46  ;;  %v7011_v46 = vshll.u32 %v6367_v16, 16 }
 0x205   : > { %v1710_v28 = vsel %vm1249_vm2, %v1700_v9, %v1709_v43  ;;  %v2148_v9 = vsel %vm1055_vm1, %v2145_v44, %v2147_v41  ;;  %v1726_v17 = vrot.slane %v1724_v50, 4 }
 0x206   : > { %v1901_v5 = vrot.slane %v7011_v46, 5 }
 0x209   : > { %3533 = vmatmul.mubr.bf16.gmra.mrb[116].mxu0 %v2140_v2  ;;  %3871 = vmatmul.mubr.bf16.gmra.mrb[40].mxu1 %v2144_v42  ;;  %v1714_v2 = vrot.slane %v1712_v13, 3  ;;  %v2358_v13 = vshrl.u32 %v2204_v54, 16  ;;  %v2099_v54 = vld [vmem:[#allocation2 + $0x98] sm:$0xf] }
 0x20a   : > { %3540 = vmatprep.mubr.bf16.mxu0 %v1701_v6  ;;  %3878 = vmatprep.mubr.bf16.mxu1 %v2338_v0  ;;  %v1723_v6 = vrot.slane %v1721_v24, 3  ;;  %v2356_v0 = vsel %vm1886_vm4, %v2346_v23, %v2355_v26  ;;  %v7010_v23 = vshrl.u32 %v6367_v16, 16  ;;  %v1764_v16 = vld [vmem:[#allocation2 + $0x10] sm:$0xff] }
 0x20b   : > { %v1718_v29 = vor.u32 %v1717_v1, %v1714_v2  ;;  %v2360_v10 = vrot.slane %v2358_v13, 4  ;;  %v1888_v1 = vshrl.u32 %v1868_v63, 16 }
 0x20c   : > { %v1727_v21 = vor.u32 %v1726_v17, %v1723_v6  ;;  %v1898_v60 = vrot.slane %v7010_v23, 4  ;;  %v2400_v6 = vld [vmem:[#allocation2 + $0x10] sm:$0xe0]  ;;  %v1800_v17 = vrot.slane %v1764_v16, 4 }
 0x20d   : > { %v2364_v2 = vor.u32 %v2363_v15, %v2360_v10  ;;  %v1890_v24 = vrot.slane %v1888_v1, 4  ;;  %v2437_v15 = vrot.slane %v2400_v6, 5 }
 0x20f   : > { %v2365_v62 = vsel %vm1886_vm4, %v2355_v26, %v2364_v2  ;;  %v1763_v26 = vld [vmem:[#allocation2 + $0x8] sm:$0xf0]  ;;  %v7012_v2 = vrot.slane %v5859_v20, 4 }
 0x210   : > { %v1799_v10 = vrot.slane %v1763_v26, 4 }
 0x211   : > { %3541 = vmatmul.mubr.bf16.gmra.mrb[120].mxu0 %v2142_v61  ;;  %3879 = vmatmul.mubr.bf16.gmra.mrb[44].mxu1 %v2146_v3  ;;  %v1719_v61 = vsel %vm1249_vm2, %v1709_v43, %v1718_v29  ;;  %v2150_v43 = vsel %vm1055_vm1, %v2147_v41, %v2149_v4  ;;  %v2151_v41 = vrot.slane %v2099_v54, 4 }
 0x212   : > { %3548 = vmatprep.mubr.bf16.mxu0 %v1710_v28  ;;  %3886 = vmatprep.mubr.bf16.mxu1 %v2347_v12  ;;  %v1891_v28 = vshll.u32 %v1868_v63, 16  ;;  %v1462_v12 = vld [vmem:[#allocation2 + $0x88] sm:$0xf] }
 0x213   : > { %v1514_v13 = vrot.slane %v1462_v12, 4 }
 0x214   : > { %v1893_v50 = vrot.slane %v1891_v28, 5 }
 0x216   : > { %v1894_v27 = vor.u32 %v1893_v50, %v1890_v24 }
 0x219   : > { %3549 = vmatmul.mubr.bf16.gmra.mrb[124].mxu0 %v2144_v42  ;;  %3887 = vmatmul.mubr.bf16.gmra.mrb[48].mxu1 %v2148_v9  ;;  %v1728_v42 = vsel %vm1249_vm2, %v1718_v29, %v1727_v21  ;;  %v1515_v29 = vsel %vm1055_vm1, %v2145_v44, %v1514_v13  ;;  %v1801_v44 = vsel %vm1055_vm1, %v1799_v10, %v1800_v17  ;;  %v2440_v21 = vrot.slane %v6388_v11, 5 }
 0x21a   : > { %3556 = vmatprep.mubr.bf16.mxu0 %v1719_v61  ;;  %3894 = vmatprep.mubr.bf16.mxu1 %v2356_v0  ;;  %v2152_v61 = vsel %vm1055_vm1, %v2149_v4, %v2151_v41  ;;  %v2438_v0 = vrot.slane %v6376_v53, 5  ;;  %v1803_v53 = vsel %vm1055_vm1, %v1800_v17, %v7012_v2  ;;  %v2444_v11 = vrot.slane %v6416_v51, 5 }
 0x21b   : > { %v7013_v51 = vrot.slane %v6469_v30, 5 }
 0x21c   : > { %v2439_v4 = vsel %vm2436_vm5, %v2437_v15, %v2438_v0  ;;  %v2441_v1 = vsel %vm2436_vm5, %v2438_v0, %v2440_v21 }
 0x221   : > { %3557 = vmatmul.mubr.bf16.gmra.mrb[128].mxu0 %v2146_v3  ;;  %3895 = vmatmul.mubr.bf16.gmra.mrb[52].mxu1 %v2150_v43  ;;  %v1902_v3 = vor.u32 %v1901_v5, %v1898_v60  ;;  %v2446_v43 = vrot.slane %v6432_v7, 5 }
 0x222   : > { %3564 = vmatprep.mubr.bf16.mxu0 %v1728_v42  ;;  %3902 = vmatprep.mubr.bf16.mxu1 %v2365_v62 }
 0x223   : > { %v1903_v9 = vsel %vm1886_vm4, %v1894_v27, %v1902_v3  ;;  %v1912_v63 = vsel %vm1886_vm4, %v1902_v3, %v5910_v48  ;;  %v2442_v48 = vrot.slane %v6401_v45, 5  ;;  %v2447_v42 = vsel %vm2436_vm5, %v2444_v11, %v2446_v43 }
 0x224   : > { %v2448_v45 = vrot.slane %v6473_v14, 5 }
 0x225   : > { %v2443_v28 = vsel %vm2436_vm5, %v2440_v21, %v2442_v48  ;;  %v2445_v20 = vsel %vm2436_vm5, %v2442_v48, %v2444_v11 }
 0x226   : > { %v2449_v12 = vsel %vm2436_vm5, %v2446_v43, %v2448_v45  ;;  %v2451_v23 = vsel %vm2436_vm5, %v2448_v45, %v7013_v51 }
 0x229   : > { %3565 = vmatmul.mubr.bf16.gmra.mrb[132].mxu0 %v1515_v29  ;;  %3903 = vmatmul.mubr.bf16.gmra.mrb[56].mxu1 %v2152_v61 }
 0x22a   : > { %3605 = vmatprep.mubr.bf16.mxu0 %v1903_v9  ;;  %4913 = vmatprep.mubr.msk.bf16.mxu1 %vm5390_vm0, %v7003_v19 }
 0x231   : > { %3606 = vmatmul.mubr.bf16.vlgmr.msra.gmra.mrb[68].mxu0 %v1801_v44  ;;  %4914 = vmatmul.mubr.bf16.vlgmr.msra.gmra.mrb[60].mxu1 %v2439_v4 }
 0x232   : > { %3613 = vmatprep.mubr.bf16.mxu0 %v1912_v63  ;;  %4917 = vmatprep.mubr.msk.bf16.mxu1 %vm5390_vm0, %v7003_v19 }
 0x239   : > { %3614 = vmatmul.mubr.bf16.gmra.mrb[72].mxu0 %v1803_v53  ;;  %4918 = vmatmul.mubr.bf16.gmra.mrb[64].mxu1 %v2441_v1 }
 0x23a   : > { %4921 = vmatprep.mubr.msk.bf16.mxu1 %vm5390_vm0, %v7003_v19 }
 0x241   : > { %4922 = vmatmul.mubr.bf16.gmra.mrb[0].mxu1 %v2443_v28 }
 0x242   : > { %4925 = vmatprep.mubr.msk.bf16.mxu1 %vm5390_vm0, %v7003_v19 }
 0x249   : > { %4926 = vmatmul.mubr.bf16.gmra.mrb[4].mxu1 %v2445_v20 }
 0x24a   : > { %4929 = vmatprep.mubr.msk.bf16.mxu1 %vm5390_vm0, %v7003_v19 }
 0x251   : > { %4930 = vmatmul.mubr.bf16.gmra.mrb[8].mxu1 %v2447_v42 }
 0x252   : > { %4933 = vmatprep.mubr.msk.bf16.mxu1 %vm5390_vm0, %v7003_v19 }
 0x259   : > { %4934 = vmatmul.mubr.bf16.gmra.mrb[12].mxu1 %v2449_v12 }
 0x25a   : > { %4937 = vmatprep.mubr.msk.bf16.mxu1 %vm5390_vm0, %v7003_v19 }
 0x261   : > { %4938 = vmatmul.mubr.bf16.gmra.mrb[16].mxu1 %v2451_v23 }
 0x262   : > { %4941 = vmatprep.mubr.msk.bf16.mxu1 %vm5390_vm0, %v7003_v19 }
 0x269   : > { %4942 = vmatmul.mubr.bf16.gmra.mrb[20].mxu1 %v6527_v58 }
 0x26a   : > { %4945 = vmatprep.mubr.msk.bf16.mxu1 %vm5390_vm0, %v7003_v19 }
 0x271   : > { %4946 = vmatmul.mubr.bf16.gmra.mrb[24].mxu1 %v6536_v22 }
 0x272   : > { %4949 = vmatprep.mubr.msk.bf16.mxu1 %vm5390_vm0, %v7003_v19 }
 0x279   : > { %4950 = vmatmul.mubr.bf16.gmra.mrb[28].mxu1 %v6543_v18 }
 0x27a   : > { %4953 = vmatprep.mubr.msk.bf16.mxu1 %vm5390_vm0, %v7003_v19 }
 0x281   : > { %4954 = vmatmul.mubr.bf16.gmra.mrb[32].mxu1 %v6546_v56 }
 0x282   : > { %4957 = vmatprep.mubr.msk.bf16.mxu1 %vm5390_vm0, %v7003_v19 }
 0x289   : > { %4958 = vmatmul.mubr.bf16.gmra.mrb[36].mxu1 %v6551_v8 }
 0x28a   : > { %4961 = vmatprep.mubr.msk.bf16.mxu1 %vm5390_vm0, %v7003_v19 }
 0x28c   : > { %v6771_v7 = vpop.f32.mrb[76].mxu0 }
 0x28d   : > { %v3456_v22 = vpop.f32.mrb[77].mxu0 }
 0x28e   : > { %v6773_v30 = vpop.f32.mrb[78].mxu0 }
 0x28f   : > { %v3459_v14 = vpop.f32.mrb[79].mxu0 }
 0x291   : > { %4962 = vmatmul.mubr.bf16.gmra.mrb[40].mxu1 %v6554_v25 }
 0x292   : > { %4965 = vmatprep.mubr.msk.bf16.mxu1 %vm5390_vm0, %v7003_v19 }
 0x294   : > { %v6778_v56 = vpop.f32.mrb[80].mxu0 }
 0x295   : > { %v3464_v18 = vpop.f32.mrb[81].mxu0 }
 0x296   : > { %v6780_v58 = vpop.f32.mrb[82].mxu0 }
 0x297   : > { %v3467_v8 = vpop.f32.mrb[83].mxu0 }
 0x299   : > { %4966 = vmatmul.mubr.bf16.gmra.mrb[44].mxu1 %v6557_v49 }
 0x29a   : > { %4969 = vmatprep.mubr.msk.bf16.mxu1 %vm5390_vm0, %v7003_v19 }
 0x29c   : > { %v6785_v60 = vpop.f32.mrb[84].mxu0 }
 0x29d   : > { %v3472_v46 = vpop.f32.mrb[85].mxu0 }
 0x29e   : > { %v6787_v5 = vpop.f32.mrb[86].mxu0 }
 0x29f   : > { %v3475_v25 = vpop.f32.mrb[87].mxu0 }
 0x2a1   : > { %4970 = vmatmul.mubr.bf16.gmra.mrb[48].mxu1 %v6563_v55 }
 0x2a2   : > { %4973 = vmatprep.mubr.msk.bf16.mxu1 %vm5390_vm0, %v7003_v19 }
 0x2a4   : > { %v6792_v62 = vpop.f32.mrb[88].mxu0 }
 0x2a5   : > { %v3480_v54 = vpop.f32.mrb[89].mxu0 }
 0x2a6   : > { %v6794_v24 = vpop.f32.mrb[90].mxu0 }
 0x2a7   : > { %v3483_v49 = vpop.f32.mrb[91].mxu0 }
 0x2a9   : > { %4974 = vmatmul.mubr.bf16.gmra.mrb[52].mxu1 %v6566_v47 }
 0x2aa   : > { %4977 = vmatprep.mubr.msk.bf16.mxu1 %vm5390_vm0, %v7003_v19 }
 0x2ac   : > { %v6799_v50 = vpop.f32.mrb[92].mxu0 }
 0x2ad   : > { %v3488_v13 = vpop.f32.mrb[93].mxu0 }
 0x2ae   : > { %v6801_v41 = vpop.f32.mrb[94].mxu0 }
 0x2af   : > { %v3491_v55 = vpop.f32.mrb[95].mxu0 }
 0x2b1   : > { %4978 = vmatmul.mubr.bf16.gmra.mrb[56].mxu1 %v6582_v52 }
 0x2b4   : > { %v6804_v3 = vpop.f32.mrb[96].mxu0 }
 0x2b5   : > { %v3496_v27 = vpop.f32.mrb[97].mxu0 }
 0x2b6   : > { %v6806_v29 = vpop.f32.mrb[98].mxu0 }
 0x2b7   : > { %v3499_v61 = vpop.f32.mrb[99].mxu0 }
 0x2bc   : > { %v6808_v9 = vpop.f32.mrb[100].mxu0 }
 0x2bd   : > { %v3504_v47 = vpop.f32.mrb[101].mxu0 }
 0x2be   : > { %v6810_v16 = vpop.f32.mrb[102].mxu0 }
 0x2bf   : > { %v3507_v19 = vpop.f32.mrb[103].mxu0 }
 0x2c4   : > { %v6812_v26 = vpop.f32.mrb[104].mxu0 }
 0x2c5   : > { %v3512_v6 = vpop.f32.mrb[105].mxu0 }
 0x2c6   : > { %v6814_v17 = vpop.f32.mrb[106].mxu0 }
 0x2c7   : > { %v3515_v0 = vpop.f32.mrb[107].mxu0 }
 0x2cc   : > { %v6816_v10 = vpop.f32.mrb[108].mxu0 }
 0x2cd   : > { %v3520_v52 = vpop.f32.mrb[109].mxu0 }
 0x2ce   : > { %v6818_v15 = vpop.f32.mrb[110].mxu0 }
 0x2cf   : > { %v3523_v44 = vpop.f32.mrb[111].mxu0 }
 0x2d4   : > { %v6820_v4 = vpop.f32.mrb[112].mxu0 }
 0x2d5   : > { %v3528_v63 = vpop.f32.mrb[113].mxu0 }
 0x2d6   : > { %v6822_v21 = vpop.f32.mrb[114].mxu0 }
 0x2d7   : > { %v3531_v2 = vpop.f32.mrb[115].mxu0 }
 0x2dc   : > { %v6824_v53 = vpop.f32.mrb[116].mxu0 }
 0x2dd   : > { %v3536_v1 = vpop.f32.mrb[117].mxu0 }
 0x2de   : > { %v6826_v48 = vpop.f32.mrb[118].mxu0 }
 0x2df   : > { %v3539_v28 = vpop.f32.mrb[119].mxu0 }
 0x2e4   : > { %v6828_v11 = vpop.f32.mrb[120].mxu0 }
 0x2e5   : > { %v3544_v20 = vpop.f32.mrb[121].mxu0 }
 0x2e6   : > { %v6830_v43 = vpop.f32.mrb[122].mxu0 }
 0x2e7   : > { %v3547_v42 = vpop.f32.mrb[123].mxu0 }
 0x2ec   : > { %v6832_v45 = vpop.f32.mrb[124].mxu0 }
 0x2ed   : > { %v3552_v12 = vpop.f32.mrb[125].mxu0 }
 0x2ee   : > { %v6834_v51 = vpop.f32.mrb[126].mxu0 }
 0x2ef   : > { %v3555_v23 = vpop.f32.mrb[127].mxu0 }
 0x2f4   : > { %v6836_v22 = vpop.f32.mrb[128].mxu0 }
 0x2f5   : > { %v3560_v14 = vpop.f32.mrb[129].mxu0 }
 0x2f6   : > { %v6838_v18 = vpop.f32.mrb[130].mxu0 }
 0x2f7   : > { %v3563_v8 = vpop.f32.mrb[131].mxu0 }
 0x2fc   : > { %v6840_v46 = vpop.f32.mrb[132].mxu0 }
 0x2fd   : > { %v3568_v25 = vpop.f32.mrb[133].mxu0 }
 0x2fe   : > { %v6842_v54 = vpop.f32.mrb[134].mxu0 }
 0x2ff   : > { %v3571_v49 = vpop.f32.mrb[135].mxu0 }
 0x304   : > { %v3607_v13 = vpop.f32.mrb[68].mxu0  ;;  %v3945_v55 = vpop.f32.mrb[60].mxu1 }
 0x305   : > { %v3609_v27 = vpop.f32.mrb[69].mxu0  ;;  %v5013_v61 = vadd.f32 %v3945_v55, %v3607_v13  ;;  %v4915_v47 = vpop.f32.mrb[61].mxu1 }
 0x306   : > { %v3610_v19 = vpop.f32.mrb[70].mxu0  ;;  %v3948_v6 = vpop.f32.mrb[62].mxu1 }
 0x307   : > { %v3612_v0 = vpop.f32.mrb[71].mxu0  ;;  %v4250_v52 = vmul.f32 %v5013_v61, %v5822_v59  ;;  %v5014_v44 = vadd.f32 %v3948_v6, %v3610_v19  ;;  %v4916_v63 = vpop.f32.mrb[63].mxu1 }
 0x309   : > { %v4665_v2 = vpack.c.bf16 %v5014_v44, %v5013_v61  ;;  %v4251_v1 = vmul.f32 %v5014_v44, %v5820_v57  ;;  %v4324_v28 = vmul.f32 %v4250_v52, %v4250_v52 }
 0x30b   : > { %4666 = vst [vmem:[%s6850_s18] sm:$0xff] %v4665_v2   ;;  %v4284_v20 = vadd.f32 %v4251_v1, %v4250_v52  ;;  %v4325_v42 = vmul.f32 %v4251_v1, %v4251_v1 }
 0x30c   : > { %v3615_v12 = vpop.f32.mrb[72].mxu0  ;;  %v3953_v23 = vpop.f32.mrb[64].mxu1 }
 0x30d   : > { %v3617_v59 = vpop.f32.mrb[73].mxu0  ;;  %v4358_v14 = vadd.f32 %v4325_v42, %v4324_v28  ;;  %v5015_v8 = vadd.f32 %v3953_v23, %v3615_v12  ;;  %v4919_v25 = vpop.f32.mrb[65].mxu1 }
 0x30e   : > { %v3618_v49 = vpop.f32.mrb[74].mxu0  ;;  %v3956_v13 = vpop.f32.mrb[66].mxu1 }
 0x30f   : > { %v3620_v55 = vpop.f32.mrb[75].mxu0  ;;  %v4252_v27 = vmul.f32 %v5015_v8, %v5776_v32  ;;  %v5016_v47 = vadd.f32 %v3956_v13, %v3618_v49  ;;  %v4920_v61 = vpop.f32.mrb[67].mxu1 }
 0x311   : > { %v4285_v19 = vadd.f32 %v4284_v20, %v4252_v27  ;;  %v4326_v57 = vmul.f32 %v4252_v27, %v4252_v27  ;;  %v4670_v6 = vpack.c.bf16 %v5016_v47, %v5015_v8  ;;  %v4253_v0 = vmul.f32 %v5016_v47, %v5780_v34 }
 0x313   : > { %v4359_v52 = vadd.f32 %v4358_v14, %v4326_v57  ;;  %4747 = vst [vmem:[%s6850_s18 + $0x8] sm:$0xff] %v4670_v6   ;;  %v4286_v44 = vadd.f32 %v4285_v19, %v4253_v0  ;;  %v4327_v63 = vmul.f32 %v4253_v0, %v4253_v0 }
 0x314   : > { %v3961_v2 = vpop.f32.mrb[0].mxu1 }
 0x315   : > { %v4360_v1 = vadd.f32 %v4359_v52, %v4327_v63  ;;  %v5017_v28 = vadd.f32 %v3961_v2, %v6771_v7  ;;  %v4923_v42 = vpop.f32.mrb[1].mxu1 }
 0x316   : > { %v3964_v12 = vpop.f32.mrb[2].mxu1 }
 0x317   : > { %v4254_v32 = vmul.f32 %v5017_v28, %v5774_v31  ;;  %v5018_v23 = vadd.f32 %v3964_v12, %v6773_v30  ;;  %v4924_v20 = vpop.f32.mrb[3].mxu1 }
 0x319   : > { %v4287_v59 = vadd.f32 %v4286_v44, %v4254_v32  ;;  %v4328_v8 = vmul.f32 %v4254_v32, %v4254_v32  ;;  %v4675_v25 = vpack.c.bf16 %v5018_v23, %v5017_v28  ;;  %v4255_v34 = vmul.f32 %v5018_v23, %v5778_v33 }
 0x31b   : > { %v4361_v14 = vadd.f32 %v4360_v1, %v4328_v8  ;;  %4748 = vst [vmem:[%s6850_s18 + $0x10] sm:$0xff] %v4675_v25   ;;  %v4288_v49 = vadd.f32 %v4287_v59, %v4255_v34  ;;  %v4329_v13 = vmul.f32 %v4255_v34, %v4255_v34 }
 0x31c   : > { %v3969_v55 = vpop.f32.mrb[4].mxu1 }
 0x31d   : > { %v4362_v27 = vadd.f32 %v4361_v14, %v4329_v13  ;;  %v5019_v7 = vadd.f32 %v3969_v55, %v6778_v56  ;;  %v4927_v47 = vpop.f32.mrb[5].mxu1 }
 0x31e   : > { %v3972_v61 = vpop.f32.mrb[6].mxu1 }
 0x31f   : > { %v4256_v31 = vmul.f32 %v5019_v7, %v5784_v36  ;;  %v5020_v30 = vadd.f32 %v3972_v61, %v6780_v58  ;;  %v4928_v19 = vpop.f32.mrb[7].mxu1 }
 0x321   : > { %v4289_v57 = vadd.f32 %v4288_v49, %v4256_v31  ;;  %v4330_v6 = vmul.f32 %v4256_v31, %v4256_v31  ;;  %v4680_v0 = vpack.c.bf16 %v5020_v30, %v5019_v7  ;;  %v4257_v33 = vmul.f32 %v5020_v30, %v5782_v35 }
 0x323   : > { %v4363_v52 = vadd.f32 %v4362_v27, %v4330_v6  ;;  %4749 = vst [vmem:[%s6850_s18 + $0x18] sm:$0xff] %v4680_v0   ;;  %v4290_v44 = vadd.f32 %v4289_v57, %v4257_v33  ;;  %v4331_v63 = vmul.f32 %v4257_v33, %v4257_v33 }
 0x324   : > { %v3977_v2 = vpop.f32.mrb[8].mxu1 }
 0x325   : > { %v4364_v1 = vadd.f32 %v4363_v52, %v4331_v63  ;;  %v5021_v56 = vadd.f32 %v3977_v2, %v6785_v60  ;;  %v4931_v28 = vpop.f32.mrb[9].mxu1 }
 0x326   : > { %v3980_v42 = vpop.f32.mrb[10].mxu1 }
 0x327   : > { %v4258_v36 = vmul.f32 %v5021_v56, %v5788_v38  ;;  %v5022_v58 = vadd.f32 %v3980_v42, %v6787_v5  ;;  %v4932_v12 = vpop.f32.mrb[11].mxu1 }
 0x329   : > { %v4291_v32 = vadd.f32 %v4290_v44, %v4258_v36  ;;  %v4332_v23 = vmul.f32 %v4258_v36, %v4258_v36  ;;  %v4685_v20 = vpack.c.bf16 %v5022_v58, %v5021_v56  ;;  %v4259_v35 = vmul.f32 %v5022_v58, %v5786_v37 }
 0x32b   : > { %v4365_v59 = vadd.f32 %v4364_v1, %v4332_v23  ;;  %4750 = vst [vmem:[%s6850_s18 + $0x20] sm:$0xff] %v4685_v20   ;;  %v4292_v8 = vadd.f32 %v4291_v32, %v4259_v35  ;;  %v4333_v25 = vmul.f32 %v4259_v35, %v4259_v35  ;;  %v7016_v23 = vld [vmem:[#allocation7_spill] sm:$0xff] }
 0x32c   : > { %v3985_v34 = vpop.f32.mrb[12].mxu1 }
 0x32d   : > { %v4366_v14 = vadd.f32 %v4365_v59, %v4333_v25  ;;  %v5023_v60 = vadd.f32 %v3985_v34, %v6792_v62  ;;  %v4935_v49 = vpop.f32.mrb[13].mxu1  ;;  %v7017_v34 = vld [vmem:[#allocation6_spill] sm:$0xff] }
 0x32e   : > { %v3988_v13 = vpop.f32.mrb[14].mxu1 }
 0x32f   : > { %v4260_v38 = vmul.f32 %v5023_v60, %v5792_v40  ;;  %v5024_v5 = vadd.f32 %v3988_v13, %v6794_v24  ;;  %v4936_v55 = vpop.f32.mrb[15].mxu1  ;;  %v7014_v40 = vld [vmem:[#allocation5_spill] sm:$0xff] }
 0x331   : > { %v4293_v27 = vadd.f32 %v4292_v8, %v4260_v38  ;;  %v4334_v7 = vmul.f32 %v4260_v38, %v4260_v38  ;;  %v4690_v47 = vpack.c.bf16 %v5024_v5, %v5023_v60  ;;  %v4261_v37 = vmul.f32 %v5024_v5, %v5790_v39  ;;  %v7015_v39 = vld [vmem:[#allocation4_spill] sm:$0xff] }
 0x333   : > { %v4367_v61 = vadd.f32 %v4366_v14, %v4334_v7  ;;  %4751 = vst [vmem:[%s6850_s18 + $0x28] sm:$0xff] %v4690_v47   ;;  %v4294_v31 = vadd.f32 %v4293_v27, %v4261_v37  ;;  %v4335_v30 = vmul.f32 %v4261_v37, %v4261_v37  ;;  %v7018_v7 = vld [vmem:[#allocation9_spill] sm:$0xff] }
 0x334   : > { %v3993_v19 = vpop.f32.mrb[16].mxu1 }
 0x335   : > { %v4368_v57 = vadd.f32 %v4367_v61, %v4335_v30  ;;  %v5025_v62 = vadd.f32 %v3993_v19, %v6799_v50  ;;  %v4939_v6 = vpop.f32.mrb[17].mxu1  ;;  %v7019_v19 = vld [vmem:[#allocation8_spill] sm:$0xff] }
 0x336   : > { %v3996_v0 = vpop.f32.mrb[18].mxu1 }
 0x337   : > { %v4262_v33 = vmul.f32 %v5025_v62, %v7014_v40  ;;  %v5026_v24 = vadd.f32 %v3996_v0, %v6801_v41  ;;  %v4940_v52 = vpop.f32.mrb[19].mxu1 }
 0x339   : > { %v4295_v44 = vadd.f32 %v4294_v31, %v4262_v33  ;;  %v4336_v63 = vmul.f32 %v4262_v33, %v4262_v33  ;;  %v4695_v2 = vpack.c.bf16 %v5026_v24, %v5025_v62  ;;  %v4263_v1 = vmul.f32 %v5026_v24, %v7015_v39 }
 0x33b   : > { %v4369_v56 = vadd.f32 %v4368_v57, %v4336_v63  ;;  %4752 = vst [vmem:[%s6850_s18 + $0x30] sm:$0xff] %v4695_v2   ;;  %v4296_v28 = vadd.f32 %v4295_v44, %v4263_v1  ;;  %v4337_v42 = vmul.f32 %v4263_v1, %v4263_v1  ;;  %v7020_v44 = vld [vmem:[#allocation11_spill] sm:$0xff] }
 0x33c   : > { %v4001_v36 = vpop.f32.mrb[20].mxu1 }
 0x33d   : > { %v4370_v58 = vadd.f32 %v4369_v56, %v4337_v42  ;;  %v5027_v50 = vadd.f32 %v4001_v36, %v6804_v3  ;;  %v4943_v12 = vpop.f32.mrb[21].mxu1 }
 0x33e   : > { %v4004_v32 = vpop.f32.mrb[22].mxu1 }
 0x33f   : > { %v4264_v20 = vmul.f32 %v5027_v50, %v7016_v23  ;;  %v5028_v41 = vadd.f32 %v4004_v32, %v6806_v29  ;;  %v4944_v35 = vpop.f32.mrb[23].mxu1 }
 0x341   : > { %v4297_v59 = vadd.f32 %v4296_v28, %v4264_v20  ;;  %v4338_v8 = vmul.f32 %v4264_v20, %v4264_v20  ;;  %v4700_v25 = vpack.c.bf16 %v5028_v41, %v5027_v50  ;;  %v4265_v14 = vmul.f32 %v5028_v41, %v7017_v34  ;;  %v7021_v28 = vld [vmem:[#allocation10_spill] sm:$0xff]  ;;  %v7022_v41 = vld [vmem:[#allocation13_spill] sm:$0xff] }
 0x343   : > { %v4371_v60 = vadd.f32 %v4370_v58, %v4338_v8  ;;  %4753 = vst [vmem:[%s6850_s18 + $0x38] sm:$0xff] %v4700_v25   ;;  %v4298_v49 = vadd.f32 %v4297_v59, %v4265_v14  ;;  %v4339_v13 = vmul.f32 %v4265_v14, %v4265_v14  ;;  %v7023_v14 = vld [vmem:[#allocation12_spill] sm:$0xff] }
 0x344   : > { %v4009_v38 = vpop.f32.mrb[24].mxu1 }
 0x345   : > { %v4372_v5 = vadd.f32 %v4371_v60, %v4339_v13  ;;  %v5029_v3 = vadd.f32 %v4009_v38, %v6808_v9  ;;  %v4947_v55 = vpop.f32.mrb[25].mxu1 }
 0x346   : > { %v4012_v27 = vpop.f32.mrb[26].mxu1 }
 0x347   : > { %v4266_v47 = vmul.f32 %v5029_v3, %v7018_v7  ;;  %v5030_v29 = vadd.f32 %v4012_v27, %v6810_v16  ;;  %v4948_v37 = vpop.f32.mrb[27].mxu1  ;;  %v7024_v7 = vld [vmem:[#allocation15_spill] sm:$0xff] }
 0x349   : > { %v4299_v61 = vadd.f32 %v4298_v49, %v4266_v47  ;;  %v4340_v31 = vmul.f32 %v4266_v47, %v4266_v47  ;;  %v4705_v30 = vpack.c.bf16 %v5030_v29, %v5029_v3  ;;  %v4267_v57 = vmul.f32 %v5030_v29, %v7019_v19 }
 0x34b   : > { %v4373_v62 = vadd.f32 %v4372_v5, %v4340_v31  ;;  %4754 = vst [vmem:[%s6850_s18 + $0x40] sm:$0xff] %v4705_v30   ;;  %v4300_v6 = vadd.f32 %v4299_v61, %v4267_v57  ;;  %v4341_v0 = vmul.f32 %v4267_v57, %v4267_v57  ;;  %v7025_v30 = vld [vmem:[#allocation14_spill] sm:$0xff] }
 0x34c   : > { %v4017_v40 = vpop.f32.mrb[28].mxu1 }
 0x34d   : > { %v4374_v33 = vadd.f32 %v4373_v62, %v4341_v0  ;;  %v5031_v9 = vadd.f32 %v4017_v40, %v6812_v26  ;;  %v4951_v24 = vpop.f32.mrb[29].mxu1 }
 0x34e   : > { %v4020_v52 = vpop.f32.mrb[30].mxu1  ;;  %v7026_v24 = vld [vmem:[#allocation17_spill] sm:$0xff] }
 0x34f   : > { %v4268_v63 = vmul.f32 %v5031_v9, %v7020_v44  ;;  %v5032_v16 = vadd.f32 %v4020_v52, %v6814_v17  ;;  %v4952_v2 = vpop.f32.mrb[31].mxu1 }
 0x351   : > { %v4301_v39 = vadd.f32 %v4300_v6, %v4268_v63  ;;  %v4342_v1 = vmul.f32 %v4268_v63, %v4268_v63  ;;  %v4710_v56 = vpack.c.bf16 %v5032_v16, %v5031_v9  ;;  %v4269_v42 = vmul.f32 %v5032_v16, %v7021_v28 }
 0x353   : > { %v4375_v36 = vadd.f32 %v4374_v33, %v4342_v1  ;;  %4755 = vst [vmem:[%s6850_s18 + $0x48] sm:$0xff] %v4710_v56   ;;  %v4302_v58 = vadd.f32 %v4301_v39, %v4269_v42  ;;  %v4343_v50 = vmul.f32 %v4269_v42, %v4269_v42  ;;  %v7027_v39 = vld [vmem:[#allocation16_spill] sm:$0xff] }
 0x354   : > { %v4025_v12 = vpop.f32.mrb[32].mxu1 }
 0x355   : > { %v4376_v32 = vadd.f32 %v4375_v36, %v4343_v50  ;;  %v5033_v26 = vadd.f32 %v4025_v12, %v6816_v10  ;;  %v4955_v23 = vpop.f32.mrb[33].mxu1 }
 0x356   : > { %v4028_v20 = vpop.f32.mrb[34].mxu1 }
 0x357   : > { %v4270_v35 = vmul.f32 %v5033_v26, %v7022_v41  ;;  %v5034_v17 = vadd.f32 %v4028_v20, %v6818_v15  ;;  %v4956_v59 = vpop.f32.mrb[35].mxu1 }
 0x359   : > { %v4303_v8 = vadd.f32 %v4302_v58, %v4270_v35  ;;  %v4344_v25 = vmul.f32 %v4270_v35, %v4270_v35  ;;  %v4715_v34 = vpack.c.bf16 %v5034_v17, %v5033_v26  ;;  %v4271_v60 = vmul.f32 %v5034_v17, %v7023_v14  ;;  %v7029_v17 = vld [vmem:[#allocation18_spill] sm:$0xff] }
 0x35b   : > { %v4377_v49 = vadd.f32 %v4376_v32, %v4344_v25  ;;  %4756 = vst [vmem:[%s6850_s18 + $0x50] sm:$0xff] %v4715_v34   ;;  %v4304_v13 = vadd.f32 %v4303_v8, %v4271_v60  ;;  %v4345_v38 = vmul.f32 %v4271_v60, %v4271_v60  ;;  %v7028_v32 = vld [vmem:[#allocation19_spill] sm:$0xff] }
 0x35c   : > { %v4033_v5 = vpop.f32.mrb[36].mxu1 }
 0x35d   : > { %v4378_v3 = vadd.f32 %v4377_v49, %v4345_v38  ;;  %v5035_v10 = vadd.f32 %v4033_v5, %v6820_v4  ;;  %v4959_v55 = vpop.f32.mrb[37].mxu1  ;;  %v7030_v38 = vld [vmem:[#allocation21_spill] sm:$0xff] }
 0x35e   : > { %v4036_v27 = vpop.f32.mrb[38].mxu1 }
 0x35f   : > { %v4272_v47 = vmul.f32 %v5035_v10, %v7024_v7  ;;  %v5036_v15 = vadd.f32 %v4036_v27, %v6822_v21  ;;  %v4960_v29 = vpop.f32.mrb[39].mxu1  ;;  %v7031_v7 = vld [vmem:[#allocation20_spill] sm:$0xff] }
 0x361   : > { %v4305_v37 = vadd.f32 %v4304_v13, %v4272_v47  ;;  %v4346_v61 = vmul.f32 %v4272_v47, %v4272_v47  ;;  %v4720_v31 = vpack.c.bf16 %v5036_v15, %v5035_v10  ;;  %v4273_v19 = vmul.f32 %v5036_v15, %v7025_v30 }
 0x363   : > { %v4379_v57 = vadd.f32 %v4378_v3, %v4346_v61  ;;  %4757 = vst [vmem:[%s6850_s18 + $0x58] sm:$0xff] %v4720_v31   ;;  %v4306_v62 = vadd.f32 %v4305_v37, %v4273_v19  ;;  %v4347_v6 = vmul.f32 %v4273_v19, %v4273_v19 }
 0x364   : > { %v4041_v0 = vpop.f32.mrb[40].mxu1 }
 0x365   : > { %v4380_v40 = vadd.f32 %v4379_v57, %v4347_v6  ;;  %v5037_v4 = vadd.f32 %v4041_v0, %v6824_v53  ;;  %v4963_v33 = vpop.f32.mrb[41].mxu1  ;;  %v7032_v57 = vld [vmem:[#allocation23_spill] sm:$0xff] }
 0x366   : > { %v4044_v9 = vpop.f32.mrb[42].mxu1  ;;  %v7033_v33 = vld [vmem:[#allocation22_spill] sm:$0xff] }
 0x367   : > { %v4274_v52 = vmul.f32 %v5037_v4, %v7026_v24  ;;  %v5038_v21 = vadd.f32 %v4044_v9, %v6826_v48  ;;  %v4964_v44 = vpop.f32.mrb[43].mxu1 }
 0x369   : > { %v4307_v63 = vadd.f32 %v4306_v62, %v4274_v52  ;;  %v4348_v16 = vmul.f32 %v4274_v52, %v4274_v52  ;;  %v4725_v2 = vpack.c.bf16 %v5038_v21, %v5037_v4  ;;  %v4275_v1 = vmul.f32 %v5038_v21, %v7027_v39 }
 0x36b   : > { %v4381_v56 = vadd.f32 %v4380_v40, %v4348_v16  ;;  %4758 = vst [vmem:[%s6850_s18 + $0x60] sm:$0xff] %v4725_v2   ;;  %v4308_v28 = vadd.f32 %v4307_v63, %v4275_v1  ;;  %v4349_v42 = vmul.f32 %v4275_v1, %v4275_v1 }
 0x36c   : > { %v4049_v36 = vpop.f32.mrb[44].mxu1 }
 0x36d   : > { %v4382_v58 = vadd.f32 %v4381_v56, %v4349_v42  ;;  %v5039_v53 = vadd.f32 %v4049_v36, %v6828_v11  ;;  %v4967_v50 = vpop.f32.mrb[45].mxu1 }
 0x36e   : > { %v4052_v12 = vpop.f32.mrb[46].mxu1 }
 0x36f   : > { %v4276_v26 = vmul.f32 %v5039_v53, %v7028_v32  ;;  %v5040_v48 = vadd.f32 %v4052_v12, %v6830_v43  ;;  %v4968_v23 = vpop.f32.mrb[47].mxu1 }
 0x371   : > { %v4309_v20 = vadd.f32 %v4308_v28, %v4276_v26  ;;  %v4350_v41 = vmul.f32 %v4276_v26, %v4276_v26  ;;  %v4730_v35 = vpack.c.bf16 %v5040_v48, %v5039_v53  ;;  %v4277_v59 = vmul.f32 %v5040_v48, %v7029_v17 }
 0x373   : > { %v4383_v8 = vadd.f32 %v4382_v58, %v4350_v41  ;;  %4759 = vst [vmem:[%s6850_s18 + $0x68] sm:$0xff] %v4730_v35   ;;  %v4310_v25 = vadd.f32 %v4309_v20, %v4277_v59  ;;  %v4351_v34 = vmul.f32 %v4277_v59, %v4277_v59  ;;  %v7035_v58 = vld [vmem:[#allocation24_spill] sm:$0xff] }
 0x374   : > { %v4057_v14 = vpop.f32.mrb[48].mxu1 }
 0x375   : > { %v4384_v60 = vadd.f32 %v4383_v8, %v4351_v34  ;;  %v5041_v11 = vadd.f32 %v4057_v14, %v6832_v45  ;;  %v4971_v49 = vpop.f32.mrb[49].mxu1 }
 0x376   : > { %v4060_v13 = vpop.f32.mrb[50].mxu1 }
 0x377   : > { %v4278_v5 = vmul.f32 %v5041_v11, %v7030_v38  ;;  %v5042_v43 = vadd.f32 %v4060_v13, %v6834_v51  ;;  %v4972_v3 = vpop.f32.mrb[51].mxu1 }
 0x379   : > { %v4311_v10 = vadd.f32 %v4310_v25, %v4278_v5  ;;  %v4352_v55 = vmul.f32 %v4278_v5, %v4278_v5  ;;  %v4735_v27 = vpack.c.bf16 %v5042_v43, %v5041_v11  ;;  %v4279_v47 = vmul.f32 %v5042_v43, %v7031_v7 }
 0x37b   : > { %v4385_v15 = vadd.f32 %v4384_v60, %v4352_v55  ;;  %4760 = vst [vmem:[%s6850_s18 + $0x70] sm:$0xff] %v4735_v27   ;;  %v4312_v29 = vadd.f32 %v4311_v10, %v4279_v47  ;;  %v4353_v37 = vmul.f32 %v4279_v47, %v4279_v47 }
 0x37c   : > { %v4065_v61 = vpop.f32.mrb[52].mxu1 }
 0x37d   : > { %v4386_v31 = vadd.f32 %v4385_v15, %v4353_v37  ;;  %v5043_v45 = vadd.f32 %v4065_v61, %v6836_v22  ;;  %v4975_v30 = vpop.f32.mrb[53].mxu1 }
 0x37e   : > { %v4068_v19 = vpop.f32.mrb[54].mxu1 }
 0x37f   : > { %v4280_v62 = vmul.f32 %v5043_v45, %v7032_v57  ;;  %v5044_v51 = vadd.f32 %v4068_v19, %v6838_v18  ;;  %v4976_v6 = vpop.f32.mrb[55].mxu1  ;;  %v7034_v18 = vld [vmem:[#allocation25_spill] sm:$0xff] }
 0x381   : > { %v4313_v0 = vadd.f32 %v4312_v29, %v4280_v62  ;;  %v4354_v40 = vmul.f32 %v4280_v62, %v4280_v62  ;;  %v4740_v4 = vpack.c.bf16 %v5044_v51, %v5043_v45  ;;  %v4281_v9 = vmul.f32 %v5044_v51, %v7033_v33 }
 0x383   : > { %v4387_v24 = vadd.f32 %v4386_v31, %v4354_v40  ;;  %4761 = vst [vmem:[%s6850_s18 + $0x78] sm:$0xff] %v4740_v4   ;;  %v4314_v52 = vadd.f32 %v4313_v0, %v4281_v9  ;;  %v4355_v21 = vmul.f32 %v4281_v9, %v4281_v9 }
 0x384   : > { %v4073_v44 = vpop.f32.mrb[56].mxu1 }
 0x385   : > { %v4388_v22 = vadd.f32 %v4387_v24, %v4355_v21  ;;  %v5045_v63 = vadd.f32 %v4073_v44, %v6840_v46  ;;  %v4979_v16 = vpop.f32.mrb[57].mxu1 }
 0x386   : > { %v4076_v2 = vpop.f32.mrb[58].mxu1 }
 0x387   : > { %v4282_v39 = vmul.f32 %v5045_v63, %v7034_v18  ;;  %v5046_v1 = vadd.f32 %v4076_v2, %v6842_v54  ;;  %v4980_v56 = vpop.f32.mrb[59].mxu1 }
 0x389   : > { %v4315_v28 = vadd.f32 %v4314_v52, %v4282_v39  ;;  %v4356_v42 = vmul.f32 %v4282_v39, %v4282_v39  ;;  %v4745_v36 = vpack.c.bf16 %v5046_v1, %v5045_v63  ;;  %v4283_v53 = vmul.f32 %v5046_v1, %v7035_v58 }
 0x38b   : > { %v4389_v50 = vadd.f32 %v4388_v22, %v4356_v42  ;;  %4762 = vst [vmem:[%s6850_s18 + $0x80] sm:$0xff] %v4745_v36   ;;  %v4316_v12 = vadd.f32 %v4315_v28, %v4283_v53  ;;  %v4357_v32 = vmul.f32 %v4283_v53, %v4283_v53 }
 0x38d   : > { %v4317_v26 = vrot.slane %v4316_v12, 4  ;;  %v4390_v46 = vadd.f32 %v4389_v50, %v4357_v32 }
 0x38f   : > { %v4318_v48 = vadd.f32 %v4317_v26, %v4316_v12  ;;  %v4391_v23 = vrot.slane %v4390_v46, 4 }
 0x391   : > { %v4319_v20 = vrot.slane %v4318_v48, 2  ;;  %v4392_v41 = vadd.f32 %v4391_v23, %v4390_v46 }
 0x393   : > { %v4320_v54 = vadd.f32 %v4319_v20, %v4318_v48  ;;  %v4393_v35 = vrot.slane %v4392_v41, 2 }
 0x395   : > { %v4321_v17 = vrot.slane %v4320_v54, 1  ;;  %v4394_v59 = vadd.f32 %v4393_v35, %v4392_v41 }
 0x397   : > { %v4322_v8 = vadd.f32 %v4321_v17, %v4320_v54  ;;  %v4395_v25 = vrot.slane %v4394_v59, 1 }
 0x399   : > { %4323 = vst [vmem:[%s292_s21] sm:$0x1] %v4322_v8  ;;  %v4396_v34 = vadd.f32 %v4395_v25, %v4394_v59 }
 0x39b   : > { %4397 = vst [vmem:[%s292_s21 + $0x1] sm:$0x1] %v4396_v34 }
 0x39c PF: > { %s18_s24 = sadd.s32 1, %s5387_s24  }
 0x39d   : > { %p15_p5 = scmp.ge.s32.totalorder %s18_s24, 4  }
 0x39f   :  { %17 = sbr.rel (!%p15_p5) target bundleno = 1 (0x1), region = 86 }

</bundles_post_ra>
